<compile_context>
chip_gen: v6e
topology: v6e:2x2x1
jax: 0.10.0
libtpu: 0.0.40
codegen_flags: <defaults>
</compile_context>

<pallas_src>
import functools
import math

import jax
import jax.numpy as jnp
from jax import lax
from jax.experimental import pallas as pl
from jax.experimental.pallas import tpu as pltpu

_EPS = 1e-5


# ----------------------------------------------------------------------------
# In-kernel helpers (traced inside the Pallas kernel)
# ----------------------------------------------------------------------------
def _shift_lanes(x, d, w_sample):
    """xs[..., c] = x[..., c+d] within each lane-packed sample of width w_sample.

    Zero fill at global edges (via concat) and at internal per-sample
    boundaries (via a static iota mask) so packed samples never mix.
    """
    if d == 0:
        return x
    rows, lanes = x.shape
    zeros = jnp.zeros((rows, abs(d)), x.dtype)
    if d > 0:
        xs = jnp.concatenate([x[:, d:], zeros], axis=1)
    else:
        xs = jnp.concatenate([zeros, x[:, :lanes + d]], axis=1)
    n_pack = lanes // w_sample
    if n_pack > 1:
        col = lax.broadcasted_iota(jnp.int32, (rows, lanes), 1)
        bad = None
        for s in range(1, n_pack):
            b = s * w_sample
            if d > 0:
                m = (col >= b - d) & (col < b)
            else:
                m = (col >= b) & (col < b - d)
            bad = m if bad is None else (bad | m)
        xs = jnp.where(bad, jnp.zeros_like(xs), xs)
    return xs


def _conv_same(x, c_mat, k, w_sample, *, shift_col, relu,
               residual=None, res_scale=None):
    """'Same' KxK conv in (C*H, n_pack*W) layout as ONE MXU matmul.

    c_mat: (Cout*H, K*Cin*H) = hstack of per-kw block matrices with the kh
    (row) taps, channel mixing and any BatchNorm scale folded in host-side.
    The K lane-shifted copies of x are vstacked and contracted in one jnp.dot.
    Residual / per-channel shift / ReLU fused as an f32 VPU epilogue.
    """
    p = (k - 1) // 2
    if k == 1:
        xs = x
    else:
        xs = jnp.concatenate(
            [_shift_lanes(x, kw - p, w_sample) for kw in range(k)], axis=0)
    acc = jnp.dot(c_mat, xs, preferred_element_type=jnp.float32)
    if residual is not None:
        acc = acc + residual.astype(jnp.float32) * res_scale
    acc = acc + shift_col
    if relu:
        acc = jnp.maximum(acc, 0.0)
    return acc


def _make_decoder_kernel(stage_meta, k_size, out_w_sample):
    """stage_meta: tuple of (n_resblocks, per_sample_width_after_upsample)."""

    def kernel(*refs):
        it = iter(refs)
        x = next(it)[...]                                   # (C0*H0, np*W0)
        cdt = x.dtype
        for n_rb, w_s in stage_meta:
            skip_ref = next(it)                             # (Cout*2H, np*2W)
            a_ref = next(it)                                # (2*Cout*2H, Cin*H)
            s_ref = next(it)                                # (2*np*W, np*2W)
            cm_ref = next(it)                               # (Cout*2H, K*2*Cout*2H)
            rb_refs = [(next(it), next(it)) for _ in range(n_rb)]
            vec_ref = next(it)                              # (Cout*2H, 2 + 3*n_rb)

            # -- ConvTranspose2d(k=2,s=2) + BN + ReLU --------------------------
            # One stacked matmul gives both even/odd column contributions, one
            # 0/1 spread matmul interleaves them into (Cout*2H, np*2W).
            r = a_ref.shape[0] // 2
            t = jnp.dot(a_ref[...], x, preferred_element_type=jnp.float32)
            up = jnp.dot(jnp.concatenate([t[:r], t[r:]], axis=1), s_ref[...],
                         preferred_element_type=jnp.float32)
            up = jnp.maximum(up + vec_ref[:, 0:1], 0.0)

            # -- skip merge: channel concat + Conv2d (bias, no BN / no ReLU) ----
            cat = jnp.concatenate([up.astype(cdt), skip_ref[...]], axis=0)
            x = _conv_same(cat, cm_ref[...], k_size, w_s,
                           shift_col=vec_ref[:, 1:2], relu=False).astype(cdt)

            # -- residual blocks ------------------------------------------------
            for rbi, (c1_ref, c2_ref) in enumerate(rb_refs):
                sh1 = vec_ref[:, 2 + 3 * rbi:3 + 3 * rbi]
                sh2 = vec_ref[:, 3 + 3 * rbi:4 + 3 * rbi]
                rsc = vec_ref[:, 4 + 3 * rbi:5 + 3 * rbi]
                h = _conv_same(x, c1_ref[...], k_size, w_s,
                               shift_col=sh1, relu=True).astype(cdt)
                # out = relu(bn2(og_x + conv2(h) + b2)): bn2 scale folded into
                # c2 and the residual path, shift fused.
                x = _conv_same(h, c2_ref[...], k_size, w_s, shift_col=sh2,
                               relu=True, residual=x, res_scale=rsc).astype(cdt)

        co_ref = next(it)
        osh_ref = next(it)
        o_ref = next(it)
        y = _conv_same(x, co_ref[...], k_size, out_w_sample,
                       shift_col=osh_ref[...], relu=False)
        o_ref[...] = y.astype(o_ref.dtype)

    return kernel


# ----------------------------------------------------------------------------
# Host-side weight-matrix builders (run under jit, tiny XLA ops)
# ----------------------------------------------------------------------------
def _bn_scale_shift(bn, bias):
    scale = bn['gamma'] / jnp.sqrt(bn['var'] + _EPS)
    shift = scale * (bias - bn['mean']) + bn['beta']
    return scale, shift


def _conv_block_mats(w_oihw, h, scale=None):
    """(Cout*H, K*Cin*H) hstacked block matrices for a 'same' KxK conv
    in (C*H, W) layout (kh taps + channel mixing + BN scale folded)."""
    cout, cin, k, _ = w_oihw.shape
    p = (k - 1) // 2
    w_eff = w_oihw.astype(jnp.float32)
    if scale is not None:
        w_eff = w_eff * scale[:, None, None, None]
    eyes = [jnp.eye(h, h, k=kh - p, dtype=jnp.float32) for kh in range(k)]
    mats = []
    for kw in range(k):
        m = jnp.zeros((cout * h, cin * h), jnp.float32)
        for kh in range(k):
            m = m + jnp.kron(w_eff[:, :, kh, kw], eyes[kh])
        mats.append(m)
    return jnp.concatenate(mats, axis=1)


def _deconv_block_mats(w_iohw, scale, h, w, n_pack):
    """A_stack (2*Cout*2H, Cin*H) (dh-sum and dw-stack folded, BN scale folded)
    and S_both (2*n_pack*W, n_pack*2W) 0/1 per-sample column interleave for
    ConvTranspose2d(k=2,s=2) in the lane-packed (C*H, n_pack*W) layout."""
    a_prime = []
    for dw in range(2):
        m = None
        for dh in range(2):
            r_spread = (jnp.zeros((2 * h, h), jnp.float32)
                        .at[2 * jnp.arange(h) + dh, jnp.arange(h)].set(1.0))
            w_ph = w_iohw[:, :, dh, dw].T.astype(jnp.float32) * scale[:, None]
            blk = jnp.kron(w_ph, r_spread)
            m = blk if m is None else m + blk      # disjoint rows -> exact sum
        a_prime.append(m)
    a_stack = jnp.concatenate(a_prime, axis=0)

    wp = n_pack * w
    src = jnp.arange(wp)
    samp, col = src // w, src % w
    s_mats = []
    for dw in range(2):
        dst = samp * (2 * w) + 2 * col + dw
        s_mats.append(jnp.zeros((wp, 2 * wp), jnp.float32).at[src, dst].set(1.0))
    s_both = jnp.concatenate(s_mats, axis=0)
    return a_stack, s_both


# ----------------------------------------------------------------------------
# Decoder forward (single fused pallas_call)
# ----------------------------------------------------------------------------
@functools.partial(jax.jit,
                   static_argnames=("padding", "samples_per_tile", "compute_dtype"))
def decoder_forward(params, x_nchw, skips_nchw, *, padding,
                    samples_per_tile=None, compute_dtype=jnp.float32):
    n, c0, h, w = x_nchw.shape
    k = params['out_w'].shape[-1]
    assert 2 * padding == k - 1, "only 'same' convolutions are supported"
    # TODO(synk): non-'same' padding (size-changing convs) not implemented.

    n_stages = len(params['stages'])
    w_final = w * (2 ** n_stages)
    if samples_per_tile is None:
        # Pack enough samples along lanes to approach 128 lanes at the widest
        # stage (dense VPU lanes / MXU-N / output stores).
        samples_per_tile = math.gcd(n, min(n, max(1, -(-128 // w_final))))
    assert n % samples_per_tile == 0, "batch must divide by samples_per_tile"
    n_pack = samples_per_tile
    n_tiles = n // n_pack
    cdt = compute_dtype

    def pack(a):      # NCHW -> (n_tiles, C*H, n_pack*W), per-sample cols contiguous
        nn, c, hh, ww = a.shape
        a = a.reshape(n_tiles, n_pack, c, hh, ww).transpose(0, 2, 3, 1, 4)
        return a.reshape(n_tiles, c * hh, n_pack * ww)

    args = [pack(x_nchw).astype(cdt)]
    in_specs = [pl.BlockSpec((None, c0 * h, n_pack * w), lambda i: (i, 0, 0))]
    stage_meta = []

    def add_const(arr):
        args.append(arr)
        in_specs.append(pl.BlockSpec(arr.shape, lambda i: (0, 0)))

    for st, skip in zip(params['stages'], skips_nchw):
        cout = st['up_w'].shape[1]
        h2, w2 = 2 * h, 2 * w
        ns, cs, hs, ws = skip.shape
        assert cs == cout and hs == h2 and ws == w2, "skip shape mismatch"

        sc_u, sh_u = _bn_scale_shift(st['up_bn'], st['up_b'])
        a_stack, s_both = _deconv_block_mats(st['up_w'], sc_u, h, w, n_pack)
        cm_mat = _conv_block_mats(st['merge_w'], h2)

        vec_cols = [jnp.repeat(sh_u, h2), jnp.repeat(st['merge_b'], h2)]
        rb_mats = []
        for rb in st['resblocks']:
            sc1, sh1 = _bn_scale_shift(rb['bn1'], rb['b1'])
            sc2, sh2 = _bn_scale_shift(rb['bn2'], rb['b2'])
            rb_mats.append((_conv_block_mats(rb['w1'], h2, sc1),
                            _conv_block_mats(rb['w2'], h2, sc2)))
            vec_cols += [jnp.repeat(sh1, h2), jnp.repeat(sh2, h2),
                         jnp.repeat(sc2, h2)]
        vec = jnp.stack(vec_cols, axis=1).astype(jnp.float32)

        args.append(pack(skip).astype(cdt))
        in_specs.append(
            pl.BlockSpec((None, cs * hs, n_pack * ws), lambda i: (i, 0, 0)))
        add_const(a_stack.astype(cdt))
        add_const(s_both)                       # 0/1 interleave matrix, keep f32
        add_const(cm_mat.astype(cdt))
        for c1m, c2m in rb_mats:
            add_const(c1m.astype(cdt))
            add_const(c2m.astype(cdt))
        add_const(vec)                          # per-channel shifts/scales, f32

        stage_meta.append((len(st['resblocks']), w2))
        h, w = h2, w2

    n_out = params['out_w'].shape[0]
    add_const(_conv_block_mats(params['out_w'], h).astype(cdt))
    add_const(jnp.repeat(params['out_b'], h).astype(jnp.float32)[:, None])

    out = pl.pallas_call(
        _make_decoder_kernel(tuple(stage_meta), k, w),
        out_shape=jax.ShapeDtypeStruct((n_tiles, n_out * h, n_pack * w),
                                       jnp.float32),
        grid=(n_tiles,),
        in_specs=in_specs,
        out_specs=pl.BlockSpec((None, n_out * h, n_pack * w),
                               lambda i: (i, 0, 0)),
        compiler_params=pltpu.CompilerParams(
            dimension_semantics=("parallel",),
            vmem_limit_bytes=32 * 1024 * 1024),
    )(*args)

    out = out.reshape(n_tiles, n_out, h, n_pack, w).transpose(0, 3, 1, 2, 4)
    return out.reshape(n, n_out, h, w)


# ----------------------------------------------------------------------------
# Deterministic parameter init (synthetic, matches PyTorch module shapes)
# ----------------------------------------------------------------------------
def init_params(key, num_hidden, n_out, K, n_resblocks):
    keys = iter(jax.random.split(key, 256))

    def w(shape, s=0.1):
        return s * jax.random.normal(next(keys), shape, dtype=jnp.float32)

    def bn(c):
        return dict(gamma=1.0 + w((c,)),
                    beta=w((c,)),
                    mean=w((c,)),
                    var=1.0 + 0.5 * jax.random.uniform(next(keys), (c,), dtype=jnp.float32))

    stages = []
    for cin, cout in zip(num_hidden[:-1], num_hidden[1:]):
        rbs = []
        for _ in range(n_resblocks):
            rbs.append(dict(w1=w((cout, cout, K, K)), b1=w((cout,)), bn1=bn(cout),
                            w2=w((cout, cout, K, K)), b2=w((cout,)), bn2=bn(cout)))
        stages.append(dict(up_w=w((cin, cout, 2, 2)), up_b=w((cout,)), up_bn=bn(cout),
                           merge_w=w((cout, 2 * cout, K, K)), merge_b=w((cout,)),
                           resblocks=rbs))
    return dict(stages=stages,
                out_w=w((n_out, num_hidden[-1], K, K)), out_b=w((n_out,)))


# ----------------------------------------------------------------------------
# Pure-JAX reference (mirrors the PyTorch forward, NCHW) for validation
# ----------------------------------------------------------------------------
def reference_forward(params, x, skips, *, padding):
    def conv(x, w, b, pad):
        y = lax.conv_general_dilated(x, w, (1, 1), [(pad, pad), (pad, pad)],
                                     dimension_numbers=('NCHW', 'OIHW', 'NCHW'),
                                     precision=lax.Precision.HIGHEST)
        return y + b[None, :, None, None]

    def bn(x, p):
        return ((x - p['mean'][None, :, None, None])
                / jnp.sqrt(p['var'][None, :, None, None] + _EPS)
                * p['gamma'][None, :, None, None] + p['beta'][None, :, None, None])

    def deconv(x, w, b):
        N, Cin, H, W = x.shape
        Cout = w.shape[1]
        y = jnp.einsum('nchw,cdij->ndhiwj', x, w, precision=lax.Precision.HIGHEST)
        return y.reshape(N, Cout, 2 * H, 2 * W) + b[None, :, None, None]

    relu = lambda v: jnp.maximum(v, 0.0)
    for st, skip in zip(params['stages'], skips):
        x = relu(bn(deconv(x, st['up_w'], st['up_b']), st['up_bn']))
        cat = jnp.concatenate([x, skip], axis=1)
        x = conv(cat, st['merge_w'], st['merge_b'], padding)
        for rb in st['resblocks']:
            h = relu(bn(conv(x, rb['w1'], rb['b1'], padding), rb['bn1']))
            h = conv(h, rb['w2'], rb['b2'], padding)
            x = relu(bn(x + h, rb['bn2']))
    return conv(x, params['out_w'], params['out_b'], padding)


# ----------------------------------------------------------------------------
if __name__ == "__main__":
    # Config: num_hidden_features=[16, 8, 4], n_features_output=3,
    #         kernel_size=3, padding=1, n_resblocks=1, dropout=0.2 (no-op).
    num_hidden = [16, 8, 4]
    n_features_output = 3
    kernel_size = 3
    padding = 1
    n_resblocks = 1

    key = jax.random.PRNGKey(0)
    kp, kx, ks1, ks2 = jax.random.split(key, 4)
    params = init_params(kp, num_hidden, n_features_output, kernel_size, n_resblocks)

    x = jax.random.normal(kx, (2, 16, 8, 8), dtype=jnp.float32)          # NCHW
    skips = [jax.random.normal(ks1, (2, 8, 16, 16), dtype=jnp.float32),
             jax.random.normal(ks2, (2, 4, 32, 32), dtype=jnp.float32)]

    out = decoder_forward(params, x, skips, padding=padding)
    out = jax.block_until_ready(out)
    assert out.shape == (2, n_features_output, 32, 32), out.shape

    ref = jax.block_until_ready(reference_forward(params, x, skips, padding=padding))
    max_err = float(jnp.max(jnp.abs(out - ref)))
    if max_err > 1e-2:
        raise AssertionError(f"mismatch vs reference: max_err={max_err}")

    print("KERNEL_OK")
</pallas_src>

<mosaic_0001>
module attributes {stable_mosaic.version = 11 : i64} {
  func.func @kernel(%arg0: i32, %arg1: memref<1x128x16xf32, #tpu.memory_space<vmem>>, %arg2: memref<1x128x32xf32, #tpu.memory_space<vmem>>, %arg3: memref<256x128xf32, #tpu.memory_space<vmem>>, %arg4: memref<32x32xf32, #tpu.memory_space<vmem>>, %arg5: memref<128x768xf32, #tpu.memory_space<vmem>>, %arg6: memref<128x384xf32, #tpu.memory_space<vmem>>, %arg7: memref<128x384xf32, #tpu.memory_space<vmem>>, %arg8: memref<128x5xf32, #tpu.memory_space<vmem>>, %arg9: memref<1x128x64xf32, #tpu.memory_space<vmem>>, %arg10: memref<256x128xf32, #tpu.memory_space<vmem>>, %arg11: memref<64x64xf32, #tpu.memory_space<vmem>>, %arg12: memref<128x768xf32, #tpu.memory_space<vmem>>, %arg13: memref<128x384xf32, #tpu.memory_space<vmem>>, %arg14: memref<128x384xf32, #tpu.memory_space<vmem>>, %arg15: memref<128x5xf32, #tpu.memory_space<vmem>>, %arg16: memref<96x384xf32, #tpu.memory_space<vmem>>, %arg17: memref<96x1xf32, #tpu.memory_space<vmem>>, %arg18: memref<1x96x64xf32, #tpu.memory_space<vmem>>) attributes {dimension_semantics = [#tpu.dimension_semantics<parallel>], iteration_bounds = array<i64: 1>, scalar_prefetch = 0 : i64, scratch_operands = 0 : i64, tpu.core_type = #tpu.core_type<tc>, window_params = [{transform_indices = @transform_0, window_bounds = array<i64: 1, 128, 16>}, {transform_indices = @transform_1, window_bounds = array<i64: 1, 128, 32>}, {pipeline_mode = #tpu.pipeline_mode<synchronous>, transform_indices = @transform_2, window_bounds = array<i64: 256, 128>}, {pipeline_mode = #tpu.pipeline_mode<synchronous>, transform_indices = @transform_3, window_bounds = array<i64: 32, 32>}, {pipeline_mode = #tpu.pipeline_mode<synchronous>, transform_indices = @transform_4, window_bounds = array<i64: 128, 768>}, {pipeline_mode = #tpu.pipeline_mode<synchronous>, transform_indices = @transform_5, window_bounds = array<i64: 128, 384>}, {pipeline_mode = #tpu.pipeline_mode<synchronous>, transform_indices = @transform_6, window_bounds = array<i64: 128, 384>}, {pipeline_mode = #tpu.pipeline_mode<synchronous>, transform_indices = @transform_7, window_bounds = array<i64: 128, 5>}, {transform_indices = @transform_8, window_bounds = array<i64: 1, 128, 64>}, {pipeline_mode = #tpu.pipeline_mode<synchronous>, transform_indices = @transform_9, window_bounds = array<i64: 256, 128>}, {pipeline_mode = #tpu.pipeline_mode<synchronous>, transform_indices = @transform_10, window_bounds = array<i64: 64, 64>}, {pipeline_mode = #tpu.pipeline_mode<synchronous>, transform_indices = @transform_11, window_bounds = array<i64: 128, 768>}, {pipeline_mode = #tpu.pipeline_mode<synchronous>, transform_indices = @transform_12, window_bounds = array<i64: 128, 384>}, {pipeline_mode = #tpu.pipeline_mode<synchronous>, transform_indices = @transform_13, window_bounds = array<i64: 128, 384>}, {pipeline_mode = #tpu.pipeline_mode<synchronous>, transform_indices = @transform_14, window_bounds = array<i64: 128, 5>}, {pipeline_mode = #tpu.pipeline_mode<synchronous>, transform_indices = @transform_15, window_bounds = array<i64: 96, 384>}, {pipeline_mode = #tpu.pipeline_mode<synchronous>, transform_indices = @transform_16, window_bounds = array<i64: 96, 1>}, {transform_indices = @transform_17, window_bounds = array<i64: 1, 96, 64>}]} {
    %c0 = arith.constant 0 : index
    %c0_0 = arith.constant 0 : index
    %c0_1 = arith.constant 0 : index
    %0 = vector.load %arg1[%c0, %c0_0, %c0_1] : memref<1x128x16xf32, #tpu.memory_space<vmem>>, vector<1x128x16xf32>
    %1 = vector.shape_cast %0 : vector<1x128x16xf32> to vector<128x16xf32>
    %c0_2 = arith.constant 0 : index
    %c0_3 = arith.constant 0 : index
    %2 = vector.load %arg3[%c0_2, %c0_3] : memref<256x128xf32, #tpu.memory_space<vmem>>, vector<256x128xf32>
    %cst = arith.constant dense<0.000000e+00> : vector<256x16xf32>
    %3 = tpu.matmul %2, %1, %cst {dimension_numbers = #tpu.dot_dimension_numbers<[1], [0], [0], [1], [0, 0, 1, 1], [], []>} : vector<256x128xf32>, vector<128x16xf32>, vector<256x16xf32> -> vector<256x16xf32>
    %4 = vector.extract_strided_slice %3 {offsets = [0, 0], sizes = [128, 16], strides = [1, 1]} : vector<256x16xf32> to vector<128x16xf32>
    %5 = vector.extract_strided_slice %3 {offsets = [128, 0], sizes = [128, 16], strides = [1, 1]} : vector<256x16xf32> to vector<128x16xf32>
    %6 = tpu.concatenate %4, %5 in 1 : vector<128x16xf32>, vector<128x16xf32> -> vector<128x32xf32>
    %c0_4 = arith.constant 0 : index
    %c0_5 = arith.constant 0 : index
    %7 = vector.load %arg4[%c0_4, %c0_5] : memref<32x32xf32, #tpu.memory_space<vmem>>, vector<32x32xf32>
    %cst_6 = arith.constant dense<0.000000e+00> : vector<128x32xf32>
    %8 = tpu.matmul %6, %7, %cst_6 {dimension_numbers = #tpu.dot_dimension_numbers<[1], [0], [0], [1], [0, 0, 1, 1], [], []>} : vector<128x32xf32>, vector<32x32xf32>, vector<128x32xf32> -> vector<128x32xf32>
    %c0_7 = arith.constant 0 : index
    %c0_8 = arith.constant 0 : index
    %9 = vector.load %arg8[%c0_7, %c0_8] : memref<128x5xf32, #tpu.memory_space<vmem>>, vector<128x1xf32>
    %10 = vector.broadcast %9 : vector<128x1xf32> to vector<128x32xf32>
    %11 = arith.addf %8, %10 : vector<128x32xf32>
    %cst_9 = arith.constant 0.000000e+00 : f32
    %12 = vector.broadcast %cst_9 : f32 to vector<128x32xf32>
    %13 = arith.maximumf %11, %12 : vector<128x32xf32>
    %c0_10 = arith.constant 0 : index
    %c0_11 = arith.constant 0 : index
    %c0_12 = arith.constant 0 : index
    %14 = vector.load %arg2[%c0_10, %c0_11, %c0_12] : memref<1x128x32xf32, #tpu.memory_space<vmem>>, vector<1x128x32xf32>
    %15 = vector.shape_cast %14 : vector<1x128x32xf32> to vector<128x32xf32>
    %16 = tpu.concatenate %13, %15 in 0 : vector<128x32xf32>, vector<128x32xf32> -> vector<256x32xf32>
    %c0_13 = arith.constant 0 : index
    %c0_14 = arith.constant 0 : index
    %17 = vector.load %arg5[%c0_13, %c0_14] : memref<128x768xf32, #tpu.memory_space<vmem>>, vector<128x768xf32>
    %c0_15 = arith.constant 0 : index
    %c1 = arith.constant 1 : index
    %18 = vector.load %arg8[%c0_15, %c1] : memref<128x5xf32, #tpu.memory_space<vmem>>, vector<128x1xf32>
    %cst_16 = arith.constant 0.000000e+00 : f32
    %19 = vector.broadcast %cst_16 : f32 to vector<256x1xf32>
    %20 = vector.extract_strided_slice %16 {offsets = [0, 0], sizes = [256, 31], strides = [1, 1]} : vector<256x32xf32> to vector<256x31xf32>
    %21 = tpu.concatenate %19, %20 in 1 : vector<256x1xf32>, vector<256x31xf32> -> vector<256x32xf32>
    %22 = tpu.iota {dimensions = array<i32: 1>} : vector<256x32xi32>
    %c16_i32 = arith.constant 16 : i32
    %23 = vector.broadcast %c16_i32 : i32 to vector<256x32xi32>
    %24 = arith.cmpi sge, %22, %23 : vector<256x32xi32>
    %c17_i32 = arith.constant 17 : i32
    %25 = vector.broadcast %c17_i32 : i32 to vector<256x32xi32>
    %26 = arith.cmpi slt, %22, %25 : vector<256x32xi32>
    %27 = arith.andi %24, %26 : vector<256x32xi1>
    %cst_17 = arith.constant 0.000000e+00 : f32
    %28 = vector.broadcast %cst_17 : f32 to vector<256x32xf32>
    %29 = arith.select %27, %28, %21 : vector<256x32xi1>, vector<256x32xf32>
    %cst_18 = arith.constant 0.000000e+00 : f32
    %30 = vector.broadcast %cst_18 : f32 to vector<256x1xf32>
    %31 = vector.extract_strided_slice %16 {offsets = [0, 1], sizes = [256, 31], strides = [1, 1]} : vector<256x32xf32> to vector<256x31xf32>
    %32 = tpu.concatenate %31, %30 in 1 : vector<256x31xf32>, vector<256x1xf32> -> vector<256x32xf32>
    %33 = tpu.iota {dimensions = array<i32: 1>} : vector<256x32xi32>
    %c15_i32 = arith.constant 15 : i32
    %34 = vector.broadcast %c15_i32 : i32 to vector<256x32xi32>
    %35 = arith.cmpi sge, %33, %34 : vector<256x32xi32>
    %c16_i32_19 = arith.constant 16 : i32
    %36 = vector.broadcast %c16_i32_19 : i32 to vector<256x32xi32>
    %37 = arith.cmpi slt, %33, %36 : vector<256x32xi32>
    %38 = arith.andi %35, %37 : vector<256x32xi1>
    %cst_20 = arith.constant 0.000000e+00 : f32
    %39 = vector.broadcast %cst_20 : f32 to vector<256x32xf32>
    %40 = arith.select %38, %39, %32 : vector<256x32xi1>, vector<256x32xf32>
    %41 = tpu.concatenate %29, %16, %40 in 0 : vector<256x32xf32>, vector<256x32xf32>, vector<256x32xf32> -> vector<768x32xf32>
    %cst_21 = arith.constant dense<0.000000e+00> : vector<128x32xf32>
    %42 = tpu.matmul %17, %41, %cst_21 {dimension_numbers = #tpu.dot_dimension_numbers<[1], [0], [0], [1], [0, 0, 1, 1], [], []>} : vector<128x768xf32>, vector<768x32xf32>, vector<128x32xf32> -> vector<128x32xf32>
    %43 = vector.broadcast %18 : vector<128x1xf32> to vector<128x32xf32>
    %44 = arith.addf %42, %43 : vector<128x32xf32>
    %c0_22 = arith.constant 0 : index
    %c2 = arith.constant 2 : index
    %45 = vector.load %arg8[%c0_22, %c2] : memref<128x5xf32, #tpu.memory_space<vmem>>, vector<128x1xf32>
    %c0_23 = arith.constant 0 : index
    %c3 = arith.constant 3 : index
    %46 = vector.load %arg8[%c0_23, %c3] : memref<128x5xf32, #tpu.memory_space<vmem>>, vector<128x1xf32>
    %c0_24 = arith.constant 0 : index
    %c4 = arith.constant 4 : index
    %47 = vector.load %arg8[%c0_24, %c4] : memref<128x5xf32, #tpu.memory_space<vmem>>, vector<128x1xf32>
    %c0_25 = arith.constant 0 : index
    %c0_26 = arith.constant 0 : index
    %48 = vector.load %arg6[%c0_25, %c0_26] : memref<128x384xf32, #tpu.memory_space<vmem>>, vector<128x384xf32>
    %cst_27 = arith.constant 0.000000e+00 : f32
    %49 = vector.broadcast %cst_27 : f32 to vector<128x1xf32>
    %50 = vector.extract_strided_slice %44 {offsets = [0, 0], sizes = [128, 31], strides = [1, 1]} : vector<128x32xf32> to vector<128x31xf32>
    %51 = tpu.concatenate %49, %50 in 1 : vector<128x1xf32>, vector<128x31xf32> -> vector<128x32xf32>
    %52 = tpu.iota {dimensions = array<i32: 1>} : vector<128x32xi32>
    %c16_i32_28 = arith.constant 16 : i32
    %53 = vector.broadcast %c16_i32_28 : i32 to vector<128x32xi32>
    %54 = arith.cmpi sge, %52, %53 : vector<128x32xi32>
    %c17_i32_29 = arith.constant 17 : i32
    %55 = vector.broadcast %c17_i32_29 : i32 to vector<128x32xi32>
    %56 = arith.cmpi slt, %52, %55 : vector<128x32xi32>
    %57 = arith.andi %54, %56 : vector<128x32xi1>
    %cst_30 = arith.constant 0.000000e+00 : f32
    %58 = vector.broadcast %cst_30 : f32 to vector<128x32xf32>
    %59 = arith.select %57, %58, %51 : vector<128x32xi1>, vector<128x32xf32>
    %cst_31 = arith.constant 0.000000e+00 : f32
    %60 = vector.broadcast %cst_31 : f32 to vector<128x1xf32>
    %61 = vector.extract_strided_slice %44 {offsets = [0, 1], sizes = [128, 31], strides = [1, 1]} : vector<128x32xf32> to vector<128x31xf32>
    %62 = tpu.concatenate %61, %60 in 1 : vector<128x31xf32>, vector<128x1xf32> -> vector<128x32xf32>
    %63 = tpu.iota {dimensions = array<i32: 1>} : vector<128x32xi32>
    %c15_i32_32 = arith.constant 15 : i32
    %64 = vector.broadcast %c15_i32_32 : i32 to vector<128x32xi32>
    %65 = arith.cmpi sge, %63, %64 : vector<128x32xi32>
    %c16_i32_33 = arith.constant 16 : i32
    %66 = vector.broadcast %c16_i32_33 : i32 to vector<128x32xi32>
    %67 = arith.cmpi slt, %63, %66 : vector<128x32xi32>
    %68 = arith.andi %65, %67 : vector<128x32xi1>
    %cst_34 = arith.constant 0.000000e+00 : f32
    %69 = vector.broadcast %cst_34 : f32 to vector<128x32xf32>
    %70 = arith.select %68, %69, %62 : vector<128x32xi1>, vector<128x32xf32>
    %71 = tpu.concatenate %59, %44, %70 in 0 : vector<128x32xf32>, vector<128x32xf32>, vector<128x32xf32> -> vector<384x32xf32>
    %cst_35 = arith.constant dense<0.000000e+00> : vector<128x32xf32>
    %72 = tpu.matmul %48, %71, %cst_35 {dimension_numbers = #tpu.dot_dimension_numbers<[1], [0], [0], [1], [0, 0, 1, 1], [], []>} : vector<128x384xf32>, vector<384x32xf32>, vector<128x32xf32> -> vector<128x32xf32>
    %73 = vector.broadcast %45 : vector<128x1xf32> to vector<128x32xf32>
    %74 = arith.addf %72, %73 : vector<128x32xf32>
    %cst_36 = arith.constant 0.000000e+00 : f32
    %75 = vector.broadcast %cst_36 : f32 to vector<128x32xf32>
    %76 = arith.maximumf %74, %75 : vector<128x32xf32>
    %c0_37 = arith.constant 0 : index
    %c0_38 = arith.constant 0 : index
    %77 = vector.load %arg7[%c0_37, %c0_38] : memref<128x384xf32, #tpu.memory_space<vmem>>, vector<128x384xf32>
    %cst_39 = arith.constant 0.000000e+00 : f32
    %78 = vector.broadcast %cst_39 : f32 to vector<128x1xf32>
    %79 = vector.extract_strided_slice %76 {offsets = [0, 0], sizes = [128, 31], strides = [1, 1]} : vector<128x32xf32> to vector<128x31xf32>
    %80 = tpu.concatenate %78, %79 in 1 : vector<128x1xf32>, vector<128x31xf32> -> vector<128x32xf32>
    %81 = tpu.iota {dimensions = array<i32: 1>} : vector<128x32xi32>
    %c16_i32_40 = arith.constant 16 : i32
    %82 = vector.broadcast %c16_i32_40 : i32 to vector<128x32xi32>
    %83 = arith.cmpi sge, %81, %82 : vector<128x32xi32>
    %c17_i32_41 = arith.constant 17 : i32
    %84 = vector.broadcast %c17_i32_41 : i32 to vector<128x32xi32>
    %85 = arith.cmpi slt, %81, %84 : vector<128x32xi32>
    %86 = arith.andi %83, %85 : vector<128x32xi1>
    %cst_42 = arith.constant 0.000000e+00 : f32
    %87 = vector.broadcast %cst_42 : f32 to vector<128x32xf32>
    %88 = arith.select %86, %87, %80 : vector<128x32xi1>, vector<128x32xf32>
    %cst_43 = arith.constant 0.000000e+00 : f32
    %89 = vector.broadcast %cst_43 : f32 to vector<128x1xf32>
    %90 = vector.extract_strided_slice %76 {offsets = [0, 1], sizes = [128, 31], strides = [1, 1]} : vector<128x32xf32> to vector<128x31xf32>
    %91 = tpu.concatenate %90, %89 in 1 : vector<128x31xf32>, vector<128x1xf32> -> vector<128x32xf32>
    %92 = tpu.iota {dimensions = array<i32: 1>} : vector<128x32xi32>
    %c15_i32_44 = arith.constant 15 : i32
    %93 = vector.broadcast %c15_i32_44 : i32 to vector<128x32xi32>
    %94 = arith.cmpi sge, %92, %93 : vector<128x32xi32>
    %c16_i32_45 = arith.constant 16 : i32
    %95 = vector.broadcast %c16_i32_45 : i32 to vector<128x32xi32>
    %96 = arith.cmpi slt, %92, %95 : vector<128x32xi32>
    %97 = arith.andi %94, %96 : vector<128x32xi1>
    %cst_46 = arith.constant 0.000000e+00 : f32
    %98 = vector.broadcast %cst_46 : f32 to vector<128x32xf32>
    %99 = arith.select %97, %98, %91 : vector<128x32xi1>, vector<128x32xf32>
    %100 = tpu.concatenate %88, %76, %99 in 0 : vector<128x32xf32>, vector<128x32xf32>, vector<128x32xf32> -> vector<384x32xf32>
    %cst_47 = arith.constant dense<0.000000e+00> : vector<128x32xf32>
    %101 = tpu.matmul %77, %100, %cst_47 {dimension_numbers = #tpu.dot_dimension_numbers<[1], [0], [0], [1], [0, 0, 1, 1], [], []>} : vector<128x384xf32>, vector<384x32xf32>, vector<128x32xf32> -> vector<128x32xf32>
    %102 = vector.broadcast %47 : vector<128x1xf32> to vector<128x32xf32>
    %103 = arith.mulf %44, %102 : vector<128x32xf32>
    %104 = arith.addf %101, %103 : vector<128x32xf32>
    %105 = vector.broadcast %46 : vector<128x1xf32> to vector<128x32xf32>
    %106 = arith.addf %104, %105 : vector<128x32xf32>
    %cst_48 = arith.constant 0.000000e+00 : f32
    %107 = vector.broadcast %cst_48 : f32 to vector<128x32xf32>
    %108 = arith.maximumf %106, %107 : vector<128x32xf32>
    %c0_49 = arith.constant 0 : index
    %c0_50 = arith.constant 0 : index
    %109 = vector.load %arg10[%c0_49, %c0_50] : memref<256x128xf32, #tpu.memory_space<vmem>>, vector<256x128xf32>
    %cst_51 = arith.constant dense<0.000000e+00> : vector<256x32xf32>
    %110 = tpu.matmul %109, %108, %cst_51 {dimension_numbers = #tpu.dot_dimension_numbers<[1], [0], [0], [1], [0, 0, 1, 1], [], []>} : vector<256x128xf32>, vector<128x32xf32>, vector<256x32xf32> -> vector<256x32xf32>
    %111 = vector.extract_strided_slice %110 {offsets = [0, 0], sizes = [128, 32], strides = [1, 1]} : vector<256x32xf32> to vector<128x32xf32>
    %112 = vector.extract_strided_slice %110 {offsets = [128, 0], sizes = [128, 32], strides = [1, 1]} : vector<256x32xf32> to vector<128x32xf32>
    %113 = tpu.concatenate %111, %112 in 1 : vector<128x32xf32>, vector<128x32xf32> -> vector<128x64xf32>
    %c0_52 = arith.constant 0 : index
    %c0_53 = arith.constant 0 : index
    %114 = vector.load %arg11[%c0_52, %c0_53] : memref<64x64xf32, #tpu.memory_space<vmem>>, vector<64x64xf32>
    %cst_54 = arith.constant dense<0.000000e+00> : vector<128x64xf32>
    %115 = tpu.matmul %113, %114, %cst_54 {dimension_numbers = #tpu.dot_dimension_numbers<[1], [0], [0], [1], [0, 0, 1, 1], [], []>} : vector<128x64xf32>, vector<64x64xf32>, vector<128x64xf32> -> vector<128x64xf32>
    %c0_55 = arith.constant 0 : index
    %c0_56 = arith.constant 0 : index
    %116 = vector.load %arg15[%c0_55, %c0_56] : memref<128x5xf32, #tpu.memory_space<vmem>>, vector<128x1xf32>
    %117 = vector.broadcast %116 : vector<128x1xf32> to vector<128x64xf32>
    %118 = arith.addf %115, %117 : vector<128x64xf32>
    %cst_57 = arith.constant 0.000000e+00 : f32
    %119 = vector.broadcast %cst_57 : f32 to vector<128x64xf32>
    %120 = arith.maximumf %118, %119 : vector<128x64xf32>
    %c0_58 = arith.constant 0 : index
    %c0_59 = arith.constant 0 : index
    %c0_60 = arith.constant 0 : index
    %121 = vector.load %arg9[%c0_58, %c0_59, %c0_60] : memref<1x128x64xf32, #tpu.memory_space<vmem>>, vector<1x128x64xf32>
    %122 = vector.shape_cast %121 : vector<1x128x64xf32> to vector<128x64xf32>
    %123 = tpu.concatenate %120, %122 in 0 : vector<128x64xf32>, vector<128x64xf32> -> vector<256x64xf32>
    %c0_61 = arith.constant 0 : index
    %c0_62 = arith.constant 0 : index
    %124 = vector.load %arg12[%c0_61, %c0_62] : memref<128x768xf32, #tpu.memory_space<vmem>>, vector<128x768xf32>
    %c0_63 = arith.constant 0 : index
    %c1_64 = arith.constant 1 : index
    %125 = vector.load %arg15[%c0_63, %c1_64] : memref<128x5xf32, #tpu.memory_space<vmem>>, vector<128x1xf32>
    %cst_65 = arith.constant 0.000000e+00 : f32
    %126 = vector.broadcast %cst_65 : f32 to vector<256x1xf32>
    %127 = vector.extract_strided_slice %123 {offsets = [0, 0], sizes = [256, 63], strides = [1, 1]} : vector<256x64xf32> to vector<256x63xf32>
    %128 = tpu.concatenate %126, %127 in 1 : vector<256x1xf32>, vector<256x63xf32> -> vector<256x64xf32>
    %129 = tpu.iota {dimensions = array<i32: 1>} : vector<256x64xi32>
    %c32_i32 = arith.constant 32 : i32
    %130 = vector.broadcast %c32_i32 : i32 to vector<256x64xi32>
    %131 = arith.cmpi sge, %129, %130 : vector<256x64xi32>
    %c33_i32 = arith.constant 33 : i32
    %132 = vector.broadcast %c33_i32 : i32 to vector<256x64xi32>
    %133 = arith.cmpi slt, %129, %132 : vector<256x64xi32>
    %134 = arith.andi %131, %133 : vector<256x64xi1>
    %cst_66 = arith.constant 0.000000e+00 : f32
    %135 = vector.broadcast %cst_66 : f32 to vector<256x64xf32>
    %136 = arith.select %134, %135, %128 : vector<256x64xi1>, vector<256x64xf32>
    %cst_67 = arith.constant 0.000000e+00 : f32
    %137 = vector.broadcast %cst_67 : f32 to vector<256x1xf32>
    %138 = vector.extract_strided_slice %123 {offsets = [0, 1], sizes = [256, 63], strides = [1, 1]} : vector<256x64xf32> to vector<256x63xf32>
    %139 = tpu.concatenate %138, %137 in 1 : vector<256x63xf32>, vector<256x1xf32> -> vector<256x64xf32>
    %140 = tpu.iota {dimensions = array<i32: 1>} : vector<256x64xi32>
    %c31_i32 = arith.constant 31 : i32
    %141 = vector.broadcast %c31_i32 : i32 to vector<256x64xi32>
    %142 = arith.cmpi sge, %140, %141 : vector<256x64xi32>
    %c32_i32_68 = arith.constant 32 : i32
    %143 = vector.broadcast %c32_i32_68 : i32 to vector<256x64xi32>
    %144 = arith.cmpi slt, %140, %143 : vector<256x64xi32>
    %145 = arith.andi %142, %144 : vector<256x64xi1>
    %cst_69 = arith.constant 0.000000e+00 : f32
    %146 = vector.broadcast %cst_69 : f32 to vector<256x64xf32>
    %147 = arith.select %145, %146, %139 : vector<256x64xi1>, vector<256x64xf32>
    %148 = tpu.concatenate %136, %123, %147 in 0 : vector<256x64xf32>, vector<256x64xf32>, vector<256x64xf32> -> vector<768x64xf32>
    %cst_70 = arith.constant dense<0.000000e+00> : vector<128x64xf32>
    %149 = tpu.matmul %124, %148, %cst_70 {dimension_numbers = #tpu.dot_dimension_numbers<[1], [0], [0], [1], [0, 0, 1, 1], [], []>} : vector<128x768xf32>, vector<768x64xf32>, vector<128x64xf32> -> vector<128x64xf32>
    %150 = vector.broadcast %125 : vector<128x1xf32> to vector<128x64xf32>
    %151 = arith.addf %149, %150 : vector<128x64xf32>
    %c0_71 = arith.constant 0 : index
    %c2_72 = arith.constant 2 : index
    %152 = vector.load %arg15[%c0_71, %c2_72] : memref<128x5xf32, #tpu.memory_space<vmem>>, vector<128x1xf32>
    %c0_73 = arith.constant 0 : index
    %c3_74 = arith.constant 3 : index
    %153 = vector.load %arg15[%c0_73, %c3_74] : memref<128x5xf32, #tpu.memory_space<vmem>>, vector<128x1xf32>
    %c0_75 = arith.constant 0 : index
    %c4_76 = arith.constant 4 : index
    %154 = vector.load %arg15[%c0_75, %c4_76] : memref<128x5xf32, #tpu.memory_space<vmem>>, vector<128x1xf32>
    %c0_77 = arith.constant 0 : index
    %c0_78 = arith.constant 0 : index
    %155 = vector.load %arg13[%c0_77, %c0_78] : memref<128x384xf32, #tpu.memory_space<vmem>>, vector<128x384xf32>
    %cst_79 = arith.constant 0.000000e+00 : f32
    %156 = vector.broadcast %cst_79 : f32 to vector<128x1xf32>
    %157 = vector.extract_strided_slice %151 {offsets = [0, 0], sizes = [128, 63], strides = [1, 1]} : vector<128x64xf32> to vector<128x63xf32>
    %158 = tpu.concatenate %156, %157 in 1 : vector<128x1xf32>, vector<128x63xf32> -> vector<128x64xf32>
    %159 = tpu.iota {dimensions = array<i32: 1>} : vector<128x64xi32>
    %c32_i32_80 = arith.constant 32 : i32
    %160 = vector.broadcast %c32_i32_80 : i32 to vector<128x64xi32>
    %161 = arith.cmpi sge, %159, %160 : vector<128x64xi32>
    %c33_i32_81 = arith.constant 33 : i32
    %162 = vector.broadcast %c33_i32_81 : i32 to vector<128x64xi32>
    %163 = arith.cmpi slt, %159, %162 : vector<128x64xi32>
    %164 = arith.andi %161, %163 : vector<128x64xi1>
    %cst_82 = arith.constant 0.000000e+00 : f32
    %165 = vector.broadcast %cst_82 : f32 to vector<128x64xf32>
    %166 = arith.select %164, %165, %158 : vector<128x64xi1>, vector<128x64xf32>
    %cst_83 = arith.constant 0.000000e+00 : f32
    %167 = vector.broadcast %cst_83 : f32 to vector<128x1xf32>
    %168 = vector.extract_strided_slice %151 {offsets = [0, 1], sizes = [128, 63], strides = [1, 1]} : vector<128x64xf32> to vector<128x63xf32>
    %169 = tpu.concatenate %168, %167 in 1 : vector<128x63xf32>, vector<128x1xf32> -> vector<128x64xf32>
    %170 = tpu.iota {dimensions = array<i32: 1>} : vector<128x64xi32>
    %c31_i32_84 = arith.constant 31 : i32
    %171 = vector.broadcast %c31_i32_84 : i32 to vector<128x64xi32>
    %172 = arith.cmpi sge, %170, %171 : vector<128x64xi32>
    %c32_i32_85 = arith.constant 32 : i32
    %173 = vector.broadcast %c32_i32_85 : i32 to vector<128x64xi32>
    %174 = arith.cmpi slt, %170, %173 : vector<128x64xi32>
    %175 = arith.andi %172, %174 : vector<128x64xi1>
    %cst_86 = arith.constant 0.000000e+00 : f32
    %176 = vector.broadcast %cst_86 : f32 to vector<128x64xf32>
    %177 = arith.select %175, %176, %169 : vector<128x64xi1>, vector<128x64xf32>
    %178 = tpu.concatenate %166, %151, %177 in 0 : vector<128x64xf32>, vector<128x64xf32>, vector<128x64xf32> -> vector<384x64xf32>
    %cst_87 = arith.constant dense<0.000000e+00> : vector<128x64xf32>
    %179 = tpu.matmul %155, %178, %cst_87 {dimension_numbers = #tpu.dot_dimension_numbers<[1], [0], [0], [1], [0, 0, 1, 1], [], []>} : vector<128x384xf32>, vector<384x64xf32>, vector<128x64xf32> -> vector<128x64xf32>
    %180 = vector.broadcast %152 : vector<128x1xf32> to vector<128x64xf32>
    %181 = arith.addf %179, %180 : vector<128x64xf32>
    %cst_88 = arith.constant 0.000000e+00 : f32
    %182 = vector.broadcast %cst_88 : f32 to vector<128x64xf32>
    %183 = arith.maximumf %181, %182 : vector<128x64xf32>
    %c0_89 = arith.constant 0 : index
    %c0_90 = arith.constant 0 : index
    %184 = vector.load %arg14[%c0_89, %c0_90] : memref<128x384xf32, #tpu.memory_space<vmem>>, vector<128x384xf32>
    %cst_91 = arith.constant 0.000000e+00 : f32
    %185 = vector.broadcast %cst_91 : f32 to vector<128x1xf32>
    %186 = vector.extract_strided_slice %183 {offsets = [0, 0], sizes = [128, 63], strides = [1, 1]} : vector<128x64xf32> to vector<128x63xf32>
    %187 = tpu.concatenate %185, %186 in 1 : vector<128x1xf32>, vector<128x63xf32> -> vector<128x64xf32>
    %188 = tpu.iota {dimensions = array<i32: 1>} : vector<128x64xi32>
    %c32_i32_92 = arith.constant 32 : i32
    %189 = vector.broadcast %c32_i32_92 : i32 to vector<128x64xi32>
    %190 = arith.cmpi sge, %188, %189 : vector<128x64xi32>
    %c33_i32_93 = arith.constant 33 : i32
    %191 = vector.broadcast %c33_i32_93 : i32 to vector<128x64xi32>
    %192 = arith.cmpi slt, %188, %191 : vector<128x64xi32>
    %193 = arith.andi %190, %192 : vector<128x64xi1>
    %cst_94 = arith.constant 0.000000e+00 : f32
    %194 = vector.broadcast %cst_94 : f32 to vector<128x64xf32>
    %195 = arith.select %193, %194, %187 : vector<128x64xi1>, vector<128x64xf32>
    %cst_95 = arith.constant 0.000000e+00 : f32
    %196 = vector.broadcast %cst_95 : f32 to vector<128x1xf32>
    %197 = vector.extract_strided_slice %183 {offsets = [0, 1], sizes = [128, 63], strides = [1, 1]} : vector<128x64xf32> to vector<128x63xf32>
    %198 = tpu.concatenate %197, %196 in 1 : vector<128x63xf32>, vector<128x1xf32> -> vector<128x64xf32>
    %199 = tpu.iota {dimensions = array<i32: 1>} : vector<128x64xi32>
    %c31_i32_96 = arith.constant 31 : i32
    %200 = vector.broadcast %c31_i32_96 : i32 to vector<128x64xi32>
    %201 = arith.cmpi sge, %199, %200 : vector<128x64xi32>
    %c32_i32_97 = arith.constant 32 : i32
    %202 = vector.broadcast %c32_i32_97 : i32 to vector<128x64xi32>
    %203 = arith.cmpi slt, %199, %202 : vector<128x64xi32>
    %204 = arith.andi %201, %203 : vector<128x64xi1>
    %cst_98 = arith.constant 0.000000e+00 : f32
    %205 = vector.broadcast %cst_98 : f32 to vector<128x64xf32>
    %206 = arith.select %204, %205, %198 : vector<128x64xi1>, vector<128x64xf32>
    %207 = tpu.concatenate %195, %183, %206 in 0 : vector<128x64xf32>, vector<128x64xf32>, vector<128x64xf32> -> vector<384x64xf32>
    %cst_99 = arith.constant dense<0.000000e+00> : vector<128x64xf32>
    %208 = tpu.matmul %184, %207, %cst_99 {dimension_numbers = #tpu.dot_dimension_numbers<[1], [0], [0], [1], [0, 0, 1, 1], [], []>} : vector<128x384xf32>, vector<384x64xf32>, vector<128x64xf32> -> vector<128x64xf32>
    %209 = vector.broadcast %154 : vector<128x1xf32> to vector<128x64xf32>
    %210 = arith.mulf %151, %209 : vector<128x64xf32>
    %211 = arith.addf %208, %210 : vector<128x64xf32>
    %212 = vector.broadcast %153 : vector<128x1xf32> to vector<128x64xf32>
    %213 = arith.addf %211, %212 : vector<128x64xf32>
    %cst_100 = arith.constant 0.000000e+00 : f32
    %214 = vector.broadcast %cst_100 : f32 to vector<128x64xf32>
    %215 = arith.maximumf %213, %214 : vector<128x64xf32>
    %c0_101 = arith.constant 0 : index
    %c0_102 = arith.constant 0 : index
    %216 = vector.load %arg16[%c0_101, %c0_102] : memref<96x384xf32, #tpu.memory_space<vmem>>, vector<96x384xf32>
    %c0_103 = arith.constant 0 : index
    %c0_104 = arith.constant 0 : index
    %217 = vector.load %arg17[%c0_103, %c0_104] : memref<96x1xf32, #tpu.memory_space<vmem>>, vector<96x1xf32>
    %cst_105 = arith.constant 0.000000e+00 : f32
    %218 = vector.broadcast %cst_105 : f32 to vector<128x1xf32>
    %219 = vector.extract_strided_slice %215 {offsets = [0, 0], sizes = [128, 63], strides = [1, 1]} : vector<128x64xf32> to vector<128x63xf32>
    %220 = tpu.concatenate %218, %219 in 1 : vector<128x1xf32>, vector<128x63xf32> -> vector<128x64xf32>
    %221 = tpu.iota {dimensions = array<i32: 1>} : vector<128x64xi32>
    %c32_i32_106 = arith.constant 32 : i32
    %222 = vector.broadcast %c32_i32_106 : i32 to vector<128x64xi32>
    %223 = arith.cmpi sge, %221, %222 : vector<128x64xi32>
    %c33_i32_107 = arith.constant 33 : i32
    %224 = vector.broadcast %c33_i32_107 : i32 to vector<128x64xi32>
    %225 = arith.cmpi slt, %221, %224 : vector<128x64xi32>
    %226 = arith.andi %223, %225 : vector<128x64xi1>
    %cst_108 = arith.constant 0.000000e+00 : f32
    %227 = vector.broadcast %cst_108 : f32 to vector<128x64xf32>
    %228 = arith.select %226, %227, %220 : vector<128x64xi1>, vector<128x64xf32>
    %cst_109 = arith.constant 0.000000e+00 : f32
    %229 = vector.broadcast %cst_109 : f32 to vector<128x1xf32>
    %230 = vector.extract_strided_slice %215 {offsets = [0, 1], sizes = [128, 63], strides = [1, 1]} : vector<128x64xf32> to vector<128x63xf32>
    %231 = tpu.concatenate %230, %229 in 1 : vector<128x63xf32>, vector<128x1xf32> -> vector<128x64xf32>
    %232 = tpu.iota {dimensions = array<i32: 1>} : vector<128x64xi32>
    %c31_i32_110 = arith.constant 31 : i32
    %233 = vector.broadcast %c31_i32_110 : i32 to vector<128x64xi32>
    %234 = arith.cmpi sge, %232, %233 : vector<128x64xi32>
    %c32_i32_111 = arith.constant 32 : i32
    %235 = vector.broadcast %c32_i32_111 : i32 to vector<128x64xi32>
    %236 = arith.cmpi slt, %232, %235 : vector<128x64xi32>
    %237 = arith.andi %234, %236 : vector<128x64xi1>
    %cst_112 = arith.constant 0.000000e+00 : f32
    %238 = vector.broadcast %cst_112 : f32 to vector<128x64xf32>
    %239 = arith.select %237, %238, %231 : vector<128x64xi1>, vector<128x64xf32>
    %240 = tpu.concatenate %228, %215, %239 in 0 : vector<128x64xf32>, vector<128x64xf32>, vector<128x64xf32> -> vector<384x64xf32>
    %cst_113 = arith.constant dense<0.000000e+00> : vector<96x64xf32>
    %241 = tpu.matmul %216, %240, %cst_113 {dimension_numbers = #tpu.dot_dimension_numbers<[1], [0], [0], [1], [0, 0, 1, 1], [], []>} : vector<96x384xf32>, vector<384x64xf32>, vector<96x64xf32> -> vector<96x64xf32>
    %242 = vector.broadcast %217 : vector<96x1xf32> to vector<96x64xf32>
    %243 = arith.addf %241, %242 : vector<96x64xf32>
    %c0_114 = arith.constant 0 : index
    %c0_115 = arith.constant 0 : index
    %c0_116 = arith.constant 0 : index
    %244 = vector.load %arg18[%c0_114, %c0_115, %c0_116] : memref<1x96x64xf32, #tpu.memory_space<vmem>>, vector<1x96x64xf32>
    %245 = vector.shape_cast %244 : vector<1x96x64xf32> to vector<96x64xf32>
    %246 = vector.shape_cast %243 : vector<96x64xf32> to vector<1x96x64xf32>
    tpu.vector_store %arg18[%c0_114, %c0_115, %c0_116], %246 {strides = array<i32>} : memref<1x96x64xf32, #tpu.memory_space<vmem>>, vector<1x96x64xf32>,
    return
  }
  func.func @transform_0(%arg0: i32) -> (i32, i32, i32) {
    %c0_i32 = arith.constant 0 : i32
    %c0_i32_0 = arith.constant 0 : i32
    %c0_i32_1 = arith.constant 0 : i32
    return %arg0, %c0_i32, %c0_i32_0 : i32, i32, i32
  }
  func.func @transform_1(%arg0: i32) -> (i32, i32, i32) {
    %c0_i32 = arith.constant 0 : i32
    %c0_i32_0 = arith.constant 0 : i32
    %c0_i32_1 = arith.constant 0 : i32
    return %arg0, %c0_i32, %c0_i32_0 : i32, i32, i32
  }
  func.func @transform_2(%arg0: i32) -> (i32, i32) {
    %c0_i32 = arith.constant 0 : i32
    %c0_i32_0 = arith.constant 0 : i32
    %c0_i32_1 = arith.constant 0 : i32
    return %c0_i32, %c0_i32_0 : i32, i32
  }
  func.func @transform_3(%arg0: i32) -> (i32, i32) {
    %c0_i32 = arith.constant 0 : i32
    %c0_i32_0 = arith.constant 0 : i32
    %c0_i32_1 = arith.constant 0 : i32
    return %c0_i32, %c0_i32_0 : i32, i32
  }
  func.func @transform_4(%arg0: i32) -> (i32, i32) {
    %c0_i32 = arith.constant 0 : i32
    %c0_i32_0 = arith.constant 0 : i32
    %c0_i32_1 = arith.constant 0 : i32
    return %c0_i32, %c0_i32_0 : i32, i32
  }
  func.func @transform_5(%arg0: i32) -> (i32, i32) {
    %c0_i32 = arith.constant 0 : i32
    %c0_i32_0 = arith.constant 0 : i32
    %c0_i32_1 = arith.constant 0 : i32
    return %c0_i32, %c0_i32_0 : i32, i32
  }
  func.func @transform_6(%arg0: i32) -> (i32, i32) {
    %c0_i32 = arith.constant 0 : i32
    %c0_i32_0 = arith.constant 0 : i32
    %c0_i32_1 = arith.constant 0 : i32
    return %c0_i32, %c0_i32_0 : i32, i32
  }
  func.func @transform_7(%arg0: i32) -> (i32, i32) {
    %c0_i32 = arith.constant 0 : i32
    %c0_i32_0 = arith.constant 0 : i32
    %c0_i32_1 = arith.constant 0 : i32
    return %c0_i32, %c0_i32_0 : i32, i32
  }
  func.func @transform_8(%arg0: i32) -> (i32, i32, i32) {
    %c0_i32 = arith.constant 0 : i32
    %c0_i32_0 = arith.constant 0 : i32
    %c0_i32_1 = arith.constant 0 : i32
    return %arg0, %c0_i32, %c0_i32_0 : i32, i32, i32
  }
  func.func @transform_9(%arg0: i32) -> (i32, i32) {
    %c0_i32 = arith.constant 0 : i32
    %c0_i32_0 = arith.constant 0 : i32
    %c0_i32_1 = arith.constant 0 : i32
    return %c0_i32, %c0_i32_0 : i32, i32
  }
  func.func @transform_10(%arg0: i32) -> (i32, i32) {
    %c0_i32 = arith.constant 0 : i32
    %c0_i32_0 = arith.constant 0 : i32
    %c0_i32_1 = arith.constant 0 : i32
    return %c0_i32, %c0_i32_0 : i32, i32
  }
  func.func @transform_11(%arg0: i32) -> (i32, i32) {
    %c0_i32 = arith.constant 0 : i32
    %c0_i32_0 = arith.constant 0 : i32
    %c0_i32_1 = arith.constant 0 : i32
    return %c0_i32, %c0_i32_0 : i32, i32
  }
  func.func @transform_12(%arg0: i32) -> (i32, i32) {
    %c0_i32 = arith.constant 0 : i32
    %c0_i32_0 = arith.constant 0 : i32
    %c0_i32_1 = arith.constant 0 : i32
    return %c0_i32, %c0_i32_0 : i32, i32
  }
  func.func @transform_13(%arg0: i32) -> (i32, i32) {
    %c0_i32 = arith.constant 0 : i32
    %c0_i32_0 = arith.constant 0 : i32
    %c0_i32_1 = arith.constant 0 : i32
    return %c0_i32, %c0_i32_0 : i32, i32
  }
  func.func @transform_14(%arg0: i32) -> (i32, i32) {
    %c0_i32 = arith.constant 0 : i32
    %c0_i32_0 = arith.constant 0 : i32
    %c0_i32_1 = arith.constant 0 : i32
    return %c0_i32, %c0_i32_0 : i32, i32
  }
  func.func @transform_15(%arg0: i32) -> (i32, i32) {
    %c0_i32 = arith.constant 0 : i32
    %c0_i32_0 = arith.constant 0 : i32
    %c0_i32_1 = arith.constant 0 : i32
    return %c0_i32, %c0_i32_0 : i32, i32
  }
  func.func @transform_16(%arg0: i32) -> (i32, i32) {
    %c0_i32 = arith.constant 0 : i32
    %c0_i32_0 = arith.constant 0 : i32
    %c0_i32_1 = arith.constant 0 : i32
    return %c0_i32, %c0_i32_0 : i32, i32
  }
  func.func @transform_17(%arg0: i32) -> (i32, i32, i32) {
    %c0_i32 = arith.constant 0 : i32
    %c0_i32_0 = arith.constant 0 : i32
    %c0_i32_1 = arith.constant 0 : i32
    return %arg0, %c0_i32, %c0_i32_0 : i32, i32, i32
  }
}

</mosaic_0001>

<bundles_post_ra>
// kernel: decoder_forward.1
= control target key start
LH: loop header
LB: loop body
LE: loop exit
PB: predicated region body
PF: predicated region fallthrough
CT: control target
= control target key end

     0   :  { %s8785_s18 = smov 16   ;;  %vm393_vm0 = vcmask 130048   ;;  %vm510_vm1 = vcmask 261120   ;;  %s8788_s21 = smov 127   ;;  %vm960_vm2 = vcmask 7168   ;;  %vm1126_vm10 = vcmask 252928   ;;  %s14339_s0 = inlined_call_operand.vmem [shape: f32[1,128,16], index: 0, kind: input, shape index: {}]   ;;  %s14340_s2 = inlined_call_operand.vmem [shape: f32[256,128], index: 2, kind: input, shape index: {}]   ;;  %s14341_s3 = inlined_call_operand.vmem [shape: f32[32,32], index: 3, kind: input, shape index: {}]   ;;  %s14342_s7 = inlined_call_operand.vmem [shape: f32[128,5], index: 7, kind: input, shape index: {}]   ;;  %s14343_s1 = inlined_call_operand.vmem [shape: f32[1,128,32], index: 1, kind: input, shape index: {}]   ;;  %s14344_s4 = inlined_call_operand.vmem [shape: f32[128,768], index: 4, kind: input, shape index: {}]   ;;  %s14345_s5 = inlined_call_operand.vmem [shape: f32[128,384], index: 5, kind: input, shape index: {}]   ;;  %s14346_s6 = inlined_call_operand.vmem [shape: f32[128,384], index: 6, kind: input, shape index: {}]   ;;  %s14347_s9 = inlined_call_operand.vmem [shape: f32[256,128], index: 9, kind: input, shape index: {}]   ;;  %s14348_s10 = inlined_call_operand.vmem [shape: f32[64,64], index: 10, kind: input, shape index: {}]   ;;  %s14349_s14 = inlined_call_operand.vmem [shape: f32[128,5], index: 14, kind: input, shape index: {}]   ;;  %s14350_s8 = inlined_call_operand.vmem [shape: f32[1,128,64], index: 8, kind: input, shape index: {}]   ;;  %s14351_s11 = inlined_call_operand.vmem [shape: f32[128,768], index: 11, kind: input, shape index: {}]   ;;  %s14352_s12 = inlined_call_operand.vmem [shape: f32[128,384], index: 12, kind: input, shape index: {}]   ;;  %s14353_s13 = inlined_call_operand.vmem [shape: f32[128,384], index: 13, kind: input, shape index: {}]   ;;  %s14354_s15 = inlined_call_operand.vmem [shape: f32[96,384], index: 15, kind: input, shape index: {}]   ;;  %s14355_s16 = inlined_call_operand.vmem [shape: f32[96,1], index: 16, kind: input, shape index: {}]   ;;  %s14356_s17 = inlined_call_operand.vmem [shape: f32[1,96,64], index: 17, kind: output, shape index: {}]  }
   0x1   :  { %14491 = sst [smem:[#allocation42_spill]] %s14339_s0  ;;  %v413_v48 = vld [vmem:[%s14341_s3 + $0x18] sm:$0xff]  ;;  %v412_v49 = vld [vmem:[%s14341_s3 + $0x10] sm:$0xff]  ;;  %v411_v61 = vld [vmem:[%s14341_s3 + $0x8] sm:$0xff]  ;;  %s8793_s28 = smov 32   ;;  %vm3418_vm12 = vcmask 523264  }
   0x2   :  { %14492 = sst [smem:[#allocation43_spill]] %s14340_s2  ;;  %8284 = vmatprep.subr.mxu1 %v413_v48  ;;  %v410_v63 = vld [vmem:[%s14341_s3] sm:$0xff]  ;;  %s8787_s2 = smov 1  }
   0x3   :  { %s14493_s26 = sld [smem:[#allocation42_spill]]  ;;  %8285 = vmatpush3.msra.mxu1 %v413_v48 }
   0x4   :  { %s14494_s20 = sld [smem:[#allocation43_spill]]  ;;  %8286 = vmatprep.subr.mxu1 %v412_v49 }
   0x5   :  { %8287 = vmatpush3.msra.mxu1 %v412_v49 }
   0x6   :  { %8288 = vmatprep.subr.mxu1 %v411_v61 }
   0x7   :  { %8289 = vmatpush3.msra.mxu1 %v411_v61 }
   0x8   :  { %8290 = vmatprep.subr.mxu1 %v410_v63 }
   0x9   :  { %v71_v0 = vld [vmem:[%s14493_s26 + $0x78] sm:$0xff]  ;;  %v70_v1 = vld [vmem:[%s14493_s26 + $0x70] sm:$0xff]  ;;  %v69_v2 = vld [vmem:[%s14493_s26 + $0x68] sm:$0xff]  ;;  %8291 = vmatpush3.msra.mxu1 %v410_v63 }
   0xa   :  { %8204 = vmatprep.subr.mxu0 %v71_v0  ;;  %v68_v3 = vld [vmem:[%s14493_s26 + $0x60] sm:$0xff]  ;;  %v67_v5 = vld [vmem:[%s14493_s26 + $0x58] sm:$0xff]  ;;  %v66_v6 = vld [vmem:[%s14493_s26 + $0x50] sm:$0xff] }
   0xb   :  { %8205 = vmatpush3.msra.mxu0 %v71_v0  ;;  %v72_v4 = vld [vmem:[%s14494_s20] sm:$0xff]  ;;  %v65_v7 = vld [vmem:[%s14493_s26 + $0x48] sm:$0xff]  ;;  %v63_v9 = vld [vmem:[%s14493_s26 + $0x38] sm:$0xff] }
   0xc   :  { %8206 = vmatprep.subr.mxu0 %v70_v1  ;;  %8236 = vmatprep.mubr.f32.mxu0 %v72_v4  ;;  %v64_v8 = vld [vmem:[%s14493_s26 + $0x40] sm:$0xff]  ;;  %v62_v10 = vld [vmem:[%s14493_s26 + $0x30] sm:$0xff]  ;;  %v61_v11 = vld [vmem:[%s14493_s26 + $0x28] sm:$0xff] }
   0xd   :  { %8207 = vmatpush3.msra.mxu0 %v70_v1  ;;  %v60_v12 = vld [vmem:[%s14493_s26 + $0x20] sm:$0xff]  ;;  %v59_v13 = vld [vmem:[%s14493_s26 + $0x18] sm:$0xff]  ;;  %v58_v14 = vld [vmem:[%s14493_s26 + $0x10] sm:$0xff] }
   0xe   :  { %8208 = vmatprep.subr.mxu0 %v69_v2  ;;  %v57_v15 = vld [vmem:[%s14493_s26 + $0x8] sm:$0xff]  ;;  %v56_v16 = vld [vmem:[%s14493_s26] sm:$0xff]  ;;  %v74_v18 = vld [vmem:[%s14494_s20 + $0x10] sm:$0xff] }
   0xf   :  { %8209 = vmatpush3.msra.mxu0 %v69_v2  ;;  %v73_v17 = vld [vmem:[%s14494_s20 + $0x8] sm:$0xff]  ;;  %v75_v19 = vld [vmem:[%s14494_s20 + $0x18] sm:$0xff]  ;;  %v76_v20 = vld [vmem:[%s14494_s20 + $0x20] sm:$0xff] }
  0x10   :  { %8210 = vmatprep.subr.mxu0 %v68_v3  ;;  %v77_v21 = vld [vmem:[%s14494_s20 + $0x28] sm:$0xff]  ;;  %v78_v22 = vld [vmem:[%s14494_s20 + $0x30] sm:$0xff]  ;;  %v79_v23 = vld [vmem:[%s14494_s20 + $0x38] sm:$0xff] }
  0x11   :  { %8211 = vmatpush3.msra.mxu0 %v68_v3  ;;  %v80_v24 = vld [vmem:[%s14494_s20 + $0x40] sm:$0xff]  ;;  %v81_v25 = vld [vmem:[%s14494_s20 + $0x48] sm:$0xff]  ;;  %v82_v26 = vld [vmem:[%s14494_s20 + $0x50] sm:$0xff] }
  0x12   :  { %8212 = vmatprep.subr.mxu0 %v67_v5  ;;  %v83_v27 = vld [vmem:[%s14494_s20 + $0x58] sm:$0xff]  ;;  %v84_v28 = vld [vmem:[%s14494_s20 + $0x60] sm:$0xff]  ;;  %v85_v29 = vld [vmem:[%s14494_s20 + $0x68] sm:$0xff] }
  0x13   :  { %8213 = vmatpush3.msra.mxu0 %v67_v5  ;;  %v86_v30 = vld [vmem:[%s14494_s20 + $0x70] sm:$0xff]  ;;  %v87_v31 = vld [vmem:[%s14494_s20 + $0x78] sm:$0xff]  ;;  %v88_v32 = vld [vmem:[%s14494_s20 + $0x80] sm:$0xff] }
  0x14   :  { %8214 = vmatprep.subr.mxu0 %v66_v6  ;;  %v89_v33 = vld [vmem:[%s14494_s20 + $0x88] sm:$0xff]  ;;  %v90_v34 = vld [vmem:[%s14494_s20 + $0x90] sm:$0xff]  ;;  %v91_v35 = vld [vmem:[%s14494_s20 + $0x98] sm:$0xff] }
  0x15   :  { %8215 = vmatpush3.msra.mxu0 %v66_v6  ;;  %v92_v36 = vld [vmem:[%s14494_s20 + $0xa0] sm:$0xff]  ;;  %v93_v37 = vld [vmem:[%s14494_s20 + $0xa8] sm:$0xff]  ;;  %v94_v38 = vld [vmem:[%s14494_s20 + $0xb0] sm:$0xff] }
  0x16   :  { %8216 = vmatprep.subr.mxu0 %v65_v7  ;;  %v95_v39 = vld [vmem:[%s14494_s20 + $0xb8] sm:$0xff]  ;;  %v96_v40 = vld [vmem:[%s14494_s20 + $0xc0] sm:$0xff]  ;;  %v97_v41 = vld [vmem:[%s14494_s20 + $0xc8] sm:$0xff] }
  0x17   :  { %8217 = vmatpush3.msra.mxu0 %v65_v7  ;;  %v98_v42 = vld [vmem:[%s14494_s20 + $0xd0] sm:$0xff]  ;;  %v99_v43 = vld [vmem:[%s14494_s20 + $0xd8] sm:$0xff]  ;;  %v100_v44 = vld [vmem:[%s14494_s20 + $0xe0] sm:$0xff] }
  0x18   :  { %8218 = vmatprep.subr.mxu0 %v64_v8  ;;  %v101_v45 = vld [vmem:[%s14494_s20 + $0xe8] sm:$0xff]  ;;  %v102_v46 = vld [vmem:[%s14494_s20 + $0xf0] sm:$0xff]  ;;  %v103_v47 = vld [vmem:[%s14494_s20 + $0xf8] sm:$0xff] }
  0x19   :  { %8219 = vmatpush3.msra.mxu0 %v64_v8 }
  0x1a   :  { %8220 = vmatprep.subr.mxu0 %v63_v9 }
  0x1b   :  { %8221 = vmatpush3.msra.mxu0 %v63_v9 }
  0x1c   :  { %8222 = vmatprep.subr.mxu0 %v62_v10 }
  0x1d   :  { %8223 = vmatpush3.msra.mxu0 %v62_v10 }
  0x1e   :  { %8224 = vmatprep.subr.mxu0 %v61_v11 }
  0x1f   :  { %8225 = vmatpush3.msra.mxu0 %v61_v11 }
  0x20   :  { %8226 = vmatprep.subr.mxu0 %v60_v12 }
  0x21   :  { %8227 = vmatpush3.msra.mxu0 %v60_v12 }
  0x22   :  { %8228 = vmatprep.subr.mxu0 %v59_v13 }
  0x23   :  { %8229 = vmatpush3.msra.mxu0 %v59_v13 }
  0x24   :  { %8230 = vmatprep.subr.mxu0 %v58_v14 }
  0x25   :  { %8231 = vmatpush3.msra.mxu0 %v58_v14 }
  0x26   :  { %8232 = vmatprep.subr.mxu0 %v57_v15 }
  0x27   :  { %8233 = vmatpush3.msra.mxu0 %v57_v15 }
  0x28   :  { %8234 = vmatprep.subr.mxu0 %v56_v16 }
  0x29   :  { %8235 = vmatpush3.msra.mxu0 %v56_v16 }
  0x2a   :  { %8237 = vmatmul.mubr.f32.vlgmr.msra.gmra.mxu0 %v73_v17  ;;  %v14359_v17 = vmov 0  }
  0x2b   :  { %8239 = vmatprep.mubr.f32.mxu0 %v74_v18  ;;  %8720 = vset.pattern.permute.xlu1 %v14359_v17 }
  0x2c   :  { %8719 = vset.pattern.permute.xlu0 %v14359_v17 }
  0x2e   :  { %8240 = vmatmul.mubr.f32.gmra.mxu0 %v75_v19 }
  0x2f   :  { %8242 = vmatprep.mubr.f32.mxu0 %v76_v20 }
  0x32   :  { %8243 = vmatmul.mubr.f32.gmra.mxu0 %v77_v21  ;;  %v9092_v21 = vld [vmem:[%s14342_s7 + $0x78] sm:$0xff] }
  0x33   :  { %8245 = vmatprep.mubr.f32.mxu0 %v78_v22  ;;  %v9099_v22 = vld [vmem:[%s14342_s7 + $0x70] sm:$0xff] }
  0x36   :  { %8246 = vmatmul.mubr.f32.gmra.mxu0 %v79_v23  ;;  %v9104_v23 = vld [vmem:[%s14342_s7 + $0x60] sm:$0xff] }
  0x37   :  { %8248 = vmatprep.mubr.f32.mxu0 %v80_v24  ;;  %v9111_v24 = vld [vmem:[%s14342_s7 + $0x68] sm:$0xff] }
  0x3a   :  { %8249 = vmatmul.mubr.f32.gmra.mxu0 %v81_v25  ;;  %v9116_v25 = vld [vmem:[%s14342_s7 + $0x50] sm:$0xff] }
  0x3b   :  { %8251 = vmatprep.mubr.f32.mxu0 %v82_v26  ;;  %v9123_v26 = vld [vmem:[%s14342_s7 + $0x58] sm:$0xff] }
  0x3e   :  { %8252 = vmatmul.mubr.f32.gmra.mxu0 %v83_v27  ;;  %v9128_v27 = vld [vmem:[%s14342_s7 + $0x40] sm:$0xff] }
  0x3f   :  { %8254 = vmatprep.mubr.f32.mxu0 %v84_v28  ;;  %v9135_v28 = vld [vmem:[%s14342_s7 + $0x48] sm:$0xff] }
  0x42   :  { %8255 = vmatmul.mubr.f32.gmra.mxu0 %v85_v29  ;;  %v9140_v29 = vld [vmem:[%s14342_s7 + $0x30] sm:$0xff] }
  0x43   :  { %8257 = vmatprep.mubr.f32.mxu0 %v86_v30  ;;  %v9147_v30 = vld [vmem:[%s14342_s7 + $0x38] sm:$0xff] }
  0x46   :  { %8258 = vmatmul.mubr.f32.gmra.mxu0 %v87_v31  ;;  %v9152_v31 = vld [vmem:[%s14342_s7 + $0x20] sm:$0xff] }
  0x47   :  { %8260 = vmatprep.mubr.f32.mxu0 %v88_v32  ;;  %v9159_v32 = vld [vmem:[%s14342_s7 + $0x28] sm:$0xff] }
  0x4a   :  { %8261 = vmatmul.mubr.f32.gmra.mxu0 %v89_v33  ;;  %v9164_v33 = vld [vmem:[%s14342_s7 + $0x10] sm:$0xff] }
  0x4b   :  { %8263 = vmatprep.mubr.f32.mxu0 %v90_v34  ;;  %v9171_v34 = vld [vmem:[%s14342_s7 + $0x18] sm:$0xff] }
  0x4e   :  { %8264 = vmatmul.mubr.f32.gmra.mxu0 %v91_v35  ;;  %v9176_v35 = vld [vmem:[%s14342_s7] sm:$0xff] }
  0x4f   :  { %8266 = vmatprep.mubr.f32.mxu0 %v92_v36  ;;  %v9183_v36 = vld [vmem:[%s14342_s7 + $0x8] sm:$0xff] }
  0x50   :  { %14495 = vst [vmem:[#allocation2_spill] sm:$0xff] %v9183_v36 }
  0x52   :  { %8267 = vmatmul.mubr.f32.gmra.mxu0 %v93_v37 }
  0x53   :  { %8269 = vmatprep.mubr.f32.mxu0 %v94_v38 }
  0x56   :  { %8270 = vmatmul.mubr.f32.gmra.mxu0 %v95_v39 }
  0x57   :  { %8272 = vmatprep.mubr.f32.mxu0 %v96_v40 }
  0x5a   :  { %8273 = vmatmul.mubr.f32.gmra.mxu0 %v97_v41 }
  0x5b   :  { %8275 = vmatprep.mubr.f32.mxu0 %v98_v42 }
  0x5e   :  { %8276 = vmatmul.mubr.f32.gmra.mxu0 %v99_v43 }
  0x5f   :  { %8278 = vmatprep.mubr.f32.mxu0 %v100_v44 }
  0x62   :  { %8279 = vmatmul.mubr.f32.gmra.mxu0 %v101_v45 }
  0x63   :  { %8281 = vmatprep.mubr.f32.mxu0 %v102_v46 }
  0x66   :  { %8282 = vmatmul.mubr.f32.gmra.mxu0 %v103_v47 }
  0xea   :  { %v9034_v50 = vpop.f32.mrf.mxu0 }
  0xec   :  { %v9036_v51 = vpop.f32.mrf.mxu0 }
  0xee   :  { %v9038_v52 = vpop.f32.mrf.mxu0 }
  0xf0   :  { %v9040_v53 = vpop.f32.mrf.mxu0 }
  0xf2   :  { %v9042_v54 = vpop.f32.mrf.mxu0 }
  0xf4   :  { %v9044_v55 = vpop.f32.mrf.mxu0 }
  0xf6   :  { %v9046_v56 = vpop.f32.mrf.mxu0 }
  0xf8   :  { %v9048_v57 = vpop.f32.mrf.mxu0 }
  0xfa   :  { %v9050_v58 = vpop.f32.mrf.mxu0 }
  0xfc   :  { %v9052_v59 = vpop.f32.mrf.mxu0 }
  0xfe   :  { %v9054_v60 = vpop.f32.mrf.mxu0 }
 0x100   :  { %v9059_v62 = vpop.f32.mrf.mxu0 }
 0x102   :  { %v9064_v0 = vpop.f32.mrf.mxu0 }
 0x104   :  { %v9066_v1 = vpop.f32.mrf.mxu0 }
 0x106   :  { %v9068_v2 = vpop.f32.mrf.mxu0 }
 0x108   :  { %v9070_v3 = vpop.f32.mrf.mxu0 }
 0x10a   :  { %v8262_v4 = vpop.f32.mrf.mxu0 }
 0x10c   :  { %v250_v5 = vpop.f32.mrf.mxu0 }
 0x10d   :  { %345 = vrot.lane.b32.xlu0 %v250_v5, %s8785_s18 }
 0x10e   :  { %v8265_v6 = vpop.f32.mrf.mxu0 }
 0x110   :  { %v260_v7 = vpop.f32.mrf.mxu0 }
 0x111   :  { %347 = vrot.lane.b32.xlu0 %v8262_v4, %s8785_s18  ;;  %349 = vrot.lane.b32.xlu1 %v260_v7, %s8785_s18 }
 0x112   :  { %v8268_v8 = vpop.f32.mrf.mxu0 }
 0x114   :  { %v270_v9 = vpop.f32.mrf.mxu0 }
 0x115   :  { %351 = vrot.lane.b32.xlu1 %v8265_v6, %s8785_s18  ;;  %353 = vrot.lane.b32.xlu0 %v270_v9, %s8785_s18  ;;  %v9262_v9 = vld [vmem:[%s14343_s1 + $0x58] sm:$0xff] }
 0x116   :  { %v8271_v10 = vpop.f32.mrf.mxu0 }
 0x118   :  { %v280_v11 = vpop.f32.mrf.mxu0 }
 0x119   :  { %355 = vrot.lane.b32.xlu1 %v8268_v8, %s8785_s18  ;;  %357 = vrot.lane.b32.xlu0 %v280_v11, %s8785_s18  ;;  %v735_v8 = vld [vmem:[%s14343_s1 + $0x78] sm:$0xff]  ;;  %v9276_v11 = vld [vmem:[%s14343_s1 + $0x48] sm:$0xff] }
 0x11a   :  { %v8274_v12 = vpop.f32.mrf.mxu0  ;;  %7188 = vmatprep.subr.mxu0 %v735_v8 }
 0x11c   :  { %v290_v13 = vpop.f32.mrf.mxu0 }
 0x11d   :  { %359 = vrot.lane.b32.xlu1 %v8271_v10, %s8785_s18  ;;  %361 = vrot.lane.b32.xlu0 %v290_v13, %s8785_s18  ;;  %v9269_v10 = vld [vmem:[%s14343_s1 + $0x50] sm:$0xff]  ;;  %v9290_v13 = vld [vmem:[%s14343_s1 + $0x38] sm:$0xff] }
 0x11e   :  { %v8277_v14 = vpop.f32.mrf.mxu0 }
 0x120   :  { %v300_v15 = vpop.f32.mrf.mxu0 }
 0x121   :  { %363 = vrot.lane.b32.xlu1 %v8274_v12, %s8785_s18  ;;  %365 = vrot.lane.b32.xlu0 %v300_v15, %s8785_s18  ;;  %v9283_v12 = vld [vmem:[%s14343_s1 + $0x40] sm:$0xff]  ;;  %v9304_v15 = vld [vmem:[%s14343_s1 + $0x28] sm:$0xff] }
 0x122   :  { %v8280_v16 = vpop.f32.mrf.mxu0 }
 0x124   :  { %v310_v18 = vpop.f32.mrf.mxu0 }
 0x125   :  { %367 = vrot.lane.b32.xlu1 %v8277_v14, %s8785_s18  ;;  %369 = vrot.lane.b32.xlu0 %v310_v18, %s8785_s18  ;;  %v9297_v14 = vld [vmem:[%s14343_s1 + $0x30] sm:$0xff]  ;;  %v9318_v18 = vld [vmem:[%s14343_s1 + $0x18] sm:$0xff] }
 0x126   :  { %v8283_v19 = vpop.f32.mrf.mxu0 }
 0x128   :  { %v320_v20 = vpop.f32.mrf.mxu0 }
 0x129   :  { %371 = vrot.lane.b32.xlu1 %v8280_v16, %s8785_s18  ;;  %373 = vrot.lane.b32.xlu0 %v320_v20, %s8785_s18  ;;  %v9311_v16 = vld [vmem:[%s14343_s1 + $0x20] sm:$0xff]  ;;  %v9332_v20 = vld [vmem:[%s14343_s1 + $0x8] sm:$0xff] }
 0x12d   :  { %375 = vrot.lane.b32.xlu1 %v8283_v19, %s8785_s18  ;;  %507 = vperm.xlu0 %8719, %v9092_v21   ;;  %v9325_v19 = vld [vmem:[%s14343_s1 + $0x10] sm:$0xff] }
 0x131   :  { %502 = vperm.xlu1 %8720, %v9099_v22   ;;  %492 = vperm.xlu0 %8719, %v9104_v23  }
 0x135   :  { %497 = vperm.xlu1 %8720, %v9111_v24   ;;  %482 = vperm.xlu0 %8719, %v9116_v25  }
 0x139   :  { %487 = vperm.xlu1 %8720, %v9123_v26   ;;  %472 = vperm.xlu0 %8719, %v9128_v27  }
 0x13d   :  { %477 = vperm.xlu1 %8720, %v9135_v28   ;;  %462 = vperm.xlu0 %8719, %v9140_v29  }
 0x141   :  { %467 = vperm.xlu1 %8720, %v9147_v30   ;;  %452 = vperm.xlu0 %8719, %v9152_v31  }
 0x145   :  { %457 = vperm.xlu1 %8720, %v9159_v32   ;;  %442 = vperm.xlu0 %8719, %v9164_v33  }
 0x149   :  { %447 = vperm.xlu1 %8720, %v9171_v34   ;;  %432 = vperm.xlu0 %8719, %v9176_v35  }
 0x14d   :  { %437 = vperm.xlu1 %8720, %v9183_v36  }
 0x151   :  { %926 = vrot.lane.b32.xlu1 %v735_v8, %s8787_s2 }
 0x17f   :  { %v346_v37 = vpop.permute.xlu0 %345 }
 0x180   :  { %v394_v38 = vsel %vm393_vm0, %v9036_v51, %v346_v37  ;;  %v9339_v37 = vld [vmem:[%s14343_s1] sm:$0xff] }
 0x181   :  { %8292 = vmatprep.mubr.msk.f32.mxu1 %vm510_vm1, %v394_v38 }
 0x183   :  { %v348_v39 = vpop.permute.xlu0 %347  ;;  %v350_v40 = vpop.permute.xlu1 %349 }
 0x184   :  { %v395_v41 = vsel %vm393_vm0, %v9034_v50, %v348_v39  ;;  %v396_v42 = vsel %vm393_vm0, %v9040_v53, %v350_v40 }
 0x185   :  { %8293 = vmatmul.mubr.msk.f32.vlgmr.msra.gmra.mxu1 %vm510_vm1, %v395_v41 }
 0x186   :  { %8295 = vmatprep.mubr.msk.f32.mxu1 %vm510_vm1, %v396_v42 }
 0x187   :  { %v352_v43 = vpop.permute.xlu1 %351  ;;  %v354_v44 = vpop.permute.xlu0 %353 }
 0x188   :  { %v397_v45 = vsel %vm393_vm0, %v9038_v52, %v352_v43  ;;  %v398_v46 = vsel %vm393_vm0, %v9044_v55, %v354_v44 }
 0x189   :  { %8296 = vmatmul.mubr.msk.f32.gmra.mxu1 %vm510_vm1, %v397_v45  ;;  %v993_v45 = vlaneseq }
 0x18a   :  { %8298 = vmatprep.mubr.msk.f32.mxu1 %vm510_vm1, %v398_v46 }
 0x18b   :  { %v356_v47 = vpop.permute.xlu1 %355  ;;  %v358_v48 = vpop.permute.xlu0 %357 }
 0x18c   :  { %v399_v49 = vsel %vm393_vm0, %v9042_v54, %v356_v47  ;;  %v400_v50 = vsel %vm393_vm0, %v9048_v57, %v358_v48  ;;  %v9376_v47 = vand.u32 127, %v993_v45 }
 0x18d   :  { %8299 = vmatmul.mubr.msk.f32.gmra.mxu1 %vm510_vm1, %v399_v49 }
 0x18e   :  { %8301 = vmatprep.mubr.msk.f32.mxu1 %vm510_vm1, %v400_v50  ;;  %14496 = vst [vmem:[#allocation3_spill] sm:$0xff] %v9376_v47  ;;  %vm995_vm3 = vcmp.ge.s32.totalorder %v9376_v47, 16  ;;  %vm996_vm4 = vcmp.lt.s32.totalorder %v9376_v47, 17 }
 0x18f   :  { %v360_v51 = vpop.permute.xlu1 %359  ;;  %v362_v52 = vpop.permute.xlu0 %361  ;;  %vm997_vm5 = vmand %vm995_vm3, %vm996_vm4 }
 0x190   :  { %v401_v53 = vsel %vm393_vm0, %v9046_v56, %v360_v51  ;;  %v402_v55 = vsel %vm393_vm0, %v9052_v59, %v362_v52  ;;  %vm9387_vm6 = vmneg %vm997_vm5  ;;  %vm4031_vm5 = vcmask 515072  }
 0x191   :  { %8302 = vmatmul.mubr.msk.f32.gmra.mxu1 %vm510_vm1, %v401_v53  ;;  %v14497_v53 = vmov 0 }
 0x192   :  { %8304 = vmatprep.mubr.msk.f32.mxu1 %vm510_vm1, %v402_v55  ;;  %v14498_v53 = vsel %vm9387_vm6, 4294967295, %v14497_v53 }
 0x193   :  { %v364_v54 = vpop.permute.xlu1 %363  ;;  %v366_v61 = vpop.permute.xlu0 %365  ;;  %14499 = vst [vmem:[#allocation4_spill] sm:$0xff] %v14498_v53 }
 0x194   :  { %v403_v57 = vsel %vm393_vm0, %v9050_v58, %v364_v54  ;;  %v404_v63 = vsel %vm393_vm0, %v9059_v62, %v366_v61 }
 0x195   :  { %8305 = vmatmul.mubr.msk.f32.gmra.mxu1 %vm510_vm1, %v403_v57 }
 0x196   :  { %8307 = vmatprep.mubr.msk.f32.mxu1 %vm510_vm1, %v404_v63 }
 0x197   :  { %v368_v56 = vpop.permute.xlu1 %367  ;;  %v370_v4 = vpop.permute.xlu0 %369 }
 0x198   :  { %v405_v59 = vsel %vm393_vm0, %v9054_v60, %v368_v56  ;;  %v406_v5 = vsel %vm393_vm0, %v9066_v1, %v370_v4 }
 0x199   :  { %8308 = vmatmul.mubr.msk.f32.gmra.mxu1 %vm510_vm1, %v405_v59 }
 0x19a   :  { %8310 = vmatprep.mubr.msk.f32.mxu1 %vm510_vm1, %v406_v5 }
 0x19b   :  { %v372_v58 = vpop.permute.xlu1 %371  ;;  %v374_v6 = vpop.permute.xlu0 %373 }
 0x19c   :  { %v407_v62 = vsel %vm393_vm0, %v9064_v0, %v372_v58  ;;  %v408_v7 = vsel %vm393_vm0, %v9070_v3, %v374_v6  ;;  %v9241_v0 = vld [vmem:[%s14343_s1 + $0x70] sm:$0xff]  ;;  %v9255_v3 = vld [vmem:[%s14343_s1 + $0x60] sm:$0xff] }
 0x19d   :  { %8311 = vmatmul.mubr.msk.f32.gmra.mxu1 %vm510_vm1, %v407_v62  ;;  %924 = vrot.lane.b32.xlu1 %v9241_v0, %s8787_s2 }
 0x19e   :  { %8313 = vmatprep.mubr.msk.f32.mxu1 %vm510_vm1, %v408_v7 }
 0x19f   :  { %v376_v60 = vpop.permute.xlu1 %375 }
 0x1a0   :  { %v409_v1 = vsel %vm393_vm0, %v9068_v2, %v376_v60  ;;  %v9248_v2 = vld [vmem:[%s14343_s1 + $0x68] sm:$0xff] }
 0x1a1   :  { %8314 = vmatmul.mubr.msk.f32.gmra.mxu1 %vm510_vm1, %v409_v1  ;;  %922 = vrot.lane.b32.xlu1 %v9248_v2, %s8787_s2 }
 0x1a5   :  { %920 = vrot.lane.b32.xlu1 %v9255_v3, %s8787_s2 }
 0x1a8   :  { %v508_v48 = vpop.permute.xlu0 %507 }
 0x1a9   :  { %918 = vrot.lane.b32.xlu1 %v9262_v9, %s8787_s2 }
 0x1ac   :  { %v9344_v38 = vpop.permute.xlu1 %502  ;;  %v493_v54 = vpop.permute.xlu0 %492 }
 0x1ad   :  { %916 = vrot.lane.b32.xlu1 %v9269_v10, %s8787_s2 }
 0x1b0   :  { %v9350_v39 = vpop.permute.xlu1 %497  ;;  %v483_v56 = vpop.permute.xlu0 %482 }
 0x1b1   :  { %914 = vrot.lane.b32.xlu1 %v9276_v11, %s8787_s2 }
 0x1b4   :  { %v488_v40 = vpop.permute.xlu1 %487  ;;  %v473_v7 = vpop.permute.xlu0 %472 }
 0x1b5   :  { %912 = vrot.lane.b32.xlu1 %v9283_v12, %s8787_s2 }
 0x1b8   :  { %v478_v41 = vpop.permute.xlu1 %477 }
 0x1b9   :  { %910 = vrot.lane.b32.xlu1 %v9290_v13, %s8787_s2 }
 0x1bc   :  { %v468_v42 = vpop.permute.xlu1 %467 }
 0x1bd   :  { %908 = vrot.lane.b32.xlu1 %v9297_v14, %s8787_s2 }
 0x1c0   :  { %v9364_v43 = vpop.permute.xlu1 %457 }
 0x1c1   :  { %906 = vrot.lane.b32.xlu1 %v9304_v15, %s8787_s2 }
 0x1c4   :  { %v9368_v44 = vpop.permute.xlu1 %447 }
 0x1c5   :  { %904 = vrot.lane.b32.xlu1 %v9311_v16, %s8787_s2 }
 0x1c8   :  { %v9374_v46 = vpop.permute.xlu1 %437 }
 0x1c9   :  { %902 = vrot.lane.b32.xlu1 %v9318_v18, %s8787_s2 }
 0x1cc   :  { %v927_v51 = vpop.permute.xlu1 %926 }
 0x1cd   :  { %900 = vrot.lane.b32.xlu1 %v9325_v19, %s8787_s2  ;;  %v992_v52 = vsel %vm960_vm2, 0.0, %v927_v51 }
 0x1ce   :  { %7108 = vmatprep.subr.msk.mxu1 %vm9387_vm6, %v992_v52 }
 0x1d1   :  { %898 = vrot.lane.b32.xlu1 %v9332_v20, %s8787_s2 }
 0x1d5   :  { %896 = vrot.lane.b32.xlu1 %v9339_v37, %s8787_s2 }
 0x1d9   :  { %1092 = vrot.lane.b32.xlu1 %v735_v8, %s8788_s21 }
 0x1dd   :  { %1090 = vrot.lane.b32.xlu1 %v9241_v0, %s8788_s21 }
 0x1e1   :  { %1088 = vrot.lane.b32.xlu1 %v9248_v2, %s8788_s21 }
 0x1e5   :  { %1086 = vrot.lane.b32.xlu1 %v9255_v3, %s8788_s21 }
 0x1e9   :  { %1084 = vrot.lane.b32.xlu1 %v9262_v9, %s8788_s21 }
 0x1ed   :  { %1082 = vrot.lane.b32.xlu1 %v9269_v10, %s8788_s21 }
 0x1f1   :  { %1080 = vrot.lane.b32.xlu1 %v9276_v11, %s8788_s21 }
 0x1f5   :  { %1078 = vrot.lane.b32.xlu1 %v9283_v12, %s8788_s21 }
 0x1f9   :  { %1076 = vrot.lane.b32.xlu1 %v9290_v13, %s8788_s21 }
 0x1fd   :  { %1074 = vrot.lane.b32.xlu1 %v9297_v14, %s8788_s21 }
 0x201   :  { %1072 = vrot.lane.b32.xlu1 %v9304_v15, %s8788_s21 }
 0x205   :  { %1070 = vrot.lane.b32.xlu1 %v9311_v16, %s8788_s21 }
 0x209   :  { %1068 = vrot.lane.b32.xlu1 %v9318_v18, %s8788_s21 }
 0x20d   :  { %1066 = vrot.lane.b32.xlu1 %v9325_v19, %s8788_s21 }
 0x211   :  { %1064 = vrot.lane.b32.xlu1 %v9332_v20, %s8788_s21 }
 0x215   :  { %1062 = vrot.lane.b32.xlu1 %v9339_v37, %s8788_s21 }
 0x245   :  { %v9378_v49 = vpop.f32.mrf.mxu1 }
 0x247   :  { %v9384_v50 = vpop.f32.mrf.mxu1 }
 0x249   :  { %v9391_v55 = vpop.f32.mrf.mxu1 }
 0x24b   :  { %v9397_v61 = vpop.f32.mrf.mxu1 }
 0x24d   :  { %v8300_v57 = vpop.f32.mrf.mxu1 }
 0x24f   :  { %v645_v63 = vpop.f32.mrf.mxu1 }
 0x251   :  { %v8303_v4 = vpop.f32.mrf.mxu1 }
 0x252   :  { %v661_v59 = vadd.f32 %v8303_v4, %v468_v42 }
 0x253   :  { %v655_v5 = vpop.f32.mrf.mxu1 }
 0x254   :  { %v9403_v58 = vmax.f32 %v661_v59, 0.0 }
 0x255   :  { %v8306_v6 = vpop.f32.mrf.mxu1 }
 0x256   :  { %v671_v62 = vadd.f32 %v8306_v6, %v478_v41  ;;  %878 = vrot.lane.b32.xlu0 %v9403_v58, %s8787_s2 }
 0x257   :  { %v665_v60 = vpop.f32.mrf.mxu1 }
 0x258   :  { %v9407_v1 = vmax.f32 %v671_v62, 0.0  ;;  %v666_v8 = vadd.f32 %v665_v60, %v473_v7 }
 0x259   :  { %v8309_v45 = vpop.f32.mrf.mxu1 }
 0x25a   :  { %882 = vrot.lane.b32.xlu0 %v9407_v1, %s8787_s2  ;;  %v9411_v52 = vmax.f32 %v666_v8, 0.0  ;;  %v681_v42 = vadd.f32 %v8309_v45, %v488_v40 }
 0x25b   :  { %v675_v51 = vpop.f32.mrf.mxu1 }
 0x25c   :  { %v9415_v59 = vmax.f32 %v681_v42, 0.0  ;;  %v676_v6 = vadd.f32 %v675_v51, %v483_v56  ;;  %v757_v56 = vld [vmem:[%s14344_s4 + $0xa8] sm:$0xff]  ;;  %v763_v42 = vld [vmem:[%s14344_s4 + $0xd8] sm:$0xff] }
 0x25d   :  { %v8312_v4 = vpop.f32.mrf.mxu1 }
 0x25e   :  { %880 = vrot.lane.b32.xlu0 %v9411_v52, %s8787_s2  ;;  %v9419_v60 = vmax.f32 %v676_v6, 0.0  ;;  %v691_v8 = vadd.f32 %v8312_v4, %v9350_v39  ;;  %v762_v4 = vld [vmem:[%s14344_s4 + $0xd0] sm:$0xff] }
 0x25f   :  { %v685_v41 = vpop.f32.mrf.mxu1 }
 0x260   :  { %v686_v45 = vadd.f32 %v685_v41, %v493_v54  ;;  %v769_v41 = vld [vmem:[%s14344_s4 + $0x108] sm:$0xff] }
 0x261   :  { %v8315_v17 = vpop.f32.mrf.mxu1 }
 0x262   :  { %v701_v62 = vadd.f32 %v8315_v17, %v508_v48  ;;  %886 = vrot.lane.b32.xlu0 %v9415_v59, %s8787_s2  ;;  %v9431_v17 = vmax.f32 %v691_v8, 0.0  ;;  %v463_v48 = vpop.permute.xlu0 %462  ;;  %v9435_v39 = vmax.f32 %v686_v45, 0.0  ;;  %v780_v45 = vld [vmem:[%s14344_s4 + $0x160] sm:$0xff] }
 0x263   :  { %v695_v7 = vpop.f32.mrf.mxu1 }
 0x264   :  { %v9422_v47 = vmax.f32 %v701_v62, 0.0  ;;  %v696_v40 = vadd.f32 %v695_v7, %v9344_v38  ;;  %v775_v62 = vld [vmem:[%s14344_s4 + $0x138] sm:$0xff]  ;;  %v774_v7 = vld [vmem:[%s14344_s4 + $0x130] sm:$0xff] }
 0x266   :  { %v9425_v36 = vmax.f32 %v696_v40, 0.0  ;;  %7189 = vmatpush3.msra.mxu0 %v9422_v47  ;;  %884 = vrot.lane.b32.xlu0 %v9419_v60, %s8787_s2  ;;  %v781_v40 = vld [vmem:[%s14344_s4 + $0x168] sm:$0xff] }
 0x267   :  { %7190 = vmatprep.subr.mxu0 %v9241_v0  ;;  %v453_v0 = vpop.permute.xlu0 %452 }
 0x268   :  { %7191 = vmatpush3.msra.mxu0 %v9425_v36 }
 0x269   :  { %7192 = vmatprep.subr.mxu0 %v9248_v2  ;;  %v656_v2 = vadd.f32 %v655_v5, %v463_v48  ;;  %v756_v5 = vld [vmem:[%s14344_s4 + $0xa0] sm:$0xff] }
 0x26a   :  { %7193 = vmatpush3.msra.mxu0 %v9431_v17  ;;  %890 = vrot.lane.b32.xlu0 %v9431_v17, %s8787_s2 }
 0x26b   :  { %7194 = vmatprep.subr.mxu0 %v9255_v3  ;;  %v651_v3 = vadd.f32 %v8300_v57, %v9364_v43  ;;  %v9456_v38 = vmax.f32 %v656_v2, 0.0  ;;  %v750_v57 = vld [vmem:[%s14344_s4 + $0x70] sm:$0xff]  ;;  %v14364_v2 = vmov 1  }
 0x26c   :  { %7195 = vmatpush3.msra.mxu0 %v9435_v39  ;;  %8721 = vset.pattern.permute.xlu1 %v14364_v2 }
 0x26d   :  { %7196 = vmatprep.subr.mxu0 %v9262_v9  ;;  %v443_v9 = vpop.permute.xlu0 %442  ;;  %8722 = vset.pattern.permute.xlu0 %v14364_v2 }
 0x26e   :  { %7197 = vmatpush3.msra.mxu0 %v9415_v59  ;;  %888 = vrot.lane.b32.xlu0 %v9435_v39, %s8787_s2 }
 0x26f   :  { %7198 = vmatprep.subr.mxu0 %v9269_v10  ;;  %v646_v10 = vadd.f32 %v645_v63, %v453_v0  ;;  %1255 = vperm.xlu1 %8721, %v9092_v21   ;;  %v804_v21 = vld [vmem:[%s14344_s4 + $0x220] sm:$0xff] }
 0x270   :  { %7199 = vmatpush3.msra.mxu0 %v9419_v60 }
 0x271   :  { %7200 = vmatprep.subr.mxu0 %v9276_v11  ;;  %v641_v11 = vadd.f32 %v9391_v55, %v9368_v44  ;;  %v9469_v43 = vmax.f32 %v646_v10, 0.0  ;;  %v433_v54 = vpop.permute.xlu0 %432 }
 0x272   :  { %7201 = vmatpush3.msra.mxu0 %v9407_v1  ;;  %894 = vrot.lane.b32.xlu0 %v9422_v47, %s8787_s2 }
 0x273   :  { %7202 = vmatprep.subr.mxu0 %v9283_v12  ;;  %v9464_v12 = vmax.f32 %v651_v3, 0.0  ;;  %v9477_v44 = vmax.f32 %v641_v11, 0.0  ;;  %v798_v3 = vld [vmem:[%s14344_s4 + $0x1f0] sm:$0xff]  ;;  %1247 = vperm.xlu1 %8721, %v9111_v24  }
 0x274   :  { %7203 = vmatpush3.msra.mxu0 %v9411_v52  ;;  %v810_v24 = vld [vmem:[%s14344_s4 + $0x250] sm:$0xff] }
 0x275   :  { %7204 = vmatprep.subr.mxu0 %v9290_v13  ;;  %v636_v13 = vadd.f32 %v9397_v61, %v443_v9  ;;  %v751_v61 = vld [vmem:[%s14344_s4 + $0x78] sm:$0xff] }
 0x276   :  { %892 = vrot.lane.b32.xlu0 %v9425_v36, %s8787_s2  ;;  %7205 = vmatpush3.msra.mxu0 %v9403_v58 }
 0x277   :  { %7206 = vmatprep.subr.mxu0 %v9297_v14  ;;  %v631_v14 = vadd.f32 %v9378_v49, %v9374_v46  ;;  %v9482_v55 = vmax.f32 %v636_v13, 0.0  ;;  %v745_v49 = vld [vmem:[%s14344_s4 + $0x48] sm:$0xff]  ;;  %1243 = vperm.xlu1 %8721, %v9104_v23   ;;  %v816_v23 = vld [vmem:[%s14344_s4 + $0x280] sm:$0xff] }
 0x278   :  { %7207 = vmatpush3.msra.mxu0 %v9456_v38 }
 0x279   :  { %7208 = vmatprep.subr.mxu0 %v9304_v15  ;;  %v626_v15 = vadd.f32 %v9384_v50, %v433_v54  ;;  %v744_v50 = vld [vmem:[%s14344_s4 + $0x40] sm:$0xff] }
 0x27a   :  { %876 = vrot.lane.b32.xlu0 %v9456_v38, %s8787_s2  ;;  %7209 = vmatpush3.msra.mxu0 %v9464_v12 }
 0x27b   :  { %7210 = vmatprep.subr.mxu0 %v9311_v16  ;;  %v9488_v16 = vmax.f32 %v631_v14, 0.0  ;;  %v9492_v46 = vmax.f32 %v626_v15, 0.0  ;;  %1235 = vperm.xlu1 %8721, %v9116_v25   ;;  %v822_v25 = vld [vmem:[%s14344_s4 + $0x2b0] sm:$0xff] }
 0x27c   :  { %7211 = vmatpush3.msra.mxu0 %v9469_v43 }
 0x27d   :  { %7212 = vmatprep.subr.mxu0 %v9318_v18  ;;  %v737_v18 = vld [vmem:[%s14344_s4 + $0x8] sm:$0xff] }
 0x27e   :  { %874 = vrot.lane.b32.xlu0 %v9464_v12, %s8787_s2  ;;  %7213 = vmatpush3.msra.mxu0 %v9477_v44 }
 0x27f   :  { %7214 = vmatprep.subr.mxu0 %v9325_v19  ;;  %1322 = vmatprep.mubr.f32.mxu1 %v737_v18  ;;  %v739_v19 = vld [vmem:[%s14344_s4 + $0x18] sm:$0xff] }
 0x280   :  { %7215 = vmatpush3.msra.mxu0 %v9482_v55  ;;  %1467 = vmatprep.mubr.f32.mxu0 %v739_v19 }
 0x281   :  { %7216 = vmatprep.subr.mxu0 %v9332_v20  ;;  %v738_v20 = vld [vmem:[%s14344_s4 + $0x10] sm:$0xff]  ;;  %1227 = vperm.xlu1 %8721, %v9128_v27   ;;  %v828_v27 = vld [vmem:[%s14344_s4 + $0x2e0] sm:$0xff] }
 0x282   :  { %872 = vrot.lane.b32.xlu0 %v9469_v43, %s8787_s2  ;;  %7217 = vmatpush3.msra.mxu0 %v9488_v16 }
 0x283   :  { %7218 = vmatprep.subr.mxu0 %v9339_v37  ;;  %v9512_v37 = vpop.permute.xlu1 %924 }
 0x284   :  { %7219 = vmatpush3.msra.mxu0 %v9492_v46 }
 0x285   :  { %1468 = vmatmul.mubr.f32.vlgmr.msra.gmra.mxu0 %v738_v20  ;;  %1219 = vperm.xlu1 %8721, %v9140_v29  }
 0x286   :  { %870 = vrot.lane.b32.xlu0 %v9477_v44, %s8787_s2  ;;  %1472 = vmatprep.mubr.f32.mxu0 %v745_v49 }
 0x287   :  { %v9528_v63 = vpop.permute.xlu1 %922 }
 0x289   :  { %1473 = vmatmul.mubr.f32.gmra.mxu0 %v744_v50  ;;  %1211 = vperm.xlu1 %8721, %v9152_v31  }
 0x28a   :  { %868 = vrot.lane.b32.xlu0 %v9482_v55, %s8787_s2  ;;  %1477 = vmatprep.mubr.f32.mxu0 %v751_v61  ;;  %v14500_v61 = vld [vmem:[#allocation2_spill] sm:$0xff] }
 0x28b   :  { %v9540_v51 = vpop.permute.xlu1 %920 }
 0x28d   :  { %1478 = vmatmul.mubr.f32.gmra.mxu0 %v750_v57  ;;  %1203 = vperm.xlu1 %8721, %v9164_v33  }
 0x28e   :  { %866 = vrot.lane.b32.xlu0 %v9488_v16, %s8787_s2  ;;  %1482 = vmatprep.mubr.f32.mxu0 %v757_v56 }
 0x28f   :  { %v9556_v6 = vpop.permute.xlu1 %918 }
 0x291   :  { %1483 = vmatmul.mubr.f32.gmra.mxu0 %v756_v5  ;;  %1195 = vperm.xlu1 %8721, %v9176_v35  }
 0x292   :  { %864 = vrot.lane.b32.xlu0 %v9492_v46, %s8787_s2  ;;  %1487 = vmatprep.mubr.f32.mxu0 %v763_v42 }
 0x293   :  { %v9568_v8 = vpop.permute.xlu1 %916 }
 0x295   :  { %1488 = vmatmul.mubr.f32.gmra.mxu0 %v762_v4 }
 0x296   :  { %1060 = vrot.lane.b32.xlu0 %v9422_v47, %s8788_s21  ;;  %1492 = vmatprep.mubr.f32.mxu0 %v769_v41  ;;  %v768_v47 = vld [vmem:[%s14344_s4 + $0x100] sm:$0xff] }
 0x297   :  { %v9584_v48 = vpop.permute.xlu1 %914 }
 0x298   :  { %v986_v42 = vsel %vm960_vm2, 0.0, %v9584_v48 }
 0x299   :  { %1493 = vmatmul.mubr.f32.gmra.mxu0 %v768_v47 }
 0x29a   :  { %1056 = vrot.lane.b32.xlu0 %v9431_v17, %s8788_s21  ;;  %1497 = vmatprep.mubr.f32.mxu0 %v775_v62  ;;  %v787_v17 = vld [vmem:[%s14344_s4 + $0x198] sm:$0xff] }
 0x29b   :  { %v9596_v0 = vpop.permute.xlu1 %912 }
 0x29c   :  { %v985_v41 = vsel %vm960_vm2, 0.0, %v9596_v0 }
 0x29d   :  { %1498 = vmatmul.mubr.f32.gmra.mxu0 %v774_v7 }
 0x29e   :  { %1054 = vrot.lane.b32.xlu0 %v9435_v39, %s8788_s21  ;;  %1502 = vmatprep.mubr.f32.mxu0 %v781_v40  ;;  %v793_v39 = vld [vmem:[%s14344_s4 + $0x1c8] sm:$0xff] }
 0x29f   :  { %v9616_v9 = vpop.permute.xlu1 %910 }
 0x2a0   :  { %v984_v62 = vsel %vm960_vm2, 0.0, %v9616_v9 }
 0x2a1   :  { %1503 = vmatmul.mubr.f32.gmra.mxu0 %v780_v45 }
 0x2a2   :  { %1052 = vrot.lane.b32.xlu0 %v9415_v59, %s8788_s21  ;;  %1507 = vmatprep.mubr.f32.mxu0 %v787_v17  ;;  %v786_v59 = vld [vmem:[%s14344_s4 + $0x190] sm:$0xff] }
 0x2a3   :  { %v9629_v10 = vpop.permute.xlu1 %908 }
 0x2a4   :  { %v983_v40 = vsel %vm960_vm2, 0.0, %v9629_v10 }
 0x2a5   :  { %1508 = vmatmul.mubr.f32.gmra.mxu0 %v786_v59 }
 0x2a6   :  { %1050 = vrot.lane.b32.xlu0 %v9419_v60, %s8788_s21  ;;  %1512 = vmatprep.mubr.f32.mxu0 %v793_v39  ;;  %v792_v60 = vld [vmem:[%s14344_s4 + $0x1c0] sm:$0xff] }
 0x2a7   :  { %v9647_v11 = vpop.permute.xlu1 %906 }
 0x2a8   :  { %v982_v59 = vsel %vm960_vm2, 0.0, %v9647_v11 }
 0x2a9   :  { %1513 = vmatmul.mubr.f32.gmra.mxu0 %v792_v60 }
 0x2aa   :  { %1048 = vrot.lane.b32.xlu0 %v9407_v1, %s8788_s21  ;;  %v799_v1 = vld [vmem:[%s14344_s4 + $0x1f8] sm:$0xff] }
 0x2ab   :  { %1517 = vmatprep.mubr.f32.mxu0 %v799_v1  ;;  %v9660_v13 = vpop.permute.xlu1 %904 }
 0x2ac   :  { %v981_v39 = vsel %vm960_vm2, 0.0, %v9660_v13 }
 0x2ad   :  { %1518 = vmatmul.mubr.f32.gmra.mxu0 %v798_v3  ;;  %v14501_v3 = vld [vmem:[#allocation3_spill] sm:$0xff] }
 0x2ae   :  { %1046 = vrot.lane.b32.xlu0 %v9411_v52, %s8788_s21  ;;  %v805_v52 = vld [vmem:[%s14344_s4 + $0x228] sm:$0xff]  ;;  %vm1159_vm7 = vcmp.ge.s32.totalorder %v14501_v3, 15  ;;  %vm1160_vm8 = vcmp.lt.s32.totalorder %v14501_v3, 16 }
 0x2af   :  { %1522 = vmatprep.mubr.f32.mxu0 %v805_v52  ;;  %v9668_v29 = vpop.permute.xlu1 %902  ;;  %vm1161_vm9 = vmand %vm1159_vm7, %vm1160_vm8 }
 0x2b0   :  { %v980_v52 = vsel %vm960_vm2, 0.0, %v9668_v29  ;;  %vm9804_vm11 = vmneg %vm1161_vm9 }
 0x2b1   :  { %1523 = vmatmul.mubr.f32.gmra.mxu0 %v804_v21 }
 0x2b2   :  { %1044 = vrot.lane.b32.xlu0 %v9403_v58, %s8788_s21  ;;  %v811_v58 = vld [vmem:[%s14344_s4 + $0x258] sm:$0xff] }
 0x2b3   :  { %1527 = vmatprep.mubr.f32.mxu0 %v811_v58 }
 0x2b5   :  { %1528 = vmatmul.mubr.f32.gmra.mxu0 %v810_v24 }
 0x2b6   :  { %1058 = vrot.lane.b32.xlu0 %v9425_v36, %s8788_s21  ;;  %v817_v36 = vld [vmem:[%s14344_s4 + $0x288] sm:$0xff] }
 0x2b7   :  { %1532 = vmatprep.mubr.f32.mxu0 %v817_v36 }
 0x2b9   :  { %1533 = vmatmul.mubr.f32.gmra.mxu0 %v816_v23 }
 0x2ba   :  { %1042 = vrot.lane.b32.xlu0 %v9456_v38, %s8788_s21  ;;  %v823_v38 = vld [vmem:[%s14344_s4 + $0x2b8] sm:$0xff] }
 0x2bb   :  { %1537 = vmatprep.mubr.f32.mxu0 %v823_v38 }
 0x2bd   :  { %1538 = vmatmul.mubr.f32.gmra.mxu0 %v822_v25  ;;  %v14502_v25 = vmov 0 }
 0x2be   :  { %1040 = vrot.lane.b32.xlu0 %v9464_v12, %s8788_s21  ;;  %v829_v12 = vld [vmem:[%s14344_s4 + $0x2e8] sm:$0xff]  ;;  %v14503_v25 = vsel %vm9804_vm11, 4294967295, %v14502_v25 }
 0x2bf   :  { %1542 = vmatprep.mubr.f32.mxu0 %v829_v12  ;;  %14504 = vst [vmem:[#allocation2_spill] sm:$0xff] %v14503_v25 }
 0x2c1   :  { %1543 = vmatmul.mubr.f32.gmra.mxu0 %v828_v27  ;;  %v736_v27 = vld [vmem:[%s14344_s4] sm:$0xff] }
 0x2c2   :  { %1038 = vrot.lane.b32.xlu0 %v9469_v43, %s8788_s21 }
 0x2c6   :  { %1036 = vrot.lane.b32.xlu0 %v9477_v44, %s8788_s21  ;;  %v9675_v44 = vpop.permute.xlu1 %900 }
 0x2c7   :  { %v979_v9 = vsel %vm960_vm2, 0.0, %v9675_v44 }
 0x2c8   :  { %v9662_v54 = vpop.permute.xlu0 %878 }
 0x2c9   :  { %v968_v7 = vsel %vm960_vm2, 0.0, %v9662_v54  ;;  %v743_v54 = vld [vmem:[%s14344_s4 + $0x38] sm:$0xff] }
 0x2ca   :  { %1034 = vrot.lane.b32.xlu0 %v9482_v55, %s8788_s21  ;;  %v9678_v55 = vpop.permute.xlu1 %898 }
 0x2cb   :  { %v978_v10 = vsel %vm960_vm2, 0.0, %v9678_v55 }
 0x2cc   :  { %v883_v43 = vpop.permute.xlu0 %882 }
 0x2cd   :  { %v970_v4 = vsel %vm960_vm2, 0.0, %v883_v43 }
 0x2ce   :  { %1032 = vrot.lane.b32.xlu0 %v9488_v16, %s8788_s21  ;;  %v9682_v16 = vpop.permute.xlu1 %896 }
 0x2cf   :  { %v977_v36 = vsel %vm960_vm2, 0.0, %v9682_v16  ;;  %v755_v16 = vld [vmem:[%s14344_s4 + $0x98] sm:$0xff] }
 0x2d0   :  { %v881_v14 = vpop.permute.xlu0 %880 }
 0x2d2   :  { %1030 = vrot.lane.b32.xlu0 %v9492_v46, %s8788_s21  ;;  %v9686_v19 = vpop.permute.xlu1 %1092 }
 0x2d3   :  { %v1158_v12 = vsel %vm1126_vm10, %v9686_v19, 0.0  ;;  %v761_v19 = vld [vmem:[%s14344_s4 + $0xc8] sm:$0xff] }
 0x2d4   :  { %v887_v31 = vpop.permute.xlu0 %886 }
 0x2d5   :  { %v972_v57 = vsel %vm960_vm2, 0.0, %v887_v31  ;;  %v749_v31 = vld [vmem:[%s14344_s4 + $0x68] sm:$0xff] }
 0x2d6   :  { %1251 = vperm.xlu0 %8722, %v9099_v22   ;;  %v991_v22 = vsel %vm960_vm2, 0.0, %v9512_v37  ;;  %v989_v37 = vsel %vm960_vm2, 0.0, %v9540_v51 }
 0x2d8   :  { %v885_v15 = vpop.permute.xlu0 %884 }
 0x2d9   :  { %v971_v5 = vsel %vm960_vm2, 0.0, %v885_v15 }
 0x2da   :  { %1239 = vperm.xlu0 %8722, %v9123_v26  }
 0x2dc   :  { %v891_v33 = vpop.permute.xlu0 %890 }
 0x2dd   :  { %v974_v20 = vsel %vm960_vm2, 0.0, %v891_v33  ;;  %v748_v33 = vld [vmem:[%s14344_s4 + $0x60] sm:$0xff] }
 0x2de   :  { %1231 = vperm.xlu0 %8722, %v9135_v28  }
 0x2e0   :  { %v889_v18 = vpop.permute.xlu0 %888 }
 0x2e1   :  { %v973_v50 = vsel %vm960_vm2, 0.0, %v889_v18 }
 0x2e2   :  { %1223 = vperm.xlu0 %8722, %v9147_v30   ;;  %v990_v30 = vsel %vm960_vm2, 0.0, %v9528_v63  ;;  %v987_v63 = vsel %vm960_vm2, 0.0, %v9568_v8 }
 0x2e4   :  { %v895_v35 = vpop.permute.xlu0 %894 }
 0x2e5   :  { %v976_v46 = vsel %vm960_vm2, 0.0, %v895_v35 }
 0x2e6   :  { %7109 = vmatpush3.msk.msra.mxu1 %vm9387_vm6, %v976_v46  ;;  %1215 = vperm.xlu0 %8722, %v9159_v32   ;;  %v9704_v32 = vpop.permute.xlu1 %1090  ;;  %v754_v46 = vld [vmem:[%s14344_s4 + $0x90] sm:$0xff] }
 0x2e7   :  { %7110 = vmatprep.subr.msk.mxu1 %vm9387_vm6, %v991_v22  ;;  %v1157_v29 = vsel %vm1126_vm10, %v9704_v32, 0.0  ;;  %v766_v32 = vld [vmem:[%s14344_s4 + $0xf0] sm:$0xff] }
 0x2e8   :  { %v893_v26 = vpop.permute.xlu0 %892 }
 0x2e9   :  { %v975_v28 = vsel %vm960_vm2, 0.0, %v893_v26  ;;  %v760_v26 = vld [vmem:[%s14344_s4 + $0xc0] sm:$0xff] }
 0x2ea   :  { %7111 = vmatpush3.msk.msra.mxu1 %vm9387_vm6, %v975_v28  ;;  %1207 = vperm.xlu0 %8722, %v9171_v34   ;;  %v988_v34 = vsel %vm960_vm2, 0.0, %v9556_v6  ;;  %v9728_v51 = vpop.permute.xlu1 %1088  ;;  %v969_v6 = vsel %vm960_vm2, 0.0, %v881_v14  ;;  %v742_v14 = vld [vmem:[%s14344_s4 + $0x30] sm:$0xff]  ;;  %v767_v28 = vld [vmem:[%s14344_s4 + $0xf8] sm:$0xff] }
 0x2eb   :  { %7112 = vmatprep.subr.msk.mxu1 %vm9387_vm6, %v990_v30 }
 0x2ec   :  { %7113 = vmatpush3.msk.msra.mxu1 %vm9387_vm6, %v974_v20  ;;  %v877_v49 = vpop.permute.xlu0 %876 }
 0x2ed   :  { %7114 = vmatprep.subr.msk.mxu1 %vm9387_vm6, %v989_v37  ;;  %v967_v17 = vsel %vm960_vm2, 0.0, %v877_v49  ;;  %v773_v37 = vld [vmem:[%s14344_s4 + $0x128] sm:$0xff] }
 0x2ee   :  { %7115 = vmatpush3.msk.msra.mxu1 %vm9387_vm6, %v973_v50  ;;  %1199 = vperm.xlu0 %8722, %v14500_v61   ;;  %v9752_v8 = vpop.permute.xlu1 %1086  ;;  %v779_v61 = vld [vmem:[%s14344_s4 + $0x158] sm:$0xff] }
 0x2ef   :  { %7116 = vmatprep.subr.msk.mxu1 %vm9387_vm6, %v988_v34  ;;  %v772_v34 = vld [vmem:[%s14344_s4 + $0x120] sm:$0xff] }
 0x2f0   :  { %7117 = vmatpush3.msk.msra.mxu1 %vm9387_vm6, %v972_v57  ;;  %v875_v56 = vpop.permute.xlu0 %874 }
 0x2f1   :  { %7118 = vmatprep.subr.msk.mxu1 %vm9387_vm6, %v987_v63  ;;  %v966_v48 = vsel %vm960_vm2, 0.0, %v875_v56  ;;  %v778_v63 = vld [vmem:[%s14344_s4 + $0x150] sm:$0xff]  ;;  %v785_v56 = vld [vmem:[%s14344_s4 + $0x188] sm:$0xff] }
 0x2f2   :  { %7119 = vmatpush3.msk.msra.mxu1 %vm9387_vm6, %v971_v5  ;;  %v9775_v1 = vpop.permute.xlu1 %1084 }
 0x2f3   :  { %7120 = vmatprep.subr.msk.mxu1 %vm9387_vm6, %v986_v42 }
 0x2f4   :  { %7121 = vmatpush3.msk.msra.mxu1 %vm9387_vm6, %v970_v4  ;;  %v873_v47 = vpop.permute.xlu0 %872  ;;  %v784_v4 = vld [vmem:[%s14344_s4 + $0x180] sm:$0xff] }
 0x2f5   :  { %7122 = vmatprep.subr.msk.mxu1 %vm9387_vm6, %v985_v41  ;;  %v965_v0 = vsel %vm960_vm2, 0.0, %v873_v47  ;;  %v791_v41 = vld [vmem:[%s14344_s4 + $0x1b8] sm:$0xff] }
 0x2f6   :  { %7123 = vmatpush3.msk.msra.mxu1 %vm9387_vm6, %v969_v6  ;;  %v9802_v38 = vpop.permute.xlu1 %1082 }
 0x2f7   :  { %7124 = vmatprep.subr.msk.mxu1 %vm9387_vm6, %v984_v62  ;;  %v790_v62 = vld [vmem:[%s14344_s4 + $0x1b0] sm:$0xff] }
 0x2f8   :  { %7125 = vmatpush3.msk.msra.mxu1 %vm9387_vm6, %v968_v7  ;;  %v871_v45 = vpop.permute.xlu0 %870 }
 0x2f9   :  { %7126 = vmatprep.subr.msk.mxu1 %vm9387_vm6, %v983_v40  ;;  %v964_v21 = vsel %vm960_vm2, 0.0, %v871_v45  ;;  %v797_v40 = vld [vmem:[%s14344_s4 + $0x1e8] sm:$0xff]  ;;  %v1156_v45 = vsel %vm1126_vm10, %v9728_v51, 0.0  ;;  %v796_v51 = vld [vmem:[%s14344_s4 + $0x1e0] sm:$0xff] }
 0x2fa   :  { %7127 = vmatpush3.msk.msra.mxu1 %vm9387_vm6, %v967_v17  ;;  %v9834_v15 = vpop.permute.xlu1 %1080 }
 0x2fb   :  { %7128 = vmatprep.subr.msk.mxu1 %vm9387_vm6, %v982_v59  ;;  %v1155_v59 = vsel %vm1126_vm10, %v9752_v8, 0.0  ;;  %v1154_v8 = vsel %vm1126_vm10, %v9775_v1, 0.0  ;;  %v802_v1 = vld [vmem:[%s14344_s4 + $0x210] sm:$0xff] }
 0x2fc   :  { %7129 = vmatpush3.msk.msra.mxu1 %vm9387_vm6, %v966_v48  ;;  %v869_v60 = vpop.permute.xlu0 %868 }
 0x2fd   :  { %7130 = vmatprep.subr.msk.mxu1 %vm9387_vm6, %v981_v39  ;;  %v963_v24 = vsel %vm960_vm2, 0.0, %v869_v60  ;;  %v803_v60 = vld [vmem:[%s14344_s4 + $0x218] sm:$0xff] }
 0x2fe   :  { %7131 = vmatpush3.msk.msra.mxu1 %vm9387_vm6, %v965_v0  ;;  %v9846_v18 = vpop.permute.xlu1 %1078 }
 0x2ff   :  { %7132 = vmatprep.subr.msk.mxu1 %vm9387_vm6, %v980_v52 }
 0x300   :  { %7133 = vmatpush3.msk.msra.mxu1 %vm9387_vm6, %v964_v21  ;;  %v867_v58 = vpop.permute.xlu0 %866  ;;  %v1153_v21 = vsel %vm1126_vm10, %v9802_v38, 0.0  ;;  %v1151_v38 = vsel %vm1126_vm10, %v9846_v18, 0.0 }
 0x301   :  { %7134 = vmatprep.subr.msk.mxu1 %vm9387_vm6, %v979_v9  ;;  %v962_v23 = vsel %vm960_vm2, 0.0, %v867_v58 }
 0x302   :  { %7135 = vmatpush3.msk.msra.mxu1 %vm9387_vm6, %v963_v24  ;;  %v9860_v30 = vpop.permute.xlu1 %1076  ;;  %v809_v24 = vld [vmem:[%s14344_s4 + $0x248] sm:$0xff] }
 0x303   :  { %7136 = vmatprep.subr.msk.mxu1 %vm9387_vm6, %v978_v10  ;;  %v1152_v10 = vsel %vm1126_vm10, %v9834_v15, 0.0  ;;  %v821_v15 = vld [vmem:[%s14344_s4 + $0x2a8] sm:$0xff] }
 0x304   :  { %7137 = vmatpush3.msk.msra.mxu1 %vm9387_vm6, %v962_v23  ;;  %v865_v11 = vpop.permute.xlu0 %864 }
 0x305   :  { %v961_v13 = vsel %vm960_vm2, 0.0, %v865_v11  ;;  %7138 = vmatprep.subr.msk.mxu1 %vm9387_vm6, %v977_v36 }
 0x306   :  { %7139 = vmatpush3.msk.msra.mxu1 %vm9387_vm6, %v961_v13  ;;  %v9868_v49 = vpop.permute.xlu1 %1074  ;;  %v815_v13 = vld [vmem:[%s14344_s4 + $0x278] sm:$0xff] }
 0x307   :  { %1323 = vmatmul.mubr.f32.vlgmr.msra.gmra.mxu1 %v736_v27  ;;  %7268 = vmatprep.subr.msk.mxu1 %vm9804_vm11, %v1158_v12  ;;  %v808_v12 = vld [vmem:[%s14344_s4 + $0x240] sm:$0xff] }
 0x308   :  { %v1061_v43 = vpop.permute.xlu0 %1060  ;;  %1327 = vmatprep.mubr.f32.mxu1 %v743_v54  ;;  %v1150_v54 = vsel %vm1126_vm10, %v9860_v30, 0.0 }
 0x309   :  { %v1142_v44 = vsel %vm1126_vm10, %v1061_v43, 0.0 }
 0x30a   :  { %7269 = vmatpush3.msk.msra.mxu1 %vm9804_vm11, %v1142_v44  ;;  %v9882_v5 = vpop.permute.xlu1 %1072  ;;  %v814_v44 = vld [vmem:[%s14344_s4 + $0x270] sm:$0xff] }
 0x30b   :  { %1328 = vmatmul.mubr.f32.gmra.mxu1 %v742_v14  ;;  %7270 = vmatprep.subr.msk.mxu1 %vm9804_vm11, %v1157_v29  ;;  %v1149_v29 = vsel %vm1126_vm10, %v9868_v49, 0.0 }
 0x30c   :  { %v1057_v55 = vpop.permute.xlu0 %1056  ;;  %1332 = vmatprep.mubr.f32.mxu1 %v749_v31 }
 0x30d   :  { %v1140_v17 = vsel %vm1126_vm10, %v1057_v55, 0.0 }
 0x30e   :  { %v9890_v47 = vpop.permute.xlu1 %1070 }
 0x30f   :  { %1333 = vmatmul.mubr.f32.gmra.mxu1 %v748_v33  ;;  %v1148_v33 = vsel %vm1126_vm10, %v9882_v5, 0.0  ;;  %v1147_v18 = vsel %vm1126_vm10, %v9890_v47, 0.0  ;;  %v752_v47 = vld [vmem:[%s14344_s4 + $0x80] sm:$0xff] }
 0x310   :  { %v1055_v35 = vpop.permute.xlu0 %1054  ;;  %1337 = vmatprep.mubr.f32.mxu1 %v755_v16 }
 0x311   :  { %v1139_v39 = vsel %vm1126_vm10, %v1055_v35, 0.0 }
 0x312   :  { %v1069_v0 = vpop.permute.xlu1 %1068 }
 0x313   :  { %1338 = vmatmul.mubr.f32.gmra.mxu1 %v754_v46  ;;  %v820_v46 = vld [vmem:[%s14344_s4 + $0x2a0] sm:$0xff] }
 0x314   :  { %v1053_v22 = vpop.permute.xlu0 %1052  ;;  %1342 = vmatprep.mubr.f32.mxu1 %v761_v19 }
 0x315   :  { %v1138_v52 = vsel %vm1126_vm10, %v1053_v22, 0.0  ;;  %v827_v22 = vld [vmem:[%s14344_s4 + $0x2d8] sm:$0xff] }
 0x316   :  { %v1067_v23 = vpop.permute.xlu1 %1066 }
 0x317   :  { %1343 = vmatmul.mubr.f32.gmra.mxu1 %v760_v26  ;;  %v1146_v26 = vsel %vm1126_vm10, %v1069_v0, 0.0  ;;  %v788_v0 = vld [vmem:[%s14344_s4 + $0x1a0] sm:$0xff] }
 0x318   :  { %v1051_v20 = vpop.permute.xlu0 %1050  ;;  %1347 = vmatprep.mubr.f32.mxu1 %v767_v28 }
 0x319   :  { %v1137_v58 = vsel %vm1126_vm10, %v1051_v20, 0.0  ;;  %v1145_v20 = vsel %vm1126_vm10, %v1067_v23, 0.0  ;;  %v818_v23 = vld [vmem:[%s14344_s4 + $0x290] sm:$0xff] }
 0x31a   :  { %v1065_v55 = vpop.permute.xlu1 %1064 }
 0x31b   :  { %1348 = vmatmul.mubr.f32.gmra.mxu1 %v766_v32 }
 0x31c   :  { %v1049_v50 = vpop.permute.xlu0 %1048  ;;  %1352 = vmatprep.mubr.f32.mxu1 %v773_v37  ;;  %v826_v37 = vld [vmem:[%s14344_s4 + $0x2d0] sm:$0xff] }
 0x31d   :  { %v1136_v36 = vsel %vm1126_vm10, %v1049_v50, 0.0  ;;  %v741_v50 = vld [vmem:[%s14344_s4 + $0x28] sm:$0xff] }
 0x31e   :  { %v1063_v30 = vpop.permute.xlu1 %1062 }
 0x31f   :  { %1353 = vmatmul.mubr.f32.gmra.mxu1 %v772_v34  ;;  %v1144_v34 = vsel %vm1126_vm10, %v1065_v55, 0.0 }
 0x320   :  { %v1047_v57 = vpop.permute.xlu0 %1046  ;;  %1357 = vmatprep.mubr.f32.mxu1 %v779_v61  ;;  %v1143_v61 = vsel %vm1126_vm10, %v1063_v30, 0.0 }
 0x321   :  { %v1135_v27 = vsel %vm1126_vm10, %v1047_v57, 0.0 }
 0x323   :  { %1358 = vmatmul.mubr.f32.gmra.mxu1 %v778_v63 }
 0x324   :  { %v1045_v42 = vpop.permute.xlu0 %1044  ;;  %1362 = vmatprep.mubr.f32.mxu1 %v785_v56  ;;  %v740_v56 = vld [vmem:[%s14344_s4 + $0x20] sm:$0xff] }
 0x325   :  { %v1134_v43 = vsel %vm1126_vm10, %v1045_v42, 0.0  ;;  %v747_v42 = vld [vmem:[%s14344_s4 + $0x58] sm:$0xff] }
 0x327   :  { %1363 = vmatmul.mubr.f32.gmra.mxu1 %v784_v4  ;;  %v746_v4 = vld [vmem:[%s14344_s4 + $0x50] sm:$0xff] }
 0x328   :  { %v1059_v6 = vpop.permute.xlu0 %1058  ;;  %1367 = vmatprep.mubr.f32.mxu1 %v791_v41  ;;  %v753_v41 = vld [vmem:[%s14344_s4 + $0x88] sm:$0xff] }
 0x329   :  { %v1141_v7 = vsel %vm1126_vm10, %v1059_v6, 0.0  ;;  %v759_v6 = vld [vmem:[%s14344_s4 + $0xb8] sm:$0xff] }
 0x32a   :  { %7271 = vmatpush3.msk.msra.mxu1 %vm9804_vm11, %v1141_v7  ;;  %v765_v7 = vld [vmem:[%s14344_s4 + $0xe8] sm:$0xff] }
 0x32b   :  { %1368 = vmatmul.mubr.f32.gmra.mxu1 %v790_v62  ;;  %7272 = vmatprep.subr.msk.mxu1 %vm9804_vm11, %v1156_v45  ;;  %v758_v62 = vld [vmem:[%s14344_s4 + $0xb0] sm:$0xff]  ;;  %v771_v45 = vld [vmem:[%s14344_s4 + $0x118] sm:$0xff] }
 0x32c   :  { %7273 = vmatpush3.msk.msra.mxu1 %vm9804_vm11, %v1140_v17  ;;  %v1043_v48 = vpop.permute.xlu0 %1042  ;;  %1372 = vmatprep.mubr.f32.mxu1 %v797_v40  ;;  %v764_v40 = vld [vmem:[%s14344_s4 + $0xe0] sm:$0xff]  ;;  %v770_v17 = vld [vmem:[%s14344_s4 + $0x110] sm:$0xff] }
 0x32d   :  { %7274 = vmatprep.subr.msk.mxu1 %vm9804_vm11, %v1155_v59  ;;  %v1133_v31 = vsel %vm1126_vm10, %v1043_v48, 0.0  ;;  %v777_v59 = vld [vmem:[%s14344_s4 + $0x148] sm:$0xff]  ;;  %v776_v48 = vld [vmem:[%s14344_s4 + $0x140] sm:$0xff] }
 0x32e   :  { %7275 = vmatpush3.msk.msra.mxu1 %vm9804_vm11, %v1139_v39  ;;  %v782_v39 = vld [vmem:[%s14344_s4 + $0x170] sm:$0xff] }
 0x32f   :  { %1373 = vmatmul.mubr.f32.gmra.mxu1 %v796_v51  ;;  %7276 = vmatprep.subr.msk.mxu1 %vm9804_vm11, %v1154_v8  ;;  %v783_v51 = vld [vmem:[%s14344_s4 + $0x178] sm:$0xff] }
 0x330   :  { %7277 = vmatpush3.msk.msra.mxu1 %vm9804_vm11, %v1138_v52  ;;  %v1041_v9 = vpop.permute.xlu0 %1040  ;;  %1377 = vmatprep.mubr.f32.mxu1 %v803_v60  ;;  %v789_v60 = vld [vmem:[%s14344_s4 + $0x1a8] sm:$0xff]  ;;  %v795_v8 = vld [vmem:[%s14344_s4 + $0x1d8] sm:$0xff]  ;;  %v794_v52 = vld [vmem:[%s14344_s4 + $0x1d0] sm:$0xff] }
 0x331   :  { %7278 = vmatprep.subr.msk.mxu1 %vm9804_vm11, %v1153_v21  ;;  %v1132_v16 = vsel %vm1126_vm10, %v1041_v9, 0.0  ;;  %v801_v21 = vld [vmem:[%s14344_s4 + $0x208] sm:$0xff]  ;;  %v800_v9 = vld [vmem:[%s14344_s4 + $0x200] sm:$0xff] }
 0x332   :  { %7279 = vmatpush3.msk.msra.mxu1 %vm9804_vm11, %v1137_v58  ;;  %v806_v58 = vld [vmem:[%s14344_s4 + $0x230] sm:$0xff] }
 0x333   :  { %1378 = vmatmul.mubr.f32.gmra.mxu1 %v802_v1  ;;  %7280 = vmatprep.subr.msk.mxu1 %vm9804_vm11, %v1152_v10  ;;  %v807_v1 = vld [vmem:[%s14344_s4 + $0x238] sm:$0xff]  ;;  %v812_v10 = vld [vmem:[%s14344_s4 + $0x260] sm:$0xff] }
 0x334   :  { %7281 = vmatpush3.msk.msra.mxu1 %vm9804_vm11, %v1136_v36  ;;  %v1039_v11 = vpop.permute.xlu0 %1038  ;;  %1382 = vmatprep.mubr.f32.mxu1 %v809_v24  ;;  %v813_v24 = vld [vmem:[%s14344_s4 + $0x268] sm:$0xff]  ;;  %v819_v36 = vld [vmem:[%s14344_s4 + $0x298] sm:$0xff] }
 0x335   :  { %7282 = vmatprep.subr.msk.mxu1 %vm9804_vm11, %v1151_v38  ;;  %v1131_v19 = vsel %vm1126_vm10, %v1039_v11, 0.0  ;;  %v825_v38 = vld [vmem:[%s14344_s4 + $0x2c8] sm:$0xff]  ;;  %v824_v11 = vld [vmem:[%s14344_s4 + $0x2c0] sm:$0xff] }
 0x336   :  { %7283 = vmatpush3.msk.msra.mxu1 %vm9804_vm11, %v1135_v27  ;;  %v830_v27 = vld [vmem:[%s14344_s4 + $0x2f0] sm:$0xff] }
 0x337   :  { %1383 = vmatmul.mubr.f32.gmra.mxu1 %v808_v12  ;;  %7284 = vmatprep.subr.msk.mxu1 %vm9804_vm11, %v1150_v54  ;;  %v831_v12 = vld [vmem:[%s14344_s4 + $0x2f8] sm:$0xff] }
 0x338   :  { %7285 = vmatpush3.msk.msra.mxu1 %vm9804_vm11, %v1134_v43  ;;  %v1037_v14 = vpop.permute.xlu0 %1036  ;;  %1387 = vmatprep.mubr.f32.mxu1 %v815_v13  ;;  %v10124_v13 = vpop.permute.xlu1 %1255 }
 0x339   :  { %7286 = vmatprep.subr.msk.mxu1 %vm9804_vm11, %v1149_v29  ;;  %v1130_v28 = vsel %vm1126_vm10, %v1037_v14, 0.0 }
 0x33a   :  { %7287 = vmatpush3.msk.msra.mxu1 %vm9804_vm11, %v1133_v31 }
 0x33b   :  { %1388 = vmatmul.mubr.f32.gmra.mxu1 %v814_v44  ;;  %7288 = vmatprep.subr.msk.mxu1 %vm9804_vm11, %v1148_v33 }
 0x33c   :  { %7289 = vmatpush3.msk.msra.mxu1 %vm9804_vm11, %v1132_v16  ;;  %v1035_v35 = vpop.permute.xlu0 %1034  ;;  %1392 = vmatprep.mubr.f32.mxu1 %v821_v15  ;;  %v10126_v54 = vpop.permute.xlu1 %1247 }
 0x33d   :  { %7290 = vmatprep.subr.msk.mxu1 %vm9804_vm11, %v1147_v18  ;;  %v1129_v49 = vsel %vm1126_vm10, %v1035_v35, 0.0 }
 0x33e   :  { %7291 = vmatpush3.msk.msra.mxu1 %vm9804_vm11, %v1131_v19 }
 0x33f   :  { %1393 = vmatmul.mubr.f32.gmra.mxu1 %v820_v46  ;;  %7292 = vmatprep.subr.msk.mxu1 %vm9804_vm11, %v1146_v26 }
 0x340   :  { %7293 = vmatpush3.msk.msra.mxu1 %vm9804_vm11, %v1130_v28  ;;  %v1033_v32 = vpop.permute.xlu0 %1032  ;;  %1397 = vmatprep.mubr.f32.mxu1 %v827_v22  ;;  %v10128_v43 = vpop.permute.xlu1 %1243 }
 0x341   :  { %7294 = vmatprep.subr.msk.mxu1 %vm9804_vm11, %v1145_v20  ;;  %v1128_v57 = vsel %vm1126_vm10, %v1033_v32, 0.0 }
 0x342   :  { %7295 = vmatpush3.msk.msra.mxu1 %vm9804_vm11, %v1129_v49 }
 0x343   :  { %1398 = vmatmul.mubr.f32.gmra.mxu1 %v826_v37  ;;  %7296 = vmatprep.subr.msk.mxu1 %vm9804_vm11, %v1144_v34 }
 0x344   :  { %7297 = vmatpush3.msk.msra.mxu1 %vm9804_vm11, %v1128_v57  ;;  %v1031_v63 = vpop.permute.xlu0 %1030  ;;  %1612 = vmatprep.mubr.f32.mxu1 %v741_v50  ;;  %v10132_v14 = vpop.permute.xlu1 %1235 }
 0x345   :  { %v1127_v5 = vsel %vm1126_vm10, %v1031_v63, 0.0  ;;  %7298 = vmatprep.subr.msk.mxu1 %vm9804_vm11, %v1143_v61  ;;  %v7220_v55 = vpop.f32.mrf.mxu0 }
 0x346   :  { %7299 = vmatpush3.msk.msra.mxu1 %vm9804_vm11, %v1127_v5 }
 0x347   :  { %1613 = vmatmul.mubr.f32.vlgmr.msra.gmra.mxu1 %v740_v56  ;;  %v7221_v16 = vpop.f32.mrf.mxu0 }
 0x348   :  { %1617 = vmatprep.mubr.f32.mxu1 %v747_v42  ;;  %v10136_v31 = vpop.permute.xlu1 %1227  ;;  %v7222_v50 = vadd.f32 %v7221_v16, %v7220_v55 }
 0x349   :  { %v7223_v46 = vpop.f32.mrf.mxu0 }
 0x34b   :  { %1618 = vmatmul.mubr.f32.gmra.mxu1 %v746_v4  ;;  %v7224_v22 = vpop.f32.mrf.mxu0 }
 0x34c   :  { %1622 = vmatprep.mubr.f32.mxu1 %v753_v41  ;;  %v10140_v33 = vpop.permute.xlu1 %1219  ;;  %v7225_v4 = vadd.f32 %v7224_v22, %v7223_v46 }
 0x34d   :  { %14505 = vst [vmem:[#allocation5_spill] sm:$0xff] %v10140_v33  ;;  %v7226_v28 = vpop.f32.mrf.mxu0 }
 0x34f   :  { %1623 = vmatmul.mubr.f32.gmra.mxu1 %v752_v47  ;;  %v7227_v61 = vpop.f32.mrf.mxu0 }
 0x350   :  { %1627 = vmatprep.mubr.f32.mxu1 %v759_v6  ;;  %v10144_v35 = vpop.permute.xlu1 %1211 }
 0x351   :  { %v10130_v29 = vpop.permute.xlu0 %1251  ;;  %14507 = vst [vmem:[#allocation7_spill] sm:$0xff] %v10144_v35  ;;  %v7229_v47 = vpop.f32.mrf.mxu0 }
 0x353   :  { %1628 = vmatmul.mubr.f32.gmra.mxu1 %v758_v62 }
 0x354   :  { %1632 = vmatprep.mubr.f32.mxu1 %v765_v7  ;;  %v1204_v26 = vpop.permute.xlu1 %1203 }
 0x355   :  { %v10134_v44 = vpop.permute.xlu0 %1239 }
 0x357   :  { %1633 = vmatmul.mubr.f32.gmra.mxu1 %v764_v40 }
 0x358   :  { %1637 = vmatprep.mubr.f32.mxu1 %v771_v45  ;;  %v1196_v37 = vpop.permute.xlu1 %1195  ;;  %v7228_v45 = vadd.f32 %v7227_v61, %v7226_v28 }
 0x359   :  { %v10138_v15 = vpop.permute.xlu0 %1231 }
 0x35b   :  { %1638 = vmatmul.mubr.f32.gmra.mxu1 %v770_v17 }
 0x35c   :  { %1642 = vmatprep.mubr.f32.mxu1 %v777_v59  ;;  %v7230_v59 = vpop.f32.mrf.mxu0 }
 0x35d   :  { %v10142_v18 = vpop.permute.xlu0 %1223 }
 0x35e   :  { %14506 = vst [vmem:[#allocation6_spill] sm:$0xff] %v10142_v18 }
 0x35f   :  { %1643 = vmatmul.mubr.f32.gmra.mxu1 %v776_v48 }
 0x360   :  { %1647 = vmatprep.mubr.f32.mxu1 %v783_v51 }
 0x361   :  { %v10146_v19 = vpop.permute.xlu0 %1215 }
 0x362   :  { %14508 = vst [vmem:[#allocation8_spill] sm:$0xff] %v10146_v19 }
 0x363   :  { %1648 = vmatmul.mubr.f32.gmra.mxu1 %v782_v39 }
 0x364   :  { %1652 = vmatprep.mubr.f32.mxu1 %v789_v60 }
 0x365   :  { %v1208_v20 = vpop.permute.xlu0 %1207 }
 0x367   :  { %1653 = vmatmul.mubr.f32.gmra.mxu1 %v788_v0  ;;  %v7231_v0 = vadd.f32 %v7230_v59, %v7229_v47 }
 0x368   :  { %1657 = vmatprep.mubr.f32.mxu1 %v795_v8 }
 0x369   :  { %v1200_v56 = vpop.permute.xlu0 %1199 }
 0x36b   :  { %1658 = vmatmul.mubr.f32.gmra.mxu1 %v794_v52 }
 0x36c   :  { %1662 = vmatprep.mubr.f32.mxu1 %v801_v21 }
 0x36f   :  { %1663 = vmatmul.mubr.f32.gmra.mxu1 %v800_v9 }
 0x370   :  { %1667 = vmatprep.mubr.f32.mxu1 %v807_v1 }
 0x373   :  { %1668 = vmatmul.mubr.f32.gmra.mxu1 %v806_v58 }
 0x374   :  { %1672 = vmatprep.mubr.f32.mxu1 %v813_v24 }
 0x377   :  { %1673 = vmatmul.mubr.f32.gmra.mxu1 %v812_v10 }
 0x378   :  { %1677 = vmatprep.mubr.f32.mxu1 %v819_v36  ;;  %v10160_v36 = vpop.f32.mrf.mxu0 }
 0x379   :  { %14513 = vst [vmem:[#allocation13_spill] sm:$0xff] %v10160_v36 }
 0x37b   :  { %1678 = vmatmul.mubr.f32.gmra.mxu1 %v818_v23 }
 0x37c   :  { %1682 = vmatprep.mubr.f32.mxu1 %v825_v38 }
 0x37f   :  { %1683 = vmatmul.mubr.f32.gmra.mxu1 %v824_v11  ;;  %v10166_v11 = vpop.f32.mrf.mxu0 }
 0x380   :  { %1687 = vmatprep.mubr.f32.mxu1 %v831_v12  ;;  %14514 = vst [vmem:[#allocation14_spill] sm:$0xff] %v10166_v11 }
 0x381   :  { %v10172_v55 = vpop.f32.mrf.mxu0 }
 0x382   :  { %14515 = vst [vmem:[#allocation15_spill] sm:$0xff] %v10172_v55 }
 0x383   :  { %1688 = vmatmul.mubr.f32.gmra.mxu1 %v830_v27  ;;  %v10178_v22 = vpop.f32.mrf.mxu0 }
 0x384   :  { %14516 = vst [vmem:[#allocation16_spill] sm:$0xff] %v10178_v22 }
 0x3c7   :  { %v7140_v30 = vpop.f32.mrf.mxu1 }
 0x3c9   :  { %v7141_v32 = vpop.f32.mrf.mxu1 }
 0x3ca   :  { %v7142_v49 = vadd.f32 %v7141_v32, %v7140_v30  ;;  %v10184_v30 = vpop.f32.mrf.mxu0 }
 0x3cb   :  { %v7143_v34 = vpop.f32.mrf.mxu1  ;;  %14517 = vst [vmem:[#allocation17_spill] sm:$0xff] %v10184_v30 }
 0x3cc   :  { %v1325_v57 = vadd.f32 %v7142_v49, %v1196_v37  ;;  %v10190_v37 = vpop.f32.mrf.mxu0 }
 0x3cd   :  { %v7144_v63 = vpop.f32.mrf.mxu1  ;;  %14518 = vst [vmem:[#allocation18_spill] sm:$0xff] %v10190_v37 }
 0x3ce   :  { %v1470_v5 = vadd.f32 %v7222_v50, %v1325_v57  ;;  %v7145_v42 = vadd.f32 %v7144_v63, %v7143_v34  ;;  %v10196_v34 = vpop.f32.mrf.mxu0 }
 0x3cf   :  { %v7146_v41 = vpop.f32.mrf.mxu1  ;;  %14519 = vst [vmem:[#allocation19_spill] sm:$0xff] %v10196_v34 }
 0x3d0   :  { %v1330_v6 = vadd.f32 %v7145_v42, %v1200_v56  ;;  %v10202_v63 = vpop.f32.mrf.mxu0 }
 0x3d1   :  { %v7147_v62 = vpop.f32.mrf.mxu1  ;;  %14520 = vst [vmem:[#allocation20_spill] sm:$0xff] %v10202_v63 }
 0x3d2   :  { %v1475_v7 = vadd.f32 %v7225_v4, %v1330_v6  ;;  %v7148_v40 = vadd.f32 %v7147_v62, %v7146_v41  ;;  %v10204_v4 = vpop.f32.mrf.mxu0 }
 0x3d3   :  { %v7149_v17 = vpop.f32.mrf.mxu1 }
 0x3d4   :  { %v1335_v48 = vadd.f32 %v7148_v40, %v1204_v26  ;;  %v10206_v6 = vpop.f32.mrf.mxu0 }
 0x3d5   :  { %v7150_v51 = vpop.f32.mrf.mxu1 }
 0x3d6   :  { %v1480_v39 = vadd.f32 %v7228_v45, %v1335_v48  ;;  %v7151_v60 = vadd.f32 %v7150_v51, %v7149_v17  ;;  %v10208_v45 = vpop.f32.mrf.mxu0 }
 0x3d7   :  { %v10148_v8 = vpop.f32.mrf.mxu1 }
 0x3d8   :  { %14509 = vst [vmem:[#allocation9_spill] sm:$0xff] %v10148_v8  ;;  %v1340_v52 = vadd.f32 %v7151_v60, %v1208_v20  ;;  %v10212_v60 = vpop.f32.mrf.mxu0 }
 0x3d9   :  { %v10150_v21 = vpop.f32.mrf.mxu1  ;;  %14522 = vst [vmem:[#allocation22_spill] sm:$0xff] %v10212_v60 }
 0x3da   :  { %14510 = vst [vmem:[#allocation10_spill] sm:$0xff] %v10150_v21  ;;  %v1485_v9 = vadd.f32 %v7231_v0, %v1340_v52  ;;  %v10216_v25 = vpop.f32.mrf.mxu0 }
 0x3db   :  { %v10152_v1 = vpop.f32.mrf.mxu1 }
 0x3dc   :  { %14511 = vst [vmem:[#allocation11_spill] sm:$0xff] %v10152_v1  ;;  %v7251_v11 = vpop.f32.mrf.mxu0 }
 0x3dd   :  { %v10154_v58 = vpop.f32.mrf.mxu1 }
 0x3de   :  { %14512 = vst [vmem:[#allocation12_spill] sm:$0xff] %v10154_v58 }
 0x3df   :  { %v10156_v24 = vpop.f32.mrf.mxu1 }
 0x3e1   :  { %v10158_v10 = vpop.f32.mrf.mxu1 }
 0x3e3   :  { %v10162_v23 = vpop.f32.mrf.mxu1 }
 0x3e5   :  { %v10164_v38 = vpop.f32.mrf.mxu1 }
 0x3e7   :  { %v10168_v12 = vpop.f32.mrf.mxu1 }
 0x3e9   :  { %v10170_v27 = vpop.f32.mrf.mxu1 }
 0x3eb   :  { %v10174_v16 = vpop.f32.mrf.mxu1 }
 0x3ed   :  { %v10176_v46 = vpop.f32.mrf.mxu1 }
 0x3ef   :  { %v10180_v26 = vpop.f32.mrf.mxu1 }
 0x3f1   :  { %v10182_v28 = vpop.f32.mrf.mxu1 }
 0x3f2   :  { %v7172_v60 = vadd.f32 %v10182_v28, %v10180_v26 }
 0x3f3   :  { %v10186_v20 = vpop.f32.mrf.mxu1 }
 0x3f5   :  { %v10188_v32 = vpop.f32.mrf.mxu1 }
 0x3f7   :  { %v10192_v49 = vpop.f32.mrf.mxu1 }
 0x3f9   :  { %v10194_v50 = vpop.f32.mrf.mxu1 }
 0x3fb   :  { %v10198_v61 = vpop.f32.mrf.mxu1 }
 0x3fd   :  { %v10200_v57 = vpop.f32.mrf.mxu1 }
 0x3fe   :  { %v7181_v21 = vadd.f32 %v10200_v57, %v10198_v61 }
 0x3ff   :  { %v7182_v56 = vpop.f32.mrf.mxu1 }
 0x401   :  { %v7183_v42 = vpop.f32.mrf.mxu1 }
 0x403   :  { %v7185_v41 = vpop.f32.mrf.mxu1 }
 0x405   :  { %v7186_v47 = vpop.f32.mrf.mxu1 }
 0x407   :  { %v7300_v62 = vpop.f32.mrf.mxu1 }
 0x409   :  { %v7301_v40 = vpop.f32.mrf.mxu1 }
 0x40a   :  { %v7302_v17 = vadd.f32 %v7301_v40, %v7300_v62 }
 0x40b   :  { %v7303_v59 = vpop.f32.mrf.mxu1 }
 0x40c   :  { %v10210_v48 = vadd.f32 %v7302_v17, %v1470_v5 }
 0x40d   :  { %v7304_v51 = vpop.f32.mrf.mxu1 }
 0x40e   :  { %14521 = vst [vmem:[#allocation21_spill] sm:$0xff] %v10210_v48  ;;  %v7305_v0 = vadd.f32 %v7304_v51, %v7303_v59  ;;  %v7253_v59 = vpop.f32.mrf.mxu0 }
 0x40f   :  { %v7306_v52 = vpop.f32.mrf.mxu1 }
 0x410   :  { %v10214_v2 = vadd.f32 %v7305_v0, %v1475_v7  ;;  %v7254_v0 = vpop.f32.mrf.mxu0 }
 0x411   :  { %v7307_v3 = vpop.f32.mrf.mxu1  ;;  %v7255_v28 = vadd.f32 %v7254_v0, %v7253_v59  ;;  %v14553_v0 = vld [vmem:[#allocation11_spill] sm:$0xff] }
 0x412   :  { %14523 = vst [vmem:[#allocation23_spill] sm:$0xff] %v10214_v2  ;;  %v7308_v53 = vadd.f32 %v7307_v3, %v7306_v52 }
 0x413   :  { %v7309_v22 = vpop.f32.mrf.mxu1 }
 0x414   :  { %v10218_v55 = vadd.f32 %v7308_v53, %v1480_v39  ;;  %v7256_v53 = vpop.f32.mrf.mxu0 }
 0x415   :  { %v7310_v19 = vpop.f32.mrf.mxu1 }
 0x416   :  { %14524 = vst [vmem:[#allocation24_spill] sm:$0xff] %v10218_v55  ;;  %v7311_v62 = vadd.f32 %v7310_v19, %v7309_v22  ;;  %v7257_v22 = vpop.f32.mrf.mxu0 }
 0x417   :  { %v10220_v40 = vpop.f32.mrf.mxu1 }
 0x418   :  { %14525 = vst [vmem:[#allocation25_spill] sm:$0xff] %v10220_v40  ;;  %v10222_v5 = vadd.f32 %v7311_v62, %v1485_v9  ;;  %v7259_v62 = vpop.f32.mrf.mxu0 }
 0x419   :  { %v10224_v17 = vpop.f32.mrf.mxu1 }
 0x41a   :  { %14526 = vst [vmem:[#allocation26_spill] sm:$0xff] %v10222_v5  ;;  %14527 = vst [vmem:[#allocation27_spill] sm:$0xff] %v10224_v17  ;;  %v7260_v55 = vpop.f32.mrf.mxu0 }
 0x41b   :  { %v10226_v51 = vpop.f32.mrf.mxu1 }
 0x41c   :  { %14528 = vst [vmem:[#allocation28_spill] sm:$0xff] %v10226_v51  ;;  %v7262_v17 = vpop.f32.mrf.mxu0 }
 0x41d   :  { %v10228_v7 = vpop.f32.mrf.mxu1 }
 0x41e   :  { %14529 = vst [vmem:[#allocation29_spill] sm:$0xff] %v10228_v7  ;;  %v7263_v35 = vpop.f32.mrf.mxu0 }
 0x41f   :  { %v10230_v2 = vpop.f32.mrf.mxu1 }
 0x420   :  { %14530 = vst [vmem:[#allocation30_spill] sm:$0xff] %v10230_v2  ;;  %v7265_v34 = vpop.f32.mrf.mxu0  ;;  %v7187_v2 = vadd.f32 %v7186_v47, %v7185_v41 }
 0x421   :  { %v10232_v3 = vpop.f32.mrf.mxu1 }
 0x422   :  { %14531 = vst [vmem:[#allocation31_spill] sm:$0xff] %v10232_v3  ;;  %v7264_v3 = vadd.f32 %v7263_v35, %v7262_v17  ;;  %v7258_v35 = vadd.f32 %v7257_v22, %v7256_v53  ;;  %v14556_v22 = vld [vmem:[#allocation19_spill] sm:$0xff] }
 0x423   :  { %v10234_v39 = vpop.f32.mrf.mxu1 }
 0x424   :  { %14532 = vst [vmem:[#allocation32_spill] sm:$0xff] %v10234_v39 }
 0x425   :  { %v10236_v19 = vpop.f32.mrf.mxu1 }
 0x426   :  { %14533 = vst [vmem:[#allocation33_spill] sm:$0xff] %v10236_v19  ;;  %v7184_v19 = vadd.f32 %v7183_v42, %v7182_v56  ;;  %v1400_v56 = vadd.f32 %v7187_v2, %v10124_v13  ;;  %v7166_v13 = vadd.f32 %v10170_v27, %v10168_v12 }
 0x427   :  { %v10238_v9 = vpop.f32.mrf.mxu1  ;;  %v14550_v17 = vld [vmem:[#allocation30_spill] sm:$0xff] }
 0x428   :  { %v1395_v1 = vadd.f32 %v7184_v19, %v10130_v29 }
 0x429   :  { %v10240_v52 = vpop.f32.mrf.mxu1  ;;  %v14551_v59 = vld [vmem:[#allocation31_spill] sm:$0xff] }
 0x42a   :  { %v1540_v8 = vadd.f32 %v7264_v3, %v1395_v1  ;;  %v1390_v1 = vadd.f32 %v7181_v21, %v10126_v54  ;;  %v7169_v54 = vadd.f32 %v10176_v46, %v10174_v16  ;;  %v7326_v12 = vadd.f32 %v10240_v52, %v10238_v9  ;;  %v14554_v3 = vld [vmem:[#allocation12_spill] sm:$0xff] }
 0x42b   :  { %v10242_v48 = vpop.f32.mrf.mxu1  ;;  %v7157_v53 = vadd.f32 %v14554_v3, %v14553_v0  ;;  %v14557_v9 = vld [vmem:[#allocation20_spill] sm:$0xff]  ;;  %v10487_v3 = vld [vmem:[%s14342_s7 + $0x8] sm:$0xff] }
 0x42c   :  { %14534 = vst [vmem:[#allocation34_spill] sm:$0xff] %v10242_v48  ;;  %v7266_v48 = vpop.f32.mrf.mxu0  ;;  %v7243_v52 = vadd.f32 %v14557_v9, %v14556_v22  ;;  %v10481_v0 = vld [vmem:[%s14342_s7 + $0x10] sm:$0xff] }
 0x42d   :  { %v10244_v5 = vpop.f32.mrf.mxu1  ;;  %v7267_v30 = vadd.f32 %v7266_v48, %v7265_v34  ;;  %v7175_v48 = vadd.f32 %v10188_v32, %v10186_v20 }
 0x42e   :  { %14535 = vst [vmem:[#allocation35_spill] sm:$0xff] %v10244_v5  ;;  %v7178_v5 = vadd.f32 %v10194_v50, %v10192_v49  ;;  %v7261_v49 = vadd.f32 %v7260_v55, %v7259_v62 }
 0x42f   :  { %v7330_v7 = vpop.f32.mrf.mxu1  ;;  %v1545_v61 = vadd.f32 %v7267_v30, %v1400_v56  ;;  %v1380_v21 = vadd.f32 %v7175_v48, %v10134_v44  ;;  %v14558_v56 = vld [vmem:[#allocation7_spill] sm:$0xff] }
 0x430   :  { %v1385_v29 = vadd.f32 %v7178_v5, %v10128_v43  ;;  %v1375_v43 = vadd.f32 %v7172_v60, %v10132_v14  ;;  %v1535_v30 = vadd.f32 %v7261_v49, %v1390_v1  ;;  %v1365_v14 = vadd.f32 %v7166_v13, %v10136_v31  ;;  %v14546_v60 = vld [vmem:[#allocation18_spill] sm:$0xff] }
 0x431   :  { %v7331_v51 = vpop.f32.mrf.mxu1  ;;  %v1370_v31 = vadd.f32 %v7169_v54, %v10138_v15  ;;  %v1525_v46 = vadd.f32 %v7255_v28, %v1380_v21  ;;  %v14569_v28 = vld [vmem:[#allocation16_spill] sm:$0xff] }
 0x432   :  { %v7332_v20 = vadd.f32 %v7331_v51, %v7330_v7  ;;  %v7320_v51 = vadd.f32 %v14551_v59, %v14550_v17  ;;  %v10463_v17 = vld [vmem:[%s14342_s7 + $0x28] sm:$0xff]  ;;  %v10469_v59 = vld [vmem:[%s14342_s7 + $0x20] sm:$0xff] }
 0x433   :  { %v7333_v40 = vpop.f32.mrf.mxu1  ;;  %v14547_v15 = vld [vmem:[#allocation34_spill] sm:$0xff] }
 0x435   :  { %v7334_v36 = vpop.f32.mrf.mxu1 }
 0x437   :  { %v7336_v39 = vpop.f32.mrf.mxu1 }
 0x439   :  { %v7337_v63 = vpop.f32.mrf.mxu1 }
 0x43a   :  { %v7338_v50 = vadd.f32 %v7337_v63, %v7336_v39  ;;  %v14544_v63 = vld [vmem:[#allocation5_spill] sm:$0xff]  ;;  %v14555_v39 = vld [vmem:[#allocation6_spill] sm:$0xff] }
 0x43b   :  { %v7339_v18 = vpop.f32.mrf.mxu1 }
 0x43d   :  { %v7340_v58 = vpop.f32.mrf.mxu1 }
 0x43e   :  { %v7341_v55 = vadd.f32 %v7340_v58, %v7339_v18  ;;  %v7246_v18 = vadd.f32 %v10206_v6, %v10204_v4  ;;  %v14545_v6 = vld [vmem:[#allocation17_spill] sm:$0xff] }
 0x43f   :  { %v7342_v37 = vpop.f32.mrf.mxu1 }
 0x440   :  { %v10283_v44 = vadd.f32 %v7341_v55, %v1535_v30  ;;  %v1510_v5 = vadd.f32 %v7246_v18, %v1365_v14  ;;  %v14568_v55 = vld [vmem:[#allocation15_spill] sm:$0xff]  ;;  %v14570_v30 = vld [vmem:[#allocation28_spill] sm:$0xff] }
 0x441   :  { %v7343_v33 = vpop.f32.mrf.mxu1 }
 0x442   :  { %v7344_v42 = vadd.f32 %v7343_v33, %v7342_v37  ;;  %v7252_v33 = vadd.f32 %v7251_v11, %v10216_v25  ;;  %v7160_v25 = vadd.f32 %v10158_v10, %v10156_v24  ;;  %v7335_v11 = vadd.f32 %v7334_v36, %v7333_v40  ;;  %14539 = vst [vmem:[#allocation39_spill] sm:$0xff] %v10283_v44  ;;  %v14541_v10 = vld [vmem:[#allocation22_spill] sm:$0xff]  ;;  %v14542_v36 = vld [vmem:[#allocation9_spill] sm:$0xff] }
 0x443   :  { %v7345_v41 = vpop.f32.mrf.mxu1  ;;  %v7163_v24 = vadd.f32 %v10164_v38, %v10162_v23  ;;  %v7249_v16 = vadd.f32 %v14541_v10, %v10208_v45  ;;  %v14543_v37 = vld [vmem:[#allocation10_spill] sm:$0xff]  ;;  %v7240_v40 = vadd.f32 %v14546_v60, %v14545_v6  ;;  %v14548_v23 = vld [vmem:[#allocation35_spill] sm:$0xff]  ;;  %v10309_v7 = vadd.f32 %v7326_v12, %v1510_v5  ;;  %v10427_v60 = vld [vmem:[%s14342_s7 + $0x58] sm:$0xff] }
 0x444   :  { %v10255_v47 = vadd.f32 %v7344_v42, %v1540_v8  ;;  %v1530_v8 = vadd.f32 %v7258_v35, %v1385_v29  ;;  %v1520_v58 = vadd.f32 %v7252_v33, %v1375_v43  ;;  %v7154_v57 = vadd.f32 %v14543_v37, %v14542_v36  ;;  %v14559_v29 = vld [vmem:[#allocation13_spill] sm:$0xff]  ;;  %v14560_v35 = vld [vmem:[#allocation14_spill] sm:$0xff]  ;;  %v14567_v33 = vld [vmem:[#allocation8_spill] sm:$0xff]  ;;  %14583 = vst [vmem:[#allocation12_spill] sm:$0xff] %v10427_v60 }
 0x445   :  { %v7346_v34 = vpop.f32.mrf.mxu1  ;;  %v1355_v4 = vadd.f32 %v7160_v25, %v14544_v63  ;;  %v7329_v38 = vadd.f32 %v14548_v23, %v14547_v15  ;;  %v10305_v45 = vadd.f32 %v7335_v11, %v1525_v46  ;;  %14552 = vst [vmem:[#allocation9_spill] sm:$0xff] %v10309_v7  ;;  %v1360_v19 = vadd.f32 %v7163_v24, %v14555_v39  ;;  %v14571_v25 = vld [vmem:[#allocation29_spill] sm:$0xff]  ;;  %v1694_v24 = vld [vmem:[%s14345_s5 + $0x8] sm:$0xff]  ;;  %v14576_v10 = vld [vmem:[#allocation26_spill] sm:$0xff] }
 0x446   :  { %14536 = vst [vmem:[#allocation36_spill] sm:$0xff] %v10255_v47  ;;  %v7347_v2 = vadd.f32 %v7346_v34, %v7345_v41  ;;  %1785 = vrot.lane.b32.xlu1 %v10255_v47, %s8787_s2  ;;  %v10268_v32 = vadd.f32 %v7338_v50, %v1530_v8  ;;  %v10287_v27 = vadd.f32 %v7332_v20, %v1520_v58  ;;  %v14561_v50 = vld [vmem:[#allocation32_spill] sm:$0xff]  ;;  %v14562_v34 = vld [vmem:[#allocation33_spill] sm:$0xff]  ;;  %v14578_v46 = vld [vmem:[#allocation23_spill] sm:$0xff]  ;;  %v14375_v37 = vmov 2  }
 0x447   :  { %14549 = vst [vmem:[#allocation22_spill] sm:$0xff] %v10305_v45  ;;  %v1515_v62 = vadd.f32 %v7249_v16, %v1370_v31  ;;  %v1345_v42 = vadd.f32 %v7154_v57, %v14558_v56  ;;  %v7234_v41 = vadd.f32 %v14560_v35, %v14559_v29  ;;  %v1500_v49 = vadd.f32 %v7240_v40, %v1355_v4  ;;  %v14575_v31 = vld [vmem:[#allocation24_spill] sm:$0xff]  ;;  %v14577_v16 = vld [vmem:[#allocation21_spill] sm:$0xff]  ;;  %v10415_v4 = vld [vmem:[%s14342_s7 + $0x68] sm:$0xff] }
 0x448   :  { %v10266_v26 = vadd.f32 %v7347_v2, %v1545_v61  ;;  %14538 = vst [vmem:[#allocation38_spill] sm:$0xff] %v10268_v32  ;;  %14540 = vst [vmem:[#allocation40_spill] sm:$0xff] %v10287_v27  ;;  %v7323_v48 = vadd.f32 %v14562_v34, %v14561_v50  ;;  %v14564_v61 = vld [vmem:[#allocation25_spill] sm:$0xff]  ;;  %v14565_v2 = vld [vmem:[#allocation27_spill] sm:$0xff]  ;;  %v1350_v8 = vadd.f32 %v7157_v53, %v14567_v33  ;;  %2045 = vmatprep.mubr.f32.mxu0 %v1694_v24 }
 0x449   :  { %v10325_v1 = vadd.f32 %v7329_v38, %v1515_v62  ;;  %v7314_v13 = vadd.f32 %v14565_v2, %v14564_v61  ;;  %v10329_v43 = vadd.f32 %v7320_v51, %v1500_v49  ;;  %v7237_v20 = vadd.f32 %v14569_v28, %v14568_v55  ;;  %v1695_v36 = vld [vmem:[%s14345_s5 + $0x10] sm:$0xff]  ;;  %8723 = vset.pattern.permute.xlu0 %v14375_v37  ;;  %v10409_v63 = vld [vmem:[%s14342_s7 + $0x78] sm:$0xff]  ;;  %v10421_v6 = vld [vmem:[%s14342_s7 + $0x60] sm:$0xff] }
 0x44a   :  { %14537 = vst [vmem:[#allocation37_spill] sm:$0xff] %v10266_v26  ;;  %1787 = vrot.lane.b32.xlu0 %v10266_v26, %s8787_s2  ;;  %7348 = vmatprep.subr.mxu0 %v10266_v26  ;;  %v1505_v54 = vadd.f32 %v7243_v52, %v1360_v19  ;;  %v1490_v21 = vadd.f32 %v7234_v41, %v1345_v42  ;;  %v10403_v57 = vld [vmem:[%s14342_s7 + $0x70] sm:$0xff]  ;;  %14580 = vst [vmem:[#allocation30_spill] sm:$0xff] %v10409_v63  ;;  %v10439_v5 = vld [vmem:[%s14342_s7 + $0x48] sm:$0xff] }
 0x44b   :  { %1781 = vrot.lane.b32.xlu1 %v10268_v32, %s8787_s2  ;;  %14563 = vst [vmem:[#allocation10_spill] sm:$0xff] %v10325_v1  ;;  %14566 = vst [vmem:[#allocation5_spill] sm:$0xff] %v10329_v43  ;;  %v7317_v14 = vadd.f32 %v14571_v25, %v14570_v30  ;;  %v1495_v11 = vadd.f32 %v7237_v20, %v1350_v8  ;;  %8348 = vmatprep.mubr.f32.mxu1 %v1695_v36  ;;  %v10433_v40 = vld [vmem:[%s14342_s7 + $0x50] sm:$0xff]  ;;  %v10445_v15 = vld [vmem:[%s14342_s7 + $0x40] sm:$0xff] }
 0x44c   :  { %v10340_v18 = vadd.f32 %v7323_v48, %v1505_v54  ;;  %v10342_v58 = vadd.f32 %v7314_v13, %v1490_v21  ;;  %8724 = vset.pattern.permute.xlu1 %v14375_v37  ;;  %14579 = vst [vmem:[#allocation35_spill] sm:$0xff] %v10403_v57  ;;  %14581 = vst [vmem:[#allocation31_spill] sm:$0xff] %v10415_v4  ;;  %v10451_v23 = vld [vmem:[%s14342_s7 + $0x38] sm:$0xff]  ;;  %v10457_v38 = vld [vmem:[%s14342_s7 + $0x30] sm:$0xff] }
 0x44d   :  { %v10348_v12 = vadd.f32 %v7317_v14, %v1495_v11  ;;  %14582 = vst [vmem:[#allocation11_spill] sm:$0xff] %v10421_v6  ;;  %14584 = vst [vmem:[#allocation6_spill] sm:$0xff] %v10433_v40  ;;  %v10475_v51 = vld [vmem:[%s14342_s7 + $0x18] sm:$0xff]  ;;  %v10493_v53 = vld [vmem:[%s14342_s7] sm:$0xff] }
 0x44e   :  { %1783 = vrot.lane.b32.xlu0 %v10283_v44, %s8787_s2  ;;  %14572 = vst [vmem:[#allocation17_spill] sm:$0xff] %v10340_v18  ;;  %14573 = vst [vmem:[#allocation18_spill] sm:$0xff] %v10342_v58 }
 0x44f   :  { %1777 = vrot.lane.b32.xlu1 %v10287_v27, %s8787_s2  ;;  %14574 = vst [vmem:[#allocation34_spill] sm:$0xff] %v10348_v12  ;;  %14585 = vst [vmem:[#allocation19_spill] sm:$0xff] %v10439_v5 }
 0x450   :  { %14586 = vst [vmem:[#allocation20_spill] sm:$0xff] %v10445_v15  ;;  %14587 = vst [vmem:[#allocation7_spill] sm:$0xff] %v10451_v23 }
 0x451   :  { %14588 = vst [vmem:[#allocation13_spill] sm:$0xff] %v10457_v38  ;;  %14589 = vst [vmem:[#allocation14_spill] sm:$0xff] %v10463_v17 }
 0x452   :  { %1779 = vrot.lane.b32.xlu0 %v10305_v45, %s8787_s2  ;;  %14590 = vst [vmem:[#allocation32_spill] sm:$0xff] %v10469_v59  ;;  %14591 = vst [vmem:[#allocation33_spill] sm:$0xff] %v10475_v51 }
 0x453   :  { %1773 = vrot.lane.b32.xlu1 %v10309_v7, %s8787_s2  ;;  %14592 = vst [vmem:[#allocation25_spill] sm:$0xff] %v10481_v0  ;;  %14593 = vst [vmem:[#allocation27_spill] sm:$0xff] %v10487_v3 }
 0x454   :  { %14594 = vst [vmem:[#allocation8_spill] sm:$0xff] %v10493_v53 }
 0x456   :  { %1775 = vrot.lane.b32.xlu0 %v10325_v1, %s8787_s2 }
 0x457   :  { %1769 = vrot.lane.b32.xlu1 %v10329_v43, %s8787_s2 }
 0x45a   :  { %1771 = vrot.lane.b32.xlu0 %v10340_v18, %s8787_s2 }
 0x45b   :  { %1765 = vrot.lane.b32.xlu1 %v10342_v58, %s8787_s2 }
 0x45e   :  { %1767 = vrot.lane.b32.xlu0 %v10348_v12, %s8787_s2 }
 0x45f   :  { %1761 = vrot.lane.b32.xlu1 %v14575_v31, %s8787_s2 }
 0x462   :  { %1763 = vrot.lane.b32.xlu0 %v14576_v10, %s8787_s2 }
 0x463   :  { %1757 = vrot.lane.b32.xlu1 %v14577_v16, %s8787_s2 }
 0x466   :  { %1759 = vrot.lane.b32.xlu0 %v14578_v46, %s8787_s2 }
 0x467   :  { %1865 = vrot.lane.b32.xlu1 %v10255_v47, %s8788_s21 }
 0x46a   :  { %1867 = vrot.lane.b32.xlu0 %v10266_v26, %s8788_s21 }
 0x46b   :  { %1861 = vrot.lane.b32.xlu1 %v10268_v32, %s8788_s21 }
 0x46e   :  { %1863 = vrot.lane.b32.xlu0 %v10283_v44, %s8788_s21 }
 0x46f   :  { %1857 = vrot.lane.b32.xlu1 %v10287_v27, %s8788_s21 }
 0x472   :  { %1859 = vrot.lane.b32.xlu0 %v10305_v45, %s8788_s21 }
 0x473   :  { %1853 = vrot.lane.b32.xlu1 %v10309_v7, %s8788_s21 }
 0x476   :  { %1855 = vrot.lane.b32.xlu0 %v10325_v1, %s8788_s21 }
 0x477   :  { %1849 = vrot.lane.b32.xlu1 %v10329_v43, %s8788_s21 }
 0x47a   :  { %1851 = vrot.lane.b32.xlu0 %v10340_v18, %s8788_s21 }
 0x47b   :  { %1845 = vrot.lane.b32.xlu1 %v10342_v58, %s8788_s21 }
 0x47e   :  { %1847 = vrot.lane.b32.xlu0 %v10348_v12, %s8788_s21 }
 0x47f   :  { %1841 = vrot.lane.b32.xlu1 %v14575_v31, %s8788_s21 }
 0x482   :  { %1843 = vrot.lane.b32.xlu0 %v14576_v10, %s8788_s21 }
 0x483   :  { %1837 = vrot.lane.b32.xlu1 %v14577_v16, %s8788_s21 }
 0x486   :  { %1839 = vrot.lane.b32.xlu0 %v14578_v46, %s8788_s21 }
 0x487   :  { %1974 = vperm.xlu1 %8724, %v10403_v57  }
 0x48a   :  { %1978 = vperm.xlu0 %8723, %v10409_v63  }
 0x48b   :  { %1970 = vperm.xlu1 %8724, %v10415_v4  }
 0x48e   :  { %1966 = vperm.xlu0 %8723, %v10421_v6  }
 0x48f   :  { %1962 = vperm.xlu1 %8724, %v10427_v60  }
 0x492   :  { %1958 = vperm.xlu0 %8723, %v10433_v40  }
 0x493   :  { %1954 = vperm.xlu1 %8724, %v10439_v5  }
 0x496   :  { %1950 = vperm.xlu0 %8723, %v10445_v15  }
 0x497   :  { %1946 = vperm.xlu1 %8724, %v10451_v23  }
 0x49a   :  { %1942 = vperm.xlu0 %8723, %v10457_v38  }
 0x49b   :  { %1938 = vperm.xlu1 %8724, %v10463_v17  }
 0x49e   :  { %1934 = vperm.xlu0 %8723, %v10469_v59  }
 0x49f   :  { %1930 = vperm.xlu1 %8724, %v10475_v51  }
 0x4a2   :  { %1926 = vperm.xlu0 %8723, %v10481_v0  }
 0x4a3   :  { %1922 = vperm.xlu1 %8724, %v10487_v3  }
 0x4a6   :  { %1918 = vperm.xlu0 %8723, %v10493_v53  }
 0x4b8   :  { %v1786_v39 = vpop.permute.xlu1 %1785 }
 0x4b9   :  { %v1819_v62 = vsel %vm960_vm2, 0.0, %v1786_v39 }
 0x4bc   :  { %v1788_v19 = vpop.permute.xlu0 %1787 }
 0x4bd   :  { %v1782_v22 = vpop.permute.xlu1 %1781  ;;  %v1820_v9 = vsel %vm960_vm2, 0.0, %v1788_v19 }
 0x4be   :  { %7349 = vmatpush3.msk.msra.mxu0 %vm9387_vm6, %v1820_v9  ;;  %v1817_v35 = vsel %vm960_vm2, 0.0, %v1782_v22  ;;  %v1693_v22 = vld [vmem:[%s14345_s5] sm:$0xff] }
 0x4bf   :  { %7350 = vmatprep.subr.mxu0 %v10255_v47 }
 0x4c0   :  { %7351 = vmatpush3.msk.msra.mxu0 %vm9387_vm6, %v1819_v62  ;;  %v1784_v56 = vpop.permute.xlu0 %1783  ;;  %v1697_v62 = vld [vmem:[%s14345_s5 + $0x20] sm:$0xff] }
 0x4c1   :  { %v1778_v42 = vpop.permute.xlu1 %1777  ;;  %v1818_v29 = vsel %vm960_vm2, 0.0, %v1784_v56  ;;  %7352 = vmatprep.subr.mxu0 %v10283_v44 }
 0x4c2   :  { %7353 = vmatpush3.msk.msra.mxu0 %vm9387_vm6, %v1818_v29  ;;  %v1815_v34 = vsel %vm960_vm2, 0.0, %v1778_v42 }
 0x4c3   :  { %7354 = vmatprep.subr.mxu0 %v10268_v32 }
 0x4c4   :  { %7355 = vmatpush3.msk.msra.mxu0 %vm9387_vm6, %v1817_v35  ;;  %v1780_v41 = vpop.permute.xlu0 %1779 }
 0x4c5   :  { %v1774_v49 = vpop.permute.xlu1 %1773  ;;  %v1816_v50 = vsel %vm960_vm2, 0.0, %v1780_v41  ;;  %7356 = vmatprep.subr.mxu0 %v10305_v45  ;;  %v1696_v41 = vld [vmem:[%s14345_s5 + $0x18] sm:$0xff] }
 0x4c6   :  { %7357 = vmatpush3.msk.msra.mxu0 %vm9387_vm6, %v1816_v50  ;;  %v1813_v13 = vsel %vm960_vm2, 0.0, %v1774_v49  ;;  %v1700_v50 = vld [vmem:[%s14345_s5 + $0x38] sm:$0xff] }
 0x4c7   :  { %7358 = vmatprep.subr.mxu0 %v10287_v27 }
 0x4c8   :  { %7359 = vmatpush3.msk.msra.mxu0 %vm9387_vm6, %v1815_v34  ;;  %v1776_v48 = vpop.permute.xlu0 %1775 }
 0x4c9   :  { %v1770_v61 = vpop.permute.xlu1 %1769  ;;  %v1814_v2 = vsel %vm960_vm2, 0.0, %v1776_v48  ;;  %7360 = vmatprep.subr.mxu0 %v10325_v1 }
 0x4ca   :  { %7361 = vmatpush3.msk.msra.mxu0 %vm9387_vm6, %v1814_v2  ;;  %v1811_v28 = vsel %vm960_vm2, 0.0, %v1770_v61  ;;  %v1699_v2 = vld [vmem:[%s14345_s5 + $0x30] sm:$0xff] }
 0x4cb   :  { %7362 = vmatprep.subr.mxu0 %v10309_v7 }
 0x4cc   :  { %7363 = vmatpush3.msk.msra.mxu0 %vm9387_vm6, %v1813_v13  ;;  %v1772_v33 = vpop.permute.xlu0 %1771 }
 0x4cd   :  { %v1766_v8 = vpop.permute.xlu1 %1765  ;;  %v1812_v55 = vsel %vm960_vm2, 0.0, %v1772_v33  ;;  %7364 = vmatprep.subr.mxu0 %v10340_v18  ;;  %v1703_v33 = vld [vmem:[%s14345_s5 + $0x50] sm:$0xff] }
 0x4ce   :  { %7365 = vmatpush3.msk.msra.mxu0 %vm9387_vm6, %v1812_v55  ;;  %v1809_v30 = vsel %vm960_vm2, 0.0, %v1766_v8 }
 0x4cf   :  { %7366 = vmatprep.subr.mxu0 %v10329_v43 }
 0x4d0   :  { %7367 = vmatpush3.msk.msra.mxu0 %vm9387_vm6, %v1811_v28  ;;  %v1768_v20 = vpop.permute.xlu0 %1767 }
 0x4d1   :  { %v1762_v54 = vpop.permute.xlu1 %1761  ;;  %v1810_v21 = vsel %vm960_vm2, 0.0, %v1768_v20  ;;  %7368 = vmatprep.subr.mxu0 %v10348_v12  ;;  %v1702_v20 = vld [vmem:[%s14345_s5 + $0x48] sm:$0xff] }
 0x4d2   :  { %7369 = vmatpush3.msk.msra.mxu0 %vm9387_vm6, %v1810_v21  ;;  %v1807_v24 = vsel %vm960_vm2, 0.0, %v1762_v54  ;;  %v1706_v21 = vld [vmem:[%s14345_s5 + $0x68] sm:$0xff] }
 0x4d3   :  { %7370 = vmatprep.subr.mxu0 %v10342_v58 }
 0x4d4   :  { %7371 = vmatpush3.msk.msra.mxu0 %vm9387_vm6, %v1809_v30  ;;  %v1764_v25 = vpop.permute.xlu0 %1763 }
 0x4d5   :  { %v1758_v14 = vpop.permute.xlu1 %1757  ;;  %v1808_v11 = vsel %vm960_vm2, 0.0, %v1764_v25  ;;  %7372 = vmatprep.subr.mxu0 %v14576_v10 }
 0x4d6   :  { %7373 = vmatpush3.msk.msra.mxu0 %vm9387_vm6, %v1808_v11  ;;  %v1805_v9 = vsel %vm960_vm2, 0.0, %v1758_v14  ;;  %v1705_v11 = vld [vmem:[%s14345_s5 + $0x60] sm:$0xff] }
 0x4d7   :  { %7374 = vmatprep.subr.mxu0 %v14575_v31 }
 0x4d8   :  { %7375 = vmatpush3.msk.msra.mxu0 %vm9387_vm6, %v1807_v24  ;;  %v1760_v36 = vpop.permute.xlu0 %1759 }
 0x4d9   :  { %v1866_v39 = vpop.permute.xlu1 %1865  ;;  %v1806_v19 = vsel %vm960_vm2, 0.0, %v1760_v36  ;;  %7376 = vmatprep.subr.mxu0 %v14578_v46  ;;  %v1709_v36 = vld [vmem:[%s14345_s5 + $0x80] sm:$0xff] }
 0x4da   :  { %7377 = vmatpush3.msk.msra.mxu0 %vm9387_vm6, %v1806_v19  ;;  %v1899_v49 = vsel %vm1126_vm10, %v1866_v39, 0.0 }
 0x4db   :  { %7378 = vmatprep.subr.mxu0 %v14577_v16 }
 0x4dc   :  { %7379 = vmatpush3.msk.msra.mxu0 %vm9387_vm6, %v1805_v9  ;;  %v1868_v56 = vpop.permute.xlu0 %1867  ;;  %v1708_v9 = vld [vmem:[%s14345_s5 + $0x78] sm:$0xff] }
 0x4dd   :  { %v1862_v42 = vpop.permute.xlu1 %1861  ;;  %v1900_v29 = vsel %vm1126_vm10, %v1868_v56, 0.0  ;;  %2046 = vmatmul.mubr.f32.vlgmr.msra.gmra.mxu0 %v1693_v22  ;;  %v1712_v56 = vld [vmem:[%s14345_s5 + $0x98] sm:$0xff] }
 0x4de   :  { %8316 = vmatprep.subr.msk.mxu1 %vm9804_vm11, %v1900_v29  ;;  %2050 = vmatprep.mubr.f32.mxu0 %v1697_v62  ;;  %v1897_v13 = vsel %vm1126_vm10, %v1862_v42, 0.0 }
 0x4df   :  { %8317 = vmatpush3.msk.msra.mxu1 %vm9804_vm11, %v1900_v29 }
 0x4e0   :  { %8318 = vmatprep.subr.msk.mxu1 %vm9804_vm11, %v1899_v49  ;;  %v1864_v34 = vpop.permute.xlu0 %1863 }
 0x4e1   :  { %v1858_v48 = vpop.permute.xlu1 %1857  ;;  %v1898_v61 = vsel %vm1126_vm10, %v1864_v34, 0.0  ;;  %2051 = vmatmul.mubr.f32.gmra.mxu0 %v1696_v41  ;;  %8319 = vmatpush3.msk.msra.mxu1 %vm9804_vm11, %v1899_v49  ;;  %v1711_v49 = vld [vmem:[%s14345_s5 + $0x90] sm:$0xff] }
 0x4e2   :  { %8320 = vmatprep.subr.msk.mxu1 %vm9804_vm11, %v1898_v61  ;;  %2055 = vmatprep.mubr.f32.mxu0 %v1700_v50  ;;  %v1895_v54 = vsel %vm1126_vm10, %v1858_v48, 0.0  ;;  %v1715_v34 = vld [vmem:[%s14345_s5 + $0xb0] sm:$0xff] }
 0x4e3   :  { %8321 = vmatpush3.msk.msra.mxu1 %vm9804_vm11, %v1898_v61 }
 0x4e4   :  { %8322 = vmatprep.subr.msk.mxu1 %vm9804_vm11, %v1897_v13  ;;  %v1860_v8 = vpop.permute.xlu0 %1859 }
 0x4e5   :  { %v1854_v55 = vpop.permute.xlu1 %1853  ;;  %v1896_v28 = vsel %vm1126_vm10, %v1860_v8, 0.0  ;;  %2056 = vmatmul.mubr.f32.gmra.mxu0 %v1699_v2  ;;  %8323 = vmatpush3.msk.msra.mxu1 %vm9804_vm11, %v1897_v13  ;;  %v1714_v2 = vld [vmem:[%s14345_s5 + $0xa8] sm:$0xff] }
 0x4e6   :  { %8324 = vmatprep.subr.msk.mxu1 %vm9804_vm11, %v1896_v28  ;;  %2060 = vmatprep.mubr.f32.mxu0 %v1703_v33  ;;  %v1893_v24 = vsel %vm1126_vm10, %v1854_v55, 0.0  ;;  %v1718_v33 = vld [vmem:[%s14345_s5 + $0xc8] sm:$0xff] }
 0x4e7   :  { %8325 = vmatpush3.msk.msra.mxu1 %vm9804_vm11, %v1896_v28 }
 0x4e8   :  { %8326 = vmatprep.subr.msk.mxu1 %vm9804_vm11, %v1895_v54  ;;  %v1856_v30 = vpop.permute.xlu0 %1855 }
 0x4e9   :  { %v1850_v25 = vpop.permute.xlu1 %1849  ;;  %v1894_v14 = vsel %vm1126_vm10, %v1856_v30, 0.0  ;;  %2061 = vmatmul.mubr.f32.gmra.mxu0 %v1702_v20  ;;  %8327 = vmatpush3.msk.msra.mxu1 %vm9804_vm11, %v1895_v54  ;;  %v1717_v20 = vld [vmem:[%s14345_s5 + $0xc0] sm:$0xff] }
 0x4ea   :  { %8328 = vmatprep.subr.msk.mxu1 %vm9804_vm11, %v1894_v14  ;;  %2065 = vmatprep.mubr.f32.mxu0 %v1706_v21  ;;  %v1891_v62 = vsel %vm1126_vm10, %v1850_v25, 0.0  ;;  %v1698_v21 = vld [vmem:[%s14345_s5 + $0x28] sm:$0xff]  ;;  %v1721_v30 = vld [vmem:[%s14345_s5 + $0xe0] sm:$0xff] }
 0x4eb   :  { %8329 = vmatpush3.msk.msra.mxu1 %vm9804_vm11, %v1894_v14  ;;  %v1701_v25 = vld [vmem:[%s14345_s5 + $0x40] sm:$0xff]  ;;  %v1720_v14 = vld [vmem:[%s14345_s5 + $0xd8] sm:$0xff] }
 0x4ec   :  { %8330 = vmatprep.subr.msk.mxu1 %vm9804_vm11, %v1893_v24  ;;  %v1852_v39 = vpop.permute.xlu0 %1851 }
 0x4ed   :  { %v1846_v19 = vpop.permute.xlu1 %1845  ;;  %v1892_v22 = vsel %vm1126_vm10, %v1852_v39, 0.0  ;;  %2066 = vmatmul.mubr.f32.gmra.mxu0 %v1705_v11  ;;  %8331 = vmatpush3.msk.msra.mxu1 %vm9804_vm11, %v1893_v24  ;;  %v1704_v11 = vld [vmem:[%s14345_s5 + $0x58] sm:$0xff]  ;;  %v1723_v39 = vld [vmem:[%s14345_s5 + $0xf0] sm:$0xff] }
 0x4ee   :  { %8332 = vmatprep.subr.msk.mxu1 %vm9804_vm11, %v1892_v22  ;;  %2070 = vmatprep.mubr.f32.mxu0 %v1709_v36  ;;  %v1889_v50 = vsel %vm1126_vm10, %v1846_v19, 0.0  ;;  %v1724_v24 = vld [vmem:[%s14345_s5 + $0xf8] sm:$0xff]  ;;  %v1707_v36 = vld [vmem:[%s14345_s5 + $0x70] sm:$0xff]  ;;  %v1710_v19 = vld [vmem:[%s14345_s5 + $0x88] sm:$0xff] }
 0x4ef   :  { %8333 = vmatpush3.msk.msra.mxu1 %vm9804_vm11, %v1892_v22  ;;  %v1727_v22 = vld [vmem:[%s14345_s5 + $0x110] sm:$0xff] }
 0x4f0   :  { %8334 = vmatprep.subr.msk.mxu1 %vm9804_vm11, %v1891_v62  ;;  %v1848_v42 = vpop.permute.xlu0 %1847 }
 0x4f1   :  { %v1890_v29 = vsel %vm1126_vm10, %v1848_v42, 0.0  ;;  %2071 = vmatmul.mubr.f32.gmra.mxu0 %v1708_v9  ;;  %8335 = vmatpush3.msk.msra.mxu1 %vm9804_vm11, %v1891_v62  ;;  %v1842_v41 = vpop.permute.xlu1 %1841  ;;  %v1713_v9 = vld [vmem:[%s14345_s5 + $0xa0] sm:$0xff]  ;;  %v1726_v62 = vld [vmem:[%s14345_s5 + $0x108] sm:$0xff] }
 0x4f2   :  { %8336 = vmatprep.subr.msk.mxu1 %vm9804_vm11, %v1890_v29  ;;  %2075 = vmatprep.mubr.f32.mxu0 %v1712_v56  ;;  %v1887_v13 = vsel %vm1126_vm10, %v1842_v41, 0.0  ;;  %v1716_v56 = vld [vmem:[%s14345_s5 + $0xb8] sm:$0xff]  ;;  %v1730_v42 = vld [vmem:[%s14345_s5 + $0x128] sm:$0xff]  ;;  %v1729_v41 = vld [vmem:[%s14345_s5 + $0x120] sm:$0xff] }
 0x4f3   :  { %8337 = vmatpush3.msk.msra.mxu1 %vm9804_vm11, %v1890_v29  ;;  %v1719_v29 = vld [vmem:[%s14345_s5 + $0xd0] sm:$0xff] }
 0x4f4   :  { %8338 = vmatprep.subr.msk.mxu1 %vm9804_vm11, %v1889_v50  ;;  %v1844_v48 = vpop.permute.xlu0 %1843 }
 0x4f5   :  { %v1888_v61 = vsel %vm1126_vm10, %v1844_v48, 0.0  ;;  %2076 = vmatmul.mubr.f32.gmra.mxu0 %v1711_v49  ;;  %8339 = vmatpush3.msk.msra.mxu1 %vm9804_vm11, %v1889_v50  ;;  %v1838_v8 = vpop.permute.xlu1 %1837  ;;  %v1722_v49 = vld [vmem:[%s14345_s5 + $0xe8] sm:$0xff]  ;;  %v1733_v50 = vld [vmem:[%s14345_s5 + $0x140] sm:$0xff]  ;;  %v1732_v48 = vld [vmem:[%s14345_s5 + $0x138] sm:$0xff] }
 0x4f6   :  { %8340 = vmatprep.subr.msk.mxu1 %vm9804_vm11, %v1888_v61  ;;  %2080 = vmatprep.mubr.f32.mxu0 %v1715_v34  ;;  %v1885_v54 = vsel %vm1126_vm10, %v1838_v8, 0.0  ;;  %v1725_v34 = vld [vmem:[%s14345_s5 + $0x100] sm:$0xff]  ;;  %v1734_v8 = vld [vmem:[%s14345_s5 + $0x148] sm:$0xff] }
 0x4f7   :  { %8341 = vmatpush3.msk.msra.mxu1 %vm9804_vm11, %v1888_v61  ;;  %v1728_v61 = vld [vmem:[%s14345_s5 + $0x118] sm:$0xff] }
 0x4f8   :  { %8342 = vmatprep.subr.msk.mxu1 %vm9804_vm11, %v1887_v13  ;;  %v1840_v55 = vpop.permute.xlu0 %1839 }
 0x4f9   :  { %v1886_v28 = vsel %vm1126_vm10, %v1840_v55, 0.0  ;;  %2081 = vmatmul.mubr.f32.gmra.mxu0 %v1714_v2  ;;  %8343 = vmatpush3.msk.msra.mxu1 %vm9804_vm11, %v1887_v13  ;;  %v1736_v2 = vld [vmem:[%s14345_s5 + $0x158] sm:$0xff]  ;;  %v1731_v13 = vld [vmem:[%s14345_s5 + $0x130] sm:$0xff] }
 0x4fa   :  { %8344 = vmatprep.subr.msk.mxu1 %vm9804_vm11, %v1886_v28  ;;  %2085 = vmatprep.mubr.f32.mxu0 %v1718_v33  ;;  %v1735_v33 = vld [vmem:[%s14345_s5 + $0x150] sm:$0xff] }
 0x4fb   :  { %8345 = vmatpush3.msk.msra.mxu1 %vm9804_vm11, %v1886_v28  ;;  %v1739_v55 = vld [vmem:[%s14345_s5 + $0x170] sm:$0xff]  ;;  %v1737_v28 = vld [vmem:[%s14345_s5 + $0x160] sm:$0xff] }
 0x4fc   :  { %8346 = vmatprep.subr.msk.mxu1 %vm9804_vm11, %v1885_v54 }
 0x4fd   :  { %2086 = vmatmul.mubr.f32.gmra.mxu0 %v1717_v20  ;;  %8347 = vmatpush3.msk.msra.mxu1 %vm9804_vm11, %v1885_v54  ;;  %v1738_v20 = vld [vmem:[%s14345_s5 + $0x168] sm:$0xff]  ;;  %v1740_v54 = vld [vmem:[%s14345_s5 + $0x178] sm:$0xff] }
 0x4fe   :  { %8349 = vmatmul.mubr.f32.vlgmr.msra.gmra.mxu1 %v1698_v21  ;;  %2090 = vmatprep.mubr.f32.mxu0 %v1721_v30  ;;  %v14377_v30 = vmov 4  }
 0x4ff   :  { %8351 = vmatprep.mubr.f32.mxu1 %v1701_v25  ;;  %8726 = vset.pattern.permute.xlu0 %v14377_v30 }
 0x500   :  { %8725 = vset.pattern.permute.xlu1 %v14377_v30 }
 0x501   :  { %2091 = vmatmul.mubr.f32.gmra.mxu0 %v1720_v14 }
 0x502   :  { %8352 = vmatmul.mubr.f32.gmra.mxu1 %v1704_v11  ;;  %2095 = vmatprep.mubr.f32.mxu0 %v1724_v24  ;;  %v1975_v46 = vpop.permute.xlu1 %1974 }
 0x503   :  { %8354 = vmatprep.mubr.f32.mxu1 %v1707_v36 }
 0x505   :  { %2096 = vmatmul.mubr.f32.gmra.mxu0 %v1723_v39 }
 0x506   :  { %8355 = vmatmul.mubr.f32.gmra.mxu1 %v1710_v19  ;;  %2100 = vmatprep.mubr.f32.mxu0 %v1727_v22  ;;  %v1971_v1 = vpop.permute.xlu1 %1970 }
 0x507   :  { %8357 = vmatprep.mubr.f32.mxu1 %v1713_v9 }
 0x509   :  { %2101 = vmatmul.mubr.f32.gmra.mxu0 %v1726_v62 }
 0x50a   :  { %8358 = vmatmul.mubr.f32.gmra.mxu1 %v1716_v56  ;;  %2105 = vmatprep.mubr.f32.mxu0 %v1730_v42  ;;  %v1963_v0 = vpop.permute.xlu1 %1962 }
 0x50b   :  { %8360 = vmatprep.mubr.f32.mxu1 %v1719_v29 }
 0x50d   :  { %2106 = vmatmul.mubr.f32.gmra.mxu0 %v1729_v41 }
 0x50e   :  { %8361 = vmatmul.mubr.f32.gmra.mxu1 %v1722_v49  ;;  %2110 = vmatprep.mubr.f32.mxu0 %v1733_v50  ;;  %v1955_v6 = vpop.permute.xlu1 %1954 }
 0x50f   :  { %8363 = vmatprep.mubr.f32.mxu1 %v1725_v34 }
 0x511   :  { %2111 = vmatmul.mubr.f32.gmra.mxu0 %v1732_v48 }
 0x512   :  { %8364 = vmatmul.mubr.f32.gmra.mxu1 %v1728_v61  ;;  %2115 = vmatprep.mubr.f32.mxu0 %v1736_v2 }
 0x513   :  { %8366 = vmatprep.mubr.f32.mxu1 %v1731_v13 }
 0x515   :  { %2116 = vmatmul.mubr.f32.gmra.mxu0 %v1735_v33 }
 0x516   :  { %8367 = vmatmul.mubr.f32.gmra.mxu1 %v1734_v8  ;;  %2120 = vmatprep.mubr.f32.mxu0 %v1739_v55 }
 0x517   :  { %8369 = vmatprep.mubr.f32.mxu1 %v1737_v28 }
 0x519   :  { %2121 = vmatmul.mubr.f32.gmra.mxu0 %v1738_v20 }
 0x51a   :  { %8370 = vmatmul.mubr.f32.gmra.mxu1 %v1740_v54  ;;  %v1979_v54 = vpop.permute.xlu0 %1978 }
 0x51e   :  { %v1967_v12 = vpop.permute.xlu0 %1966 }
 0x522   :  { %v1959_v26 = vpop.permute.xlu0 %1958 }
 0x526   :  { %v1951_v15 = vpop.permute.xlu0 %1950 }
 0x59d   :  { %v10777_v21 = vpop.f32.mrf.mxu0 }
 0x59f   :  { %v10781_v25 = vpop.f32.mrf.mxu0 }
 0x5a1   :  { %v10783_v14 = vpop.f32.mrf.mxu0 }
 0x5a2   :  { %14597 = vst [vmem:[#allocation15_spill] sm:$0xff] %v10783_v14 }
 0x5a3   :  { %v10785_v11 = vpop.f32.mrf.mxu0 }
 0x5a4   :  { %14598 = vst [vmem:[#allocation16_spill] sm:$0xff] %v10785_v11 }
 0x5a5   :  { %v10787_v24 = vpop.f32.mrf.mxu0 }
 0x5a7   :  { %v10789_v36 = vpop.f32.mrf.mxu0 }
 0x5a9   :  { %v10791_v39 = vpop.f32.mrf.mxu0 }
 0x5ab   :  { %v10793_v19 = vpop.f32.mrf.mxu0 }
 0x5ad   :  { %v10795_v22 = vpop.f32.mrf.mxu0 }
 0x5af   :  { %v10797_v9 = vpop.f32.mrf.mxu0 }
 0x5b1   :  { %v10799_v62 = vpop.f32.mrf.mxu0 }
 0x5b3   :  { %v10801_v56 = vpop.f32.mrf.mxu0 }
 0x5b5   :  { %v10803_v42 = vpop.f32.mrf.mxu0 }
 0x5b7   :  { %v10805_v29 = vpop.f32.mrf.mxu0 }
 0x5b9   :  { %v10807_v41 = vpop.f32.mrf.mxu0 }
 0x5bb   :  { %v10809_v49 = vpop.f32.mrf.mxu0 }
 0x5bd   :  { %v7404_v50 = vpop.f32.mrf.mxu0 }
 0x5be   :  { %v10811_v34 = vpop.f32.mrf.mxu1 }
 0x5bf   :  { %14599 = vst [vmem:[#allocation28_spill] sm:$0xff] %v10811_v34  ;;  %v7405_v48 = vpop.f32.mrf.mxu0 }
 0x5c0   :  { %v10813_v61 = vpop.f32.mrf.mxu1 }
 0x5c1   :  { %14600 = vst [vmem:[#allocation29_spill] sm:$0xff] %v10813_v61  ;;  %v7407_v2 = vpop.f32.mrf.mxu0 }
 0x5c2   :  { %v10815_v13 = vpop.f32.mrf.mxu1 }
 0x5c3   :  { %14601 = vst [vmem:[#allocation41_spill] sm:$0xff] %v10815_v13  ;;  %v7408_v33 = vpop.f32.mrf.mxu0 }
 0x5c4   :  { %v10817_v8 = vpop.f32.mrf.mxu1 }
 0x5c5   :  { %v7410_v55 = vpop.f32.mrf.mxu0 }
 0x5c6   :  { %v10819_v28 = vpop.f32.mrf.mxu1 }
 0x5c7   :  { %v7411_v20 = vpop.f32.mrf.mxu0 }
 0x5c8   :  { %v10821_v37 = vpop.f32.mrf.mxu1  ;;  %v7412_v4 = vadd.f32 %v7411_v20, %v7410_v55 }
 0x5c9   :  { %v7413_v30 = vpop.f32.mrf.mxu0 }
 0x5ca   :  { %v10823_v16 = vpop.f32.mrf.mxu1  ;;  %v2098_v14 = vadd.f32 %v7412_v4, %v1959_v26  ;;  %v7400_v26 = vadd.f32 %v10805_v29, %v10803_v42 }
 0x5cb   :  { %v7414_v31 = vpop.f32.mrf.mxu0 }
 0x5cc   :  { %v10825_v10 = vpop.f32.mrf.mxu1 }
 0x5cd   :  { %v7416_v58 = vpop.f32.mrf.mxu0 }
 0x5ce   :  { %v8362_v43 = vpop.f32.mrf.mxu1 }
 0x5cf   :  { %v7417_v18 = vpop.f32.mrf.mxu0 }
 0x5d0   :  { %v2232_v7 = vpop.f32.mrf.mxu1  ;;  %v7418_v51 = vadd.f32 %v7417_v18, %v7416_v58  ;;  %v7406_v58 = vadd.f32 %v7405_v48, %v7404_v50 }
 0x5d1   :  { %v7419_v27 = vpop.f32.mrf.mxu0 }
 0x5d2   :  { %v8365_v45 = vpop.f32.mrf.mxu1  ;;  %v2108_v63 = vadd.f32 %v7418_v51, %v1967_v12 }
 0x5d3   :  { %v7420_v32 = vpop.f32.mrf.mxu0 }
 0x5d4   :  { %v2242_v44 = vpop.f32.mrf.mxu1  ;;  %v7421_v59 = vadd.f32 %v7420_v32, %v7419_v27 }
 0x5d5   :  { %v7422_v47 = vpop.f32.mrf.mxu0 }
 0x5d6   :  { %v8368_v35 = vpop.f32.mrf.mxu1  ;;  %v2113_v34 = vadd.f32 %v7421_v59, %v1971_v1  ;;  %v7409_v1 = vadd.f32 %v7408_v33, %v7407_v2  ;;  %v2288_v2 = vld [vmem:[%s14346_s6 + $0x8] sm:$0xff] }
 0x5d7   :  { %v7423_v52 = vpop.f32.mrf.mxu0  ;;  %2655 = vmatprep.mubr.f32.mxu1 %v2288_v2 }
 0x5d8   :  { %v7424_v17 = vadd.f32 %v7423_v52, %v7422_v47  ;;  %v2252_v53 = vpop.f32.mrf.mxu1  ;;  %v1943_v47 = vpop.permute.xlu0 %1942  ;;  %v7415_v52 = vadd.f32 %v7414_v31, %v7413_v30  ;;  %v2258_v32 = vadd.f32 %v8368_v35, %v2113_v34  ;;  %v2088_v31 = vadd.f32 %v7406_v58, %v1951_v15  ;;  %v14604_v34 = vld [vmem:[#allocation41_spill] sm:$0xff]  ;;  %v14607_v58 = vld [vmem:[#allocation35_spill] sm:$0xff] }
 0x5d9   :  { %v7425_v3 = vpop.f32.mrf.mxu0  ;;  %v2253_v13 = vadd.f32 %v2252_v53, %v2108_v63  ;;  %v7394_v15 = vadd.f32 %v10797_v9, %v10795_v22  ;;  %v2078_v59 = vadd.f32 %v7400_v26, %v1943_v47  ;;  %v7388_v35 = vadd.f32 %v10789_v36, %v10787_v24  ;;  %v14613_v26 = vld [vmem:[#allocation13_spill] sm:$0xff] }
 0x5da   :  { %v8371_v23 = vpop.f32.mrf.mxu1  ;;  %v2118_v40 = vadd.f32 %v7424_v17, %v1975_v46  ;;  %v1947_v46 = vpop.permute.xlu1 %1946  ;;  %v10842_v4 = vmax.f32 %v2258_v32, 0.0  ;;  %v7382_v24 = vadd.f32 %v10781_v25, %v10777_v21  ;;  %v14608_v32 = vld [vmem:[#allocation30_spill] sm:$0xff] }
 0x5db   :  { %v7426_v38 = vpop.f32.mrf.mxu0  ;;  %v10833_v12 = vmax.f32 %v2253_v13, 0.0  ;;  %v14605_v13 = vld [vmem:[#allocation29_spill] sm:$0xff] }
 0x5dc   :  { %v7427_v60 = vadd.f32 %v7426_v38, %v7425_v3  ;;  %v2262_v5 = vpop.f32.mrf.mxu1  ;;  %v2243_v38 = vadd.f32 %v2242_v44, %v2098_v14  ;;  %v2233_v44 = vadd.f32 %v2232_v7, %v2088_v31  ;;  %v2223_v7 = vadd.f32 %v10825_v10, %v2078_v59 }
 0x5dd   :  { %v2263_v57 = vadd.f32 %v2262_v5, %v2118_v40  ;;  %v7403_v5 = vadd.f32 %v10809_v49, %v10807_v41  ;;  %v14614_v31 = vmov 4   ;;  %v14622_v59 = vmov 0  }
 0x5de   :  { %v2123_v61 = vadd.f32 %v7427_v60, %v1979_v54  ;;  %v2103_v60 = vadd.f32 %v7415_v52, %v1963_v0  ;;  %v10844_v40 = vmax.f32 %v2243_v38, 0.0  ;;  %v1939_v17 = vpop.permute.xlu1 %1938  ;;  %v10857_v0 = vmax.f32 %v2233_v44, 0.0  ;;  %v14610_v38 = vld [vmem:[#allocation11_spill] sm:$0xff]  ;;  %v14617_v44 = vld [vmem:[#allocation32_spill] sm:$0xff] }
 0x5df   :  { %v10827_v11 = vmax.f32 %v2263_v57, 0.0  ;;  %v1935_v57 = vpop.permute.xlu0 %1934  ;;  %v2083_v53 = vadd.f32 %v7403_v5, %v1947_v46  ;;  %v10871_v9 = vmax.f32 %v2223_v7, 0.0  ;;  %v14609_v46 = vld [vmem:[#allocation31_spill] sm:$0xff]  ;;  %v14618_v5 = vld [vmem:[#allocation20_spill] sm:$0xff]  ;;  %v14623_v7 = vld [vmem:[#allocation14_spill] sm:$0xff] }
 0x5e0   :  { %v2268_v18 = vadd.f32 %v8371_v23, %v2123_v61  ;;  %v2248_v63 = vadd.f32 %v8365_v45, %v2103_v60  ;;  %v2093_v23 = vadd.f32 %v7409_v1, %v1955_v6  ;;  %v7397_v6 = vadd.f32 %v10801_v56, %v10799_v62  ;;  %v14611_v1 = vld [vmem:[#allocation19_spill] sm:$0xff]  ;;  %v14612_v60 = vld [vmem:[#allocation12_spill] sm:$0xff] }
 0x5e1   :  { %2379 = vrot.lane.b32.xlu0 %v10827_v11, %s8787_s2  ;;  %v2068_v30 = vadd.f32 %v7394_v15, %v1935_v57  ;;  %v7391_v62 = vadd.f32 %v10793_v19, %v10791_v39  ;;  %v14602_v39 = vld [vmem:[#allocation15_spill] sm:$0xff]  ;;  %v14603_v19 = vld [vmem:[#allocation16_spill] sm:$0xff]  ;;  %v14615_v57 = vld [vmem:[#allocation6_spill] sm:$0xff] }
 0x5e2   :  { %v10831_v27 = vmax.f32 %v2268_v18, 0.0  ;;  %v2238_v45 = vadd.f32 %v8362_v43, %v2093_v23  ;;  %v10854_v51 = vmax.f32 %v2248_v63, 0.0  ;;  %v2228_v43 = vadd.f32 %v10823_v16, %v2083_v53  ;;  %v1931_v14 = vpop.permute.xlu1 %1930  ;;  %v2289_v18 = vld [vmem:[%s14346_s6 + $0x10] sm:$0xff]  ;;  %v14616_v63 = vld [vmem:[#allocation7_spill] sm:$0xff] }
 0x5e3   :  { %v1927_v3 = vpop.permute.xlu0 %1926  ;;  %v2213_v22 = vadd.f32 %v10821_v37, %v2068_v30  ;;  %v2073_v56 = vadd.f32 %v7397_v6, %v1939_v17  ;;  %v7385_v49 = vadd.f32 %v14603_v19, %v14602_v39  ;;  %v2063_v50 = vadd.f32 %v7391_v62, %v1931_v14  ;;  %8404 = vmatprep.mubr.f32.mxu0 %v2289_v18  ;;  %v14619_v23 = vld [vmem:[#allocation27_spill] sm:$0xff]  ;;  %v14620_v17 = vld [vmem:[#allocation33_spill] sm:$0xff]  ;;  %v14621_v15 = vld [vmem:[#allocation8_spill] sm:$0xff] }
 0x5e4   :  { %2381 = vrot.lane.b32.xlu1 %v10831_v27, %s8787_s2  ;;  %7460 = vmatprep.subr.mxu1 %v10831_v27  ;;  %v10868_v10 = vmax.f32 %v2238_v45, 0.0  ;;  %v2058_v36 = vadd.f32 %v7388_v35, %v1927_v3  ;;  %v10882_v37 = vmax.f32 %v2228_v43, 0.0  ;;  %v8767_v18 = vld [vmem:[%s14342_s7 + $0x10] sm:$0xff] }
 0x5e5   :  { %2375 = vrot.lane.b32.xlu0 %v10833_v12, %s8787_s2  ;;  %v2218_v42 = vadd.f32 %v10819_v28, %v2073_v56  ;;  %v10885_v41 = vmax.f32 %v2213_v22, 0.0  ;;  %v2208_v48 = vadd.f32 %v14604_v34, %v2063_v50  ;;  %v14606_v28 = vld [vmem:[#allocation28_spill] sm:$0xff] }
 0x5e6   :  { %v2203_v29 = vadd.f32 %v10817_v8, %v2058_v36  ;;  %v1923_v25 = vpop.permute.xlu1 %1922 }
 0x5e7   :  { %v1919_v16 = vpop.permute.xlu0 %1918  ;;  %v10894_v61 = vmax.f32 %v2218_v42, 0.0  ;;  %v2053_v55 = vadd.f32 %v7385_v49, %v1923_v25  ;;  %v10907_v54 = vmax.f32 %v2208_v48, 0.0  ;;  %v14625_v42 = vld [vmem:[#allocation25_spill] sm:$0xff] }
 0x5e8   :  { %2377 = vrot.lane.b32.xlu1 %v10842_v4, %s8787_s2  ;;  %v2048_v21 = vadd.f32 %v7382_v24, %v1919_v16  ;;  %v10900_v8 = vmax.f32 %v2203_v29, 0.0 }
 0x5e9   :  { %2371 = vrot.lane.b32.xlu0 %v10844_v40, %s8787_s2  ;;  %v2198_v20 = vadd.f32 %v14606_v28, %v2053_v55  ;;  %v2323_v28 = vld [vmem:[%s14346_s6 + $0x120] sm:$0xff] }
 0x5ea   :  { %v2193_v33 = vadd.f32 %v14605_v13, %v2048_v21  ;;  %v2291_v13 = vld [vmem:[%s14346_s6 + $0x20] sm:$0xff] }
 0x5eb   :  { %v10915_v52 = vmax.f32 %v2198_v20, 0.0  ;;  %v2290_v20 = vld [vmem:[%s14346_s6 + $0x18] sm:$0xff] }
 0x5ec   :  { %2373 = vrot.lane.b32.xlu1 %v10854_v51, %s8787_s2  ;;  %v10909_v47 = vmax.f32 %v2193_v33, 0.0 }
 0x5ed   :  { %2367 = vrot.lane.b32.xlu0 %v10857_v0, %s8787_s2 }
 0x5f0   :  { %2369 = vrot.lane.b32.xlu1 %v10868_v10, %s8787_s2 }
 0x5f1   :  { %2363 = vrot.lane.b32.xlu0 %v10871_v9, %s8787_s2 }
 0x5f4   :  { %2365 = vrot.lane.b32.xlu1 %v10882_v37, %s8787_s2 }
 0x5f5   :  { %2359 = vrot.lane.b32.xlu0 %v10885_v41, %s8787_s2 }
 0x5f8   :  { %2361 = vrot.lane.b32.xlu1 %v10894_v61, %s8787_s2 }
 0x5f9   :  { %2355 = vrot.lane.b32.xlu0 %v10900_v8, %s8787_s2 }
 0x5fc   :  { %2357 = vrot.lane.b32.xlu1 %v10907_v54, %s8787_s2 }
 0x5fd   :  { %2351 = vrot.lane.b32.xlu0 %v10909_v47, %s8787_s2 }
 0x600   :  { %2353 = vrot.lane.b32.xlu1 %v10915_v52, %s8787_s2 }
 0x601   :  { %2459 = vrot.lane.b32.xlu0 %v10827_v11, %s8788_s21 }
 0x604   :  { %2461 = vrot.lane.b32.xlu1 %v10831_v27, %s8788_s21  ;;  %v14427_v27 = vmov 3  }
 0x605   :  { %2455 = vrot.lane.b32.xlu0 %v10833_v12, %s8788_s21 }
 0x608   :  { %2457 = vrot.lane.b32.xlu1 %v10842_v4, %s8788_s21 }
 0x609   :  { %2451 = vrot.lane.b32.xlu0 %v10844_v40, %s8788_s21 }
 0x60c   :  { %2453 = vrot.lane.b32.xlu1 %v10854_v51, %s8788_s21 }
 0x60d   :  { %2447 = vrot.lane.b32.xlu0 %v10857_v0, %s8788_s21 }
 0x610   :  { %2449 = vrot.lane.b32.xlu1 %v10868_v10, %s8788_s21 }
 0x611   :  { %2443 = vrot.lane.b32.xlu0 %v10871_v9, %s8788_s21 }
 0x614   :  { %2445 = vrot.lane.b32.xlu1 %v10882_v37, %s8788_s21 }
 0x615   :  { %2439 = vrot.lane.b32.xlu0 %v10885_v41, %s8788_s21 }
 0x618   :  { %2441 = vrot.lane.b32.xlu1 %v10894_v61, %s8788_s21 }
 0x619   :  { %2435 = vrot.lane.b32.xlu0 %v10900_v8, %s8788_s21 }
 0x61c   :  { %2437 = vrot.lane.b32.xlu1 %v10907_v54, %s8788_s21 }
 0x61d   :  { %2431 = vrot.lane.b32.xlu0 %v10909_v47, %s8788_s21 }
 0x620   :  { %2433 = vrot.lane.b32.xlu1 %v10915_v52, %s8788_s21 }
 0x621   :  { %2568 = vperm.xlu0 %8726, %v14607_v58  }
 0x624   :  { %2572 = vperm.xlu1 %8725, %v14608_v32  }
 0x625   :  { %8727 = vset.pattern.permute.xlu0 %v14427_v27 }
 0x626   :  { %2942 = vperm.xlu0 %8727, %v14608_v32  }
 0x628   :  { %2564 = vperm.xlu1 %8725, %v14609_v46  }
 0x62a   :  { %2930 = vperm.xlu0 %8727, %v14610_v38  }
 0x62c   :  { %2560 = vperm.xlu1 %8725, %v14610_v38  }
 0x62e   :  { %2918 = vperm.xlu0 %8727, %v14611_v1  }
 0x630   :  { %2556 = vperm.xlu1 %8725, %v14612_v60  }
 0x632   :  { %2906 = vperm.xlu0 %8727, %v14613_v26  }
 0x634   :  { %8728 = vset.pattern.permute.xlu1 %v14427_v27 }
 0x635   :  { %2938 = vperm.xlu1 %8728, %v14607_v58  }
 0x636   :  { %8734 = vset.pattern.permute.xlu0 %v14614_v31 }
 0x637   :  { %2552 = vperm.xlu0 %8734, %v14615_v57  }
 0x639   :  { %2934 = vperm.xlu1 %8728, %v14609_v46   ;;  %v2293_v46 = vld [vmem:[%s14346_s6 + $0x30] sm:$0xff] }
 0x63b   :  { %2540 = vperm.xlu0 %8734, %v14616_v63  }
 0x63d   :  { %8729 = vset.pattern.permute.xlu1 %v14614_v31 }
 0x63e   :  { %2548 = vperm.xlu1 %8729, %v14611_v1   ;;  %v2297_v1 = vld [vmem:[%s14346_s6 + $0x50] sm:$0xff] }
 0x63f   :  { %2528 = vperm.xlu0 %8734, %v14617_v44  }
 0x642   :  { %2544 = vperm.xlu1 %8729, %v14618_v5  }
 0x643   :  { %2516 = vperm.xlu0 %8734, %v14619_v23   ;;  %v2300_v23 = vld [vmem:[%s14346_s6 + $0x68] sm:$0xff] }
 0x646   :  { %8730 = vset.pattern.permute.xlu1 %v14427_v27 }
 0x647   :  { %2926 = vperm.xlu1 %8730, %v14612_v60   ;;  %8737 = vset.pattern.permute.xlu0 %v14427_v27 }
 0x648   :  { %2894 = vperm.xlu0 %8737, %v14620_v17  }
 0x64b   :  { %2922 = vperm.xlu1 %8730, %v14615_v57  }
 0x64c   :  { %2882 = vperm.xlu0 %8737, %v14621_v15  }
 0x64f   :  { %8731 = vset.pattern.permute.xlu1 %v14614_v31 }
 0x650   :  { %2536 = vperm.xlu1 %8731, %v14613_v26   ;;  %8740 = vset.pattern.permute.xlu0 %v14622_v59  ;;  %v8768_v26 = vld [vmem:[%s14342_s7 + $0x8] sm:$0xff] }
 0x653   :  { %v2380_v45 = vpop.permute.xlu0 %2379 }
 0x654   :  { %2532 = vperm.xlu1 %8731, %v14623_v7   ;;  %v2413_v30 = vsel %vm960_vm2, 0.0, %v2380_v45 }
 0x656   :  { %v2382_v3 = vpop.permute.xlu1 %2381 }
 0x657   :  { %v2414_v6 = vsel %vm960_vm2, 0.0, %v2382_v3  ;;  %v2376_v53 = vpop.permute.xlu0 %2375 }
 0x658   :  { %8732 = vset.pattern.permute.xlu1 %v14427_v27  ;;  %7461 = vmatpush3.msk.msra.mxu1 %vm9387_vm6, %v2414_v6  ;;  %v2411_v62 = vsel %vm960_vm2, 0.0, %v2376_v53  ;;  %v2303_v6 = vld [vmem:[%s14346_s6 + $0x80] sm:$0xff] }
 0x659   :  { %2914 = vperm.xlu1 %8732, %v14618_v5   ;;  %7462 = vmatprep.subr.mxu1 %v10827_v11 }
 0x65a   :  { %v2378_v43 = vpop.permute.xlu1 %2377  ;;  %7463 = vmatpush3.msk.msra.mxu1 %vm9387_vm6, %v2413_v30 }
 0x65b   :  { %v2412_v14 = vsel %vm960_vm2, 0.0, %v2378_v43  ;;  %7464 = vmatprep.subr.mxu1 %v10842_v4  ;;  %v2372_v22 = vpop.permute.xlu0 %2371  ;;  %v2302_v43 = vld [vmem:[%s14346_s6 + $0x78] sm:$0xff] }
 0x65c   :  { %7465 = vmatpush3.msk.msra.mxu1 %vm9387_vm6, %v2412_v14  ;;  %v2409_v4 = vsel %vm960_vm2, 0.0, %v2372_v22  ;;  %v2306_v22 = vld [vmem:[%s14346_s6 + $0x98] sm:$0xff] }
 0x65d   :  { %2910 = vperm.xlu1 %8732, %v14616_v63   ;;  %7466 = vmatprep.subr.mxu1 %v10833_v12 }
 0x65e   :  { %v2374_v56 = vpop.permute.xlu1 %2373  ;;  %7467 = vmatpush3.msk.msra.mxu1 %vm9387_vm6, %v2411_v62 }
 0x65f   :  { %v2410_v11 = vsel %vm960_vm2, 0.0, %v2374_v56  ;;  %7468 = vmatprep.subr.mxu1 %v10854_v51  ;;  %v2368_v24 = vpop.permute.xlu0 %2367 }
 0x660   :  { %7469 = vmatpush3.msk.msra.mxu1 %vm9387_vm6, %v2410_v11  ;;  %v2407_v16 = vsel %vm960_vm2, 0.0, %v2368_v24  ;;  %v2305_v24 = vld [vmem:[%s14346_s6 + $0x90] sm:$0xff] }
 0x661   :  { %8733 = vset.pattern.permute.xlu1 %v14614_v31  ;;  %7470 = vmatprep.subr.mxu1 %v10844_v40 }
 0x662   :  { %2524 = vperm.xlu1 %8733, %v14620_v17   ;;  %v2370_v12 = vpop.permute.xlu1 %2369  ;;  %7471 = vmatpush3.msk.msra.mxu1 %vm9387_vm6, %v2409_v4 }
 0x663   :  { %v2408_v36 = vsel %vm960_vm2, 0.0, %v2370_v12  ;;  %7472 = vmatprep.subr.mxu1 %v10868_v10  ;;  %v2364_v51 = vpop.permute.xlu0 %2363  ;;  %v2309_v12 = vld [vmem:[%s14346_s6 + $0xb0] sm:$0xff] }
 0x664   :  { %7473 = vmatpush3.msk.msra.mxu1 %vm9387_vm6, %v2408_v36  ;;  %v2405_v10 = vsel %vm960_vm2, 0.0, %v2364_v51 }
 0x665   :  { %7474 = vmatprep.subr.mxu1 %v10857_v0 }
 0x666   :  { %2520 = vperm.xlu1 %8733, %v14625_v42   ;;  %v2366_v40 = vpop.permute.xlu1 %2365  ;;  %7475 = vmatpush3.msk.msra.mxu1 %vm9387_vm6, %v2407_v16  ;;  %v2308_v16 = vld [vmem:[%s14346_s6 + $0xa8] sm:$0xff] }
 0x667   :  { %v2406_v29 = vsel %vm960_vm2, 0.0, %v2366_v40  ;;  %7476 = vmatprep.subr.mxu1 %v10882_v37  ;;  %v2360_v39 = vpop.permute.xlu0 %2359  ;;  %v2312_v40 = vld [vmem:[%s14346_s6 + $0xc8] sm:$0xff] }
 0x668   :  { %7477 = vmatpush3.msk.msra.mxu1 %vm9387_vm6, %v2406_v29  ;;  %v2403_v49 = vsel %vm960_vm2, 0.0, %v2360_v39 }
 0x669   :  { %7478 = vmatprep.subr.mxu1 %v10871_v9 }
 0x66a   :  { %8735 = vset.pattern.permute.xlu1 %v14427_v27  ;;  %v2362_v0 = vpop.permute.xlu1 %2361  ;;  %7479 = vmatpush3.msk.msra.mxu1 %vm9387_vm6, %v2405_v10 }
 0x66b   :  { %v2404_v19 = vsel %vm960_vm2, 0.0, %v2362_v0  ;;  %2902 = vperm.xlu1 %8735, %v14623_v7   ;;  %7480 = vmatprep.subr.mxu1 %v10894_v61  ;;  %v2356_v37 = vpop.permute.xlu0 %2355  ;;  %v2287_v61 = vld [vmem:[%s14346_s6] sm:$0xff] }
 0x66c   :  { %7481 = vmatpush3.msk.msra.mxu1 %vm9387_vm6, %v2404_v19  ;;  %v2401_v25 = vsel %vm960_vm2, 0.0, %v2356_v37  ;;  %v2299_v7 = vld [vmem:[%s14346_s6 + $0x60] sm:$0xff]  ;;  %v2292_v37 = vld [vmem:[%s14346_s6 + $0x28] sm:$0xff] }
 0x66d   :  { %7482 = vmatprep.subr.mxu1 %v10885_v41  ;;  %v2311_v0 = vld [vmem:[%s14346_s6 + $0xc0] sm:$0xff] }
 0x66e   :  { %v2358_v9 = vpop.permute.xlu1 %2357  ;;  %7483 = vmatpush3.msk.msra.mxu1 %vm9387_vm6, %v2403_v49  ;;  %v2315_v49 = vld [vmem:[%s14346_s6 + $0xe0] sm:$0xff] }
 0x66f   :  { %v2402_v50 = vsel %vm960_vm2, 0.0, %v2358_v9  ;;  %2898 = vperm.xlu1 %8735, %v14617_v44   ;;  %7484 = vmatprep.subr.mxu1 %v10907_v54  ;;  %v2352_v21 = vpop.permute.xlu0 %2351  ;;  %v2296_v44 = vld [vmem:[%s14346_s6 + $0x48] sm:$0xff]  ;;  %v2295_v9 = vld [vmem:[%s14346_s6 + $0x40] sm:$0xff] }
 0x670   :  { %7485 = vmatpush3.msk.msra.mxu1 %vm9387_vm6, %v2402_v50  ;;  %v2399_v2 = vsel %vm960_vm2, 0.0, %v2352_v21  ;;  %v2314_v50 = vld [vmem:[%s14346_s6 + $0xd8] sm:$0xff] }
 0x671   :  { %7486 = vmatprep.subr.mxu1 %v10900_v8  ;;  %v2298_v21 = vld [vmem:[%s14346_s6 + $0x58] sm:$0xff] }
 0x672   :  { %v2354_v34 = vpop.permute.xlu1 %2353  ;;  %7487 = vmatpush3.msk.msra.mxu1 %vm9387_vm6, %v2401_v25  ;;  %v2318_v25 = vld [vmem:[%s14346_s6 + $0xf8] sm:$0xff] }
 0x673   :  { %v2400_v41 = vsel %vm960_vm2, 0.0, %v2354_v34  ;;  %8736 = vset.pattern.permute.xlu1 %v14614_v31  ;;  %7488 = vmatprep.subr.mxu1 %v10915_v52  ;;  %v2460_v48 = vpop.permute.xlu0 %2459  ;;  %v2301_v34 = vld [vmem:[%s14346_s6 + $0x70] sm:$0xff] }
 0x674   :  { %2512 = vperm.xlu1 %8736, %v14621_v15   ;;  %7489 = vmatpush3.msk.msra.mxu1 %vm9387_vm6, %v2400_v41  ;;  %v2493_v54 = vsel %vm1126_vm10, %v2460_v48, 0.0  ;;  %v2317_v41 = vld [vmem:[%s14346_s6 + $0xf0] sm:$0xff]  ;;  %v2304_v48 = vld [vmem:[%s14346_s6 + $0x88] sm:$0xff] }
 0x675   :  { %7490 = vmatprep.subr.mxu1 %v10909_v47  ;;  %v2294_v47 = vld [vmem:[%s14346_s6 + $0x38] sm:$0xff] }
 0x676   :  { %v2462_v33 = vpop.permute.xlu1 %2461  ;;  %7491 = vmatpush3.msk.msra.mxu1 %vm9387_vm6, %v2399_v2  ;;  %v2307_v2 = vld [vmem:[%s14346_s6 + $0xa0] sm:$0xff] }
 0x677   :  { %v2494_v8 = vsel %vm1126_vm10, %v2462_v33, 0.0  ;;  %2656 = vmatmul.mubr.f32.vlgmr.msra.gmra.mxu1 %v2287_v61  ;;  %v2456_v55 = vpop.permute.xlu0 %2455  ;;  %v2321_v61 = vld [vmem:[%s14346_s6 + $0x110] sm:$0xff]  ;;  %v2310_v33 = vld [vmem:[%s14346_s6 + $0xb8] sm:$0xff] }
 0x678   :  { %8372 = vmatprep.subr.msk.mxu0 %vm9804_vm11, %v2494_v8  ;;  %2660 = vmatprep.mubr.f32.mxu1 %v2291_v13  ;;  %v2491_v38 = vsel %vm1126_vm10, %v2456_v55, 0.0  ;;  %v2320_v13 = vld [vmem:[%s14346_s6 + $0x108] sm:$0xff]  ;;  %v2313_v55 = vld [vmem:[%s14346_s6 + $0xd0] sm:$0xff] }
 0x679   :  { %8373 = vmatpush3.msk.msra.mxu0 %vm9804_vm11, %v2494_v8  ;;  %8738 = vset.pattern.permute.xlu1 %v14427_v27  ;;  %v2324_v8 = vld [vmem:[%s14346_s6 + $0x128] sm:$0xff]  ;;  %v14643_v27 = vld [vmem:[#allocation36_spill] sm:$0xff] }
 0x67a   :  { %v2458_v52 = vpop.permute.xlu1 %2457  ;;  %8374 = vmatprep.subr.msk.mxu0 %vm9804_vm11, %v2493_v54  ;;  %2890 = vperm.xlu1 %8738, %v8767_v18   ;;  %v2322_v18 = vld [vmem:[%s14346_s6 + $0x118] sm:$0xff] }
 0x67b   :  { %v2492_v58 = vsel %vm1126_vm10, %v2458_v52, 0.0  ;;  %2661 = vmatmul.mubr.f32.gmra.mxu1 %v2290_v20  ;;  %8375 = vmatpush3.msk.msra.mxu0 %vm9804_vm11, %v2493_v54  ;;  %v2452_v32 = vpop.permute.xlu0 %2451  ;;  %v2316_v20 = vld [vmem:[%s14346_s6 + $0xe8] sm:$0xff]  ;;  %v2327_v54 = vld [vmem:[%s14346_s6 + $0x140] sm:$0xff]  ;;  %v2326_v52 = vld [vmem:[%s14346_s6 + $0x138] sm:$0xff] }
 0x67c   :  { %8376 = vmatprep.subr.msk.mxu0 %vm9804_vm11, %v2492_v58  ;;  %2665 = vmatprep.mubr.f32.mxu1 %v2294_v47  ;;  %v2489_v5 = vsel %vm1126_vm10, %v2452_v32, 0.0  ;;  %v2319_v47 = vld [vmem:[%s14346_s6 + $0x100] sm:$0xff]  ;;  %v2325_v32 = vld [vmem:[%s14346_s6 + $0x130] sm:$0xff] }
 0x67d   :  { %8377 = vmatpush3.msk.msra.mxu0 %vm9804_vm11, %v2492_v58  ;;  %v2330_v58 = vld [vmem:[%s14346_s6 + $0x158] sm:$0xff] }
 0x67e   :  { %v2454_v60 = vpop.permute.xlu1 %2453  ;;  %8378 = vmatprep.subr.msk.mxu0 %vm9804_vm11, %v2491_v38  ;;  %2886 = vperm.xlu1 %8738, %v8768_v26   ;;  %v2332_v26 = vld [vmem:[%s14346_s6 + $0x168] sm:$0xff] }
 0x67f   :  { %v2490_v57 = vsel %vm1126_vm10, %v2454_v60, 0.0  ;;  %2666 = vmatmul.mubr.f32.gmra.mxu1 %v2293_v46  ;;  %8379 = vmatpush3.msk.msra.mxu0 %vm9804_vm11, %v2491_v38  ;;  %v2448_v63 = vpop.permute.xlu0 %2447  ;;  %v2329_v46 = vld [vmem:[%s14346_s6 + $0x150] sm:$0xff]  ;;  %v2328_v38 = vld [vmem:[%s14346_s6 + $0x148] sm:$0xff]  ;;  %v2331_v60 = vld [vmem:[%s14346_s6 + $0x160] sm:$0xff] }
 0x680   :  { %8380 = vmatprep.subr.msk.mxu0 %vm9804_vm11, %v2490_v57  ;;  %2670 = vmatprep.mubr.f32.mxu1 %v2297_v1  ;;  %v2487_v3 = vsel %vm1126_vm10, %v2448_v63, 0.0  ;;  %v2333_v1 = vld [vmem:[%s14346_s6 + $0x170] sm:$0xff]  ;;  %v2977_v63 = vld [vmem:[%s14347_s9] sm:$0xff] }
 0x681   :  { %8381 = vmatpush3.msk.msra.mxu0 %vm9804_vm11, %v2490_v57  ;;  %v2334_v57 = vld [vmem:[%s14346_s6 + $0x178] sm:$0xff] }
 0x682   :  { %v2450_v17 = vpop.permute.xlu1 %2449  ;;  %8382 = vmatprep.subr.msk.mxu0 %vm9804_vm11, %v2489_v5  ;;  %8739 = vset.pattern.permute.xlu1 %v14622_v59 }
 0x683   :  { %v2488_v15 = vsel %vm1126_vm10, %v2450_v17, 0.0  ;;  %2671 = vmatmul.mubr.f32.gmra.mxu1 %v2296_v44  ;;  %8383 = vmatpush3.msk.msra.mxu0 %vm9804_vm11, %v2489_v5  ;;  %v2444_v45 = vpop.permute.xlu0 %2443 }
 0x684   :  { %8384 = vmatprep.subr.msk.mxu0 %vm9804_vm11, %v2488_v15  ;;  %2675 = vmatprep.mubr.f32.mxu1 %v2300_v23  ;;  %v2485_v14 = vsel %vm1126_vm10, %v2444_v45, 0.0 }
 0x685   :  { %8385 = vmatpush3.msk.msra.mxu0 %vm9804_vm11, %v2488_v15 }
 0x686   :  { %v2446_v53 = vpop.permute.xlu1 %2445  ;;  %8386 = vmatprep.subr.msk.mxu0 %vm9804_vm11, %v2487_v3 }
 0x687   :  { %v2486_v35 = vsel %vm1126_vm10, %v2446_v53, 0.0  ;;  %2676 = vmatmul.mubr.f32.gmra.mxu1 %v2299_v7  ;;  %8387 = vmatpush3.msk.msra.mxu0 %vm9804_vm11, %v2487_v3  ;;  %v2440_v30 = vpop.permute.xlu0 %2439 }
 0x688   :  { %8388 = vmatprep.subr.msk.mxu0 %vm9804_vm11, %v2486_v35  ;;  %2680 = vmatprep.mubr.f32.mxu1 %v2303_v6  ;;  %v2483_v4 = vsel %vm1126_vm10, %v2440_v30, 0.0 }
 0x689   :  { %8389 = vmatpush3.msk.msra.mxu0 %vm9804_vm11, %v2486_v35 }
 0x68a   :  { %v2442_v62 = vpop.permute.xlu1 %2441  ;;  %8390 = vmatprep.subr.msk.mxu0 %vm9804_vm11, %v2485_v14 }
 0x68b   :  { %v2484_v56 = vsel %vm1126_vm10, %v2442_v62, 0.0  ;;  %2681 = vmatmul.mubr.f32.gmra.mxu1 %v2302_v43  ;;  %8391 = vmatpush3.msk.msra.mxu0 %vm9804_vm11, %v2485_v14  ;;  %v2436_v11 = vpop.permute.xlu0 %2435 }
 0x68c   :  { %8392 = vmatprep.subr.msk.mxu0 %vm9804_vm11, %v2484_v56  ;;  %2685 = vmatprep.mubr.f32.mxu1 %v2306_v22  ;;  %v2481_v42 = vsel %vm1126_vm10, %v2436_v11, 0.0 }
 0x68d   :  { %8393 = vmatpush3.msk.msra.mxu0 %vm9804_vm11, %v2484_v56 }
 0x68e   :  { %v2438_v36 = vpop.permute.xlu1 %2437  ;;  %8394 = vmatprep.subr.msk.mxu0 %vm9804_vm11, %v2483_v4 }
 0x68f   :  { %v2482_v51 = vsel %vm1126_vm10, %v2438_v36, 0.0  ;;  %2686 = vmatmul.mubr.f32.gmra.mxu1 %v2305_v24  ;;  %8395 = vmatpush3.msk.msra.mxu0 %vm9804_vm11, %v2483_v4  ;;  %v2432_v29 = vpop.permute.xlu0 %2431 }
 0x690   :  { %8396 = vmatprep.subr.msk.mxu0 %vm9804_vm11, %v2482_v51  ;;  %2690 = vmatprep.mubr.f32.mxu1 %v2309_v12  ;;  %v2479_v19 = vsel %vm1126_vm10, %v2432_v29, 0.0 }
 0x691   :  { %8397 = vmatpush3.msk.msra.mxu0 %vm9804_vm11, %v2482_v51 }
 0x692   :  { %v2434_v39 = vpop.permute.xlu1 %2433  ;;  %8398 = vmatprep.subr.msk.mxu0 %vm9804_vm11, %v2481_v42 }
 0x693   :  { %v2480_v10 = vsel %vm1126_vm10, %v2434_v39, 0.0  ;;  %2691 = vmatmul.mubr.f32.gmra.mxu1 %v2308_v16  ;;  %8399 = vmatpush3.msk.msra.mxu0 %vm9804_vm11, %v2481_v42 }
 0x694   :  { %8400 = vmatprep.subr.msk.mxu0 %vm9804_vm11, %v2480_v10  ;;  %2695 = vmatprep.mubr.f32.mxu1 %v2312_v40 }
 0x695   :  { %8401 = vmatpush3.msk.msra.mxu0 %vm9804_vm11, %v2480_v10 }
 0x696   :  { %8402 = vmatprep.subr.msk.mxu0 %vm9804_vm11, %v2479_v19 }
 0x697   :  { %2696 = vmatmul.mubr.f32.gmra.mxu1 %v2311_v0  ;;  %8403 = vmatpush3.msk.msra.mxu0 %vm9804_vm11, %v2479_v19 }
 0x698   :  { %8405 = vmatmul.mubr.f32.vlgmr.msra.gmra.mxu0 %v2292_v37  ;;  %2700 = vmatprep.mubr.f32.mxu1 %v2315_v49 }
 0x699   :  { %8407 = vmatprep.mubr.f32.mxu0 %v2295_v9 }
 0x69b   :  { %2701 = vmatmul.mubr.f32.gmra.mxu1 %v2314_v50 }
 0x69c   :  { %8408 = vmatmul.mubr.f32.gmra.mxu0 %v2298_v21  ;;  %2705 = vmatprep.mubr.f32.mxu1 %v2318_v25  ;;  %v2569_v37 = vpop.permute.xlu0 %2568 }
 0x69d   :  { %8410 = vmatprep.mubr.f32.mxu0 %v2301_v34  ;;  %v2589_v59 = vmul.f32 %v2569_v37, %v14643_v27 }
 0x69f   :  { %2706 = vmatmul.mubr.f32.gmra.mxu1 %v2317_v41  ;;  %v11288_v44 = vpop.permute.xlu1 %2572 }
 0x6a0   :  { %8411 = vmatmul.mubr.f32.gmra.mxu0 %v2304_v48  ;;  %2710 = vmatprep.mubr.f32.mxu1 %v2321_v61 }
 0x6a1   :  { %8413 = vmatprep.mubr.f32.mxu0 %v2307_v2  ;;  %v2943_v34 = vpop.permute.xlu0 %2942 }
 0x6a3   :  { %2711 = vmatmul.mubr.f32.gmra.mxu1 %v2320_v13  ;;  %v11290_v5 = vpop.permute.xlu1 %2564 }
 0x6a4   :  { %8414 = vmatmul.mubr.f32.gmra.mxu0 %v2310_v33  ;;  %2715 = vmatprep.mubr.f32.mxu1 %v2324_v8 }
 0x6a5   :  { %8416 = vmatprep.mubr.f32.mxu0 %v2313_v55  ;;  %v2931_v55 = vpop.permute.xlu0 %2930 }
 0x6a7   :  { %2716 = vmatmul.mubr.f32.gmra.mxu1 %v2323_v28  ;;  %v11292_v23 = vpop.permute.xlu1 %2560 }
 0x6a8   :  { %8417 = vmatmul.mubr.f32.gmra.mxu0 %v2316_v20  ;;  %2720 = vmatprep.mubr.f32.mxu1 %v2327_v54 }
 0x6a9   :  { %8419 = vmatprep.mubr.f32.mxu0 %v2319_v47 }
 0x6ab   :  { %2721 = vmatmul.mubr.f32.gmra.mxu1 %v2326_v52  ;;  %v11294_v17 = vpop.permute.xlu1 %2556 }
 0x6ac   :  { %8420 = vmatmul.mubr.f32.gmra.mxu0 %v2322_v18  ;;  %2725 = vmatprep.mubr.f32.mxu1 %v2330_v58 }
 0x6ad   :  { %8422 = vmatprep.mubr.f32.mxu0 %v2325_v32  ;;  %v11370_v32 = vpop.permute.xlu0 %2918 }
 0x6af   :  { %2726 = vmatmul.mubr.f32.gmra.mxu1 %v2329_v46 }
 0x6b0   :  { %8423 = vmatmul.mubr.f32.gmra.mxu0 %v2328_v38  ;;  %2730 = vmatprep.mubr.f32.mxu1 %v2333_v1  ;;  %v11300_v7 = vpop.permute.xlu1 %2938 }
 0x6b1   :  { %8425 = vmatprep.mubr.f32.mxu0 %v2331_v60  ;;  %v11375_v31 = vpop.permute.xlu0 %2906 }
 0x6b2   :  { %14644 = vst [vmem:[#allocation27_spill] sm:$0xff] %v11375_v31  ;;  %v14648_v31 = vld [vmem:[#allocation38_spill] sm:$0xff] }
 0x6b3   :  { %2731 = vmatmul.mubr.f32.gmra.mxu1 %v2332_v26 }
 0x6b4   :  { %8426 = vmatmul.mubr.f32.gmra.mxu0 %v2334_v57  ;;  %v11308_v35 = vpop.permute.xlu1 %2934 }
 0x6b5   :  { %8460 = vmatprep.mubr.f32.mxu0 %v2977_v63 }
 0x6b9   :  { %v11316_v22 = vpop.permute.xlu1 %2548 }
 0x6bd   :  { %v11324_v24 = vpop.permute.xlu1 %2544 }
 0x6c2   :  { %v11330_v36 = vpop.permute.xlu1 %2926 }
 0x6c6   :  { %v11338_v40 = vpop.permute.xlu1 %2922 }
 0x6cb   :  { %v11350_v9 = vpop.permute.xlu1 %2536 }
 0x6cf   :  { %v11358_v2 = vpop.permute.xlu1 %2532 }
 0x6d4   :  { %v11364_v20 = vpop.permute.xlu1 %2914 }
 0x6d5   :  { %14641 = vst [vmem:[#allocation32_spill] sm:$0xff] %v11364_v20 }
 0x6d8   :  { %v11372_v38 = vpop.permute.xlu1 %2910 }
 0x6d9   :  { %14642 = vst [vmem:[#allocation20_spill] sm:$0xff] %v11372_v38 }
 0x737   :  { %v11296_v15 = vpop.f32.mrf.mxu1 }
 0x738   :  { %14627 = vst [vmem:[#allocation15_spill] sm:$0xff] %v11296_v15  ;;  %v14646_v15 = vld [vmem:[#allocation39_spill] sm:$0xff] }
 0x739   :  { %v11298_v45 = vpop.f32.mrf.mxu1 }
 0x73a   :  { %14628 = vst [vmem:[#allocation16_spill] sm:$0xff] %v11298_v45 }
 0x73b   :  { %v11302_v3 = vpop.f32.mrf.mxu1 }
 0x73c   :  { %14629 = vst [vmem:[#allocation41_spill] sm:$0xff] %v11302_v3 }
 0x73d   :  { %v11304_v6 = vpop.f32.mrf.mxu1 }
 0x73e   :  { %14630 = vst [vmem:[#allocation29_spill] sm:$0xff] %v11304_v6 }
 0x73f   :  { %v11306_v53 = vpop.f32.mrf.mxu1 }
 0x740   :  { %14631 = vst [vmem:[#allocation28_spill] sm:$0xff] %v11306_v53 }
 0x741   :  { %v11310_v30 = vpop.f32.mrf.mxu1 }
 0x742   :  { %14632 = vst [vmem:[#allocation35_spill] sm:$0xff] %v11310_v30 }
 0x743   :  { %v11312_v43 = vpop.f32.mrf.mxu1 }
 0x745   :  { %v11314_v14 = vpop.f32.mrf.mxu1 }
 0x746   :  { %14633 = vst [vmem:[#allocation30_spill] sm:$0xff] %v11314_v14 }
 0x747   :  { %v11318_v62 = vpop.f32.mrf.mxu1 }
 0x749   :  { %v11320_v56 = vpop.f32.mrf.mxu1 }
 0x74b   :  { %v11322_v11 = vpop.f32.mrf.mxu1 }
 0x74d   :  { %v11326_v4 = vpop.f32.mrf.mxu1 }
 0x74f   :  { %v11328_v12 = vpop.f32.mrf.mxu1 }
 0x751   :  { %v11332_v51 = vpop.f32.mrf.mxu1 }
 0x753   :  { %v11334_v16 = vpop.f32.mrf.mxu1 }
 0x755   :  { %v11336_v42 = vpop.f32.mrf.mxu1 }
 0x757   :  { %v11340_v29 = vpop.f32.mrf.mxu1 }
 0x758   :  { %v11342_v39 = vpop.f32.mrf.mxu0 }
 0x759   :  { %14634 = vst [vmem:[#allocation31_spill] sm:$0xff] %v11342_v39  ;;  %v11344_v10 = vpop.f32.mrf.mxu1 }
 0x75a   :  { %v11346_v0 = vpop.f32.mrf.mxu0 }
 0x75b   :  { %14635 = vst [vmem:[#allocation11_spill] sm:$0xff] %v11346_v0  ;;  %v7519_v19 = vpop.f32.mrf.mxu1 }
 0x75c   :  { %v11348_v49 = vpop.f32.mrf.mxu0 }
 0x75d   :  { %14636 = vst [vmem:[#allocation19_spill] sm:$0xff] %v11348_v49  ;;  %v7520_v50 = vpop.f32.mrf.mxu1  ;;  %v11377_v49 = vpop.permute.xlu1 %2524 }
 0x75e   :  { %v11352_v21 = vpop.f32.mrf.mxu0  ;;  %14645 = vst [vmem:[#allocation33_spill] sm:$0xff] %v11377_v49 }
 0x75f   :  { %14637 = vst [vmem:[#allocation12_spill] sm:$0xff] %v11352_v21  ;;  %v7522_v25 = vpop.f32.mrf.mxu1 }
 0x760   :  { %v11354_v41 = vpop.f32.mrf.mxu0 }
 0x761   :  { %14638 = vst [vmem:[#allocation13_spill] sm:$0xff] %v11354_v41  ;;  %v7523_v48 = vpop.f32.mrf.mxu1  ;;  %v14647_v41 = vld [vmem:[#allocation37_spill] sm:$0xff] }
 0x762   :  { %v11356_v61 = vpop.f32.mrf.mxu0  ;;  %v2590_v30 = vmul.f32 %v11288_v44, %v14647_v41  ;;  %v14650_v41 = vld [vmem:[#allocation40_spill] sm:$0xff] }
 0x763   :  { %14639 = vst [vmem:[#allocation6_spill] sm:$0xff] %v11356_v61  ;;  %v7525_v13 = vpop.f32.mrf.mxu1  ;;  %v2588_v61 = vmul.f32 %v11290_v5, %v14646_v15  ;;  %v11387_v15 = vpop.permute.xlu1 %2520 }
 0x764   :  { %v11360_v33 = vpop.f32.mrf.mxu0 }
 0x765   :  { %v7526_v8 = vpop.f32.mrf.mxu1 }
 0x766   :  { %v11362_v28 = vpop.f32.mrf.mxu0 }
 0x767   :  { %14640 = vst [vmem:[#allocation7_spill] sm:$0xff] %v11362_v28  ;;  %v7528_v54 = vpop.f32.mrf.mxu1  ;;  %v14649_v28 = vld [vmem:[#allocation22_spill] sm:$0xff] }
 0x768   :  { %v11366_v47 = vpop.f32.mrf.mxu0  ;;  %v2586_v5 = vmul.f32 %v11294_v17, %v14649_v28  ;;  %v7518_v17 = vadd.f32 %v11344_v10, %v11340_v29  ;;  %v7512_v29 = vadd.f32 %v11332_v51, %v11328_v12 }
 0x769   :  { %v7529_v52 = vpop.f32.mrf.mxu1 }
 0x76a   :  { %v11368_v18 = vpop.f32.mrf.mxu0  ;;  %v7530_v53 = vadd.f32 %v7529_v52, %v7528_v54  ;;  %v14654_v52 = vld [vmem:[#allocation5_spill] sm:$0xff] }
 0x76b   :  { %v7531_v58 = vpop.f32.mrf.mxu1 }
 0x76c   :  { %v8421_v46 = vpop.f32.mrf.mxu0 }
 0x76d   :  { %v7532_v1 = vpop.f32.mrf.mxu1 }
 0x76e   :  { %v2852_v60 = vpop.f32.mrf.mxu0  ;;  %v7533_v0 = vadd.f32 %v7532_v1, %v7531_v58  ;;  %v2587_v58 = vmul.f32 %v11292_v23, %v14648_v31  ;;  %v2553_v1 = vpop.permute.xlu0 %2552 }
 0x76f   :  { %v7534_v26 = vpop.f32.mrf.mxu1 }
 0x770   :  { %v8424_v57 = vpop.f32.mrf.mxu0  ;;  %v2723_v20 = vadd.f32 %v7533_v0, %v2588_v61  ;;  %v2718_v14 = vadd.f32 %v7530_v53, %v2587_v58  ;;  %v2585_v0 = vmul.f32 %v2553_v1, %v14650_v41 }
 0x771   :  { %v7535_v63 = vpop.f32.mrf.mxu1 }
 0x772   :  { %v7536_v39 = vadd.f32 %v7535_v63, %v7534_v26  ;;  %v2862_v21 = vpop.f32.mrf.mxu0  ;;  %v7527_v26 = vadd.f32 %v7526_v8, %v7525_v13  ;;  %v14651_v13 = vld [vmem:[#allocation10_spill] sm:$0xff] }
 0x773   :  { %v7537_v45 = vpop.f32.mrf.mxu1  ;;  %v2863_v54 = vadd.f32 %v2862_v21, %v2718_v14 }
 0x774   :  { %v8427_v6 = vpop.f32.mrf.mxu0  ;;  %v2728_v3 = vadd.f32 %v7536_v39, %v2589_v59  ;;  %v7524_v59 = vadd.f32 %v7523_v48, %v7522_v25  ;;  %v2868_v39 = vadd.f32 %v8424_v57, %v2723_v20  ;;  %v2713_v61 = vadd.f32 %v7527_v26, %v2586_v5  ;;  %v2541_v25 = vpop.permute.xlu0 %2540  ;;  %v14658_v26 = vld [vmem:[#allocation7_spill] sm:$0xff] }
 0x775   :  { %v7538_v38 = vpop.f32.mrf.mxu1  ;;  %v7506_v57 = vadd.f32 %v11320_v56, %v11318_v62  ;;  %v14660_v56 = vld [vmem:[#allocation26_spill] sm:$0xff] }
 0x776   :  { %v7539_v27 = vadd.f32 %v7538_v38, %v7537_v45  ;;  %v2872_v37 = vpop.f32.mrf.mxu0  ;;  %v7521_v45 = vadd.f32 %v7520_v50, %v7519_v19  ;;  %v2858_v48 = vadd.f32 %v8421_v46, %v2713_v61  ;;  %v2708_v53 = vadd.f32 %v7524_v59, %v2585_v0  ;;  %v14652_v19 = vld [vmem:[#allocation9_spill] sm:$0xff] }
 0x777   :  { %v2873_v49 = vadd.f32 %v2872_v37, %v2728_v3  ;;  %v2584_v3 = vmul.f32 %v11316_v22, %v14651_v13  ;;  %v2583_v14 = vmul.f32 %v11324_v24, %v14652_v19  ;;  %v2957_v22 = vadd.f32 %v2931_v55, %v2863_v54  ;;  %v14656_v37 = vld [vmem:[#allocation18_spill] sm:$0xff]  ;;  %v14665_v54 = vld [vmem:[#allocation20_spill] sm:$0xff]  ;;  %v14670_v19 = vld [vmem:[#allocation27_spill] sm:$0xff] }
 0x778   :  { %v2733_v63 = vadd.f32 %v7539_v27, %v2590_v30  ;;  %v11393_v30 = vpop.permute.xlu1 %2902  ;;  %v2853_v50 = vadd.f32 %v2852_v60, %v2708_v53  ;;  %v2956_v20 = vadd.f32 %v11330_v36, %v2858_v48  ;;  %v7509_v55 = vadd.f32 %v11326_v4, %v11322_v11  ;;  %v2529_v46 = vpop.permute.xlu0 %2528  ;;  %v14655_v60 = vld [vmem:[#allocation34_spill] sm:$0xff]  ;;  %v14666_v13 = vld [vmem:[#allocation24_spill] sm:$0xff] }
 0x779   :  { %v2959_v31 = vadd.f32 %v11300_v7, %v2873_v49  ;;  %v7515_v7 = vadd.f32 %v11336_v42, %v11334_v16  ;;  %v2703_v49 = vadd.f32 %v7521_v45, %v2584_v3  ;;  %v2698_v10 = vadd.f32 %v7518_v17, %v2583_v14  ;;  %v14664_v45 = vld [vmem:[#allocation13_spill] sm:$0xff] }
 0x77a   :  { %v2878_v44 = vadd.f32 %v8427_v6, %v2733_v63  ;;  %v2958_v6 = vadd.f32 %v11308_v35, %v2868_v39  ;;  %v2581_v16 = vmul.f32 %v11350_v9, %v14654_v52  ;;  %v2955_v51 = vadd.f32 %v11338_v40, %v2853_v50  ;;  %v14657_v40 = vld [vmem:[#allocation30_spill] sm:$0xff]  ;;  %v14659_v63 = vld [vmem:[#allocation32_spill] sm:$0xff]  ;;  %v14667_v17 = vld [vmem:[#allocation41_spill] sm:$0xff] }
 0x77b   :  { %v2975_v21 = vmax.f32 %v2959_v31, 0.0  ;;  %v2848_v35 = vadd.f32 %v11366_v47, %v2703_v49  ;;  %v2843_v12 = vadd.f32 %v11368_v18, %v2698_v10  ;;  %v2973_v47 = vmax.f32 %v2957_v22, 0.0  ;;  %v14671_v49 = vld [vmem:[#allocation23_spill] sm:$0xff] }
 0x77c   :  { %v2960_v23 = vadd.f32 %v2943_v34, %v2878_v44  ;;  %v14653_v34 = vld [vmem:[#allocation17_spill] sm:$0xff]  ;;  %v2974_v24 = vmax.f32 %v2958_v6, 0.0  ;;  %v2899_v42 = vpop.permute.xlu1 %2898  ;;  %v2580_v36 = vmul.f32 %v11358_v2, %v14655_v60  ;;  %v2688_v27 = vadd.f32 %v7512_v29, %v2581_v16  ;;  %v14663_v44 = vld [vmem:[#allocation35_spill] sm:$0xff]  ;;  %v2517_v0 = vpop.permute.xlu0 %2516  ;;  %v14669_v6 = vld [vmem:[#allocation6_spill] sm:$0xff] }
 0x77d   :  { %v2582_v28 = vmul.f32 %v2541_v25, %v14653_v34  ;;  %v2954_v11 = vadd.f32 %v11370_v32, %v2848_v35  ;;  %v2972_v4 = vmax.f32 %v2956_v20, 0.0  ;;  %v2579_v18 = vmul.f32 %v2529_v46, %v14656_v37  ;;  %v14662_v32 = vld [vmem:[#allocation28_spill] sm:$0xff]  ;;  %v14668_v25 = vld [vmem:[#allocation29_spill] sm:$0xff]  ;;  %v14672_v22 = vld [vmem:[#allocation15_spill] sm:$0xff] }
 0x77e   :  { %v2976_v8 = vmax.f32 %v2960_v23, 0.0  ;;  %v7503_v58 = vadd.f32 %v14657_v40, %v11312_v43  ;;  %v2683_v1 = vadd.f32 %v7509_v55, %v2580_v36  ;;  %v2833_v2 = vadd.f32 %v14658_v26, %v2688_v27  ;;  %v14674_v29 = vld [vmem:[#allocation19_spill] sm:$0xff]  ;;  %v14676_v46 = vld [vmem:[#allocation12_spill] sm:$0xff] }
 0x77f   :  { %v2693_v38 = vadd.f32 %v7515_v7, %v2582_v28  ;;  %v2953_v5 = vadd.f32 %v14659_v63, %v2843_v12  ;;  %v2971_v62 = vmax.f32 %v2955_v51, 0.0  ;;  %v7500_v41 = vadd.f32 %v14663_v44, %v14662_v32  ;;  %v14678_v27 = vld [vmem:[#allocation11_spill] sm:$0xff]  ;;  %v2985_v32 = vld [vmem:[%s14347_s9 + $0x40] sm:$0xff] }
 0x780   :  { %8428 = vmatprep.subr.mxu0 %v2976_v8  ;;  %v2513_v39 = vpop.permute.xlu1 %2512  ;;  %v2828_v61 = vadd.f32 %v14664_v45, %v2683_v1  ;;  %v2678_v43 = vadd.f32 %v7506_v57, %v2579_v18  ;;  %v2970_v23 = vmax.f32 %v2954_v11, 0.0  ;;  %v2577_v3 = vmul.f32 %v11387_v15, %v14666_v13  ;;  %v2895_v16 = vpop.permute.xlu0 %2894  ;;  %v2978_v63 = vld [vmem:[%s14347_s9 + $0x8] sm:$0xff]  ;;  %v2989_v45 = vld [vmem:[%s14347_s9 + $0x60] sm:$0xff]  ;;  %v2995_v13 = vld [vmem:[%s14347_s9 + $0x90] sm:$0xff] }
 0x781   :  { %8429 = vmatpush3.msra.mxu0 %v2976_v8  ;;  %v2838_v9 = vadd.f32 %v11360_v33, %v2693_v38  ;;  %v14661_v33 = vld [vmem:[#allocation33_spill] sm:$0xff]  ;;  %v7497_v48 = vadd.f32 %v14668_v25, %v14667_v17  ;;  %v2951_v14 = vadd.f32 %v14670_v19, %v2833_v2  ;;  %v2969_v7 = vmax.f32 %v2953_v5, 0.0  ;;  %v2979_v5 = vld [vmem:[%s14347_s9 + $0x10] sm:$0xff]  ;;  %v2986_v44 = vld [vmem:[%s14347_s9 + $0x48] sm:$0xff] }
 0x782   :  { %8430 = vmatprep.subr.mxu0 %v2975_v21  ;;  %v2578_v59 = vmul.f32 %v14661_v33, %v14660_v56  ;;  %v2823_v8 = vadd.f32 %v14669_v6, %v2678_v43  ;;  %v2576_v50 = vmul.f32 %v2517_v0, %v14671_v49  ;;  %v2668_v35 = vadd.f32 %v7500_v41, %v2577_v3  ;;  %v2981_v56 = vld [vmem:[%s14347_s9 + $0x20] sm:$0xff]  ;;  %v2982_v33 = vld [vmem:[%s14347_s9 + $0x28] sm:$0xff]  ;;  %v2987_v41 = vld [vmem:[%s14347_s9 + $0x50] sm:$0xff] }
 0x783   :  { %8431 = vmatpush3.msra.mxu0 %v2975_v21  ;;  %v2952_v31 = vadd.f32 %v14665_v54, %v2838_v9  ;;  %v14673_v21 = vld [vmem:[#allocation16_spill] sm:$0xff]  ;;  %v2950_v10 = vadd.f32 %v11393_v30, %v2828_v61  ;;  %v2967_v51 = vmax.f32 %v2951_v14, 0.0  ;;  %v2988_v0 = vld [vmem:[%s14347_s9 + $0x58] sm:$0xff]  ;;  %v2990_v61 = vld [vmem:[%s14347_s9 + $0x68] sm:$0xff] }
 0x784   :  { %8432 = vmatprep.subr.mxu0 %v2974_v24  ;;  %v2673_v53 = vadd.f32 %v7503_v58, %v2578_v59  ;;  %v7494_v34 = vadd.f32 %v14673_v21, %v14672_v22  ;;  %v2891_v28 = vpop.permute.xlu1 %2890  ;;  %v2663_v55 = vadd.f32 %v7497_v48, %v2576_v50  ;;  %v2813_v38 = vadd.f32 %v14676_v46, %v2668_v35  ;;  %v2883_v18 = vpop.permute.xlu0 %2882  ;;  %v2983_v59 = vld [vmem:[%s14347_s9 + $0x30] sm:$0xff]  ;;  %v2992_v54 = vld [vmem:[%s14347_s9 + $0x78] sm:$0xff]  ;;  %v2997_v17 = vld [vmem:[%s14347_s9 + $0xa0] sm:$0xff] }
 0x785   :  { %8433 = vmatpush3.msra.mxu0 %v2974_v24  ;;  %v2968_v20 = vmax.f32 %v2952_v31, 0.0  ;;  %v14675_v24 = vld [vmem:[#allocation21_spill] sm:$0xff]  ;;  %v2949_v12 = vadd.f32 %v2899_v42, %v2823_v8  ;;  %v2966_v9 = vmax.f32 %v2950_v10, 0.0  ;;  %v2991_v43 = vld [vmem:[%s14347_s9 + $0x70] sm:$0xff]  ;;  %v2993_v31 = vld [vmem:[%s14347_s9 + $0x80] sm:$0xff] }
 0x786   :  { %8434 = vmatprep.subr.mxu0 %v2973_v47  ;;  %v2818_v15 = vadd.f32 %v14674_v29, %v2673_v53  ;;  %v2575_v52 = vmul.f32 %v2513_v39, %v14675_v24  ;;  %v2984_v39 = vld [vmem:[%s14347_s9 + $0x38] sm:$0xff]  ;;  %v2998_v25 = vld [vmem:[%s14347_s9 + $0xa8] sm:$0xff]  ;;  %v2999_v48 = vld [vmem:[%s14347_s9 + $0xb0] sm:$0xff] }
 0x787   :  { %8435 = vmatpush3.msra.mxu0 %v2973_v47  ;;  %v14677_v47 = vld [vmem:[#allocation31_spill] sm:$0xff]  ;;  %v2965_v37 = vmax.f32 %v2949_v12, 0.0  ;;  %v2996_v3 = vld [vmem:[%s14347_s9 + $0x98] sm:$0xff]  ;;  %v3001_v6 = vld [vmem:[%s14347_s9 + $0xc0] sm:$0xff] }
 0x788   :  { %8436 = vmatprep.subr.mxu0 %v2972_v4  ;;  %v2808_v60 = vadd.f32 %v14677_v47, %v2663_v55  ;;  %v2658_v36 = vadd.f32 %v7494_v34, %v2575_v52  ;;  %v2948_v57 = vadd.f32 %v2895_v16, %v2818_v15  ;;  %v2887_v30 = vpop.permute.xlu1 %2886  ;;  %v3000_v53 = vld [vmem:[%s14347_s9 + $0xb8] sm:$0xff]  ;;  %v3002_v8 = vld [vmem:[%s14347_s9 + $0xc8] sm:$0xff]  ;;  %v3003_v19 = vld [vmem:[%s14347_s9 + $0xd0] sm:$0xff] }
 0x789   :  { %8437 = vmatpush3.msra.mxu0 %v2972_v4  ;;  %v2947_v4 = vadd.f32 %v2891_v28, %v2813_v38  ;;  %v3004_v14 = vld [vmem:[%s14347_s9 + $0xd8] sm:$0xff]  ;;  %v3006_v49 = vld [vmem:[%s14347_s9 + $0xe8] sm:$0xff]  ;;  %v3007_v50 = vld [vmem:[%s14347_s9 + $0xf0] sm:$0xff] }
 0x78a   :  { %8438 = vmatprep.subr.mxu0 %v2971_v62  ;;  %v2803_v11 = vadd.f32 %v14678_v27, %v2658_v36  ;;  %v2946_v40 = vadd.f32 %v2887_v30, %v2808_v60  ;;  %v2964_v42 = vmax.f32 %v2948_v57, 0.0  ;;  %v3008_v22 = vld [vmem:[%s14347_s9 + $0xf8] sm:$0xff]  ;;  %v3320_v34 = vld [vmem:[%s14348_s10 + $0x30] sm:$0xff]  ;;  %v3319_v28 = vld [vmem:[%s14348_s10 + $0x28] sm:$0xff] }
 0x78b   :  { %8439 = vmatpush3.msra.mxu0 %v2971_v62  ;;  %v2963_v1 = vmax.f32 %v2947_v4, 0.0  ;;  %v2980_v62 = vld [vmem:[%s14347_s9 + $0x18] sm:$0xff]  ;;  %v3318_v29 = vld [vmem:[%s14348_s10 + $0x20] sm:$0xff]  ;;  %v3316_v35 = vld [vmem:[%s14348_s10 + $0x10] sm:$0xff] }
 0x78c   :  { %8440 = vmatprep.subr.mxu0 %v2970_v23  ;;  %v2945_v58 = vadd.f32 %v2883_v18, %v2803_v11  ;;  %v2962_v26 = vmax.f32 %v2946_v40, 0.0  ;;  %v3321_v21 = vld [vmem:[%s14348_s10 + $0x38] sm:$0xff]  ;;  %v3315_v60 = vld [vmem:[%s14348_s10 + $0x8] sm:$0xff]  ;;  %v3314_v57 = vld [vmem:[%s14348_s10] sm:$0xff] }
 0x78d   :  { %8441 = vmatpush3.msra.mxu0 %v2970_v23  ;;  %v2994_v23 = vld [vmem:[%s14347_s9 + $0x88] sm:$0xff]  ;;  %8508 = vmatprep.subr.mxu1 %v3321_v21  ;;  %v3317_v15 = vld [vmem:[%s14348_s10 + $0x18] sm:$0xff] }
 0x78e   :  { %8442 = vmatprep.subr.mxu0 %v2969_v7  ;;  %v2961_v2 = vmax.f32 %v2945_v58, 0.0  ;;  %8509 = vmatpush3.msra.mxu1 %v3321_v21 }
 0x78f   :  { %8443 = vmatpush3.msra.mxu0 %v2969_v7  ;;  %v3005_v7 = vld [vmem:[%s14347_s9 + $0xe0] sm:$0xff]  ;;  %8510 = vmatprep.subr.mxu1 %v3320_v34 }
 0x790   :  { %8444 = vmatprep.subr.mxu0 %v2968_v20  ;;  %8511 = vmatpush3.msra.mxu1 %v3320_v34 }
 0x791   :  { %8445 = vmatpush3.msra.mxu0 %v2968_v20  ;;  %8512 = vmatprep.subr.mxu1 %v3319_v28 }
 0x792   :  { %8446 = vmatprep.subr.mxu0 %v2967_v51  ;;  %8513 = vmatpush3.msra.mxu1 %v3319_v28 }
 0x793   :  { %8447 = vmatpush3.msra.mxu0 %v2967_v51  ;;  %8514 = vmatprep.subr.mxu1 %v3318_v29 }
 0x794   :  { %8448 = vmatprep.subr.mxu0 %v2966_v9  ;;  %8515 = vmatpush3.msra.mxu1 %v3318_v29 }
 0x795   :  { %8449 = vmatpush3.msra.mxu0 %v2966_v9  ;;  %8516 = vmatprep.subr.mxu1 %v3317_v15 }
 0x796   :  { %8450 = vmatprep.subr.mxu0 %v2965_v37  ;;  %8517 = vmatpush3.msra.mxu1 %v3317_v15 }
 0x797   :  { %8451 = vmatpush3.msra.mxu0 %v2965_v37  ;;  %8518 = vmatprep.subr.mxu1 %v3316_v35 }
 0x798   :  { %8452 = vmatprep.subr.mxu0 %v2964_v42  ;;  %8519 = vmatpush3.msra.mxu1 %v3316_v35 }
 0x799   :  { %8453 = vmatpush3.msra.mxu0 %v2964_v42  ;;  %8520 = vmatprep.subr.mxu1 %v3315_v60 }
 0x79a   :  { %8454 = vmatprep.subr.mxu0 %v2963_v1  ;;  %8521 = vmatpush3.msra.mxu1 %v3315_v60 }
 0x79b   :  { %8455 = vmatpush3.msra.mxu0 %v2963_v1  ;;  %8522 = vmatprep.subr.mxu1 %v3314_v57 }
 0x79c   :  { %8456 = vmatprep.subr.mxu0 %v2962_v26  ;;  %8523 = vmatpush3.msra.mxu1 %v3314_v57 }
 0x79d   :  { %8457 = vmatpush3.msra.mxu0 %v2962_v26 }
 0x79e   :  { %8458 = vmatprep.subr.mxu0 %v2961_v2 }
 0x79f   :  { %8459 = vmatpush3.msra.mxu0 %v2961_v2 }
 0x7a0   :  { %8461 = vmatmul.mubr.f32.vlgmr.msra.gmra.mxu0 %v2978_v63 }
 0x7a1   :  { %8463 = vmatprep.mubr.f32.mxu0 %v2979_v5 }
 0x7a4   :  { %8464 = vmatmul.mubr.f32.gmra.mxu0 %v2980_v62 }
 0x7a5   :  { %8466 = vmatprep.mubr.f32.mxu0 %v2981_v56 }
 0x7a8   :  { %8467 = vmatmul.mubr.f32.gmra.mxu0 %v2982_v33 }
 0x7a9   :  { %8469 = vmatprep.mubr.f32.mxu0 %v2983_v59 }
 0x7ac   :  { %8470 = vmatmul.mubr.f32.gmra.mxu0 %v2984_v39 }
 0x7ad   :  { %8472 = vmatprep.mubr.f32.mxu0 %v2985_v32  ;;  %v11612_v32 = vld [vmem:[%s14349_s14 + $0x70] sm:$0xff] }
 0x7b0   :  { %8473 = vmatmul.mubr.f32.gmra.mxu0 %v2986_v44  ;;  %v11618_v44 = vld [vmem:[%s14349_s14 + $0x78] sm:$0xff] }
 0x7b1   :  { %8475 = vmatprep.mubr.f32.mxu0 %v2987_v41  ;;  %v11624_v41 = vld [vmem:[%s14349_s14 + $0x58] sm:$0xff] }
 0x7b4   :  { %8476 = vmatmul.mubr.f32.gmra.mxu0 %v2988_v0  ;;  %v11630_v0 = vld [vmem:[%s14349_s14 + $0x68] sm:$0xff] }
 0x7b5   :  { %8478 = vmatprep.mubr.f32.mxu0 %v2989_v45  ;;  %v11636_v45 = vld [vmem:[%s14349_s14 + $0x48] sm:$0xff] }
 0x7b8   :  { %8479 = vmatmul.mubr.f32.gmra.mxu0 %v2990_v61  ;;  %v11642_v61 = vld [vmem:[%s14349_s14 + $0x60] sm:$0xff] }
 0x7b9   :  { %8481 = vmatprep.mubr.f32.mxu0 %v2991_v43  ;;  %v11648_v43 = vld [vmem:[%s14349_s14 + $0x38] sm:$0xff] }
 0x7bc   :  { %8482 = vmatmul.mubr.f32.gmra.mxu0 %v2992_v54  ;;  %v11654_v54 = vld [vmem:[%s14349_s14 + $0x50] sm:$0xff] }
 0x7bd   :  { %8484 = vmatprep.mubr.f32.mxu0 %v2993_v31  ;;  %v11660_v31 = vld [vmem:[%s14349_s14 + $0x28] sm:$0xff] }
 0x7c0   :  { %8485 = vmatmul.mubr.f32.gmra.mxu0 %v2994_v23  ;;  %v11666_v23 = vld [vmem:[%s14349_s14 + $0x40] sm:$0xff] }
 0x7c1   :  { %8487 = vmatprep.mubr.f32.mxu0 %v2995_v13  ;;  %v11672_v13 = vld [vmem:[%s14349_s14 + $0x18] sm:$0xff] }
 0x7c4   :  { %8488 = vmatmul.mubr.f32.gmra.mxu0 %v2996_v3  ;;  %v11678_v3 = vld [vmem:[%s14349_s14 + $0x30] sm:$0xff] }
 0x7c5   :  { %8490 = vmatprep.mubr.f32.mxu0 %v2997_v17  ;;  %v11684_v17 = vld [vmem:[%s14349_s14 + $0x8] sm:$0xff] }
 0x7c8   :  { %8491 = vmatmul.mubr.f32.gmra.mxu0 %v2998_v25  ;;  %v11690_v25 = vld [vmem:[%s14349_s14 + $0x20] sm:$0xff] }
 0x7c9   :  { %8493 = vmatprep.mubr.f32.mxu0 %v2999_v48  ;;  %v11697_v48 = vld [vmem:[%s14349_s14 + $0x10] sm:$0xff] }
 0x7cc   :  { %8494 = vmatmul.mubr.f32.gmra.mxu0 %v3000_v53  ;;  %v14679_v53 = vmov 1  }
 0x7cd   :  { %8496 = vmatprep.mubr.f32.mxu0 %v3001_v6  ;;  %v11704_v6 = vld [vmem:[%s14349_s14] sm:$0xff] }
 0x7d0   :  { %8497 = vmatmul.mubr.f32.gmra.mxu0 %v3002_v8 }
 0x7d1   :  { %8499 = vmatprep.mubr.f32.mxu0 %v3003_v19 }
 0x7d4   :  { %8500 = vmatmul.mubr.f32.gmra.mxu0 %v3004_v14 }
 0x7d5   :  { %8502 = vmatprep.mubr.f32.mxu0 %v3005_v7 }
 0x7d8   :  { %8503 = vmatmul.mubr.f32.gmra.mxu0 %v3006_v49 }
 0x7d9   :  { %8505 = vmatprep.mubr.f32.mxu0 %v3007_v50 }
 0x7dc   :  { %8506 = vmatmul.mubr.f32.gmra.mxu0 %v3008_v22 }
 0x860   :  { %v11556_v10 = vpop.f32.mrf.mxu0 }
 0x862   :  { %v11558_v20 = vpop.f32.mrf.mxu0 }
 0x864   :  { %v11560_v24 = vpop.f32.mrf.mxu0 }
 0x866   :  { %v11562_v52 = vpop.f32.mrf.mxu0 }
 0x868   :  { %v11564_v16 = vpop.f32.mrf.mxu0 }
 0x86a   :  { %v11566_v55 = vpop.f32.mrf.mxu0 }
 0x86c   :  { %v11568_v46 = vpop.f32.mrf.mxu0 }
 0x86e   :  { %v11570_v38 = vpop.f32.mrf.mxu0 }
 0x870   :  { %v11572_v12 = vpop.f32.mrf.mxu0 }
 0x872   :  { %v11574_v51 = vpop.f32.mrf.mxu0 }
 0x874   :  { %v11576_v47 = vpop.f32.mrf.mxu0 }
 0x876   :  { %v11581_v36 = vpop.f32.mrf.mxu0 }
 0x878   :  { %v11586_v9 = vpop.f32.mrf.mxu0 }
 0x87a   :  { %v11588_v30 = vpop.f32.mrf.mxu0 }
 0x87c   :  { %v11590_v27 = vpop.f32.mrf.mxu0 }
 0x87e   :  { %v11592_v11 = vpop.f32.mrf.mxu0 }
 0x880   :  { %v8486_v4 = vpop.f32.mrf.mxu0 }
 0x881   :  { %3252 = vrot.lane.b32.xlu0 %v8486_v4, %s8793_s28 }
 0x882   :  { %v3155_v37 = vpop.f32.mrf.mxu0 }
 0x883   :  { %3250 = vrot.lane.b32.xlu1 %v3155_v37, %s8793_s28 }
 0x884   :  { %v8489_v18 = vpop.f32.mrf.mxu0 }
 0x885   :  { %3256 = vrot.lane.b32.xlu0 %v8489_v18, %s8793_s28 }
 0x886   :  { %v3165_v40 = vpop.f32.mrf.mxu0 }
 0x887   :  { %3254 = vrot.lane.b32.xlu1 %v3165_v40, %s8793_s28 }
 0x888   :  { %v8492_v42 = vpop.f32.mrf.mxu0 }
 0x889   :  { %3260 = vrot.lane.b32.xlu0 %v8492_v42, %s8793_s28 }
 0x88a   :  { %v3175_v58 = vpop.f32.mrf.mxu0 }
 0x88b   :  { %3258 = vrot.lane.b32.xlu1 %v3175_v58, %s8793_s28  ;;  %v11784_v58 = vld [vmem:[%s14350_s8 + $0x58] sm:$0xff] }
 0x88c   :  { %v8495_v1 = vpop.f32.mrf.mxu0 }
 0x88d   :  { %3264 = vrot.lane.b32.xlu0 %v8495_v1, %s8793_s28  ;;  %v11791_v1 = vld [vmem:[%s14350_s8 + $0x50] sm:$0xff] }
 0x88e   :  { %v3185_v26 = vpop.f32.mrf.mxu0 }
 0x88f   :  { %3262 = vrot.lane.b32.xlu1 %v3185_v26, %s8793_s28  ;;  %v11798_v26 = vld [vmem:[%s14350_s8 + $0x48] sm:$0xff] }
 0x890   :  { %v8498_v2 = vpop.f32.mrf.mxu0 }
 0x891   :  { %3268 = vrot.lane.b32.xlu0 %v8498_v2, %s8793_s28  ;;  %v11805_v2 = vld [vmem:[%s14350_s8 + $0x40] sm:$0xff] }
 0x892   :  { %v3195_v63 = vpop.f32.mrf.mxu0 }
 0x893   :  { %3266 = vrot.lane.b32.xlu1 %v3195_v63, %s8793_s28  ;;  %v11812_v63 = vld [vmem:[%s14350_s8 + $0x38] sm:$0xff] }
 0x894   :  { %v8501_v5 = vpop.f32.mrf.mxu0 }
 0x895   :  { %3272 = vrot.lane.b32.xlu0 %v8501_v5, %s8793_s28  ;;  %v11819_v5 = vld [vmem:[%s14350_s8 + $0x30] sm:$0xff] }
 0x896   :  { %v3205_v62 = vpop.f32.mrf.mxu0 }
 0x897   :  { %3270 = vrot.lane.b32.xlu1 %v3205_v62, %s8793_s28  ;;  %v11826_v62 = vld [vmem:[%s14350_s8 + $0x28] sm:$0xff] }
 0x898   :  { %v8504_v56 = vpop.f32.mrf.mxu0 }
 0x899   :  { %3276 = vrot.lane.b32.xlu0 %v8504_v56, %s8793_s28  ;;  %v11833_v56 = vld [vmem:[%s14350_s8 + $0x20] sm:$0xff] }
 0x89a   :  { %v3215_v33 = vpop.f32.mrf.mxu0 }
 0x89b   :  { %3274 = vrot.lane.b32.xlu1 %v3215_v33, %s8793_s28  ;;  %v11840_v33 = vld [vmem:[%s14350_s8 + $0x18] sm:$0xff] }
 0x89c   :  { %v8507_v59 = vpop.f32.mrf.mxu0 }
 0x89d   :  { %3280 = vrot.lane.b32.xlu0 %v8507_v59, %s8793_s28  ;;  %v11847_v59 = vld [vmem:[%s14350_s8 + $0x10] sm:$0xff] }
 0x89e   :  { %v3225_v39 = vpop.f32.mrf.mxu0 }
 0x89f   :  { %3278 = vrot.lane.b32.xlu1 %v3225_v39, %s8793_s28  ;;  %v11854_v39 = vld [vmem:[%s14350_s8 + $0x8] sm:$0xff] }
 0x8a1   :  { %3410 = vperm.xlu0 %8740, %v11612_v32  }
 0x8a3   :  { %3415 = vperm.xlu1 %8739, %v11618_v44  }
 0x8a5   :  { %3395 = vperm.xlu0 %8740, %v11624_v41  }
 0x8a7   :  { %3405 = vperm.xlu1 %8739, %v11630_v0  }
 0x8a9   :  { %3385 = vperm.xlu0 %8740, %v11636_v45  }
 0x8ab   :  { %3400 = vperm.xlu1 %8739, %v11642_v61  }
 0x8ad   :  { %3375 = vperm.xlu0 %8740, %v11648_v43  }
 0x8af   :  { %3390 = vperm.xlu1 %8739, %v11654_v54  }
 0x8b1   :  { %3365 = vperm.xlu0 %8740, %v11660_v31  }
 0x8b3   :  { %3380 = vperm.xlu1 %8739, %v11666_v23  }
 0x8b5   :  { %3355 = vperm.xlu0 %8740, %v11672_v13  }
 0x8b7   :  { %3370 = vperm.xlu1 %8739, %v11678_v3  }
 0x8b9   :  { %3345 = vperm.xlu0 %8740, %v11684_v17  }
 0x8bb   :  { %3360 = vperm.xlu1 %8739, %v11690_v25  }
 0x8bd   :  { %8741 = vset.pattern.permute.xlu0 %v14679_v53 }
 0x8bf   :  { %3350 = vperm.xlu1 %8739, %v11697_v48  }
 0x8c3   :  { %3340 = vperm.xlu1 %8739, %v11704_v6  }
 0x8c7   :  { %8742 = vset.pattern.permute.xlu1 %v14679_v53  ;;  %v11861_v53 = vld [vmem:[%s14350_s8] sm:$0xff] }
 0x8f3   :  { %v3253_v8 = vpop.permute.xlu0 %3252 }
 0x8f4   :  { %v3299_v7 = vsel %vm510_vm1, %v11556_v10, %v3253_v8 }
 0x8f5   :  { %v3251_v19 = vpop.permute.xlu1 %3250 }
 0x8f6   :  { %v3298_v14 = vsel %vm510_vm1, %v11558_v20, %v3251_v19 }
 0x8f7   :  { %8524 = vmatprep.mubr.msk.f32.mxu1 %vm3418_vm12, %v3298_v14  ;;  %v3257_v49 = vpop.permute.xlu0 %3256 }
 0x8f8   :  { %8525 = vmatmul.mubr.msk.f32.vlgmr.msra.gmra.mxu1 %vm3418_vm12, %v3299_v7  ;;  %v3301_v21 = vsel %vm510_vm1, %v11560_v24, %v3257_v49 }
 0x8f9   :  { %v3255_v50 = vpop.permute.xlu1 %3254 }
 0x8fa   :  { %v3300_v22 = vsel %vm510_vm1, %v11562_v52, %v3255_v50 }
 0x8fb   :  { %8527 = vmatprep.mubr.msk.f32.mxu1 %vm3418_vm12, %v3300_v22  ;;  %v3261_v34 = vpop.permute.xlu0 %3260 }
 0x8fc   :  { %8528 = vmatmul.mubr.msk.f32.gmra.mxu1 %vm3418_vm12, %v3301_v21  ;;  %v3303_v15 = vsel %vm510_vm1, %v11564_v16, %v3261_v34  ;;  %v14680_v21 = vld [vmem:[#allocation3_spill] sm:$0xff] }
 0x8fd   :  { %v3259_v28 = vpop.permute.xlu1 %3258  ;;  %vm3900_vm13 = vcmp.ge.s32.totalorder %v14680_v21, 32  ;;  %vm3901_vm14 = vcmp.lt.s32.totalorder %v14680_v21, 33  ;;  %vm4065_vm3 = vcmp.lt.s32.totalorder %v14680_v21, 32 }
 0x8fe   :  { %v3302_v29 = vsel %vm510_vm1, %v11566_v55, %v3259_v28  ;;  %vm3902_vm15 = vmand %vm3900_vm13, %vm3901_vm14 }
 0x8ff   :  { %8530 = vmatprep.mubr.msk.f32.mxu1 %vm3418_vm12, %v3302_v29  ;;  %v3265_v35 = vpop.permute.xlu0 %3264  ;;  %vm11902_vm0 = vmneg %vm3902_vm15 }
 0x900   :  { %8531 = vmatmul.mubr.msk.f32.gmra.mxu1 %vm3418_vm12, %v3303_v15  ;;  %v3305_v24 = vsel %vm510_vm1, %v11568_v46, %v3265_v35  ;;  %v14681_v15 = vmov 0 }
 0x901   :  { %v3263_v10 = vpop.permute.xlu1 %3262  ;;  %v14682_v15 = vsel %vm11902_vm0, 4294967295, %v14681_v15 }
 0x902   :  { %v3304_v20 = vsel %vm510_vm1, %v11570_v38, %v3263_v10  ;;  %14683 = vst [vmem:[#allocation8_spill] sm:$0xff] %v14682_v15 }
 0x903   :  { %8533 = vmatprep.mubr.msk.f32.mxu1 %vm3418_vm12, %v3304_v20  ;;  %v3269_v52 = vpop.permute.xlu0 %3268 }
 0x904   :  { %8534 = vmatmul.mubr.msk.f32.gmra.mxu1 %vm3418_vm12, %v3305_v24  ;;  %v3307_v60 = vsel %vm510_vm1, %v11572_v12, %v3269_v52 }
 0x905   :  { %v3267_v55 = vpop.permute.xlu1 %3266 }
 0x906   :  { %v3306_v16 = vsel %vm510_vm1, %v11574_v51, %v3267_v55 }
 0x907   :  { %8536 = vmatprep.mubr.msk.f32.mxu1 %vm3418_vm12, %v3306_v16  ;;  %v3273_v57 = vpop.permute.xlu0 %3272 }
 0x908   :  { %8537 = vmatmul.mubr.msk.f32.gmra.mxu1 %vm3418_vm12, %v3307_v60  ;;  %v3309_v4 = vsel %vm510_vm1, %v11576_v47, %v3273_v57 }
 0x909   :  { %v3271_v38 = vpop.permute.xlu1 %3270 }
 0x90a   :  { %v3308_v46 = vsel %vm510_vm1, %v11581_v36, %v3271_v38 }
 0x90b   :  { %8539 = vmatprep.mubr.msk.f32.mxu1 %vm3418_vm12, %v3308_v46  ;;  %v3277_v37 = vpop.permute.xlu0 %3276 }
 0x90c   :  { %8540 = vmatmul.mubr.msk.f32.gmra.mxu1 %vm3418_vm12, %v3309_v4  ;;  %v3311_v18 = vsel %vm510_vm1, %v11586_v9, %v3277_v37  ;;  %v3643_v9 = vld [vmem:[%s14350_s8 + $0x78] sm:$0xff] }
 0x90d   :  { %v3275_v51 = vpop.permute.xlu1 %3274  ;;  %3834 = vrot.lane.b32.xlu0 %v3643_v9, %s8787_s2  ;;  %7724 = vmatprep.subr.mxu0 %v3643_v9 }
 0x90e   :  { %v3310_v12 = vsel %vm510_vm1, %v11588_v30, %v3275_v51  ;;  %v11763_v30 = vld [vmem:[%s14350_s8 + $0x70] sm:$0xff] }
 0x90f   :  { %8542 = vmatprep.mubr.msk.f32.mxu1 %vm3418_vm12, %v3310_v12  ;;  %v3281_v40 = vpop.permute.xlu0 %3280 }
 0x910   :  { %8543 = vmatmul.mubr.msk.f32.gmra.mxu1 %vm3418_vm12, %v3311_v18  ;;  %v3313_v42 = vsel %vm510_vm1, %v11590_v27, %v3281_v40  ;;  %v11770_v27 = vld [vmem:[%s14350_s8 + $0x68] sm:$0xff] }
 0x911   :  { %v3279_v36 = vpop.permute.xlu1 %3278  ;;  %3832 = vrot.lane.b32.xlu0 %v11763_v30, %s8787_s2 }
 0x912   :  { %v3312_v47 = vsel %vm510_vm1, %v11592_v11, %v3279_v36  ;;  %v11777_v11 = vld [vmem:[%s14350_s8 + $0x60] sm:$0xff]  ;;  %vm4064_vm1 = vcmp.ge.s32.totalorder %v14680_v21, 31 }
 0x913   :  { %8545 = vmatprep.mubr.msk.f32.mxu1 %vm3418_vm12, %v3312_v47  ;;  %vm4066_vm4 = vmand %vm4064_vm1, %vm4065_vm3 }
 0x914   :  { %8546 = vmatmul.mubr.msk.f32.gmra.mxu1 %vm3418_vm12, %v3313_v42  ;;  %vm12324_vm6 = vmneg %vm4066_vm4 }
 0x915   :  { %3830 = vrot.lane.b32.xlu0 %v11770_v27, %s8787_s2 }
 0x919   :  { %3828 = vrot.lane.b32.xlu0 %v11777_v11, %s8787_s2 }
 0x91c   :  { %v11870_v8 = vpop.permute.xlu0 %3410 }
 0x91d   :  { %3826 = vrot.lane.b32.xlu0 %v11784_v58, %s8787_s2 }
 0x91e   :  { %v3416_v22 = vpop.permute.xlu1 %3415 }
 0x920   :  { %v3396_v19 = vpop.permute.xlu0 %3395 }
 0x921   :  { %3824 = vrot.lane.b32.xlu0 %v11791_v1, %s8787_s2 }
 0x922   :  { %v3406_v28 = vpop.permute.xlu1 %3405 }
 0x924   :  { %v3386_v14 = vpop.permute.xlu0 %3385 }
 0x925   :  { %3822 = vrot.lane.b32.xlu0 %v11798_v26, %s8787_s2 }
 0x926   :  { %v3401_v52 = vpop.permute.xlu1 %3400 }
 0x928   :  { %v3376_v7 = vpop.permute.xlu0 %3375 }
 0x929   :  { %3820 = vrot.lane.b32.xlu0 %v11805_v2, %s8787_s2 }
 0x92a   :  { %v3391_v57 = vpop.permute.xlu1 %3390 }
 0x92c   :  { %v11884_v49 = vpop.permute.xlu0 %3365 }
 0x92d   :  { %3818 = vrot.lane.b32.xlu0 %v11812_v63, %s8787_s2 }
 0x92e   :  { %v3381_v18 = vpop.permute.xlu1 %3380 }
 0x930   :  { %v11888_v50 = vpop.permute.xlu0 %3355 }
 0x931   :  { %3816 = vrot.lane.b32.xlu0 %v11819_v5, %s8787_s2 }
 0x934   :  { %v11896_v34 = vpop.permute.xlu0 %3345 }
 0x935   :  { %3814 = vrot.lane.b32.xlu0 %v11826_v62, %s8787_s2 }
 0x939   :  { %3812 = vrot.lane.b32.xlu0 %v11833_v56, %s8787_s2 }
 0x93d   :  { %3810 = vrot.lane.b32.xlu0 %v11840_v33, %s8787_s2 }
 0x941   :  { %3808 = vrot.lane.b32.xlu0 %v11847_v59, %s8787_s2 }
 0x945   :  { %3806 = vrot.lane.b32.xlu0 %v11854_v39, %s8787_s2 }
 0x949   :  { %3804 = vrot.lane.b32.xlu0 %v11861_v53, %s8787_s2 }
 0x94d   :  { %3997 = vrot.lane.b32.xlu0 %v3643_v9, %s8788_s21 }
 0x951   :  { %3995 = vrot.lane.b32.xlu0 %v11763_v30, %s8788_s21 }
 0x955   :  { %3993 = vrot.lane.b32.xlu0 %v11770_v27, %s8788_s21 }
 0x959   :  { %3991 = vrot.lane.b32.xlu0 %v11777_v11, %s8788_s21 }
 0x95d   :  { %3989 = vrot.lane.b32.xlu0 %v11784_v58, %s8788_s21 }
 0x961   :  { %3987 = vrot.lane.b32.xlu0 %v11791_v1, %s8788_s21 }
 0x965   :  { %3985 = vrot.lane.b32.xlu0 %v11798_v26, %s8788_s21 }
 0x969   :  { %3983 = vrot.lane.b32.xlu0 %v11805_v2, %s8788_s21 }
 0x96d   :  { %3981 = vrot.lane.b32.xlu0 %v11812_v63, %s8788_s21 }
 0x971   :  { %3979 = vrot.lane.b32.xlu0 %v11819_v5, %s8788_s21 }
 0x975   :  { %3977 = vrot.lane.b32.xlu0 %v11826_v62, %s8788_s21 }
 0x979   :  { %3975 = vrot.lane.b32.xlu0 %v11833_v56, %s8788_s21 }
 0x97d   :  { %3973 = vrot.lane.b32.xlu0 %v11840_v33, %s8788_s21 }
 0x97f   :  { %v3835_v10 = vpop.permute.xlu0 %3834 }
 0x980   :  { %v3899_v24 = vsel %vm960_vm2, 0.0, %v3835_v10 }
 0x981   :  { %3971 = vrot.lane.b32.xlu0 %v11847_v59, %s8788_s21  ;;  %7644 = vmatprep.subr.msk.mxu1 %vm11902_vm0, %v3899_v24 }
 0x985   :  { %3969 = vrot.lane.b32.xlu0 %v11854_v39, %s8788_s21 }
 0x989   :  { %3967 = vrot.lane.b32.xlu0 %v11861_v53, %s8788_s21 }
 0x98d   :  { %4160 = vperm.xlu0 %8741, %v11618_v44  }
 0x991   :  { %4148 = vperm.xlu0 %8741, %v11642_v61  }
 0x995   :  { %4140 = vperm.xlu0 %8741, %v11654_v54  }
 0x999   :  { %4132 = vperm.xlu0 %8741, %v11666_v23  }
 0x99d   :  { %4124 = vperm.xlu0 %8741, %v11678_v3  }
 0x9a1   :  { %4116 = vperm.xlu0 %8741, %v11690_v25  }
 0x9a5   :  { %4108 = vperm.xlu0 %8741, %v11697_v48  }
 0x9a9   :  { %4100 = vperm.xlu0 %8741, %v11704_v6   ;;  %v14684_v6 = vmov 2  }
 0x9ad   :  { %8744 = vset.pattern.permute.xlu0 %v14684_v6 }
 0x9b8   :  { %v11898_v29 = vpop.f32.mrf.mxu1 }
 0x9ba   :  { %v11906_v35 = vpop.f32.mrf.mxu1 }
 0x9bc   :  { %v11908_v20 = vpop.f32.mrf.mxu1 }
 0x9be   :  { %v11915_v55 = vpop.f32.mrf.mxu1 }
 0x9c0   :  { %v11917_v16 = vpop.f32.mrf.mxu1 }
 0x9c1   :  { %v3559_v25 = vadd.f32 %v11917_v16, %v11884_v49  ;;  %v3664_v16 = vld [vmem:[%s14351_s11 + $0xa0] sm:$0xff] }
 0x9c2   :  { %v11921_v60 = vpop.f32.mrf.mxu1 }
 0x9c4   :  { %v8535_v38 = vpop.f32.mrf.mxu1 }
 0x9c5   :  { %v3569_v46 = vadd.f32 %v8535_v38, %v3376_v7 }
 0x9c6   :  { %v3563_v4 = vpop.f32.mrf.mxu1 }
 0x9c7   :  { %v11925_v37 = vmax.f32 %v3569_v46, 0.0 }
 0x9c8   :  { %v8538_v51 = vpop.f32.mrf.mxu1 }
 0x9c9   :  { %v3579_v12 = vadd.f32 %v8538_v51, %v3386_v14  ;;  %3786 = vrot.lane.b32.xlu1 %v11925_v37, %s8787_s2 }
 0x9ca   :  { %v3573_v40 = vpop.f32.mrf.mxu1 }
 0x9cb   :  { %v11930_v36 = vmax.f32 %v3579_v12, 0.0  ;;  %v3574_v47 = vadd.f32 %v3573_v40, %v3381_v18 }
 0x9cc   :  { %v8541_v42 = vpop.f32.mrf.mxu1 }
 0x9cd   :  { %3790 = vrot.lane.b32.xlu1 %v11930_v36, %s8787_s2  ;;  %v11935_v7 = vmax.f32 %v3574_v47, 0.0  ;;  %v3589_v14 = vadd.f32 %v8541_v42, %v3396_v19  ;;  %v3677_v42 = vld [vmem:[%s14351_s11 + $0x108] sm:$0xff] }
 0x9ce   :  { %v3583_v9 = vpop.f32.mrf.mxu1 }
 0x9cf   :  { %v11940_v24 = vmax.f32 %v3589_v14, 0.0  ;;  %v3584_v38 = vadd.f32 %v3583_v9, %v3391_v57  ;;  %v3671_v57 = vld [vmem:[%s14351_s11 + $0xd8] sm:$0xff]  ;;  %v3676_v14 = vld [vmem:[%s14351_s11 + $0x100] sm:$0xff] }
 0x9d0   :  { %v8544_v10 = vpop.f32.mrf.mxu1 }
 0x9d1   :  { %3788 = vrot.lane.b32.xlu1 %v11935_v7, %s8787_s2  ;;  %v11945_v12 = vmax.f32 %v3584_v38, 0.0  ;;  %v3599_v19 = vadd.f32 %v8544_v10, %v3406_v28  ;;  %v3653_v28 = vld [vmem:[%s14351_s11 + $0x48] sm:$0xff]  ;;  %v3683_v10 = vld [vmem:[%s14351_s11 + $0x138] sm:$0xff] }
 0x9d2   :  { %v3593_v44 = vpop.f32.mrf.mxu1 }
 0x9d3   :  { %v3594_v54 = vadd.f32 %v3593_v44, %v3401_v52  ;;  %v11957_v23 = vmax.f32 %v3599_v19, 0.0  ;;  %v3658_v52 = vld [vmem:[%s14351_s11 + $0x70] sm:$0xff] }
 0x9d4   :  { %v8547_v46 = vpop.f32.mrf.mxu1  ;;  %v3682_v44 = vld [vmem:[%s14351_s11 + $0x130] sm:$0xff] }
 0x9d5   :  { %v3609_v51 = vadd.f32 %v8547_v46, %v3416_v22  ;;  %3794 = vrot.lane.b32.xlu1 %v11940_v24, %s8787_s2  ;;  %v3371_v22 = vpop.permute.xlu1 %3370  ;;  %v3689_v46 = vld [vmem:[%s14351_s11 + $0x168] sm:$0xff]  ;;  %v3694_v19 = vld [vmem:[%s14351_s11 + $0x190] sm:$0xff] }
 0x9d6   :  { %v3603_v61 = vpop.f32.mrf.mxu1 }
 0x9d7   :  { %v11947_v18 = vmax.f32 %v3609_v51, 0.0  ;;  %v3604_v40 = vadd.f32 %v3603_v61, %v11870_v8  ;;  %v11961_v8 = vmax.f32 %v3594_v54, 0.0  ;;  %v3688_v51 = vld [vmem:[%s14351_s11 + $0x160] sm:$0xff]  ;;  %v3706_v54 = vld [vmem:[%s14351_s11 + $0x1f0] sm:$0xff] }
 0x9d9   :  { %v11950_v47 = vmax.f32 %v3604_v40, 0.0  ;;  %7725 = vmatpush3.msra.mxu0 %v11947_v18  ;;  %3792 = vrot.lane.b32.xlu1 %v11945_v12, %s8787_s2  ;;  %v3361_v3 = vpop.permute.xlu1 %3360 }
 0x9da   :  { %7726 = vmatprep.subr.mxu0 %v11763_v30  ;;  %v3564_v30 = vadd.f32 %v3563_v4, %v3371_v22  ;;  %v3670_v4 = vld [vmem:[%s14351_s11 + $0xd0] sm:$0xff]  ;;  %v3712_v22 = vld [vmem:[%s14351_s11 + $0x220] sm:$0xff] }
 0x9db   :  { %7727 = vmatpush3.msra.mxu0 %v11950_v47 }
 0x9dc   :  { %7728 = vmatprep.subr.mxu0 %v11770_v27  ;;  %v3554_v27 = vadd.f32 %v11921_v60, %v3361_v3 }
 0x9dd   :  { %7729 = vmatpush3.msra.mxu0 %v11957_v23  ;;  %3798 = vrot.lane.b32.xlu1 %v11957_v23, %s8787_s2  ;;  %v3351_v48 = vpop.permute.xlu1 %3350 }
 0x9de   :  { %7730 = vmatprep.subr.mxu0 %v11777_v11  ;;  %v11987_v11 = vmax.f32 %v3564_v30, 0.0  ;;  %v3724_v30 = vld [vmem:[%s14351_s11 + $0x280] sm:$0xff] }
 0x9df   :  { %7731 = vmatpush3.msra.mxu0 %v11961_v8 }
 0x9e0   :  { %7732 = vmatprep.subr.mxu0 %v11784_v58  ;;  %v3549_v58 = vadd.f32 %v11908_v20, %v11888_v50 }
 0x9e1   :  { %7733 = vmatpush3.msra.mxu0 %v11940_v24  ;;  %3796 = vrot.lane.b32.xlu1 %v11961_v8, %s8787_s2 }
 0x9e2   :  { %7734 = vmatprep.subr.mxu0 %v11791_v1  ;;  %v11996_v1 = vmax.f32 %v3559_v25, 0.0  ;;  %v12009_v49 = vmax.f32 %v3549_v58, 0.0  ;;  %v3731_v25 = vld [vmem:[%s14351_s11 + $0x2b8] sm:$0xff]  ;;  %v3736_v58 = vld [vmem:[%s14351_s11 + $0x2e0] sm:$0xff] }
 0x9e3   :  { %7735 = vmatpush3.msra.mxu0 %v11945_v12 }
 0x9e4   :  { %7736 = vmatprep.subr.mxu0 %v11798_v26  ;;  %v3544_v26 = vadd.f32 %v11915_v55, %v3351_v48  ;;  %v3665_v55 = vld [vmem:[%s14351_s11 + $0xa8] sm:$0xff] }
 0x9e5   :  { %7737 = vmatpush3.msra.mxu0 %v11930_v36  ;;  %3802 = vrot.lane.b32.xlu1 %v11947_v18, %s8787_s2 }
 0x9e6   :  { %7738 = vmatprep.subr.mxu0 %v11805_v2  ;;  %v12001_v2 = vmax.f32 %v3554_v27, 0.0  ;;  %v12014_v50 = vmax.f32 %v3544_v26, 0.0  ;;  %v3730_v27 = vld [vmem:[%s14351_s11 + $0x2b0] sm:$0xff] }
 0x9e7   :  { %7739 = vmatpush3.msra.mxu0 %v11935_v7 }
 0x9e8   :  { %7740 = vmatprep.subr.mxu0 %v11812_v63  ;;  %v3341_v63 = vpop.permute.xlu1 %3340 }
 0x9e9   :  { %3800 = vrot.lane.b32.xlu1 %v11950_v47, %s8787_s2  ;;  %7741 = vmatpush3.msra.mxu0 %v11925_v37 }
 0x9ea   :  { %7742 = vmatprep.subr.mxu0 %v11819_v5  ;;  %v3539_v5 = vadd.f32 %v11898_v29, %v11896_v34  ;;  %v3652_v29 = vld [vmem:[%s14351_s11 + $0x40] sm:$0xff] }
 0x9eb   :  { %7743 = vmatpush3.msra.mxu0 %v11987_v11 }
 0x9ec   :  { %7744 = vmatprep.subr.mxu0 %v11826_v62  ;;  %v3534_v62 = vadd.f32 %v11906_v35, %v3341_v63  ;;  %v3659_v35 = vld [vmem:[%s14351_s11 + $0x78] sm:$0xff] }
 0x9ed   :  { %3784 = vrot.lane.b32.xlu1 %v11987_v11, %s8787_s2  ;;  %7745 = vmatpush3.msra.mxu0 %v11996_v1 }
 0x9ee   :  { %7746 = vmatprep.subr.mxu0 %v11833_v56  ;;  %v12020_v56 = vmax.f32 %v3539_v5, 0.0  ;;  %v12024_v34 = vmax.f32 %v3534_v62, 0.0 }
 0x9ef   :  { %7747 = vmatpush3.msra.mxu0 %v12001_v2 }
 0x9f0   :  { %7748 = vmatprep.subr.mxu0 %v11840_v33  ;;  %v3645_v33 = vld [vmem:[%s14351_s11 + $0x8] sm:$0xff] }
 0x9f1   :  { %3782 = vrot.lane.b32.xlu1 %v11996_v1, %s8787_s2  ;;  %7749 = vmatpush3.msra.mxu0 %v12009_v49 }
 0x9f2   :  { %7750 = vmatprep.subr.mxu0 %v11847_v59  ;;  %4227 = vmatprep.mubr.f32.mxu1 %v3645_v33  ;;  %v3647_v59 = vld [vmem:[%s14351_s11 + $0x18] sm:$0xff] }
 0x9f3   :  { %7751 = vmatpush3.msra.mxu0 %v12014_v50  ;;  %4372 = vmatprep.mubr.f32.mxu0 %v3647_v59 }
 0x9f4   :  { %7752 = vmatprep.subr.mxu0 %v11854_v39  ;;  %v3646_v39 = vld [vmem:[%s14351_s11 + $0x10] sm:$0xff] }
 0x9f5   :  { %3780 = vrot.lane.b32.xlu1 %v12001_v2, %s8787_s2  ;;  %7753 = vmatpush3.msra.mxu0 %v12020_v56 }
 0x9f6   :  { %7754 = vmatprep.subr.mxu0 %v11861_v53  ;;  %v12044_v53 = vpop.permute.xlu0 %3832 }
 0x9f7   :  { %7755 = vmatpush3.msra.mxu0 %v12024_v34 }
 0x9f8   :  { %4373 = vmatmul.mubr.f32.vlgmr.msra.gmra.mxu0 %v3646_v39 }
 0x9f9   :  { %3778 = vrot.lane.b32.xlu1 %v12009_v49, %s8787_s2  ;;  %4377 = vmatprep.mubr.f32.mxu0 %v3653_v28 }
 0x9fa   :  { %v12057_v20 = vpop.permute.xlu0 %3830 }
 0x9fc   :  { %4378 = vmatmul.mubr.f32.gmra.mxu0 %v3652_v29 }
 0x9fd   :  { %3776 = vrot.lane.b32.xlu1 %v12014_v50, %s8787_s2  ;;  %4382 = vmatprep.mubr.f32.mxu0 %v3659_v35 }
 0x9fe   :  { %v12072_v60 = vpop.permute.xlu0 %3828 }
 0x9ff   :  { %v3896_v35 = vsel %vm960_vm2, 0.0, %v12072_v60 }
 0xa00   :  { %4383 = vmatmul.mubr.f32.gmra.mxu0 %v3658_v52 }
 0xa01   :  { %3774 = vrot.lane.b32.xlu1 %v12020_v56, %s8787_s2  ;;  %4387 = vmatprep.mubr.f32.mxu0 %v3665_v55 }
 0xa02   :  { %v12085_v9 = vpop.permute.xlu0 %3826 }
 0xa04   :  { %4388 = vmatmul.mubr.f32.gmra.mxu0 %v3664_v16 }
 0xa05   :  { %3772 = vrot.lane.b32.xlu1 %v12024_v34, %s8787_s2  ;;  %4392 = vmatprep.mubr.f32.mxu0 %v3671_v57 }
 0xa06   :  { %v12100_v38 = vpop.permute.xlu0 %3824 }
 0xa07   :  { %v3894_v16 = vsel %vm960_vm2, 0.0, %v12100_v38 }
 0xa08   :  { %4393 = vmatmul.mubr.f32.gmra.mxu0 %v3670_v4 }
 0xa09   :  { %3965 = vrot.lane.b32.xlu1 %v11947_v18, %s8788_s21  ;;  %4397 = vmatprep.mubr.f32.mxu0 %v3677_v42  ;;  %v3700_v18 = vld [vmem:[%s14351_s11 + $0x1c0] sm:$0xff] }
 0xa0a   :  { %v12113_v61 = vpop.permute.xlu0 %3822 }
 0xa0c   :  { %4398 = vmatmul.mubr.f32.gmra.mxu0 %v3676_v14 }
 0xa0d   :  { %3961 = vrot.lane.b32.xlu1 %v11957_v23, %s8788_s21  ;;  %4402 = vmatprep.mubr.f32.mxu0 %v3683_v10 }
 0xa0e   :  { %v12128_v40 = vpop.permute.xlu0 %3820 }
 0xa10   :  { %4403 = vmatmul.mubr.f32.gmra.mxu0 %v3682_v44 }
 0xa11   :  { %3959 = vrot.lane.b32.xlu1 %v11961_v8, %s8788_s21  ;;  %4407 = vmatprep.mubr.f32.mxu0 %v3689_v46  ;;  %v3718_v8 = vld [vmem:[%s14351_s11 + $0x250] sm:$0xff] }
 0xa12   :  { %v12141_v23 = vpop.permute.xlu0 %3818 }
 0xa14   :  { %4408 = vmatmul.mubr.f32.gmra.mxu0 %v3688_v51 }
 0xa15   :  { %3957 = vrot.lane.b32.xlu1 %v11940_v24, %s8788_s21  ;;  %v3695_v24 = vld [vmem:[%s14351_s11 + $0x198] sm:$0xff] }
 0xa16   :  { %4412 = vmatprep.mubr.f32.mxu0 %v3695_v24  ;;  %v12156_v3 = vpop.permute.xlu0 %3816 }
 0xa17   :  { %v3890_v46 = vsel %vm960_vm2, 0.0, %v12156_v3 }
 0xa18   :  { %4413 = vmatmul.mubr.f32.gmra.mxu0 %v3694_v19 }
 0xa19   :  { %3955 = vrot.lane.b32.xlu1 %v11945_v12, %s8788_s21  ;;  %v3701_v12 = vld [vmem:[%s14351_s11 + $0x1c8] sm:$0xff] }
 0xa1a   :  { %4417 = vmatprep.mubr.f32.mxu0 %v3701_v12  ;;  %v12169_v48 = vpop.permute.xlu0 %3814 }
 0xa1c   :  { %4418 = vmatmul.mubr.f32.gmra.mxu0 %v3700_v18 }
 0xa1d   :  { %3953 = vrot.lane.b32.xlu1 %v11930_v36, %s8788_s21  ;;  %v3707_v36 = vld [vmem:[%s14351_s11 + $0x1f8] sm:$0xff] }
 0xa1e   :  { %4422 = vmatprep.mubr.f32.mxu0 %v3707_v36 }
 0xa20   :  { %4423 = vmatmul.mubr.f32.gmra.mxu0 %v3706_v54 }
 0xa21   :  { %3951 = vrot.lane.b32.xlu1 %v11935_v7, %s8788_s21  ;;  %v3713_v7 = vld [vmem:[%s14351_s11 + $0x228] sm:$0xff] }
 0xa22   :  { %4427 = vmatprep.mubr.f32.mxu0 %v3713_v7 }
 0xa24   :  { %4428 = vmatmul.mubr.f32.gmra.mxu0 %v3712_v22 }
 0xa25   :  { %3949 = vrot.lane.b32.xlu1 %v11925_v37, %s8788_s21  ;;  %v3719_v37 = vld [vmem:[%s14351_s11 + $0x258] sm:$0xff] }
 0xa26   :  { %4432 = vmatprep.mubr.f32.mxu0 %v3719_v37 }
 0xa28   :  { %4433 = vmatmul.mubr.f32.gmra.mxu0 %v3718_v8 }
 0xa29   :  { %3963 = vrot.lane.b32.xlu1 %v11950_v47, %s8788_s21  ;;  %v3725_v47 = vld [vmem:[%s14351_s11 + $0x288] sm:$0xff] }
 0xa2a   :  { %4437 = vmatprep.mubr.f32.mxu0 %v3725_v47  ;;  %v14685_v47 = vmov 0 }
 0xa2b   :  { %v14686_v47 = vsel %vm12324_vm6, 4294967295, %v14685_v47 }
 0xa2c   :  { %4438 = vmatmul.mubr.f32.gmra.mxu0 %v3724_v30  ;;  %14687 = vst [vmem:[#allocation14_spill] sm:$0xff] %v14686_v47 }
 0xa2d   :  { %3947 = vrot.lane.b32.xlu1 %v11987_v11, %s8788_s21  ;;  %4442 = vmatprep.mubr.f32.mxu0 %v3731_v25  ;;  %v3737_v11 = vld [vmem:[%s14351_s11 + $0x2e8] sm:$0xff] }
 0xa30   :  { %4443 = vmatmul.mubr.f32.gmra.mxu0 %v3730_v27 }
 0xa31   :  { %3945 = vrot.lane.b32.xlu1 %v11996_v1, %s8788_s21  ;;  %4447 = vmatprep.mubr.f32.mxu0 %v3737_v11  ;;  %v12184_v1 = vpop.permute.xlu0 %3812  ;;  %v3651_v11 = vld [vmem:[%s14351_s11 + $0x38] sm:$0xff] }
 0xa32   :  { %v3888_v19 = vsel %vm960_vm2, 0.0, %v12184_v1 }
 0xa34   :  { %4448 = vmatmul.mubr.f32.gmra.mxu0 %v3736_v58 }
 0xa35   :  { %3943 = vrot.lane.b32.xlu1 %v12001_v2, %s8788_s21  ;;  %v12188_v63 = vpop.permute.xlu0 %3810 }
 0xa36   :  { %v3887_v36 = vsel %vm960_vm2, 0.0, %v12188_v63  ;;  %v3657_v63 = vld [vmem:[%s14351_s11 + $0x68] sm:$0xff] }
 0xa39   :  { %3941 = vrot.lane.b32.xlu1 %v12009_v49, %s8788_s21  ;;  %v12194_v62 = vpop.permute.xlu0 %3808 }
 0xa3a   :  { %v3886_v7 = vsel %vm960_vm2, 0.0, %v12194_v62 }
 0xa3b   :  { %v3787_v26 = vpop.permute.xlu1 %3786 }
 0xa3c   :  { %v3875_v44 = vsel %vm960_vm2, 0.0, %v3787_v26  ;;  %v3650_v26 = vld [vmem:[%s14351_s11 + $0x30] sm:$0xff] }
 0xa3d   :  { %3939 = vrot.lane.b32.xlu1 %v12014_v50, %s8788_s21  ;;  %v12197_v59 = vpop.permute.xlu0 %3806 }
 0xa3e   :  { %v3885_v22 = vsel %vm960_vm2, 0.0, %v12197_v59 }
 0xa3f   :  { %v3791_v2 = vpop.permute.xlu1 %3790 }
 0xa40   :  { %v3877_v42 = vsel %vm960_vm2, 0.0, %v3791_v2 }
 0xa41   :  { %3937 = vrot.lane.b32.xlu1 %v12020_v56, %s8788_s21  ;;  %v12201_v39 = vpop.permute.xlu0 %3804 }
 0xa42   :  { %v3884_v37 = vsel %vm960_vm2, 0.0, %v12201_v39  ;;  %v3662_v39 = vld [vmem:[%s14351_s11 + $0x90] sm:$0xff] }
 0xa43   :  { %v3789_v5 = vpop.permute.xlu1 %3788 }
 0xa44   :  { %v3876_v10 = vsel %vm960_vm2, 0.0, %v3789_v5 }
 0xa45   :  { %3935 = vrot.lane.b32.xlu1 %v12024_v34, %s8788_s21  ;;  %v12205_v29 = vpop.permute.xlu0 %3997 }
 0xa46   :  { %v4063_v25 = vsel %vm4031_vm5, %v12205_v29, 0.0  ;;  %v3675_v29 = vld [vmem:[%s14351_s11 + $0xf8] sm:$0xff] }
 0xa47   :  { %v3795_v49 = vpop.permute.xlu1 %3794 }
 0xa48   :  { %v3879_v55 = vsel %vm960_vm2, 0.0, %v3795_v49  ;;  %v3656_v49 = vld [vmem:[%s14351_s11 + $0x60] sm:$0xff] }
 0xa49   :  { %4156 = vperm.xlu1 %8742, %v11612_v32   ;;  %v3898_v32 = vsel %vm960_vm2, 0.0, %v12044_v53 }
 0xa4b   :  { %v3793_v33 = vpop.permute.xlu1 %3792 }
 0xa4c   :  { %v3878_v57 = vsel %vm960_vm2, 0.0, %v3793_v33  ;;  %v3663_v33 = vld [vmem:[%s14351_s11 + $0x98] sm:$0xff] }
 0xa4d   :  { %4152 = vperm.xlu1 %8742, %v11630_v0  }
 0xa4f   :  { %v3799_v50 = vpop.permute.xlu1 %3798 }
 0xa50   :  { %v3881_v53 = vsel %vm960_vm2, 0.0, %v3799_v50 }
 0xa51   :  { %4144 = vperm.xlu1 %8742, %v11624_v41  }
 0xa53   :  { %v3797_v56 = vpop.permute.xlu1 %3796 }
 0xa55   :  { %4136 = vperm.xlu1 %8742, %v11636_v45   ;;  %v3897_v45 = vsel %vm960_vm2, 0.0, %v12057_v20  ;;  %v3880_v20 = vsel %vm960_vm2, 0.0, %v3797_v56  ;;  %v3669_v56 = vld [vmem:[%s14351_s11 + $0xc8] sm:$0xff] }
 0xa57   :  { %v3803_v28 = vpop.permute.xlu1 %3802 }
 0xa58   :  { %v3883_v34 = vsel %vm960_vm2, 0.0, %v3803_v28 }
 0xa59   :  { %7645 = vmatpush3.msk.msra.mxu1 %vm11902_vm0, %v3883_v34  ;;  %4128 = vperm.xlu1 %8742, %v11648_v43   ;;  %v12223_v43 = vpop.permute.xlu0 %3995  ;;  %v3668_v34 = vld [vmem:[%s14351_s11 + $0xc0] sm:$0xff] }
 0xa5a   :  { %7646 = vmatprep.subr.msk.mxu1 %vm11902_vm0, %v3898_v32  ;;  %v4062_v1 = vsel %vm4031_vm5, %v12223_v43, 0.0 }
 0xa5b   :  { %v3801_v41 = vpop.permute.xlu1 %3800 }
 0xa5c   :  { %v3882_v0 = vsel %vm960_vm2, 0.0, %v3801_v41 }
 0xa5d   :  { %7647 = vmatpush3.msk.msra.mxu1 %vm11902_vm0, %v3882_v0  ;;  %4120 = vperm.xlu1 %8742, %v11660_v31   ;;  %v3895_v31 = vsel %vm960_vm2, 0.0, %v12085_v9  ;;  %v12247_v4 = vpop.permute.xlu0 %3993  ;;  %v3892_v9 = vsel %vm960_vm2, 0.0, %v12128_v40  ;;  %v3674_v0 = vld [vmem:[%s14351_s11 + $0xf0] sm:$0xff] }
 0xa5e   :  { %7648 = vmatprep.subr.msk.mxu1 %vm11902_vm0, %v3897_v45  ;;  %v3681_v45 = vld [vmem:[%s14351_s11 + $0x128] sm:$0xff] }
 0xa5f   :  { %7649 = vmatpush3.msk.msra.mxu1 %vm11902_vm0, %v3881_v53  ;;  %v3785_v52 = vpop.permute.xlu1 %3784 }
 0xa60   :  { %7650 = vmatprep.subr.msk.mxu1 %vm11902_vm0, %v3896_v35  ;;  %v3874_v24 = vsel %vm960_vm2, 0.0, %v3785_v52  ;;  %v3680_v35 = vld [vmem:[%s14351_s11 + $0x120] sm:$0xff]  ;;  %v3687_v52 = vld [vmem:[%s14351_s11 + $0x158] sm:$0xff] }
 0xa61   :  { %7651 = vmatpush3.msk.msra.mxu1 %vm11902_vm0, %v3880_v20  ;;  %4112 = vperm.xlu1 %8742, %v11672_v13   ;;  %v3893_v13 = vsel %vm960_vm2, 0.0, %v12113_v61  ;;  %v12272_v38 = vpop.permute.xlu0 %3991 }
 0xa62   :  { %7652 = vmatprep.subr.msk.mxu1 %vm11902_vm0, %v3895_v31  ;;  %v3686_v31 = vld [vmem:[%s14351_s11 + $0x150] sm:$0xff] }
 0xa63   :  { %7653 = vmatpush3.msk.msra.mxu1 %vm11902_vm0, %v3879_v55  ;;  %v3783_v60 = vpop.permute.xlu1 %3782  ;;  %v3693_v55 = vld [vmem:[%s14351_s11 + $0x188] sm:$0xff] }
 0xa64   :  { %7654 = vmatprep.subr.msk.mxu1 %vm11902_vm0, %v3894_v16  ;;  %v3873_v61 = vsel %vm960_vm2, 0.0, %v3783_v60 }
 0xa65   :  { %7655 = vmatpush3.msk.msra.mxu1 %vm11902_vm0, %v3878_v57  ;;  %4104 = vperm.xlu1 %8742, %v11684_v17   ;;  %v3891_v17 = vsel %vm960_vm2, 0.0, %v12141_v23  ;;  %v12295_v40 = vpop.permute.xlu0 %3989  ;;  %v3692_v57 = vld [vmem:[%s14351_s11 + $0x180] sm:$0xff] }
 0xa66   :  { %7656 = vmatprep.subr.msk.mxu1 %vm11902_vm0, %v3893_v13  ;;  %v3699_v13 = vld [vmem:[%s14351_s11 + $0x1b8] sm:$0xff] }
 0xa67   :  { %7657 = vmatpush3.msk.msra.mxu1 %vm11902_vm0, %v3877_v42  ;;  %v3781_v14 = vpop.permute.xlu1 %3780 }
 0xa68   :  { %7658 = vmatprep.subr.msk.mxu1 %vm11902_vm0, %v3892_v9  ;;  %v3872_v18 = vsel %vm960_vm2, 0.0, %v3781_v14  ;;  %v3698_v14 = vld [vmem:[%s14351_s11 + $0x1b0] sm:$0xff] }
 0xa69   :  { %7659 = vmatpush3.msk.msra.mxu1 %vm11902_vm0, %v3876_v10  ;;  %8743 = vset.pattern.permute.xlu1 %v14684_v6  ;;  %v3889_v6 = vsel %vm960_vm2, 0.0, %v12169_v48  ;;  %v12322_v3 = vpop.permute.xlu0 %3987  ;;  %v3644_v48 = vld [vmem:[%s14351_s11] sm:$0xff] }
 0xa6a   :  { %7660 = vmatprep.subr.msk.mxu1 %vm11902_vm0, %v3891_v17  ;;  %v3705_v17 = vld [vmem:[%s14351_s11 + $0x1e8] sm:$0xff] }
 0xa6b   :  { %7661 = vmatpush3.msk.msra.mxu1 %vm11902_vm0, %v3875_v44  ;;  %v3779_v51 = vpop.permute.xlu1 %3778  ;;  %v4061_v44 = vsel %vm4031_vm5, %v12247_v4, 0.0  ;;  %v3704_v4 = vld [vmem:[%s14351_s11 + $0x1e0] sm:$0xff] }
 0xa6c   :  { %7662 = vmatprep.subr.msk.mxu1 %vm11902_vm0, %v3890_v46  ;;  %v3871_v54 = vsel %vm960_vm2, 0.0, %v3779_v51  ;;  %v4060_v51 = vsel %vm4031_vm5, %v12272_v38, 0.0  ;;  %v4059_v38 = vsel %vm4031_vm5, %v12295_v40, 0.0  ;;  %v3710_v40 = vld [vmem:[%s14351_s11 + $0x210] sm:$0xff] }
 0xa6d   :  { %7663 = vmatpush3.msk.msra.mxu1 %vm11902_vm0, %v3874_v24  ;;  %v12354_v5 = vpop.permute.xlu0 %3985 }
 0xa6e   :  { %7664 = vmatprep.subr.msk.mxu1 %vm11902_vm0, %v3889_v6 }
 0xa6f   :  { %7665 = vmatpush3.msk.msra.mxu1 %vm11902_vm0, %v3873_v61  ;;  %v3777_v12 = vpop.permute.xlu1 %3776  ;;  %v3711_v61 = vld [vmem:[%s14351_s11 + $0x218] sm:$0xff] }
 0xa70   :  { %7666 = vmatprep.subr.msk.mxu1 %vm11902_vm0, %v3888_v19  ;;  %v3870_v21 = vsel %vm960_vm2, 0.0, %v3777_v12 }
 0xa71   :  { %7667 = vmatpush3.msk.msra.mxu1 %vm11902_vm0, %v3872_v18  ;;  %v12366_v59 = vpop.permute.xlu0 %3983  ;;  %v4058_v18 = vsel %vm4031_vm5, %v12322_v3, 0.0  ;;  %v3716_v3 = vld [vmem:[%s14351_s11 + $0x240] sm:$0xff] }
 0xa72   :  { %7668 = vmatprep.subr.msk.mxu1 %vm11902_vm0, %v3887_v36 }
 0xa73   :  { %7669 = vmatpush3.msk.msra.mxu1 %vm11902_vm0, %v3871_v54  ;;  %v3775_v23 = vpop.permute.xlu1 %3774 }
 0xa74   :  { %7670 = vmatprep.subr.msk.mxu1 %vm11902_vm0, %v3886_v7  ;;  %v3869_v8 = vsel %vm960_vm2, 0.0, %v3775_v23  ;;  %v3717_v7 = vld [vmem:[%s14351_s11 + $0x248] sm:$0xff]  ;;  %v4057_v23 = vsel %vm4031_vm5, %v12354_v5, 0.0 }
 0xa75   :  { %7671 = vmatpush3.msk.msra.mxu1 %vm11902_vm0, %v3870_v21  ;;  %v12380_v32 = vpop.permute.xlu0 %3981 }
 0xa76   :  { %7672 = vmatprep.subr.msk.mxu1 %vm11902_vm0, %v3885_v22 }
 0xa77   :  { %7673 = vmatpush3.msk.msra.mxu1 %vm11902_vm0, %v3869_v8  ;;  %v3773_v30 = vpop.permute.xlu1 %3772 }
 0xa78   :  { %v3868_v27 = vsel %vm960_vm2, 0.0, %v3773_v30  ;;  %7674 = vmatprep.subr.msk.mxu1 %vm11902_vm0, %v3884_v37  ;;  %v4056_v37 = vsel %vm4031_vm5, %v12366_v59, 0.0  ;;  %v3728_v59 = vld [vmem:[%s14351_s11 + $0x2a0] sm:$0xff] }
 0xa79   :  { %7675 = vmatpush3.msk.msra.mxu1 %vm11902_vm0, %v3868_v27  ;;  %v12388_v53 = vpop.permute.xlu0 %3979 }
 0xa7a   :  { %4228 = vmatmul.mubr.f32.vlgmr.msra.gmra.mxu1 %v3644_v48  ;;  %7804 = vmatprep.subr.msk.mxu1 %vm12324_vm6, %v4063_v25  ;;  %v3723_v25 = vld [vmem:[%s14351_s11 + $0x278] sm:$0xff]  ;;  %v4055_v48 = vsel %vm4031_vm5, %v12380_v32, 0.0 }
 0xa7b   :  { %v3966_v58 = vpop.permute.xlu1 %3965  ;;  %4232 = vmatprep.mubr.f32.mxu1 %v3651_v11  ;;  %v4054_v11 = vsel %vm4031_vm5, %v12388_v53, 0.0 }
 0xa7c   :  { %v4047_v2 = vsel %vm4031_vm5, %v3966_v58, 0.0 }
 0xa7d   :  { %7805 = vmatpush3.msk.msra.mxu1 %vm12324_vm6, %v4047_v2  ;;  %v12402_v16 = vpop.permute.xlu0 %3977  ;;  %v3729_v2 = vld [vmem:[%s14351_s11 + $0x2a8] sm:$0xff] }
 0xa7e   :  { %4233 = vmatmul.mubr.f32.gmra.mxu1 %v3650_v26  ;;  %7806 = vmatprep.subr.msk.mxu1 %vm12324_vm6, %v4062_v1  ;;  %v3722_v1 = vld [vmem:[%s14351_s11 + $0x270] sm:$0xff]  ;;  %v4053_v5 = vsel %vm4031_vm5, %v12402_v16, 0.0 }
 0xa7f   :  { %v3962_v62 = vpop.permute.xlu1 %3961  ;;  %4237 = vmatprep.mubr.f32.mxu1 %v3657_v63  ;;  %v3654_v16 = vld [vmem:[%s14351_s11 + $0x50] sm:$0xff] }
 0xa80   :  { %v4045_v46 = vsel %vm4031_vm5, %v3962_v62, 0.0 }
 0xa81   :  { %v12410_v42 = vpop.permute.xlu0 %3975 }
 0xa82   :  { %4238 = vmatmul.mubr.f32.gmra.mxu1 %v3656_v49  ;;  %v4052_v49 = vsel %vm4031_vm5, %v12410_v42, 0.0 }
 0xa83   :  { %v3960_v50 = vpop.permute.xlu1 %3959  ;;  %4242 = vmatprep.mubr.f32.mxu1 %v3663_v33 }
 0xa84   :  { %v4044_v6 = vsel %vm4031_vm5, %v3960_v50, 0.0 }
 0xa85   :  { %v3974_v19 = vpop.permute.xlu0 %3973 }
 0xa86   :  { %4243 = vmatmul.mubr.f32.gmra.mxu1 %v3662_v39  ;;  %v3735_v39 = vld [vmem:[%s14351_s11 + $0x2d8] sm:$0xff] }
 0xa87   :  { %v3958_v28 = vpop.permute.xlu1 %3957  ;;  %4247 = vmatprep.mubr.f32.mxu1 %v3669_v56  ;;  %v4051_v56 = vsel %vm4031_vm5, %v3974_v19, 0.0 }
 0xa88   :  { %v4043_v12 = vsel %vm4031_vm5, %v3958_v28, 0.0 }
 0xa89   :  { %v3972_v22 = vpop.permute.xlu0 %3971 }
 0xa8a   :  { %4248 = vmatmul.mubr.f32.gmra.mxu1 %v3668_v34 }
 0xa8b   :  { %v3956_v41 = vpop.permute.xlu1 %3955  ;;  %4252 = vmatprep.mubr.f32.mxu1 %v3675_v29  ;;  %v4050_v29 = vsel %vm4031_vm5, %v3972_v22, 0.0  ;;  %v3696_v22 = vld [vmem:[%s14351_s11 + $0x1a0] sm:$0xff] }
 0xa8c   :  { %v4042_v54 = vsel %vm4031_vm5, %v3956_v41, 0.0  ;;  %v3734_v41 = vld [vmem:[%s14351_s11 + $0x2d0] sm:$0xff] }
 0xa8d   :  { %v3970_v63 = vpop.permute.xlu0 %3969 }
 0xa8e   :  { %4253 = vmatmul.mubr.f32.gmra.mxu1 %v3674_v0  ;;  %v4049_v53 = vsel %vm4031_vm5, %v3970_v63, 0.0  ;;  %v3739_v63 = vld [vmem:[%s14351_s11 + $0x2f8] sm:$0xff] }
 0xa8f   :  { %v3954_v43 = vpop.permute.xlu1 %3953  ;;  %4257 = vmatprep.mubr.f32.mxu1 %v3681_v45  ;;  %v3649_v45 = vld [vmem:[%s14351_s11 + $0x28] sm:$0xff] }
 0xa90   :  { %v4041_v21 = vsel %vm4031_vm5, %v3954_v43, 0.0 }
 0xa91   :  { %v3968_v34 = vpop.permute.xlu0 %3967 }
 0xa92   :  { %4258 = vmatmul.mubr.f32.gmra.mxu1 %v3680_v35  ;;  %v4048_v43 = vsel %vm4031_vm5, %v3968_v34, 0.0 }
 0xa93   :  { %v3952_v20 = vpop.permute.xlu1 %3951  ;;  %4262 = vmatprep.mubr.f32.mxu1 %v3687_v52 }
 0xa94   :  { %v4040_v30 = vsel %vm4031_vm5, %v3952_v20, 0.0  ;;  %v3648_v20 = vld [vmem:[%s14351_s11 + $0x20] sm:$0xff] }
 0xa96   :  { %4263 = vmatmul.mubr.f32.gmra.mxu1 %v3686_v31 }
 0xa97   :  { %v3950_v60 = vpop.permute.xlu1 %3949  ;;  %4267 = vmatprep.mubr.f32.mxu1 %v3693_v55  ;;  %v3655_v55 = vld [vmem:[%s14351_s11 + $0x58] sm:$0xff] }
 0xa98   :  { %v4039_v27 = vsel %vm4031_vm5, %v3950_v60, 0.0  ;;  %v3661_v60 = vld [vmem:[%s14351_s11 + $0x88] sm:$0xff] }
 0xa9a   :  { %4268 = vmatmul.mubr.f32.gmra.mxu1 %v3692_v57 }
 0xa9b   :  { %v3964_v9 = vpop.permute.xlu1 %3963  ;;  %4272 = vmatprep.mubr.f32.mxu1 %v3699_v13  ;;  %v3660_v13 = vld [vmem:[%s14351_s11 + $0x80] sm:$0xff] }
 0xa9c   :  { %v4046_v10 = vsel %vm4031_vm5, %v3964_v9, 0.0  ;;  %v3667_v9 = vld [vmem:[%s14351_s11 + $0xb8] sm:$0xff] }
 0xa9d   :  { %7807 = vmatpush3.msk.msra.mxu1 %vm12324_vm6, %v4046_v10 }
 0xa9e   :  { %4273 = vmatmul.mubr.f32.gmra.mxu1 %v3698_v14  ;;  %7808 = vmatprep.subr.msk.mxu1 %vm12324_vm6, %v4061_v44 }
 0xa9f   :  { %7809 = vmatpush3.msk.msra.mxu1 %vm12324_vm6, %v4045_v46  ;;  %v3948_v24 = vpop.permute.xlu1 %3947  ;;  %4277 = vmatprep.mubr.f32.mxu1 %v3705_v17  ;;  %v3666_v17 = vld [vmem:[%s14351_s11 + $0xb0] sm:$0xff]  ;;  %v3673_v46 = vld [vmem:[%s14351_s11 + $0xe8] sm:$0xff] }
 0xaa0   :  { %7810 = vmatprep.subr.msk.mxu1 %vm12324_vm6, %v4060_v51  ;;  %v4038_v26 = vsel %vm4031_vm5, %v3948_v24, 0.0 }
 0xaa1   :  { %7811 = vmatpush3.msk.msra.mxu1 %vm12324_vm6, %v4044_v6 }
 0xaa2   :  { %4278 = vmatmul.mubr.f32.gmra.mxu1 %v3704_v4  ;;  %7812 = vmatprep.subr.msk.mxu1 %vm12324_vm6, %v4059_v38  ;;  %v3672_v4 = vld [vmem:[%s14351_s11 + $0xe0] sm:$0xff] }
 0xaa3   :  { %7813 = vmatpush3.msk.msra.mxu1 %vm12324_vm6, %v4043_v12  ;;  %v3946_v36 = vpop.permute.xlu1 %3945  ;;  %4282 = vmatprep.mubr.f32.mxu1 %v3711_v61  ;;  %v3679_v61 = vld [vmem:[%s14351_s11 + $0x118] sm:$0xff]  ;;  %v3678_v12 = vld [vmem:[%s14351_s11 + $0x110] sm:$0xff] }
 0xaa4   :  { %7814 = vmatprep.subr.msk.mxu1 %vm12324_vm6, %v4058_v18  ;;  %v4037_v62 = vsel %vm4031_vm5, %v3946_v36, 0.0  ;;  %v3685_v36 = vld [vmem:[%s14351_s11 + $0x148] sm:$0xff] }
 0xaa5   :  { %7815 = vmatpush3.msk.msra.mxu1 %vm12324_vm6, %v4042_v54  ;;  %v3684_v54 = vld [vmem:[%s14351_s11 + $0x140] sm:$0xff] }
 0xaa6   :  { %4283 = vmatmul.mubr.f32.gmra.mxu1 %v3710_v40  ;;  %7816 = vmatprep.subr.msk.mxu1 %vm12324_vm6, %v4057_v23  ;;  %v3690_v23 = vld [vmem:[%s14351_s11 + $0x170] sm:$0xff] }
 0xaa7   :  { %7817 = vmatpush3.msk.msra.mxu1 %vm12324_vm6, %v4041_v21  ;;  %v3944_v8 = vpop.permute.xlu1 %3943  ;;  %4287 = vmatprep.mubr.f32.mxu1 %v3717_v7  ;;  %v3691_v7 = vld [vmem:[%s14351_s11 + $0x178] sm:$0xff]  ;;  %v3697_v21 = vld [vmem:[%s14351_s11 + $0x1a8] sm:$0xff] }
 0xaa8   :  { %7818 = vmatprep.subr.msk.mxu1 %vm12324_vm6, %v4056_v37  ;;  %v4036_v50 = vsel %vm4031_vm5, %v3944_v8, 0.0  ;;  %v3703_v37 = vld [vmem:[%s14351_s11 + $0x1d8] sm:$0xff]  ;;  %v3702_v8 = vld [vmem:[%s14351_s11 + $0x1d0] sm:$0xff] }
 0xaa9   :  { %7819 = vmatpush3.msk.msra.mxu1 %vm12324_vm6, %v4040_v30  ;;  %v3708_v30 = vld [vmem:[%s14351_s11 + $0x200] sm:$0xff] }
 0xaaa   :  { %4288 = vmatmul.mubr.f32.gmra.mxu1 %v3716_v3  ;;  %7820 = vmatprep.subr.msk.mxu1 %vm12324_vm6, %v4055_v48  ;;  %v3709_v3 = vld [vmem:[%s14351_s11 + $0x208] sm:$0xff]  ;;  %v3714_v48 = vld [vmem:[%s14351_s11 + $0x230] sm:$0xff] }
 0xaab   :  { %7821 = vmatpush3.msk.msra.mxu1 %vm12324_vm6, %v4039_v27  ;;  %v3942_v58 = vpop.permute.xlu1 %3941  ;;  %4292 = vmatprep.mubr.f32.mxu1 %v3723_v25  ;;  %v3715_v25 = vld [vmem:[%s14351_s11 + $0x238] sm:$0xff]  ;;  %v3721_v27 = vld [vmem:[%s14351_s11 + $0x268] sm:$0xff] }
 0xaac   :  { %7822 = vmatprep.subr.msk.mxu1 %vm12324_vm6, %v4054_v11  ;;  %v4035_v28 = vsel %vm4031_vm5, %v3942_v58, 0.0  ;;  %v3720_v11 = vld [vmem:[%s14351_s11 + $0x260] sm:$0xff]  ;;  %v3727_v58 = vld [vmem:[%s14351_s11 + $0x298] sm:$0xff] }
 0xaad   :  { %7823 = vmatpush3.msk.msra.mxu1 %vm12324_vm6, %v4038_v26  ;;  %v3733_v26 = vld [vmem:[%s14351_s11 + $0x2c8] sm:$0xff] }
 0xaae   :  { %4293 = vmatmul.mubr.f32.gmra.mxu1 %v3722_v1  ;;  %7824 = vmatprep.subr.msk.mxu1 %vm12324_vm6, %v4053_v5  ;;  %v3726_v1 = vld [vmem:[%s14351_s11 + $0x290] sm:$0xff] }
 0xaaf   :  { %7825 = vmatpush3.msk.msra.mxu1 %vm12324_vm6, %v4037_v62  ;;  %v3940_v33 = vpop.permute.xlu1 %3939  ;;  %4297 = vmatprep.mubr.f32.mxu1 %v3729_v2  ;;  %v3732_v2 = vld [vmem:[%s14351_s11 + $0x2c0] sm:$0xff]  ;;  %v3738_v5 = vld [vmem:[%s14351_s11 + $0x2f0] sm:$0xff]  ;;  %v12652_v62 = vpop.permute.xlu0 %4160 }
 0xab0   :  { %7826 = vmatprep.subr.msk.mxu1 %vm12324_vm6, %v4052_v49  ;;  %v4034_v0 = vsel %vm4031_vm5, %v3940_v33, 0.0 }
 0xab1   :  { %7827 = vmatpush3.msk.msra.mxu1 %vm12324_vm6, %v4036_v50 }
 0xab2   :  { %4298 = vmatmul.mubr.f32.gmra.mxu1 %v3728_v59  ;;  %7828 = vmatprep.subr.msk.mxu1 %vm12324_vm6, %v4051_v56 }
 0xab3   :  { %7829 = vmatpush3.msk.msra.mxu1 %vm12324_vm6, %v4035_v28  ;;  %v3938_v32 = vpop.permute.xlu1 %3937  ;;  %4302 = vmatprep.mubr.f32.mxu1 %v3735_v39  ;;  %v12656_v33 = vpop.permute.xlu0 %4148 }
 0xab4   :  { %7830 = vmatprep.subr.msk.mxu1 %vm12324_vm6, %v4050_v29  ;;  %v4033_v35 = vsel %vm4031_vm5, %v3938_v32, 0.0 }
 0xab5   :  { %7831 = vmatpush3.msk.msra.mxu1 %vm12324_vm6, %v4034_v0 }
 0xab6   :  { %4303 = vmatmul.mubr.f32.gmra.mxu1 %v3734_v41  ;;  %7832 = vmatprep.subr.msk.mxu1 %vm12324_vm6, %v4049_v53 }
 0xab7   :  { %7833 = vmatpush3.msk.msra.mxu1 %vm12324_vm6, %v4033_v35  ;;  %v3936_v52 = vpop.permute.xlu1 %3935  ;;  %4517 = vmatprep.mubr.f32.mxu1 %v3649_v45  ;;  %v12660_v50 = vpop.permute.xlu0 %4140 }
 0xab8   :  { %v4032_v31 = vsel %vm4031_vm5, %v3936_v52, 0.0  ;;  %7834 = vmatprep.subr.msk.mxu1 %vm12324_vm6, %v4048_v43  ;;  %v7756_v57 = vpop.f32.mrf.mxu0 }
 0xab9   :  { %7835 = vmatpush3.msk.msra.mxu1 %vm12324_vm6, %v4032_v31 }
 0xaba   :  { %4518 = vmatmul.mubr.f32.vlgmr.msra.gmra.mxu1 %v3648_v20  ;;  %v7757_v42 = vpop.f32.mrf.mxu0 }
 0xabb   :  { %4522 = vmatprep.mubr.f32.mxu1 %v3655_v55  ;;  %v12569_v14 = vadd.f32 %v7757_v42, %v7756_v57  ;;  %v12664_v56 = vpop.permute.xlu0 %4132 }
 0xabc   :  { %v7759_v10 = vpop.f32.mrf.mxu0 }
 0xabe   :  { %4523 = vmatmul.mubr.f32.gmra.mxu1 %v3654_v16  ;;  %v7760_v44 = vpop.f32.mrf.mxu0 }
 0xabf   :  { %4527 = vmatprep.mubr.f32.mxu1 %v3661_v60  ;;  %v12577_v51 = vadd.f32 %v7760_v44, %v7759_v10  ;;  %v12668_v34 = vpop.permute.xlu0 %4124 }
 0xac0   :  { %v7762_v24 = vpop.f32.mrf.mxu0 }
 0xac2   :  { %4528 = vmatmul.mubr.f32.gmra.mxu1 %v3660_v13  ;;  %v7763_v6 = vpop.f32.mrf.mxu0 }
 0xac3   :  { %4532 = vmatprep.mubr.f32.mxu1 %v3667_v9  ;;  %v12585_v19 = vadd.f32 %v7763_v6, %v7762_v24  ;;  %v12672_v32 = vpop.permute.xlu0 %4116 }
 0xac4   :  { %v7765_v38 = vpop.f32.mrf.mxu0  ;;  %v12654_v49 = vpop.permute.xlu1 %4156  ;;  %14689 = vst [vmem:[#allocation25_spill] sm:$0xff] %v12672_v32 }
 0xac6   :  { %4533 = vmatmul.mubr.f32.gmra.mxu1 %v3666_v17  ;;  %v7766_v18 = vpop.f32.mrf.mxu0 }
 0xac7   :  { %4537 = vmatprep.mubr.f32.mxu1 %v3673_v46  ;;  %v12593_v40 = vadd.f32 %v7766_v18, %v7765_v38  ;;  %v4109_v0 = vpop.permute.xlu0 %4108 }
 0xac8   :  { %v12658_v59 = vpop.permute.xlu1 %4152 }
 0xaca   :  { %4538 = vmatmul.mubr.f32.gmra.mxu1 %v3672_v4 }
 0xacb   :  { %4542 = vmatprep.mubr.f32.mxu1 %v3679_v61  ;;  %v4101_v35 = vpop.permute.xlu0 %4100 }
 0xacc   :  { %v12662_v39 = vpop.permute.xlu1 %4144 }
 0xace   :  { %4543 = vmatmul.mubr.f32.gmra.mxu1 %v3678_v12 }
 0xacf   :  { %4547 = vmatprep.mubr.f32.mxu1 %v3685_v36 }
 0xad0   :  { %v12666_v28 = vpop.permute.xlu1 %4136 }
 0xad2   :  { %4548 = vmatmul.mubr.f32.gmra.mxu1 %v3684_v54 }
 0xad3   :  { %4552 = vmatprep.mubr.f32.mxu1 %v3691_v7 }
 0xad4   :  { %v12670_v29 = vpop.permute.xlu1 %4128 }
 0xad5   :  { %14688 = vst [vmem:[#allocation4_spill] sm:$0xff] %v12670_v29 }
 0xad6   :  { %4553 = vmatmul.mubr.f32.gmra.mxu1 %v3690_v23 }
 0xad7   :  { %4557 = vmatprep.mubr.f32.mxu1 %v3697_v21 }
 0xad8   :  { %v12674_v41 = vpop.permute.xlu1 %4120 }
 0xad9   :  { %14690 = vst [vmem:[#allocation2_spill] sm:$0xff] %v12674_v41 }
 0xada   :  { %4558 = vmatmul.mubr.f32.gmra.mxu1 %v3696_v22  ;;  %v12694_v22 = vpop.f32.mrf.mxu0 }
 0xadb   :  { %4562 = vmatprep.mubr.f32.mxu1 %v3703_v37  ;;  %14693 = vst [vmem:[#allocation37_spill] sm:$0xff] %v12694_v22 }
 0xadc   :  { %v4113_v53 = vpop.permute.xlu1 %4112 }
 0xade   :  { %4563 = vmatmul.mubr.f32.gmra.mxu1 %v3702_v8 }
 0xadf   :  { %4567 = vmatprep.mubr.f32.mxu1 %v3709_v3  ;;  %v12698_v3 = vpop.f32.mrf.mxu0 }
 0xae0   :  { %v4105_v16 = vpop.permute.xlu1 %4104  ;;  %14695 = vst [vmem:[#allocation22_spill] sm:$0xff] %v12698_v3 }
 0xae2   :  { %4568 = vmatmul.mubr.f32.gmra.mxu1 %v3708_v30 }
 0xae3   :  { %4572 = vmatprep.mubr.f32.mxu1 %v3715_v25 }
 0xae6   :  { %4573 = vmatmul.mubr.f32.gmra.mxu1 %v3714_v48  ;;  %v12702_v48 = vpop.f32.mrf.mxu0 }
 0xae7   :  { %4577 = vmatprep.mubr.f32.mxu1 %v3721_v27  ;;  %14696 = vst [vmem:[#allocation40_spill] sm:$0xff] %v12702_v48 }
 0xaea   :  { %4578 = vmatmul.mubr.f32.gmra.mxu1 %v3720_v11 }
 0xaeb   :  { %4582 = vmatprep.mubr.f32.mxu1 %v3727_v58 }
 0xaee   :  { %4583 = vmatmul.mubr.f32.gmra.mxu1 %v3726_v1  ;;  %v12706_v1 = vpop.f32.mrf.mxu0 }
 0xaef   :  { %4587 = vmatprep.mubr.f32.mxu1 %v3733_v26  ;;  %14697 = vst [vmem:[#allocation10_spill] sm:$0xff] %v12706_v1 }
 0xaf2   :  { %4588 = vmatmul.mubr.f32.gmra.mxu1 %v3732_v2 }
 0xaf3   :  { %4592 = vmatprep.mubr.f32.mxu1 %v3739_v63 }
 0xaf6   :  { %4593 = vmatmul.mubr.f32.gmra.mxu1 %v3738_v5  ;;  %v12710_v5 = vpop.f32.mrf.mxu0 }
 0xb3a   :  { %v7676_v45 = vpop.f32.mrf.mxu1 }
 0xb3c   :  { %v7677_v43 = vpop.f32.mrf.mxu1 }
 0xb3d   :  { %v7678_v52 = vadd.f32 %v7677_v43, %v7676_v45  ;;  %v12714_v43 = vpop.f32.mrf.mxu0 }
 0xb3e   :  { %v7679_v20 = vpop.f32.mrf.mxu1 }
 0xb3f   :  { %v4230_v31 = vadd.f32 %v7678_v52, %v4101_v35 }
 0xb40   :  { %v7680_v55 = vpop.f32.mrf.mxu1 }
 0xb41   :  { %v12677_v60 = vadd.f32 %v12569_v14, %v4230_v31  ;;  %v7681_v57 = vadd.f32 %v7680_v55, %v7679_v20  ;;  %v12718_v31 = vpop.f32.mrf.mxu0 }
 0xb42   :  { %v7682_v13 = vpop.f32.mrf.mxu1  ;;  %14698 = vst [vmem:[#allocation9_spill] sm:$0xff] %v12718_v31 }
 0xb43   :  { %v4235_v42 = vadd.f32 %v7681_v57, %v4105_v16 }
 0xb44   :  { %v7683_v9 = vpop.f32.mrf.mxu1 }
 0xb45   :  { %v12680_v10 = vadd.f32 %v12577_v51, %v4235_v42  ;;  %v7684_v17 = vadd.f32 %v7683_v9, %v7682_v13  ;;  %v12722_v13 = vpop.f32.mrf.mxu0 }
 0xb46   :  { %v7685_v44 = vpop.f32.mrf.mxu1  ;;  %14699 = vst [vmem:[#allocation17_spill] sm:$0xff] %v12722_v13 }
 0xb47   :  { %v4240_v46 = vadd.f32 %v7684_v17, %v4109_v0  ;;  %v12724_v17 = vpop.f32.mrf.mxu0 }
 0xb48   :  { %v7686_v24 = vpop.f32.mrf.mxu1 }
 0xb49   :  { %v12683_v4 = vadd.f32 %v12585_v19, %v4240_v46  ;;  %v7687_v6 = vadd.f32 %v7686_v24, %v7685_v44  ;;  %v12726_v24 = vpop.f32.mrf.mxu0 }
 0xb4a   :  { %v7688_v61 = vpop.f32.mrf.mxu1 }
 0xb4b   :  { %v4245_v38 = vadd.f32 %v7687_v6, %v4113_v53 }
 0xb4c   :  { %v7689_v12 = vpop.f32.mrf.mxu1 }
 0xb4d   :  { %v12686_v14 = vadd.f32 %v12593_v40, %v4245_v38  ;;  %v12688_v18 = vadd.f32 %v7689_v12, %v7688_v61  ;;  %v12728_v12 = vpop.f32.mrf.mxu0 }
 0xb4e   :  { %v7691_v36 = vpop.f32.mrf.mxu1 }
 0xb4f   :  { %14691 = vst [vmem:[#allocation36_spill] sm:$0xff] %v12688_v18 }
 0xb50   :  { %v7692_v54 = vpop.f32.mrf.mxu1 }
 0xb51   :  { %v12690_v51 = vadd.f32 %v7692_v54, %v7691_v36 }
 0xb52   :  { %v7694_v7 = vpop.f32.mrf.mxu1 }
 0xb53   :  { %14692 = vst [vmem:[#allocation39_spill] sm:$0xff] %v12690_v51 }
 0xb54   :  { %v7695_v23 = vpop.f32.mrf.mxu1 }
 0xb55   :  { %v12692_v21 = vadd.f32 %v7695_v23, %v7694_v7 }
 0xb56   :  { %v7697_v19 = vpop.f32.mrf.mxu1 }
 0xb58   :  { %v7698_v37 = vpop.f32.mrf.mxu1 }
 0xb59   :  { %v12696_v8 = vadd.f32 %v7698_v37, %v7697_v19  ;;  %v12733_v19 = vpop.f32.mrf.mxu0 }
 0xb5a   :  { %v7700_v40 = vpop.f32.mrf.mxu1 }
 0xb5b   :  { %14694 = vst [vmem:[#allocation38_spill] sm:$0xff] %v12696_v8 }
 0xb5c   :  { %v7701_v30 = vpop.f32.mrf.mxu1 }
 0xb5d   :  { %v12700_v25 = vadd.f32 %v7701_v30, %v7700_v40 }
 0xb5e   :  { %v7703_v27 = vpop.f32.mrf.mxu1 }
 0xb60   :  { %v7704_v11 = vpop.f32.mrf.mxu1 }
 0xb61   :  { %v12704_v58 = vadd.f32 %v7704_v11, %v7703_v27  ;;  %v7786_v11 = vpop.f32.mrf.mxu0 }
 0xb62   :  { %v7706_v26 = vpop.f32.mrf.mxu1 }
 0xb64   :  { %v7707_v2 = vpop.f32.mrf.mxu1 }
 0xb65   :  { %v12708_v63 = vadd.f32 %v7707_v2, %v7706_v26 }
 0xb66   :  { %v7709_v0 = vpop.f32.mrf.mxu1 }
 0xb68   :  { %v7710_v45 = vpop.f32.mrf.mxu1 }
 0xb69   :  { %v12712_v53 = vadd.f32 %v7710_v45, %v7709_v0 }
 0xb6a   :  { %v7712_v35 = vpop.f32.mrf.mxu1 }
 0xb6c   :  { %v7713_v52 = vpop.f32.mrf.mxu1 }
 0xb6d   :  { %v12716_v20 = vadd.f32 %v7713_v52, %v7712_v35  ;;  %v7787_v35 = vpop.f32.mrf.mxu0 }
 0xb6e   :  { %v7715_v55 = vpop.f32.mrf.mxu1 }
 0xb6f   :  { %v4290_v8 = vadd.f32 %v12716_v20, %v12656_v33 }
 0xb70   :  { %v7716_v16 = vpop.f32.mrf.mxu1 }
 0xb71   :  { %v12720_v57 = vadd.f32 %v7716_v16, %v7715_v55  ;;  %v7789_v16 = vpop.f32.mrf.mxu0 }
 0xb72   :  { %v7718_v42 = vpop.f32.mrf.mxu1 }
 0xb74   :  { %v7719_v9 = vpop.f32.mrf.mxu1 }
 0xb75   :  { %v7720_v1 = vadd.f32 %v7719_v9, %v7718_v42 }
 0xb76   :  { %v7721_v44 = vpop.f32.mrf.mxu1 }
 0xb78   :  { %v7722_v46 = vpop.f32.mrf.mxu1 }
 0xb7a   :  { %v7836_v6 = vpop.f32.mrf.mxu1 }
 0xb7c   :  { %v7837_v61 = vpop.f32.mrf.mxu1 }
 0xb7d   :  { %v7838_v38 = vadd.f32 %v7837_v61, %v7836_v6  ;;  %v7790_v61 = vpop.f32.mrf.mxu0 }
 0xb7e   :  { %v7839_v36 = vpop.f32.mrf.mxu1 }
 0xb7f   :  { %v12731_v54 = vadd.f32 %v7838_v38, %v12677_v60 }
 0xb80   :  { %v7840_v7 = vpop.f32.mrf.mxu1 }
 0xb81   :  { %14700 = vst [vmem:[#allocation5_spill] sm:$0xff] %v12731_v54  ;;  %v7841_v23 = vadd.f32 %v7840_v7, %v7839_v36  ;;  %v7792_v36 = vpop.f32.mrf.mxu0 }
 0xb82   :  { %v7842_v37 = vpop.f32.mrf.mxu1 }
 0xb83   :  { %v12736_v40 = vadd.f32 %v7841_v23, %v12680_v10 }
 0xb84   :  { %v7843_v30 = vpop.f32.mrf.mxu1 }
 0xb85   :  { %14701 = vst [vmem:[#allocation34_spill] sm:$0xff] %v12736_v40  ;;  %v7844_v27 = vadd.f32 %v7843_v30, %v7842_v37  ;;  %v7793_v37 = vpop.f32.mrf.mxu0 }
 0xb86   :  { %v7845_v26 = vpop.f32.mrf.mxu1  ;;  %v7794_v29 = vadd.f32 %v7793_v37, %v7792_v36  ;;  %v14735_v37 = vld [vmem:[#allocation2_spill] sm:$0xff] }
 0xb87   :  { %v12739_v2 = vadd.f32 %v7844_v27, %v12683_v4  ;;  %v7795_v27 = vpop.f32.mrf.mxu0 }
 0xb88   :  { %v7846_v0 = vpop.f32.mrf.mxu1  ;;  %v4435_v33 = vadd.f32 %v7794_v29, %v4290_v8  ;;  %v7782_v29 = vadd.f32 %v12726_v24, %v12724_v17  ;;  %v4275_v8 = vadd.f32 %v12704_v58, %v12666_v28 }
 0xb89   :  { %14702 = vst [vmem:[#allocation18_spill] sm:$0xff] %v12739_v2  ;;  %v7847_v45 = vadd.f32 %v7846_v0, %v7845_v26 }
 0xb8a   :  { %v12741_v60 = vpop.f32.mrf.mxu1 }
 0xb8b   :  { %14703 = vst [vmem:[#allocation30_spill] sm:$0xff] %v12741_v60  ;;  %v12744_v52 = vadd.f32 %v7847_v45, %v12686_v14  ;;  %v7796_v45 = vpop.f32.mrf.mxu0 }
 0xb8c   :  { %v12746_v55 = vpop.f32.mrf.mxu1 }
 0xb8d   :  { %14704 = vst [vmem:[#allocation7_spill] sm:$0xff] %v12744_v52  ;;  %14705 = vst [vmem:[#allocation32_spill] sm:$0xff] %v12746_v55  ;;  %v7798_v40 = vpop.f32.mrf.mxu0  ;;  %v4300_v55 = vadd.f32 %v7720_v1, %v12654_v49  ;;  %v4295_v49 = vadd.f32 %v12720_v57, %v12658_v59  ;;  %v7797_v1 = vadd.f32 %v7796_v45, %v7795_v27  ;;  %v14737_v27 = vld [vmem:[#allocation40_spill] sm:$0xff] }
 0xb8e   :  { %v12748_v10 = vpop.f32.mrf.mxu1  ;;  %v4285_v59 = vadd.f32 %v12712_v53, %v12662_v39  ;;  %v7776_v53 = vadd.f32 %v12714_v43, %v12710_v5 }
 0xb8f   :  { %14706 = vst [vmem:[#allocation26_spill] sm:$0xff] %v12748_v10  ;;  %v7799_v2 = vpop.f32.mrf.mxu0 }
 0xb90   :  { %v12750_v6 = vpop.f32.mrf.mxu1  ;;  %v7800_v60 = vadd.f32 %v7799_v2, %v7798_v40  ;;  %v14724_v40 = vld [vmem:[#allocation17_spill] sm:$0xff]  ;;  %v14726_v2 = vld [vmem:[#allocation36_spill] sm:$0xff] }
 0xb91   :  { %14707 = vst [vmem:[#allocation33_spill] sm:$0xff] %v12750_v6  ;;  %v7801_v48 = vpop.f32.mrf.mxu0 }
 0xb92   :  { %v12752_v38 = vpop.f32.mrf.mxu1  ;;  %v4445_v18 = vadd.f32 %v7800_v60, %v4300_v55  ;;  %v14727_v60 = vld [vmem:[#allocation37_spill] sm:$0xff] }
 0xb93   :  { %14708 = vst [vmem:[#allocation28_spill] sm:$0xff] %v12752_v38 }
 0xb94   :  { %v12754_v4 = vpop.f32.mrf.mxu1  ;;  %v14733_v36 = vld [vmem:[#allocation32_spill] sm:$0xff] }
 0xb95   :  { %14709 = vst [vmem:[#allocation35_spill] sm:$0xff] %v12754_v4 }
 0xb96   :  { %v12756_v7 = vpop.f32.mrf.mxu1 }
 0xb97   :  { %14710 = vst [vmem:[#allocation13_spill] sm:$0xff] %v12756_v7  ;;  %v7802_v7 = vpop.f32.mrf.mxu0 }
 0xb98   :  { %v12758_v23 = vpop.f32.mrf.mxu1  ;;  %v7803_v13 = vadd.f32 %v7802_v7, %v7801_v48 }
 0xb99   :  { %14711 = vst [vmem:[#allocation20_spill] sm:$0xff] %v12758_v23  ;;  %v7723_v23 = vadd.f32 %v7722_v46, %v7721_v44 }
 0xb9a   :  { %v7860_v14 = vpop.f32.mrf.mxu1 }
 0xb9b   :  { %v4305_v32 = vadd.f32 %v7723_v23, %v12652_v62  ;;  %v4280_v62 = vadd.f32 %v12708_v63, %v12660_v50  ;;  %v4270_v50 = vadd.f32 %v12700_v25, %v12664_v56  ;;  %v7785_v63 = vadd.f32 %v12733_v19, %v12728_v12  ;;  %v14722_v19 = vld [vmem:[#allocation38_spill] sm:$0xff] }
 0xb9c   :  { %v7861_v30 = vpop.f32.mrf.mxu1  ;;  %v4260_v25 = vadd.f32 %v12692_v21, %v12668_v34  ;;  %v14719_v17 = vld [vmem:[#allocation35_spill] sm:$0xff]  ;;  %v14723_v21 = vld [vmem:[#allocation9_spill] sm:$0xff] }
 0xb9d   :  { %v4450_v44 = vadd.f32 %v7803_v13, %v4305_v32  ;;  %v4440_v32 = vadd.f32 %v7797_v1, %v4295_v49  ;;  %v7862_v39 = vadd.f32 %v7861_v30, %v7860_v14  ;;  %v4415_v57 = vadd.f32 %v7782_v29, %v4270_v50  ;;  %v14718_v13 = vld [vmem:[#allocation28_spill] sm:$0xff]  ;;  %v14736_v14 = vld [vmem:[#allocation39_spill] sm:$0xff]  ;;  %v14739_v49 = vld [vmem:[#allocation26_spill] sm:$0xff] }
 0xb9e   :  { %v12760_v26 = vpop.f32.mrf.mxu1  ;;  %v7856_v24 = vadd.f32 %v14719_v17, %v14718_v13  ;;  %v7779_v5 = vadd.f32 %v14724_v40, %v14723_v21  ;;  %v4420_v43 = vadd.f32 %v7785_v63, %v4275_v8  ;;  %v4255_v30 = vadd.f32 %v14736_v14, %v14735_v37  ;;  %v14740_v1 = vld [vmem:[#allocation33_spill] sm:$0xff]  ;;  %v4600_v50 = vld [vmem:[%s14352_s12 + $0x10] sm:$0xff]  ;;  %v12930_v8 = vld [vmem:[%s14349_s14 + $0x48] sm:$0xff] }
 0xb9f   :  { %v12813_v12 = vadd.f32 %v7862_v39, %v4415_v57  ;;  %8580 = vmatprep.mubr.f32.mxu1 %v4600_v50  ;;  %v12906_v29 = vld [vmem:[%s14349_s14 + $0x70] sm:$0xff]  ;;  %v12924_v39 = vld [vmem:[%s14349_s14 + $0x68] sm:$0xff]  ;;  %v12936_v63 = vld [vmem:[%s14349_s14 + $0x60] sm:$0xff] }
 0xba0   :  { %v12762_v0 = vpop.f32.mrf.mxu1  ;;  %14748 = vst [vmem:[#allocation11_spill] sm:$0xff] %v12906_v29  ;;  %14751 = vst [vmem:[#allocation35_spill] sm:$0xff] %v12924_v39  ;;  %v12960_v57 = vld [vmem:[%s14349_s14 + $0x40] sm:$0xff]  ;;  %v12972_v13 = vld [vmem:[%s14349_s14 + $0x30] sm:$0xff] }
 0xba1   :  { %v7865_v28 = vadd.f32 %v12762_v0, %v12760_v26  ;;  %14720 = vst [vmem:[#allocation15_spill] sm:$0xff] %v12813_v12  ;;  %v14738_v26 = vld [vmem:[#allocation10_spill] sm:$0xff]  ;;  %14753 = vst [vmem:[#allocation38_spill] sm:$0xff] %v12936_v63  ;;  %v12978_v17 = vld [vmem:[%s14349_s14 + $0x8] sm:$0xff] }
 0xba2   :  { %v7866_v47 = vpop.f32.mrf.mxu1  ;;  %v7773_v0 = vadd.f32 %v14738_v26, %v14737_v27  ;;  %14757 = vst [vmem:[#allocation36_spill] sm:$0xff] %v12960_v57 }
 0xba4   :  { %v7867_v15 = vpop.f32.mrf.mxu1 }
 0xba6   :  { %v7869_v54 = vpop.f32.mrf.mxu1 }
 0xba8   :  { %v7870_v52 = vpop.f32.mrf.mxu1 }
 0xbaa   :  { %v7872_v6 = vpop.f32.mrf.mxu1 }
 0xbac   :  { %v7873_v10 = vpop.f32.mrf.mxu1 }
 0xbad   :  { %v7874_v4 = vadd.f32 %v7873_v10, %v7872_v6  ;;  %v14729_v10 = vld [vmem:[#allocation13_spill] sm:$0xff]  ;;  %v14730_v6 = vld [vmem:[#allocation20_spill] sm:$0xff] }
 0xbae   :  { %v7875_v51 = vpop.f32.mrf.mxu1  ;;  %14760 = vst [vmem:[#allocation13_spill] sm:$0xff] %v12978_v17 }
 0xbaf   :  { %v12778_v20 = vadd.f32 %v7874_v4, %v4435_v33  ;;  %v14732_v4 = vld [vmem:[#allocation30_spill] sm:$0xff] }
 0xbb0   :  { %v7876_v41 = vpop.f32.mrf.mxu1  ;;  %v7850_v7 = vadd.f32 %v14733_v36, %v14732_v4 }
 0xbb1   :  { %14714 = vst [vmem:[#allocation29_spill] sm:$0xff] %v12778_v20 }
 0xbb2   :  { %v7878_v3 = vpop.f32.mrf.mxu1 }
 0xbb4   :  { %v7879_v22 = vpop.f32.mrf.mxu1 }
 0xbb5   :  { %v7880_v31 = vadd.f32 %v7879_v22, %v7878_v3  ;;  %v7788_v22 = vadd.f32 %v7787_v35, %v7786_v11  ;;  %v7877_v3 = vadd.f32 %v7876_v41, %v7875_v51  ;;  %v14725_v11 = vld [vmem:[#allocation25_spill] sm:$0xff] }
 0xbb6   :  { %v7881_v42 = vpop.f32.mrf.mxu1  ;;  %v4250_v35 = vadd.f32 %v14726_v2, %v14725_v11 }
 0xbb7   :  { %v12768_v9 = vadd.f32 %v7880_v31, %v4445_v18  ;;  %v7868_v18 = vadd.f32 %v7867_v15, %v7866_v47  ;;  %v7791_v31 = vadd.f32 %v7790_v61, %v7789_v16  ;;  %v4425_v41 = vadd.f32 %v7788_v22, %v4280_v62 }
 0xbb8   :  { %v7882_v38 = vpop.f32.mrf.mxu1  ;;  %v7871_v15 = vadd.f32 %v7870_v52, %v7869_v54  ;;  %v12791_v47 = vadd.f32 %v7877_v3, %v4440_v32  ;;  %v14721_v54 = vld [vmem:[#allocation4_spill] sm:$0xff]  ;;  %v14728_v52 = vld [vmem:[#allocation22_spill] sm:$0xff]  ;;  %v4405_v16 = vadd.f32 %v7776_v53, %v4260_v25  ;;  %v7859_v61 = vadd.f32 %v14730_v6, %v14729_v10  ;;  %v4599_v3 = vld [vmem:[%s14352_s12 + $0x8] sm:$0xff] }
 0xbb9   :  { %14712 = vst [vmem:[#allocation24_spill] sm:$0xff] %v12768_v9  ;;  %v7883_v46 = vadd.f32 %v7882_v38, %v7881_v42  ;;  %4690 = vrot.lane.b32.xlu0 %v12768_v9, %s8787_s2  ;;  %v12793_v51 = vadd.f32 %v7868_v18, %v4425_v41  ;;  %v4430_v56 = vadd.f32 %v7791_v31, %v4285_v59  ;;  %v14744_v18 = vld [vmem:[#allocation18_spill] sm:$0xff]  ;;  %v14745_v59 = vld [vmem:[#allocation7_spill] sm:$0xff]  ;;  %v14746_v31 = vld [vmem:[#allocation5_spill] sm:$0xff] }
 0xbba   :  { %14715 = vst [vmem:[#allocation6_spill] sm:$0xff] %v12791_v47  ;;  %v4265_v34 = vadd.f32 %v14722_v19, %v14721_v54  ;;  %v7770_v55 = vadd.f32 %v14728_v52, %v14727_v60  ;;  %v12829_v38 = vadd.f32 %v7865_v28, %v4420_v43  ;;  %v12833_v23 = vadd.f32 %v7856_v24, %v4405_v16  ;;  %v14747_v32 = vld [vmem:[#allocation34_spill] sm:$0xff]  ;;  %v12912_v41 = vld [vmem:[%s14349_s14 + $0x78] sm:$0xff]  ;;  %v12948_v25 = vld [vmem:[%s14349_s14 + $0x50] sm:$0xff] }
 0xbbb   :  { %v12776_v48 = vadd.f32 %v7883_v46, %v4450_v44  ;;  %14716 = vst [vmem:[#allocation27_spill] sm:$0xff] %v12793_v51  ;;  %v12809_v58 = vadd.f32 %v7871_v15, %v4430_v56  ;;  %v7853_v44 = vadd.f32 %v14740_v1, %v14739_v49  ;;  %v4400_v22 = vadd.f32 %v7773_v0, %v4255_v30  ;;  %v12918_v15 = vld [vmem:[%s14349_s14 + $0x58] sm:$0xff]  ;;  %v12954_v53 = vld [vmem:[%s14349_s14 + $0x28] sm:$0xff]  ;;  %v12984_v24 = vld [vmem:[%s14349_s14 + $0x20] sm:$0xff] }
 0xbbc   :  { %14731 = vst [vmem:[#allocation16_spill] sm:$0xff] %v12829_v38  ;;  %14734 = vst [vmem:[#allocation19_spill] sm:$0xff] %v12833_v23  ;;  %v4410_v45 = vadd.f32 %v7779_v5, %v4265_v34  ;;  %v4395_v42 = vadd.f32 %v7770_v55, %v4250_v35  ;;  %4950 = vmatprep.mubr.f32.mxu0 %v4599_v3  ;;  %v12942_v56 = vld [vmem:[%s14349_s14 + $0x38] sm:$0xff]  ;;  %v14762_v54 = vmov 4   ;;  %v12991_v19 = vld [vmem:[%s14349_s14 + $0x10] sm:$0xff] }
 0xbbd   :  { %14713 = vst [vmem:[#allocation41_spill] sm:$0xff] %v12776_v48  ;;  %4692 = vrot.lane.b32.xlu1 %v12776_v48, %s8787_s2  ;;  %7884 = vmatprep.subr.mxu0 %v12776_v48  ;;  %14717 = vst [vmem:[#allocation23_spill] sm:$0xff] %v12809_v58  ;;  %v12853_v33 = vadd.f32 %v7853_v44, %v4400_v22  ;;  %v12966_v28 = vld [vmem:[%s14349_s14 + $0x18] sm:$0xff]  ;;  %v12997_v34 = vld [vmem:[%s14349_s14] sm:$0xff] }
 0xbbe   :  { %4686 = vrot.lane.b32.xlu0 %v12778_v20, %s8787_s2  ;;  %v12845_v46 = vadd.f32 %v7859_v61, %v4410_v45  ;;  %v12847_v62 = vadd.f32 %v7850_v7, %v4395_v42  ;;  %14749 = vst [vmem:[#allocation3_spill] sm:$0xff] %v12912_v41  ;;  %14750 = vst [vmem:[#allocation28_spill] sm:$0xff] %v12918_v15 }
 0xbbf   :  { %14743 = vst [vmem:[#allocation31_spill] sm:$0xff] %v12853_v33  ;;  %14752 = vst [vmem:[#allocation4_spill] sm:$0xff] %v12930_v8 }
 0xbc0   :  { %14741 = vst [vmem:[#allocation21_spill] sm:$0xff] %v12845_v46  ;;  %14742 = vst [vmem:[#allocation12_spill] sm:$0xff] %v12847_v62 }
 0xbc1   :  { %4688 = vrot.lane.b32.xlu1 %v12791_v47, %s8787_s2  ;;  %14754 = vst [vmem:[#allocation9_spill] sm:$0xff] %v12942_v56  ;;  %14755 = vst [vmem:[#allocation17_spill] sm:$0xff] %v12948_v25 }
 0xbc2   :  { %4682 = vrot.lane.b32.xlu0 %v12793_v51, %s8787_s2  ;;  %14756 = vst [vmem:[#allocation25_spill] sm:$0xff] %v12954_v53  ;;  %14758 = vst [vmem:[#allocation37_spill] sm:$0xff] %v12966_v28 }
 0xbc3   :  { %14759 = vst [vmem:[#allocation22_spill] sm:$0xff] %v12972_v13  ;;  %14761 = vst [vmem:[#allocation20_spill] sm:$0xff] %v12984_v24 }
 0xbc4   :  { %14763 = vst [vmem:[#allocation30_spill] sm:$0xff] %v12991_v19  ;;  %14764 = vst [vmem:[#allocation32_spill] sm:$0xff] %v12997_v34 }
 0xbc5   :  { %4684 = vrot.lane.b32.xlu1 %v12809_v58, %s8787_s2 }
 0xbc6   :  { %4678 = vrot.lane.b32.xlu0 %v12813_v12, %s8787_s2 }
 0xbc9   :  { %4680 = vrot.lane.b32.xlu1 %v12829_v38, %s8787_s2 }
 0xbca   :  { %4674 = vrot.lane.b32.xlu0 %v12833_v23, %s8787_s2 }
 0xbcd   :  { %4676 = vrot.lane.b32.xlu1 %v12845_v46, %s8787_s2 }
 0xbce   :  { %4670 = vrot.lane.b32.xlu0 %v12847_v62, %s8787_s2 }
 0xbd1   :  { %4672 = vrot.lane.b32.xlu1 %v12853_v33, %s8787_s2 }
 0xbd2   :  { %4666 = vrot.lane.b32.xlu0 %v14744_v18, %s8787_s2 }
 0xbd5   :  { %4668 = vrot.lane.b32.xlu1 %v14745_v59, %s8787_s2 }
 0xbd6   :  { %4662 = vrot.lane.b32.xlu0 %v14746_v31, %s8787_s2 }
 0xbd9   :  { %4664 = vrot.lane.b32.xlu1 %v14747_v32, %s8787_s2 }
 0xbda   :  { %4770 = vrot.lane.b32.xlu0 %v12768_v9, %s8788_s21 }
 0xbdd   :  { %4772 = vrot.lane.b32.xlu1 %v12776_v48, %s8788_s21 }
 0xbde   :  { %4766 = vrot.lane.b32.xlu0 %v12778_v20, %s8788_s21 }
 0xbe1   :  { %4768 = vrot.lane.b32.xlu1 %v12791_v47, %s8788_s21 }
 0xbe2   :  { %4762 = vrot.lane.b32.xlu0 %v12793_v51, %s8788_s21 }
 0xbe5   :  { %4764 = vrot.lane.b32.xlu1 %v12809_v58, %s8788_s21 }
 0xbe6   :  { %4758 = vrot.lane.b32.xlu0 %v12813_v12, %s8788_s21 }
 0xbe9   :  { %4760 = vrot.lane.b32.xlu1 %v12829_v38, %s8788_s21 }
 0xbea   :  { %4754 = vrot.lane.b32.xlu0 %v12833_v23, %s8788_s21 }
 0xbed   :  { %4756 = vrot.lane.b32.xlu1 %v12845_v46, %s8788_s21 }
 0xbee   :  { %4750 = vrot.lane.b32.xlu0 %v12847_v62, %s8788_s21 }
 0xbf1   :  { %4752 = vrot.lane.b32.xlu1 %v12853_v33, %s8788_s21 }
 0xbf2   :  { %4746 = vrot.lane.b32.xlu0 %v14744_v18, %s8788_s21 }
 0xbf5   :  { %4748 = vrot.lane.b32.xlu1 %v14745_v59, %s8788_s21 }
 0xbf6   :  { %4742 = vrot.lane.b32.xlu0 %v14746_v31, %s8788_s21 }
 0xbf9   :  { %4744 = vrot.lane.b32.xlu1 %v14747_v32, %s8788_s21 }
 0xbfa   :  { %4879 = vperm.xlu0 %8744, %v12906_v29  }
 0xbfd   :  { %4883 = vperm.xlu1 %8743, %v12912_v41  }
 0xbfe   :  { %4867 = vperm.xlu0 %8744, %v12918_v15  }
 0xc01   :  { %4875 = vperm.xlu1 %8743, %v12924_v39  }
 0xc02   :  { %4859 = vperm.xlu0 %8744, %v12930_v8  }
 0xc05   :  { %4871 = vperm.xlu1 %8743, %v12936_v63  }
 0xc06   :  { %4851 = vperm.xlu0 %8744, %v12942_v56  }
 0xc09   :  { %4863 = vperm.xlu1 %8743, %v12948_v25  }
 0xc0a   :  { %4843 = vperm.xlu0 %8744, %v12954_v53  }
 0xc0d   :  { %4855 = vperm.xlu1 %8743, %v12960_v57  }
 0xc0e   :  { %4835 = vperm.xlu0 %8744, %v12966_v28  }
 0xc11   :  { %4847 = vperm.xlu1 %8743, %v12972_v13  }
 0xc12   :  { %4827 = vperm.xlu0 %8744, %v12978_v17  }
 0xc15   :  { %4839 = vperm.xlu1 %8743, %v12984_v24  }
 0xc16   :  { %8745 = vset.pattern.permute.xlu0 %v14762_v54 }
 0xc19   :  { %4831 = vperm.xlu1 %8743, %v12991_v19  }
 0xc1d   :  { %4823 = vperm.xlu1 %8743, %v12997_v34  }
 0xc21   :  { %8746 = vset.pattern.permute.xlu1 %v14762_v54 }
 0xc2b   :  { %v4691_v21 = vpop.permute.xlu0 %4690 }
 0xc2c   :  { %v4724_v2 = vsel %vm960_vm2, 0.0, %v4691_v21 }
 0xc2f   :  { %v4693_v40 = vpop.permute.xlu1 %4692 }
 0xc30   :  { %v4687_v5 = vpop.permute.xlu0 %4686  ;;  %v4725_v43 = vsel %vm960_vm2, 0.0, %v4693_v40  ;;  %v4598_v40 = vld [vmem:[%s14352_s12] sm:$0xff] }
 0xc31   :  { %7885 = vmatpush3.msk.msra.mxu0 %vm11902_vm0, %v4725_v43  ;;  %v4722_v55 = vsel %vm960_vm2, 0.0, %v4687_v5  ;;  %v4602_v43 = vld [vmem:[%s14352_s12 + $0x20] sm:$0xff] }
 0xc32   :  { %7886 = vmatprep.subr.mxu0 %v12768_v9 }
 0xc33   :  { %7887 = vmatpush3.msk.msra.mxu0 %vm11902_vm0, %v4724_v2  ;;  %v4689_v35 = vpop.permute.xlu1 %4688 }
 0xc34   :  { %v4683_v60 = vpop.permute.xlu0 %4682  ;;  %v4723_v52 = vsel %vm960_vm2, 0.0, %v4689_v35  ;;  %7888 = vmatprep.subr.mxu0 %v12791_v47 }
 0xc35   :  { %7889 = vmatpush3.msk.msra.mxu0 %vm11902_vm0, %v4723_v52  ;;  %v4720_v61 = vsel %vm960_vm2, 0.0, %v4683_v60 }
 0xc36   :  { %7890 = vmatprep.subr.mxu0 %v12778_v20 }
 0xc37   :  { %7891 = vmatpush3.msk.msra.mxu0 %vm11902_vm0, %v4722_v55  ;;  %v4685_v16 = vpop.permute.xlu1 %4684  ;;  %v4601_v55 = vld [vmem:[%s14352_s12 + $0x18] sm:$0xff] }
 0xc38   :  { %v4679_v10 = vpop.permute.xlu0 %4678  ;;  %v4721_v6 = vsel %vm960_vm2, 0.0, %v4685_v16  ;;  %7892 = vmatprep.subr.mxu0 %v12809_v58 }
 0xc39   :  { %7893 = vmatpush3.msk.msra.mxu0 %vm11902_vm0, %v4721_v6  ;;  %v4718_v37 = vsel %vm960_vm2, 0.0, %v4679_v10  ;;  %v4605_v10 = vld [vmem:[%s14352_s12 + $0x38] sm:$0xff] }
 0xc3a   :  { %7894 = vmatprep.subr.mxu0 %v12793_v51 }
 0xc3b   :  { %7895 = vmatpush3.msk.msra.mxu0 %vm11902_vm0, %v4720_v61  ;;  %v4681_v4 = vpop.permute.xlu1 %4680 }
 0xc3c   :  { %v4675_v36 = vpop.permute.xlu0 %4674  ;;  %v4719_v7 = vsel %vm960_vm2, 0.0, %v4681_v4  ;;  %7896 = vmatprep.subr.mxu0 %v12829_v38 }
 0xc3d   :  { %7897 = vmatpush3.msk.msra.mxu0 %vm11902_vm0, %v4719_v7  ;;  %v4716_v26 = vsel %vm960_vm2, 0.0, %v4675_v36  ;;  %v4604_v36 = vld [vmem:[%s14352_s12 + $0x30] sm:$0xff] }
 0xc3e   :  { %7898 = vmatprep.subr.mxu0 %v12813_v12 }
 0xc3f   :  { %7899 = vmatpush3.msk.msra.mxu0 %vm11902_vm0, %v4718_v37  ;;  %v4677_v14 = vpop.permute.xlu1 %4676  ;;  %v4608_v37 = vld [vmem:[%s14352_s12 + $0x50] sm:$0xff] }
 0xc40   :  { %v4671_v30 = vpop.permute.xlu0 %4670  ;;  %v4717_v27 = vsel %vm960_vm2, 0.0, %v4677_v14  ;;  %7900 = vmatprep.subr.mxu0 %v12845_v46 }
 0xc41   :  { %7901 = vmatpush3.msk.msra.mxu0 %vm11902_vm0, %v4717_v27  ;;  %v4714_v49 = vsel %vm960_vm2, 0.0, %v4671_v30 }
 0xc42   :  { %7902 = vmatprep.subr.mxu0 %v12833_v23 }
 0xc43   :  { %7903 = vmatpush3.msk.msra.mxu0 %vm11902_vm0, %v4716_v26  ;;  %v4673_v0 = vpop.permute.xlu1 %4672  ;;  %v4607_v26 = vld [vmem:[%s14352_s12 + $0x48] sm:$0xff] }
 0xc44   :  { %v4667_v45 = vpop.permute.xlu0 %4666  ;;  %v4715_v42 = vsel %vm960_vm2, 0.0, %v4673_v0  ;;  %7904 = vmatprep.subr.mxu0 %v12853_v33 }
 0xc45   :  { %7905 = vmatpush3.msk.msra.mxu0 %vm11902_vm0, %v4715_v42  ;;  %v4712_v3 = vsel %vm960_vm2, 0.0, %v4667_v45  ;;  %v4611_v45 = vld [vmem:[%s14352_s12 + $0x68] sm:$0xff] }
 0xc46   :  { %7906 = vmatprep.subr.mxu0 %v12847_v62 }
 0xc47   :  { %7907 = vmatpush3.msk.msra.mxu0 %vm11902_vm0, %v4714_v49  ;;  %v4669_v1 = vpop.permute.xlu1 %4668 }
 0xc48   :  { %v4663_v44 = vpop.permute.xlu0 %4662  ;;  %v4713_v22 = vsel %vm960_vm2, 0.0, %v4669_v1  ;;  %7908 = vmatprep.subr.mxu0 %v14745_v59 }
 0xc49   :  { %7909 = vmatpush3.msk.msra.mxu0 %vm11902_vm0, %v4713_v22  ;;  %v4710_v5 = vsel %vm960_vm2, 0.0, %v4663_v44  ;;  %v4610_v44 = vld [vmem:[%s14352_s12 + $0x60] sm:$0xff] }
 0xc4a   :  { %7910 = vmatprep.subr.mxu0 %v14744_v18 }
 0xc4b   :  { %7911 = vmatpush3.msk.msra.mxu0 %vm11902_vm0, %v4712_v3  ;;  %v4665_v50 = vpop.permute.xlu1 %4664  ;;  %v4614_v3 = vld [vmem:[%s14352_s12 + $0x80] sm:$0xff] }
 0xc4c   :  { %v4771_v54 = vpop.permute.xlu0 %4770  ;;  %v4711_v21 = vsel %vm960_vm2, 0.0, %v4665_v50  ;;  %7912 = vmatprep.subr.mxu0 %v14747_v32 }
 0xc4d   :  { %7913 = vmatpush3.msk.msra.mxu0 %vm11902_vm0, %v4711_v21  ;;  %v4804_v16 = vsel %vm4031_vm5, %v4771_v54, 0.0 }
 0xc4e   :  { %7914 = vmatprep.subr.mxu0 %v14746_v31 }
 0xc4f   :  { %7915 = vmatpush3.msk.msra.mxu0 %vm11902_vm0, %v4710_v5  ;;  %v4773_v2 = vpop.permute.xlu1 %4772 }
 0xc50   :  { %v4767_v35 = vpop.permute.xlu0 %4766  ;;  %v4805_v60 = vsel %vm4031_vm5, %v4773_v2, 0.0  ;;  %4951 = vmatmul.mubr.f32.vlgmr.msra.gmra.mxu0 %v4598_v40  ;;  %v4613_v40 = vld [vmem:[%s14352_s12 + $0x78] sm:$0xff] }
 0xc51   :  { %8548 = vmatprep.subr.msk.mxu1 %vm12324_vm6, %v4805_v60  ;;  %4955 = vmatprep.mubr.f32.mxu0 %v4602_v43  ;;  %v4802_v7 = vsel %vm4031_vm5, %v4767_v35, 0.0  ;;  %v4617_v43 = vld [vmem:[%s14352_s12 + $0x98] sm:$0xff] }
 0xc52   :  { %8549 = vmatpush3.msk.msra.mxu1 %vm12324_vm6, %v4805_v60 }
 0xc53   :  { %8550 = vmatprep.subr.msk.mxu1 %vm12324_vm6, %v4804_v16  ;;  %v4769_v6 = vpop.permute.xlu1 %4768 }
 0xc54   :  { %v4763_v61 = vpop.permute.xlu0 %4762  ;;  %v4803_v4 = vsel %vm4031_vm5, %v4769_v6, 0.0  ;;  %4956 = vmatmul.mubr.f32.gmra.mxu0 %v4601_v55  ;;  %8551 = vmatpush3.msk.msra.mxu1 %vm12324_vm6, %v4804_v16  ;;  %v4616_v55 = vld [vmem:[%s14352_s12 + $0x90] sm:$0xff] }
 0xc55   :  { %8552 = vmatprep.subr.msk.mxu1 %vm12324_vm6, %v4803_v4  ;;  %4960 = vmatprep.mubr.f32.mxu0 %v4605_v10  ;;  %v4800_v0 = vsel %vm4031_vm5, %v4763_v61, 0.0  ;;  %v4620_v10 = vld [vmem:[%s14352_s12 + $0xb0] sm:$0xff] }
 0xc56   :  { %8553 = vmatpush3.msk.msra.mxu1 %vm12324_vm6, %v4803_v4  ;;  %v4619_v4 = vld [vmem:[%s14352_s12 + $0xa8] sm:$0xff] }
 0xc57   :  { %8554 = vmatprep.subr.msk.mxu1 %vm12324_vm6, %v4802_v7  ;;  %v4765_v14 = vpop.permute.xlu1 %4764 }
 0xc58   :  { %v4759_v30 = vpop.permute.xlu0 %4758  ;;  %v4801_v27 = vsel %vm4031_vm5, %v4765_v14, 0.0  ;;  %4961 = vmatmul.mubr.f32.gmra.mxu0 %v4604_v36  ;;  %8555 = vmatpush3.msk.msra.mxu1 %vm12324_vm6, %v4802_v7  ;;  %v4623_v7 = vld [vmem:[%s14352_s12 + $0xc8] sm:$0xff] }
 0xc59   :  { %8556 = vmatprep.subr.msk.mxu1 %vm12324_vm6, %v4801_v27  ;;  %4965 = vmatprep.mubr.f32.mxu0 %v4608_v37  ;;  %v4798_v22 = vsel %vm4031_vm5, %v4759_v30, 0.0 }
 0xc5a   :  { %8557 = vmatpush3.msk.msra.mxu1 %vm12324_vm6, %v4801_v27  ;;  %v4622_v27 = vld [vmem:[%s14352_s12 + $0xc0] sm:$0xff] }
 0xc5b   :  { %8558 = vmatprep.subr.msk.mxu1 %vm12324_vm6, %v4800_v0  ;;  %v4761_v42 = vpop.permute.xlu1 %4760 }
 0xc5c   :  { %v4755_v49 = vpop.permute.xlu0 %4754  ;;  %v4799_v1 = vsel %vm4031_vm5, %v4761_v42, 0.0  ;;  %4966 = vmatmul.mubr.f32.gmra.mxu0 %v4607_v26  ;;  %8559 = vmatpush3.msk.msra.mxu1 %vm12324_vm6, %v4800_v0  ;;  %v4603_v0 = vld [vmem:[%s14352_s12 + $0x28] sm:$0xff]  ;;  %v4606_v42 = vld [vmem:[%s14352_s12 + $0x40] sm:$0xff] }
 0xc5d   :  { %8560 = vmatprep.subr.msk.mxu1 %vm12324_vm6, %v4799_v1  ;;  %4970 = vmatprep.mubr.f32.mxu0 %v4611_v45  ;;  %v4796_v5 = vsel %vm4031_vm5, %v4755_v49, 0.0  ;;  %v4626_v45 = vld [vmem:[%s14352_s12 + $0xe0] sm:$0xff]  ;;  %v4625_v49 = vld [vmem:[%s14352_s12 + $0xd8] sm:$0xff] }
 0xc5e   :  { %8561 = vmatpush3.msk.msra.mxu1 %vm12324_vm6, %v4799_v1  ;;  %v4609_v1 = vld [vmem:[%s14352_s12 + $0x58] sm:$0xff] }
 0xc5f   :  { %8562 = vmatprep.subr.msk.mxu1 %vm12324_vm6, %v4798_v22  ;;  %v4757_v50 = vpop.permute.xlu1 %4756 }
 0xc60   :  { %v4751_v54 = vpop.permute.xlu0 %4750  ;;  %v4797_v21 = vsel %vm4031_vm5, %v4757_v50, 0.0  ;;  %4971 = vmatmul.mubr.f32.gmra.mxu0 %v4610_v44  ;;  %8563 = vmatpush3.msk.msra.mxu1 %vm12324_vm6, %v4798_v22  ;;  %v4629_v44 = vld [vmem:[%s14352_s12 + $0xf8] sm:$0xff]  ;;  %v4612_v22 = vld [vmem:[%s14352_s12 + $0x70] sm:$0xff]  ;;  %v4615_v50 = vld [vmem:[%s14352_s12 + $0x88] sm:$0xff] }
 0xc61   :  { %8564 = vmatprep.subr.msk.mxu1 %vm12324_vm6, %v4797_v21  ;;  %4975 = vmatprep.mubr.f32.mxu0 %v4614_v3  ;;  %v4794_v16 = vsel %vm4031_vm5, %v4751_v54, 0.0  ;;  %v4628_v3 = vld [vmem:[%s14352_s12 + $0xf0] sm:$0xff] }
 0xc62   :  { %8565 = vmatpush3.msk.msra.mxu1 %vm12324_vm6, %v4797_v21  ;;  %v4632_v54 = vld [vmem:[%s14352_s12 + $0x110] sm:$0xff]  ;;  %v4618_v21 = vld [vmem:[%s14352_s12 + $0xa0] sm:$0xff] }
 0xc63   :  { %8566 = vmatprep.subr.msk.mxu1 %vm12324_vm6, %v4796_v5  ;;  %v4753_v2 = vpop.permute.xlu1 %4752 }
 0xc64   :  { %v4795_v35 = vsel %vm4031_vm5, %v4753_v2, 0.0  ;;  %4976 = vmatmul.mubr.f32.gmra.mxu0 %v4613_v40  ;;  %8567 = vmatpush3.msk.msra.mxu1 %vm12324_vm6, %v4796_v5  ;;  %v4747_v60 = vpop.permute.xlu0 %4746  ;;  %v4631_v40 = vld [vmem:[%s14352_s12 + $0x108] sm:$0xff]  ;;  %v4621_v5 = vld [vmem:[%s14352_s12 + $0xb8] sm:$0xff]  ;;  %v4624_v2 = vld [vmem:[%s14352_s12 + $0xd0] sm:$0xff] }
 0xc65   :  { %8568 = vmatprep.subr.msk.mxu1 %vm12324_vm6, %v4795_v35  ;;  %4980 = vmatprep.mubr.f32.mxu0 %v4617_v43  ;;  %v4792_v36 = vsel %vm4031_vm5, %v4747_v60, 0.0  ;;  %v4635_v43 = vld [vmem:[%s14352_s12 + $0x128] sm:$0xff] }
 0xc66   :  { %8569 = vmatpush3.msk.msra.mxu1 %vm12324_vm6, %v4795_v35  ;;  %v4634_v35 = vld [vmem:[%s14352_s12 + $0x120] sm:$0xff]  ;;  %v4627_v60 = vld [vmem:[%s14352_s12 + $0xe8] sm:$0xff] }
 0xc67   :  { %8570 = vmatprep.subr.msk.mxu1 %vm12324_vm6, %v4794_v16  ;;  %v4749_v6 = vpop.permute.xlu1 %4748 }
 0xc68   :  { %v4793_v61 = vsel %vm4031_vm5, %v4749_v6, 0.0  ;;  %4981 = vmatmul.mubr.f32.gmra.mxu0 %v4616_v55  ;;  %8571 = vmatpush3.msk.msra.mxu1 %vm12324_vm6, %v4794_v16  ;;  %v4743_v37 = vpop.permute.xlu0 %4742  ;;  %v4638_v55 = vld [vmem:[%s14352_s12 + $0x140] sm:$0xff]  ;;  %v4633_v6 = vld [vmem:[%s14352_s12 + $0x118] sm:$0xff] }
 0xc69   :  { %8572 = vmatprep.subr.msk.mxu1 %vm12324_vm6, %v4793_v61  ;;  %4985 = vmatprep.mubr.f32.mxu0 %v4620_v10  ;;  %v4790_v26 = vsel %vm4031_vm5, %v4743_v37, 0.0  ;;  %v4630_v16 = vld [vmem:[%s14352_s12 + $0x100] sm:$0xff]  ;;  %v4637_v10 = vld [vmem:[%s14352_s12 + $0x138] sm:$0xff]  ;;  %v4644_v37 = vld [vmem:[%s14352_s12 + $0x170] sm:$0xff] }
 0xc6a   :  { %8573 = vmatpush3.msk.msra.mxu1 %vm12324_vm6, %v4793_v61  ;;  %v4641_v61 = vld [vmem:[%s14352_s12 + $0x158] sm:$0xff] }
 0xc6b   :  { %8574 = vmatprep.subr.msk.mxu1 %vm12324_vm6, %v4792_v36  ;;  %v4745_v14 = vpop.permute.xlu1 %4744 }
 0xc6c   :  { %v4791_v30 = vsel %vm4031_vm5, %v4745_v14, 0.0  ;;  %4986 = vmatmul.mubr.f32.gmra.mxu0 %v4619_v4  ;;  %8575 = vmatpush3.msk.msra.mxu1 %vm12324_vm6, %v4792_v36  ;;  %v4636_v4 = vld [vmem:[%s14352_s12 + $0x130] sm:$0xff]  ;;  %v4642_v14 = vld [vmem:[%s14352_s12 + $0x160] sm:$0xff] }
 0xc6d   :  { %8576 = vmatprep.subr.msk.mxu1 %vm12324_vm6, %v4791_v30  ;;  %4990 = vmatprep.mubr.f32.mxu0 %v4623_v7  ;;  %v4640_v36 = vld [vmem:[%s14352_s12 + $0x150] sm:$0xff]  ;;  %v4639_v7 = vld [vmem:[%s14352_s12 + $0x148] sm:$0xff] }
 0xc6e   :  { %8577 = vmatpush3.msk.msra.mxu1 %vm12324_vm6, %v4791_v30  ;;  %v4643_v30 = vld [vmem:[%s14352_s12 + $0x168] sm:$0xff] }
 0xc6f   :  { %8578 = vmatprep.subr.msk.mxu1 %vm12324_vm6, %v4790_v26 }
 0xc70   :  { %4991 = vmatmul.mubr.f32.gmra.mxu0 %v4622_v27  ;;  %8579 = vmatpush3.msk.msra.mxu1 %vm12324_vm6, %v4790_v26  ;;  %v4645_v27 = vld [vmem:[%s14352_s12 + $0x178] sm:$0xff] }
 0xc71   :  { %8581 = vmatmul.mubr.f32.vlgmr.msra.gmra.mxu1 %v4603_v0  ;;  %4995 = vmatprep.mubr.f32.mxu0 %v4626_v45 }
 0xc72   :  { %8583 = vmatprep.mubr.f32.mxu1 %v4606_v42 }
 0xc74   :  { %4996 = vmatmul.mubr.f32.gmra.mxu0 %v4625_v49 }
 0xc75   :  { %8584 = vmatmul.mubr.f32.gmra.mxu1 %v4609_v1  ;;  %5000 = vmatprep.mubr.f32.mxu0 %v4629_v44  ;;  %v4880_v62 = vpop.permute.xlu0 %4879 }
 0xc76   :  { %8586 = vmatprep.mubr.f32.mxu1 %v4612_v22 }
 0xc78   :  { %5001 = vmatmul.mubr.f32.gmra.mxu0 %v4628_v3 }
 0xc79   :  { %8587 = vmatmul.mubr.f32.gmra.mxu1 %v4615_v50  ;;  %5005 = vmatprep.mubr.f32.mxu0 %v4632_v54  ;;  %v4868_v9 = vpop.permute.xlu0 %4867 }
 0xc7a   :  { %8589 = vmatprep.mubr.f32.mxu1 %v4618_v21 }
 0xc7c   :  { %5006 = vmatmul.mubr.f32.gmra.mxu0 %v4631_v40 }
 0xc7d   :  { %8590 = vmatmul.mubr.f32.gmra.mxu1 %v4621_v5  ;;  %5010 = vmatprep.mubr.f32.mxu0 %v4635_v43  ;;  %v4860_v57 = vpop.permute.xlu0 %4859 }
 0xc7e   :  { %8592 = vmatprep.mubr.f32.mxu1 %v4624_v2 }
 0xc80   :  { %5011 = vmatmul.mubr.f32.gmra.mxu0 %v4634_v35 }
 0xc81   :  { %8593 = vmatmul.mubr.f32.gmra.mxu1 %v4627_v60  ;;  %5015 = vmatprep.mubr.f32.mxu0 %v4638_v55 }
 0xc82   :  { %8595 = vmatprep.mubr.f32.mxu1 %v4630_v16 }
 0xc84   :  { %5016 = vmatmul.mubr.f32.gmra.mxu0 %v4637_v10 }
 0xc85   :  { %8596 = vmatmul.mubr.f32.gmra.mxu1 %v4633_v6  ;;  %5020 = vmatprep.mubr.f32.mxu0 %v4641_v61 }
 0xc86   :  { %8598 = vmatprep.mubr.f32.mxu1 %v4636_v4 }
 0xc88   :  { %5021 = vmatmul.mubr.f32.gmra.mxu0 %v4640_v36 }
 0xc89   :  { %8599 = vmatmul.mubr.f32.gmra.mxu1 %v4639_v7  ;;  %5025 = vmatprep.mubr.f32.mxu0 %v4644_v37  ;;  %v4884_v7 = vpop.permute.xlu1 %4883 }
 0xc8a   :  { %8601 = vmatprep.mubr.f32.mxu1 %v4642_v14 }
 0xc8c   :  { %5026 = vmatmul.mubr.f32.gmra.mxu0 %v4643_v30 }
 0xc8d   :  { %8602 = vmatmul.mubr.f32.gmra.mxu1 %v4645_v27 }
 0xd10   :  { %v7916_v26 = vpop.f32.mrf.mxu0 }
 0xd12   :  { %v7917_v0 = vpop.f32.mrf.mxu0 }
 0xd13   :  { %v13282_v45 = vadd.f32 %v7917_v0, %v7916_v26 }
 0xd14   :  { %v7919_v42 = vpop.f32.mrf.mxu0 }
 0xd16   :  { %v7920_v49 = vpop.f32.mrf.mxu0 }
 0xd17   :  { %v13284_v1 = vadd.f32 %v7920_v49, %v7919_v42  ;;  %v4876_v42 = vpop.permute.xlu1 %4875 }
 0xd18   :  { %v7922_v44 = vpop.f32.mrf.mxu0 }
 0xd1a   :  { %v7923_v22 = vpop.f32.mrf.mxu0 }
 0xd1b   :  { %v13286_v3 = vadd.f32 %v7923_v22, %v7922_v44  ;;  %v4872_v32 = vpop.permute.xlu1 %4871 }
 0xd1c   :  { %v7925_v50 = vpop.f32.mrf.mxu0 }
 0xd1e   :  { %v7926_v54 = vpop.f32.mrf.mxu0 }
 0xd1f   :  { %v13288_v21 = vadd.f32 %v7926_v54, %v7925_v50  ;;  %v4864_v12 = vpop.permute.xlu1 %4863 }
 0xd20   :  { %v13290_v40 = vpop.f32.mrf.mxu0 }
 0xd22   :  { %v13292_v5 = vpop.f32.mrf.mxu0 }
 0xd23   :  { %v4856_v17 = vpop.permute.xlu1 %4855 }
 0xd24   :  { %v13294_v43 = vpop.f32.mrf.mxu0 }
 0xd26   :  { %v13296_v2 = vpop.f32.mrf.mxu0 }
 0xd28   :  { %v13298_v35 = vpop.f32.mrf.mxu0 }
 0xd2a   :  { %v13300_v60 = vpop.f32.mrf.mxu0 }
 0xd2c   :  { %v13302_v55 = vpop.f32.mrf.mxu0 }
 0xd2e   :  { %v13304_v16 = vpop.f32.mrf.mxu0 }
 0xd30   :  { %v7940_v10 = vpop.f32.mrf.mxu0 }
 0xd31   :  { %v13306_v6 = vpop.f32.mrf.mxu1 }
 0xd32   :  { %14767 = vst [vmem:[#allocation2_spill] sm:$0xff] %v13306_v6  ;;  %v7941_v61 = vpop.f32.mrf.mxu0 }
 0xd33   :  { %v13308_v4 = vpop.f32.mrf.mxu1 }
 0xd34   :  { %v7943_v36 = vpop.f32.mrf.mxu0 }
 0xd35   :  { %v13310_v37 = vpop.f32.mrf.mxu1 }
 0xd36   :  { %v7944_v14 = vpop.f32.mrf.mxu0 }
 0xd37   :  { %v13312_v30 = vpop.f32.mrf.mxu1 }
 0xd38   :  { %v7946_v27 = vpop.f32.mrf.mxu0 }
 0xd39   :  { %v13314_v26 = vpop.f32.mrf.mxu1 }
 0xd3a   :  { %v7947_v0 = vpop.f32.mrf.mxu0 }
 0xd3b   :  { %v13316_v49 = vpop.f32.mrf.mxu1  ;;  %v7948_v8 = vadd.f32 %v7947_v0, %v7946_v27 }
 0xd3c   :  { %v7949_v44 = vpop.f32.mrf.mxu0 }
 0xd3d   :  { %v13318_v22 = vpop.f32.mrf.mxu1  ;;  %v5003_v6 = vadd.f32 %v7948_v8, %v4864_v12  ;;  %v7936_v12 = vadd.f32 %v13300_v60, %v13298_v35 }
 0xd3e   :  { %v7950_v50 = vpop.f32.mrf.mxu0 }
 0xd3f   :  { %v13320_v54 = vpop.f32.mrf.mxu1 }
 0xd40   :  { %v7952_v31 = vpop.f32.mrf.mxu0 }
 0xd41   :  { %v8594_v59 = vpop.f32.mrf.mxu1 }
 0xd42   :  { %v7953_v18 = vpop.f32.mrf.mxu0 }
 0xd43   :  { %v5137_v33 = vpop.f32.mrf.mxu1  ;;  %v7954_v34 = vadd.f32 %v7953_v18, %v7952_v31  ;;  %v7942_v31 = vadd.f32 %v7941_v61, %v7940_v10 }
 0xd44   :  { %v7955_v46 = vpop.f32.mrf.mxu0 }
 0xd45   :  { %v8597_v23 = vpop.f32.mrf.mxu1  ;;  %v5013_v25 = vadd.f32 %v7954_v34, %v4872_v32 }
 0xd46   :  { %v7956_v38 = vpop.f32.mrf.mxu0 }
 0xd47   :  { %v5147_v58 = vpop.f32.mrf.mxu1  ;;  %v7957_v19 = vadd.f32 %v7956_v38, %v7955_v46  ;;  %v4852_v46 = vpop.permute.xlu0 %4851 }
 0xd48   :  { %v7958_v48 = vpop.f32.mrf.mxu0 }
 0xd49   :  { %v8600_v51 = vpop.f32.mrf.mxu1  ;;  %v5018_v63 = vadd.f32 %v7957_v19, %v4876_v42 }
 0xd4a   :  { %v7959_v20 = vpop.f32.mrf.mxu0 }
 0xd4b   :  { %v7960_v47 = vadd.f32 %v7959_v20, %v7958_v48  ;;  %v5157_v52 = vpop.f32.mrf.mxu1  ;;  %v4848_v48 = vpop.permute.xlu1 %4847  ;;  %v7951_v20 = vadd.f32 %v7950_v50, %v7949_v44  ;;  %v14770_v44 = vld [vmem:[#allocation3_spill] sm:$0xff]  ;;  %v14772_v50 = vld [vmem:[#allocation38_spill] sm:$0xff] }
 0xd4c   :  { %v7961_v11 = vpop.f32.mrf.mxu0  ;;  %v5158_v41 = vadd.f32 %v5157_v52, %v5013_v25  ;;  %v4844_v25 = vpop.permute.xlu0 %4843 }
 0xd4d   :  { %v8603_v28 = vpop.f32.mrf.mxu1  ;;  %v5023_v24 = vadd.f32 %v7960_v47, %v4880_v62  ;;  %v5163_v47 = vadd.f32 %v8600_v51, %v5018_v63  ;;  %v5148_v62 = vadd.f32 %v5147_v58, %v5003_v6 }
 0xd4e   :  { %v7962_v53 = vpop.f32.mrf.mxu0  ;;  %v13328_v32 = vmax.f32 %v5158_v41, 0.0 }
 0xd4f   :  { %v7963_v13 = vadd.f32 %v7962_v53, %v7961_v11  ;;  %v5167_v56 = vpop.f32.mrf.mxu1  ;;  %v5008_v53 = vadd.f32 %v7951_v20, %v4868_v9  ;;  %v4840_v51 = vpop.permute.xlu1 %4839  ;;  %v13337_v8 = vmax.f32 %v5163_v47, 0.0  ;;  %v13339_v41 = vmax.f32 %v5148_v62, 0.0  ;;  %v14775_v20 = vld [vmem:[#allocation17_spill] sm:$0xff]  ;;  %v14781_v62 = vld [vmem:[#allocation20_spill] sm:$0xff] }
 0xd50   :  { %v5168_v15 = vadd.f32 %v5167_v56, %v5023_v24  ;;  %v7945_v56 = vadd.f32 %v7944_v14, %v7943_v36  ;;  %v7939_v9 = vadd.f32 %v13304_v16, %v13302_v55  ;;  %v14778_v47 = vld [vmem:[#allocation9_spill] sm:$0xff] }
 0xd51   :  { %v5028_v39 = vadd.f32 %v7963_v13, %v4884_v7  ;;  %v4983_v13 = vadd.f32 %v7936_v12, %v4848_v48  ;;  %v14774_v48 = vld [vmem:[#allocation28_spill] sm:$0xff] }
 0xd52   :  { %v13322_v29 = vmax.f32 %v5168_v15, 0.0  ;;  %v4993_v15 = vadd.f32 %v7942_v31, %v4856_v17  ;;  %v4998_v63 = vadd.f32 %v7945_v56, %v4860_v57  ;;  %v7933_v57 = vadd.f32 %v13296_v2, %v13294_v43  ;;  %v14777_v31 = vld [vmem:[#allocation36_spill] sm:$0xff]  ;;  %v14782_v56 = vld [vmem:[#allocation37_spill] sm:$0xff] }
 0xd53   :  { %v5173_v18 = vadd.f32 %v8603_v28, %v5028_v39  ;;  %v5153_v39 = vadd.f32 %v8597_v23, %v5008_v53  ;;  %v7930_v28 = vadd.f32 %v13292_v5, %v13290_v40  ;;  %v4832_v19 = vpop.permute.xlu1 %4831  ;;  %v4988_v34 = vadd.f32 %v7939_v9, %v4852_v46  ;;  %v4836_v40 = vpop.permute.xlu0 %4835  ;;  %v14780_v46 = vld [vmem:[#allocation25_spill] sm:$0xff]  ;;  %v14783_v53 = vld [vmem:[#allocation30_spill] sm:$0xff] }
 0xd54   :  { %5284 = vrot.lane.b32.xlu1 %v13322_v29, %s8787_s2  ;;  %v5138_v58 = vadd.f32 %v5137_v33, %v4993_v15  ;;  %v5143_v23 = vadd.f32 %v8594_v59, %v4998_v63  ;;  %v5128_v33 = vadd.f32 %v13320_v54, %v4983_v13  ;;  %v4978_v60 = vadd.f32 %v7933_v57, %v4844_v25  ;;  %v14784_v15 = vld [vmem:[#allocation13_spill] sm:$0xff]  ;;  %v14786_v63 = vld [vmem:[#allocation32_spill] sm:$0xff] }
 0xd55   :  { %v13326_v38 = vmax.f32 %v5173_v18, 0.0  ;;  %v13349_v17 = vmax.f32 %v5153_v39, 0.0  ;;  %v4973_v11 = vadd.f32 %v7930_v28, %v4840_v51  ;;  %v5133_v59 = vadd.f32 %v13318_v22, %v4988_v34  ;;  %v14771_v22 = vld [vmem:[#allocation35_spill] sm:$0xff]  ;;  %v14776_v18 = vld [vmem:[#allocation4_spill] sm:$0xff] }
 0xd56   :  { %v13352_v24 = vmax.f32 %v5138_v58, 0.0  ;;  %v13361_v52 = vmax.f32 %v5143_v23, 0.0  ;;  %v13364_v35 = vmax.f32 %v5128_v33, 0.0  ;;  %v4963_v43 = vadd.f32 %v13286_v3, %v4832_v19 }
 0xd57   :  { %5286 = vrot.lane.b32.xlu0 %v13326_v38, %s8787_s2  ;;  %7996 = vmatprep.subr.mxu0 %v13326_v38  ;;  %v5118_v5 = vadd.f32 %v13316_v49, %v4973_v11  ;;  %v4824_v2 = vpop.permute.xlu1 %4823  ;;  %v5123_v55 = vadd.f32 %v13314_v26, %v4978_v60  ;;  %v13372_v16 = vmax.f32 %v5133_v59, 0.0  ;;  %v4968_v61 = vadd.f32 %v13288_v21, %v4836_v40  ;;  %v4828_v3 = vpop.permute.xlu0 %4827  ;;  %v14769_v49 = vld [vmem:[#allocation11_spill] sm:$0xff] }
 0xd58   :  { %5280 = vrot.lane.b32.xlu1 %v13328_v32, %s8787_s2  ;;  %v5108_v10 = vadd.f32 %v13312_v30, %v4963_v43  ;;  %v4953_v36 = vadd.f32 %v13282_v45, %v4824_v2  ;;  %v5193_v30 = vld [vmem:[%s14353_s13 + $0x8] sm:$0xff]  ;;  %v4958_v26 = vadd.f32 %v13284_v1, %v4828_v3  ;;  %v14768_v45 = vld [vmem:[#allocation2_spill] sm:$0xff]  ;;  %v5194_v1 = vld [vmem:[%s14353_s13 + $0x10] sm:$0xff]  ;;  %v14773_v54 = vmov 3  }
 0xd59   :  { %v13375_v6 = vmax.f32 %v5118_v5, 0.0  ;;  %v5113_v7 = vadd.f32 %v13310_v37, %v4968_v61  ;;  %v13384_v14 = vmax.f32 %v5123_v55, 0.0  ;;  %5560 = vmatprep.mubr.f32.mxu0 %v5193_v30  ;;  %8636 = vmatprep.mubr.f32.mxu1 %v5194_v1  ;;  %v5192_v3 = vld [vmem:[%s14353_s13] sm:$0xff] }
 0xd5a   :  { %v5098_v27 = vadd.f32 %v13308_v4, %v4953_v36  ;;  %v13390_v21 = vmax.f32 %v5108_v10, 0.0  ;;  %v5103_v37 = vadd.f32 %v14768_v45, %v4958_v26  ;;  %v5195_v45 = vld [vmem:[%s14353_s13 + $0x18] sm:$0xff] }
 0xd5b   :  { %5282 = vrot.lane.b32.xlu0 %v13337_v8, %s8787_s2  ;;  %v13398_v0 = vmax.f32 %v5113_v7, 0.0 }
 0xd5c   :  { %5276 = vrot.lane.b32.xlu1 %v13339_v41, %s8787_s2  ;;  %v13400_v42 = vmax.f32 %v5098_v27, 0.0  ;;  %v13406_v4 = vmax.f32 %v5103_v37, 0.0 }
 0xd5f   :  { %5278 = vrot.lane.b32.xlu0 %v13349_v17, %s8787_s2 }
 0xd60   :  { %5272 = vrot.lane.b32.xlu1 %v13352_v24, %s8787_s2 }
 0xd63   :  { %5274 = vrot.lane.b32.xlu0 %v13361_v52, %s8787_s2 }
 0xd64   :  { %5268 = vrot.lane.b32.xlu1 %v13364_v35, %s8787_s2 }
 0xd67   :  { %5270 = vrot.lane.b32.xlu0 %v13372_v16, %s8787_s2 }
 0xd68   :  { %5264 = vrot.lane.b32.xlu1 %v13375_v6, %s8787_s2 }
 0xd6b   :  { %5266 = vrot.lane.b32.xlu0 %v13384_v14, %s8787_s2 }
 0xd6c   :  { %5260 = vrot.lane.b32.xlu1 %v13390_v21, %s8787_s2 }
 0xd6f   :  { %5262 = vrot.lane.b32.xlu0 %v13398_v0, %s8787_s2 }
 0xd70   :  { %5256 = vrot.lane.b32.xlu1 %v13400_v42, %s8787_s2 }
 0xd73   :  { %5258 = vrot.lane.b32.xlu0 %v13406_v4, %s8787_s2 }
 0xd74   :  { %5364 = vrot.lane.b32.xlu1 %v13322_v29, %s8788_s21 }
 0xd77   :  { %5366 = vrot.lane.b32.xlu0 %v13326_v38, %s8788_s21  ;;  %v14779_v38 = vld [vmem:[#allocation22_spill] sm:$0xff] }
 0xd78   :  { %5360 = vrot.lane.b32.xlu1 %v13328_v32, %s8788_s21 }
 0xd7b   :  { %5362 = vrot.lane.b32.xlu0 %v13337_v8, %s8788_s21 }
 0xd7c   :  { %5356 = vrot.lane.b32.xlu1 %v13339_v41, %s8788_s21 }
 0xd7f   :  { %5358 = vrot.lane.b32.xlu0 %v13349_v17, %s8788_s21 }
 0xd80   :  { %5352 = vrot.lane.b32.xlu1 %v13352_v24, %s8788_s21 }
 0xd83   :  { %5354 = vrot.lane.b32.xlu0 %v13361_v52, %s8788_s21 }
 0xd84   :  { %5348 = vrot.lane.b32.xlu1 %v13364_v35, %s8788_s21 }
 0xd87   :  { %5350 = vrot.lane.b32.xlu0 %v13372_v16, %s8788_s21 }
 0xd88   :  { %5344 = vrot.lane.b32.xlu1 %v13375_v6, %s8788_s21 }
 0xd8b   :  { %5346 = vrot.lane.b32.xlu0 %v13384_v14, %s8788_s21 }
 0xd8c   :  { %5340 = vrot.lane.b32.xlu1 %v13390_v21, %s8788_s21 }
 0xd8f   :  { %5342 = vrot.lane.b32.xlu0 %v13398_v0, %s8788_s21 }
 0xd90   :  { %5336 = vrot.lane.b32.xlu1 %v13400_v42, %s8788_s21 }
 0xd93   :  { %5338 = vrot.lane.b32.xlu0 %v13406_v4, %s8788_s21 }
 0xd94   :  { %5473 = vperm.xlu1 %8746, %v14769_v49  }
 0xd97   :  { %5477 = vperm.xlu0 %8745, %v14770_v44  }
 0xd98   :  { %5469 = vperm.xlu1 %8746, %v14771_v22  }
 0xd9b   :  { %5465 = vperm.xlu0 %8745, %v14772_v50  }
 0xd9c   :  { %8747 = vset.pattern.permute.xlu1 %v14773_v54 }
 0xd9d   :  { %5847 = vperm.xlu1 %8747, %v14770_v44  }
 0xd9f   :  { %5461 = vperm.xlu0 %8745, %v14774_v48  }
 0xda1   :  { %5843 = vperm.xlu1 %8747, %v14769_v49   ;;  %v5198_v49 = vld [vmem:[%s14353_s13 + $0x30] sm:$0xff] }
 0xda3   :  { %5457 = vperm.xlu0 %8745, %v14775_v20  }
 0xda5   :  { %5839 = vperm.xlu1 %8747, %v14771_v22   ;;  %v5202_v22 = vld [vmem:[%s14353_s13 + $0x50] sm:$0xff] }
 0xda7   :  { %5453 = vperm.xlu0 %8745, %v14776_v18  }
 0xda9   :  { %5835 = vperm.xlu1 %8747, %v14772_v50  }
 0xdab   :  { %5449 = vperm.xlu0 %8745, %v14777_v31  }
 0xdad   :  { %5831 = vperm.xlu1 %8747, %v14774_v48  }
 0xdaf   :  { %5445 = vperm.xlu0 %8745, %v14778_v47  }
 0xdb1   :  { %5827 = vperm.xlu1 %8747, %v14775_v20   ;;  %v5201_v20 = vld [vmem:[%s14353_s13 + $0x48] sm:$0xff] }
 0xdb3   :  { %5441 = vperm.xlu0 %8745, %v14779_v38  }
 0xdb5   :  { %5823 = vperm.xlu1 %8747, %v14776_v18  }
 0xdb7   :  { %5437 = vperm.xlu0 %8745, %v14780_v46  }
 0xdb9   :  { %5819 = vperm.xlu1 %8747, %v14777_v31   ;;  %v5205_v31 = vld [vmem:[%s14353_s13 + $0x68] sm:$0xff] }
 0xdbb   :  { %5433 = vperm.xlu0 %8745, %v14781_v62  }
 0xdbd   :  { %5815 = vperm.xlu1 %8747, %v14778_v47  }
 0xdbf   :  { %5429 = vperm.xlu0 %8745, %v14782_v56  }
 0xdc1   :  { %5811 = vperm.xlu1 %8747, %v14779_v38  }
 0xdc3   :  { %5425 = vperm.xlu0 %8745, %v14783_v53  }
 0xdc5   :  { %5807 = vperm.xlu1 %8747, %v14780_v46  }
 0xdc6   :  { %v5285_v12 = vpop.permute.xlu1 %5284 }
 0xdc7   :  { %5421 = vperm.xlu0 %8745, %v14784_v15   ;;  %v5318_v25 = vsel %vm960_vm2, 0.0, %v5285_v12 }
 0xdc9   :  { %v5287_v51 = vpop.permute.xlu0 %5286  ;;  %5803 = vperm.xlu1 %8747, %v14781_v62   ;;  %v5204_v62 = vld [vmem:[%s14353_s13 + $0x60] sm:$0xff] }
 0xdca   :  { %v5319_v39 = vsel %vm960_vm2, 0.0, %v5287_v51  ;;  %v5281_v58 = vpop.permute.xlu1 %5280 }
 0xdcb   :  { %7997 = vmatpush3.msk.msra.mxu0 %vm11902_vm0, %v5319_v39  ;;  %5417 = vperm.xlu0 %8745, %v14786_v63   ;;  %v5316_v33 = vsel %vm960_vm2, 0.0, %v5281_v58  ;;  %v5207_v39 = vld [vmem:[%s14353_s13 + $0x78] sm:$0xff] }
 0xdcc   :  { %7998 = vmatprep.subr.mxu0 %v13322_v29 }
 0xdcd   :  { %v5283_v28 = vpop.permute.xlu0 %5282  ;;  %7999 = vmatpush3.msk.msra.mxu0 %vm11902_vm0, %v5318_v25  ;;  %5799 = vperm.xlu1 %8747, %v14782_v56  }
 0xdce   :  { %v5317_v13 = vsel %vm960_vm2, 0.0, %v5283_v28  ;;  %8000 = vmatprep.subr.mxu0 %v13337_v8  ;;  %v5277_v23 = vpop.permute.xlu1 %5276 }
 0xdcf   :  { %8001 = vmatpush3.msk.msra.mxu0 %vm11902_vm0, %v5317_v13  ;;  %8748 = vset.pattern.permute.xlu0 %v14773_v54  ;;  %v5314_v57 = vsel %vm960_vm2, 0.0, %v5277_v23  ;;  %v5210_v23 = vld [vmem:[%s14353_s13 + $0x90] sm:$0xff] }
 0xdd0   :  { %8002 = vmatprep.subr.mxu0 %v13328_v32  ;;  %5795 = vperm.xlu0 %8748, %v14783_v53   ;;  %v14787_v32 = vmov 0   ;;  %v5208_v53 = vld [vmem:[%s14353_s13 + $0x80] sm:$0xff] }
 0xdd1   :  { %v5279_v29 = vpop.permute.xlu0 %5278  ;;  %8003 = vmatpush3.msk.msra.mxu0 %vm11902_vm0, %v5316_v33  ;;  %5791 = vperm.xlu1 %8747, %v14784_v15  }
 0xdd2   :  { %v5315_v8 = vsel %vm960_vm2, 0.0, %v5279_v29  ;;  %8004 = vmatprep.subr.mxu0 %v13349_v17  ;;  %v5273_v19 = vpop.permute.xlu1 %5272  ;;  %v5214_v29 = vld [vmem:[%s14353_s13 + $0xb0] sm:$0xff] }
 0xdd3   :  { %8005 = vmatpush3.msk.msra.mxu0 %vm11902_vm0, %v5315_v8  ;;  %v5312_v59 = vsel %vm960_vm2, 0.0, %v5273_v19 }
 0xdd4   :  { %8006 = vmatprep.subr.mxu0 %v13339_v41  ;;  %8749 = vset.pattern.permute.xlu0 %v14787_v32 }
 0xdd5   :  { %v5275_v34 = vpop.permute.xlu0 %5274  ;;  %8007 = vmatpush3.msk.msra.mxu0 %vm11902_vm0, %v5314_v57  ;;  %5787 = vperm.xlu1 %8747, %v14786_v63   ;;  %v5211_v63 = vld [vmem:[%s14353_s13 + $0x98] sm:$0xff]  ;;  %v5213_v57 = vld [vmem:[%s14353_s13 + $0xa8] sm:$0xff] }
 0xdd6   :  { %v5313_v11 = vsel %vm960_vm2, 0.0, %v5275_v34  ;;  %8008 = vmatprep.subr.mxu0 %v13361_v52  ;;  %v5269_v17 = vpop.permute.xlu1 %5268  ;;  %v5217_v34 = vld [vmem:[%s14353_s13 + $0xc8] sm:$0xff] }
 0xdd7   :  { %8009 = vmatpush3.msk.msra.mxu0 %vm11902_vm0, %v5313_v11  ;;  %v5310_v52 = vsel %vm960_vm2, 0.0, %v5269_v17 }
 0xdd8   :  { %8010 = vmatprep.subr.mxu0 %v13352_v24 }
 0xdd9   :  { %v5271_v41 = vpop.permute.xlu0 %5270  ;;  %8011 = vmatpush3.msk.msra.mxu0 %vm11902_vm0, %v5312_v59  ;;  %8750 = vset.pattern.permute.xlu1 %v14787_v32 }
 0xdda   :  { %v5311_v40 = vsel %vm960_vm2, 0.0, %v5271_v41  ;;  %8012 = vmatprep.subr.mxu0 %v13372_v16  ;;  %v5265_v5 = vpop.permute.xlu1 %5264  ;;  %v5216_v41 = vld [vmem:[%s14353_s13 + $0xc0] sm:$0xff] }
 0xddb   :  { %8013 = vmatpush3.msk.msra.mxu0 %vm11902_vm0, %v5311_v40  ;;  %v5308_v2 = vsel %vm960_vm2, 0.0, %v5265_v5  ;;  %v5197_v5 = vld [vmem:[%s14353_s13 + $0x28] sm:$0xff] }
 0xddc   :  { %8014 = vmatprep.subr.mxu0 %v13364_v35 }
 0xddd   :  { %v5267_v60 = vpop.permute.xlu0 %5266  ;;  %8015 = vmatpush3.msk.msra.mxu0 %vm11902_vm0, %v5310_v52  ;;  %v5220_v52 = vld [vmem:[%s14353_s13 + $0xe0] sm:$0xff] }
 0xdde   :  { %v5309_v24 = vsel %vm960_vm2, 0.0, %v5267_v60  ;;  %8016 = vmatprep.subr.mxu0 %v13384_v14  ;;  %v5261_v43 = vpop.permute.xlu1 %5260  ;;  %v5196_v14 = vld [vmem:[%s14353_s13 + $0x20] sm:$0xff] }
 0xddf   :  { %8017 = vmatpush3.msk.msra.mxu0 %vm11902_vm0, %v5309_v24  ;;  %v5306_v10 = vsel %vm960_vm2, 0.0, %v5261_v43  ;;  %v5200_v60 = vld [vmem:[%s14353_s13 + $0x40] sm:$0xff]  ;;  %v5219_v24 = vld [vmem:[%s14353_s13 + $0xd8] sm:$0xff] }
 0xde0   :  { %8018 = vmatprep.subr.mxu0 %v13375_v6  ;;  %v5203_v43 = vld [vmem:[%s14353_s13 + $0x58] sm:$0xff] }
 0xde1   :  { %v5263_v55 = vpop.permute.xlu0 %5262  ;;  %8019 = vmatpush3.msk.msra.mxu0 %vm11902_vm0, %v5308_v2  ;;  %v5223_v2 = vld [vmem:[%s14353_s13 + $0xf8] sm:$0xff] }
 0xde2   :  { %v5307_v35 = vsel %vm960_vm2, 0.0, %v5263_v55  ;;  %8020 = vmatprep.subr.mxu0 %v13398_v0  ;;  %v5257_v16 = vpop.permute.xlu1 %5256  ;;  %v5199_v0 = vld [vmem:[%s14353_s13 + $0x38] sm:$0xff]  ;;  %v5206_v55 = vld [vmem:[%s14353_s13 + $0x70] sm:$0xff] }
 0xde3   :  { %8021 = vmatpush3.msk.msra.mxu0 %vm11902_vm0, %v5307_v35  ;;  %v5304_v7 = vsel %vm960_vm2, 0.0, %v5257_v16  ;;  %v5222_v35 = vld [vmem:[%s14353_s13 + $0xf0] sm:$0xff]  ;;  %v5209_v16 = vld [vmem:[%s14353_s13 + $0x88] sm:$0xff] }
 0xde4   :  { %8022 = vmatprep.subr.mxu0 %v13390_v21 }
 0xde5   :  { %v5259_v61 = vpop.permute.xlu0 %5258  ;;  %8023 = vmatpush3.msk.msra.mxu0 %vm11902_vm0, %v5306_v10  ;;  %v5226_v10 = vld [vmem:[%s14353_s13 + $0x110] sm:$0xff] }
 0xde6   :  { %v5305_v6 = vsel %vm960_vm2, 0.0, %v5259_v61  ;;  %8024 = vmatprep.subr.mxu0 %v13406_v4  ;;  %v5365_v36 = vpop.permute.xlu1 %5364  ;;  %v5212_v61 = vld [vmem:[%s14353_s13 + $0xa0] sm:$0xff] }
 0xde7   :  { %8025 = vmatpush3.msk.msra.mxu0 %vm11902_vm0, %v5305_v6  ;;  %v5398_v37 = vsel %vm4031_vm5, %v5365_v36, 0.0  ;;  %v5225_v6 = vld [vmem:[%s14353_s13 + $0x108] sm:$0xff]  ;;  %v5215_v36 = vld [vmem:[%s14353_s13 + $0xb8] sm:$0xff] }
 0xde8   :  { %8026 = vmatprep.subr.mxu0 %v13400_v42 }
 0xde9   :  { %v5367_v30 = vpop.permute.xlu0 %5366  ;;  %8027 = vmatpush3.msk.msra.mxu0 %vm11902_vm0, %v5304_v7  ;;  %v5218_v7 = vld [vmem:[%s14353_s13 + $0xd0] sm:$0xff] }
 0xdea   :  { %v5399_v27 = vsel %vm4031_vm5, %v5367_v30, 0.0  ;;  %5561 = vmatmul.mubr.f32.vlgmr.msra.gmra.mxu0 %v5192_v3  ;;  %v5361_v21 = vpop.permute.xlu1 %5360  ;;  %v5229_v3 = vld [vmem:[%s14353_s13 + $0x128] sm:$0xff] }
 0xdeb   :  { %8604 = vmatprep.subr.msk.mxu1 %vm12324_vm6, %v5399_v27  ;;  %5565 = vmatprep.mubr.f32.mxu0 %v5196_v14  ;;  %v5396_v44 = vsel %vm4031_vm5, %v5361_v21, 0.0  ;;  %v5228_v14 = vld [vmem:[%s14353_s13 + $0x120] sm:$0xff]  ;;  %v5221_v30 = vld [vmem:[%s14353_s13 + $0xe8] sm:$0xff] }
 0xdec   :  { %8605 = vmatpush3.msk.msra.mxu1 %vm12324_vm6, %v5399_v27  ;;  %v5232_v27 = vld [vmem:[%s14353_s13 + $0x140] sm:$0xff] }
 0xded   :  { %v5363_v42 = vpop.permute.xlu0 %5362  ;;  %8606 = vmatprep.subr.msk.mxu1 %vm12324_vm6, %v5398_v37  ;;  %v5224_v21 = vld [vmem:[%s14353_s13 + $0x100] sm:$0xff] }
 0xdee   :  { %v5397_v4 = vsel %vm4031_vm5, %v5363_v42, 0.0  ;;  %5566 = vmatmul.mubr.f32.gmra.mxu0 %v5195_v45  ;;  %8607 = vmatpush3.msk.msra.mxu1 %vm12324_vm6, %v5398_v37  ;;  %v5357_v1 = vpop.permute.xlu1 %5356  ;;  %v5231_v45 = vld [vmem:[%s14353_s13 + $0x138] sm:$0xff]  ;;  %v5230_v42 = vld [vmem:[%s14353_s13 + $0x130] sm:$0xff] }
 0xdef   :  { %8608 = vmatprep.subr.msk.mxu1 %vm12324_vm6, %v5397_v4  ;;  %5570 = vmatprep.mubr.f32.mxu0 %v5199_v0  ;;  %v5394_v18 = vsel %vm4031_vm5, %v5357_v1, 0.0  ;;  %v5227_v37 = vld [vmem:[%s14353_s13 + $0x118] sm:$0xff]  ;;  %v5233_v1 = vld [vmem:[%s14353_s13 + $0x148] sm:$0xff] }
 0xdf0   :  { %8609 = vmatpush3.msk.msra.mxu1 %vm12324_vm6, %v5397_v4  ;;  %v5235_v0 = vld [vmem:[%s14353_s13 + $0x158] sm:$0xff]  ;;  %v5234_v4 = vld [vmem:[%s14353_s13 + $0x150] sm:$0xff] }
 0xdf1   :  { %v5359_v50 = vpop.permute.xlu0 %5358  ;;  %8610 = vmatprep.subr.msk.mxu1 %vm12324_vm6, %v5396_v44 }
 0xdf2   :  { %v5395_v54 = vsel %vm4031_vm5, %v5359_v50, 0.0  ;;  %5571 = vmatmul.mubr.f32.gmra.mxu0 %v5198_v49  ;;  %8611 = vmatpush3.msk.msra.mxu1 %vm12324_vm6, %v5396_v44  ;;  %v5353_v48 = vpop.permute.xlu1 %5352  ;;  %v5238_v49 = vld [vmem:[%s14353_s13 + $0x170] sm:$0xff]  ;;  %v5236_v44 = vld [vmem:[%s14353_s13 + $0x160] sm:$0xff]  ;;  %v5239_v50 = vld [vmem:[%s14353_s13 + $0x178] sm:$0xff] }
 0xdf3   :  { %8612 = vmatprep.subr.msk.mxu1 %vm12324_vm6, %v5395_v54  ;;  %5575 = vmatprep.mubr.f32.mxu0 %v5202_v22  ;;  %v5392_v56 = vsel %vm4031_vm5, %v5353_v48, 0.0  ;;  %v5237_v22 = vld [vmem:[%s14353_s13 + $0x168] sm:$0xff] }
 0xdf4   :  { %8613 = vmatpush3.msk.msra.mxu1 %vm12324_vm6, %v5395_v54 }
 0xdf5   :  { %v5355_v47 = vpop.permute.xlu0 %5354  ;;  %8614 = vmatprep.subr.msk.mxu1 %vm12324_vm6, %v5394_v18 }
 0xdf6   :  { %v5393_v38 = vsel %vm4031_vm5, %v5355_v47, 0.0  ;;  %5576 = vmatmul.mubr.f32.gmra.mxu0 %v5201_v20  ;;  %8615 = vmatpush3.msk.msra.mxu1 %vm12324_vm6, %v5394_v18  ;;  %v5349_v46 = vpop.permute.xlu1 %5348 }
 0xdf7   :  { %8616 = vmatprep.subr.msk.mxu1 %vm12324_vm6, %v5393_v38  ;;  %5580 = vmatprep.mubr.f32.mxu0 %v5205_v31  ;;  %v5390_v58 = vsel %vm4031_vm5, %v5349_v46, 0.0 }
 0xdf8   :  { %8617 = vmatpush3.msk.msra.mxu1 %vm12324_vm6, %v5393_v38 }
 0xdf9   :  { %v5351_v12 = vpop.permute.xlu0 %5350  ;;  %8618 = vmatprep.subr.msk.mxu1 %vm12324_vm6, %v5392_v56 }
 0xdfa   :  { %v5391_v15 = vsel %vm4031_vm5, %v5351_v12, 0.0  ;;  %5581 = vmatmul.mubr.f32.gmra.mxu0 %v5204_v62  ;;  %8619 = vmatpush3.msk.msra.mxu1 %vm12324_vm6, %v5392_v56  ;;  %v5345_v51 = vpop.permute.xlu1 %5344 }
 0xdfb   :  { %8620 = vmatprep.subr.msk.mxu1 %vm12324_vm6, %v5391_v15  ;;  %5585 = vmatprep.mubr.f32.mxu0 %v5208_v53  ;;  %v5388_v33 = vsel %vm4031_vm5, %v5345_v51, 0.0 }
 0xdfc   :  { %8621 = vmatpush3.msk.msra.mxu1 %vm12324_vm6, %v5391_v15 }
 0xdfd   :  { %v5347_v25 = vpop.permute.xlu0 %5346  ;;  %8622 = vmatprep.subr.msk.mxu1 %vm12324_vm6, %v5390_v58 }
 0xdfe   :  { %v5389_v28 = vsel %vm4031_vm5, %v5347_v25, 0.0  ;;  %5586 = vmatmul.mubr.f32.gmra.mxu0 %v5207_v39  ;;  %8623 = vmatpush3.msk.msra.mxu1 %vm12324_vm6, %v5390_v58  ;;  %v5341_v13 = vpop.permute.xlu1 %5340 }
 0xdff   :  { %8624 = vmatprep.subr.msk.mxu1 %vm12324_vm6, %v5389_v28  ;;  %5590 = vmatprep.mubr.f32.mxu0 %v5211_v63  ;;  %v5386_v32 = vsel %vm4031_vm5, %v5341_v13, 0.0 }
 0xe00   :  { %8625 = vmatpush3.msk.msra.mxu1 %vm12324_vm6, %v5389_v28 }
 0xe01   :  { %v5343_v8 = vpop.permute.xlu0 %5342  ;;  %8626 = vmatprep.subr.msk.mxu1 %vm12324_vm6, %v5388_v33 }
 0xe02   :  { %v5387_v19 = vsel %vm4031_vm5, %v5343_v8, 0.0  ;;  %5591 = vmatmul.mubr.f32.gmra.mxu0 %v5210_v23  ;;  %8627 = vmatpush3.msk.msra.mxu1 %vm12324_vm6, %v5388_v33  ;;  %v5337_v11 = vpop.permute.xlu1 %5336 }
 0xe03   :  { %8628 = vmatprep.subr.msk.mxu1 %vm12324_vm6, %v5387_v19  ;;  %5595 = vmatprep.mubr.f32.mxu0 %v5214_v29  ;;  %v5384_v40 = vsel %vm4031_vm5, %v5337_v11, 0.0 }
 0xe04   :  { %8629 = vmatpush3.msk.msra.mxu1 %vm12324_vm6, %v5387_v19 }
 0xe05   :  { %v5339_v17 = vpop.permute.xlu0 %5338  ;;  %8630 = vmatprep.subr.msk.mxu1 %vm12324_vm6, %v5386_v32 }
 0xe06   :  { %v5385_v59 = vsel %vm4031_vm5, %v5339_v17, 0.0  ;;  %5596 = vmatmul.mubr.f32.gmra.mxu0 %v5213_v57  ;;  %8631 = vmatpush3.msk.msra.mxu1 %vm12324_vm6, %v5386_v32 }
 0xe07   :  { %8632 = vmatprep.subr.msk.mxu1 %vm12324_vm6, %v5385_v59  ;;  %5600 = vmatprep.mubr.f32.mxu0 %v5217_v34 }
 0xe08   :  { %8633 = vmatpush3.msk.msra.mxu1 %vm12324_vm6, %v5385_v59 }
 0xe09   :  { %8634 = vmatprep.subr.msk.mxu1 %vm12324_vm6, %v5384_v40 }
 0xe0a   :  { %5601 = vmatmul.mubr.f32.gmra.mxu0 %v5216_v41  ;;  %8635 = vmatpush3.msk.msra.mxu1 %vm12324_vm6, %v5384_v40 }
 0xe0b   :  { %8637 = vmatmul.mubr.f32.vlgmr.msra.gmra.mxu1 %v5197_v5  ;;  %5605 = vmatprep.mubr.f32.mxu0 %v5220_v52 }
 0xe0c   :  { %8639 = vmatprep.mubr.f32.mxu1 %v5200_v60 }
 0xe0e   :  { %5606 = vmatmul.mubr.f32.gmra.mxu0 %v5219_v24 }
 0xe0f   :  { %8640 = vmatmul.mubr.f32.gmra.mxu1 %v5203_v43  ;;  %5610 = vmatprep.mubr.f32.mxu0 %v5223_v2  ;;  %v13762_v54 = vpop.permute.xlu1 %5473 }
 0xe10   :  { %8642 = vmatprep.mubr.f32.mxu1 %v5206_v55 }
 0xe12   :  { %5611 = vmatmul.mubr.f32.gmra.mxu0 %v5222_v35  ;;  %v13764_v48 = vpop.permute.xlu0 %5477 }
 0xe13   :  { %8643 = vmatmul.mubr.f32.gmra.mxu1 %v5209_v16  ;;  %5615 = vmatprep.mubr.f32.mxu0 %v5226_v10  ;;  %v5470_v18 = vpop.permute.xlu1 %5469 }
 0xe14   :  { %8645 = vmatprep.mubr.f32.mxu1 %v5212_v61 }
 0xe16   :  { %5616 = vmatmul.mubr.f32.gmra.mxu0 %v5225_v6  ;;  %v5466_v38 = vpop.permute.xlu0 %5465 }
 0xe17   :  { %8646 = vmatmul.mubr.f32.gmra.mxu1 %v5215_v36  ;;  %5620 = vmatprep.mubr.f32.mxu0 %v5229_v3 }
 0xe18   :  { %8648 = vmatprep.mubr.f32.mxu1 %v5218_v7  ;;  %v13768_v62 = vpop.permute.xlu1 %5847 }
 0xe1a   :  { %5621 = vmatmul.mubr.f32.gmra.mxu0 %v5228_v14  ;;  %v13772_v15 = vpop.permute.xlu0 %5461 }
 0xe1b   :  { %8649 = vmatmul.mubr.f32.gmra.mxu1 %v5221_v30  ;;  %5625 = vmatprep.mubr.f32.mxu0 %v5232_v27 }
 0xe1c   :  { %8651 = vmatprep.mubr.f32.mxu1 %v5224_v21  ;;  %v13774_v39 = vpop.permute.xlu1 %5843 }
 0xe1e   :  { %5626 = vmatmul.mubr.f32.gmra.mxu0 %v5231_v45  ;;  %v5458_v13 = vpop.permute.xlu0 %5457 }
 0xe1f   :  { %8652 = vmatmul.mubr.f32.gmra.mxu1 %v5227_v37  ;;  %5630 = vmatprep.mubr.f32.mxu0 %v5235_v0 }
 0xe20   :  { %8654 = vmatprep.mubr.f32.mxu1 %v5230_v42  ;;  %v13782_v33 = vpop.permute.xlu1 %5839 }
 0xe22   :  { %5631 = vmatmul.mubr.f32.gmra.mxu0 %v5234_v4  ;;  %v13788_v19 = vpop.permute.xlu0 %5453 }
 0xe23   :  { %8655 = vmatmul.mubr.f32.gmra.mxu1 %v5233_v1  ;;  %5635 = vmatprep.mubr.f32.mxu0 %v5238_v49 }
 0xe24   :  { %8657 = vmatprep.mubr.f32.mxu1 %v5236_v44  ;;  %v13792_v32 = vpop.permute.xlu1 %5835 }
 0xe26   :  { %5636 = vmatmul.mubr.f32.gmra.mxu0 %v5237_v22  ;;  %v13798_v17 = vpop.permute.xlu0 %5449 }
 0xe27   :  { %8658 = vmatmul.mubr.f32.gmra.mxu1 %v5239_v50 }
 0xe28   :  { %v13802_v41 = vpop.permute.xlu1 %5831 }
 0xe2a   :  { %v13808_v60 = vpop.permute.xlu0 %5445 }
 0xe2c   :  { %v13810_v43 = vpop.permute.xlu1 %5827 }
 0xe2e   :  { %v13820_v61 = vpop.permute.xlu0 %5441 }
 0xe30   :  { %v13822_v36 = vpop.permute.xlu1 %5823 }
 0xe32   :  { %v13830_v21 = vpop.permute.xlu0 %5437 }
 0xe34   :  { %v13832_v37 = vpop.permute.xlu1 %5819 }
 0xe36   :  { %v13838_v44 = vpop.permute.xlu0 %5433 }
 0xe38   :  { %v13840_v50 = vpop.permute.xlu1 %5815 }
 0xe39   :  { %14797 = vst [vmem:[#allocation35_spill] sm:$0xff] %v13840_v50 }
 0xeaa   :  { %v8028_v20 = vpop.f32.mrf.mxu0 }
 0xeac   :  { %v8029_v31 = vpop.f32.mrf.mxu0 }
 0xead   :  { %v13766_v47 = vadd.f32 %v8029_v31, %v8028_v20 }
 0xeae   :  { %v8031_v46 = vpop.f32.mrf.mxu0 }
 0xeaf   :  { %14789 = vst [vmem:[#allocation39_spill] sm:$0xff] %v13766_v47 }
 0xeb0   :  { %v8032_v56 = vpop.f32.mrf.mxu0 }
 0xeb1   :  { %v13770_v53 = vadd.f32 %v8032_v56, %v8031_v46  ;;  %v14798_v56 = vld [vmem:[#allocation6_spill] sm:$0xff] }
 0xeb2   :  { %v8034_v12 = vpop.f32.mrf.mxu0 }
 0xeb3   :  { %14790 = vst [vmem:[#allocation40_spill] sm:$0xff] %v13770_v53 }
 0xeb4   :  { %v8035_v51 = vpop.f32.mrf.mxu0 }
 0xeb5   :  { %v13776_v58 = vadd.f32 %v8035_v51, %v8034_v12  ;;  %v5493_v12 = vmul.f32 %v5470_v18, %v14798_v56 }
 0xeb6   :  { %v8037_v63 = vpop.f32.mrf.mxu0 }
 0xeb8   :  { %v8038_v25 = vpop.f32.mrf.mxu0 }
 0xeb9   :  { %v13778_v28 = vadd.f32 %v8038_v25, %v8037_v63  ;;  %v14799_v25 = vld [vmem:[#allocation29_spill] sm:$0xff] }
 0xeba   :  { %v13780_v23 = vpop.f32.mrf.mxu0  ;;  %v5492_v26 = vmul.f32 %v5466_v38, %v14799_v25 }
 0xebb   :  { %14791 = vst [vmem:[#allocation10_spill] sm:$0xff] %v13778_v28 }
 0xebc   :  { %v13784_v29 = vpop.f32.mrf.mxu0 }
 0xebe   :  { %v13786_v8 = vpop.f32.mrf.mxu0 }
 0xec0   :  { %v13790_v57 = vpop.f32.mrf.mxu0 }
 0xec2   :  { %v13794_v34 = vpop.f32.mrf.mxu0 }
 0xec4   :  { %v13796_v11 = vpop.f32.mrf.mxu0 }
 0xec6   :  { %v13800_v59 = vpop.f32.mrf.mxu0 }
 0xec8   :  { %v13804_v40 = vpop.f32.mrf.mxu0 }
 0xeca   :  { %v8052_v5 = vpop.f32.mrf.mxu0 }
 0xecb   :  { %v13806_v52 = vpop.f32.mrf.mxu1 }
 0xecc   :  { %14792 = vst [vmem:[#allocation26_spill] sm:$0xff] %v13806_v52  ;;  %v8053_v24 = vpop.f32.mrf.mxu0  ;;  %v13844_v52 = vpop.permute.xlu0 %5429 }
 0xecd   :  { %v13812_v2 = vpop.f32.mrf.mxu1  ;;  %14800 = vst [vmem:[#allocation38_spill] sm:$0xff] %v13844_v52 }
 0xece   :  { %14793 = vst [vmem:[#allocation33_spill] sm:$0xff] %v13812_v2  ;;  %v13814_v55 = vpop.f32.mrf.mxu0 }
 0xecf   :  { %v13816_v35 = vpop.f32.mrf.mxu1 }
 0xed0   :  { %14794 = vst [vmem:[#allocation2_spill] sm:$0xff] %v13816_v35  ;;  %v8056_v16 = vpop.f32.mrf.mxu0 }
 0xed1   :  { %v13818_v10 = vpop.f32.mrf.mxu1 }
 0xed2   :  { %14795 = vst [vmem:[#allocation11_spill] sm:$0xff] %v13818_v10  ;;  %v8058_v6 = vpop.f32.mrf.mxu0  ;;  %v14801_v10 = vld [vmem:[#allocation24_spill] sm:$0xff] }
 0xed3   :  { %v13824_v3 = vpop.f32.mrf.mxu1  ;;  %v5494_v50 = vmul.f32 %v13762_v54, %v14801_v10  ;;  %v14803_v54 = vld [vmem:[#allocation41_spill] sm:$0xff] }
 0xed4   :  { %14796 = vst [vmem:[#allocation3_spill] sm:$0xff] %v13824_v3  ;;  %v8059_v7 = vpop.f32.mrf.mxu0  ;;  %v13848_v3 = vpop.permute.xlu1 %5811  ;;  %v5495_v10 = vmul.f32 %v13764_v48, %v14803_v54 }
 0xed5   :  { %v13826_v14 = vpop.f32.mrf.mxu1  ;;  %v8060_v35 = vadd.f32 %v8059_v7, %v8058_v6  ;;  %v8054_v6 = vadd.f32 %v8053_v24, %v8052_v5  ;;  %v5426_v24 = vpop.permute.xlu0 %5425 }
 0xed6   :  { %v8061_v30 = vpop.f32.mrf.mxu0 }
 0xed7   :  { %v13828_v27 = vpop.f32.mrf.mxu1 }
 0xed8   :  { %v8062_v45 = vpop.f32.mrf.mxu0 }
 0xed9   :  { %v13834_v0 = vpop.f32.mrf.mxu1  ;;  %v8063_v25 = vadd.f32 %v8062_v45, %v8061_v30 }
 0xeda   :  { %v8064_v42 = vpop.f32.mrf.mxu0 }
 0xedb   :  { %v13836_v4 = vpop.f32.mrf.mxu1 }
 0xedc   :  { %v8065_v1 = vpop.f32.mrf.mxu0 }
 0xedd   :  { %v5747_v49 = vpop.f32.mrf.mxu1  ;;  %v8066_v31 = vadd.f32 %v8065_v1, %v8064_v42 }
 0xede   :  { %v8067_v22 = vpop.f32.mrf.mxu0 }
 0xedf   :  { %v8653_v20 = vpop.f32.mrf.mxu1  ;;  %v5623_v28 = vadd.f32 %v8066_v31, %v5492_v26 }
 0xee0   :  { %v8068_v46 = vpop.f32.mrf.mxu0 }
 0xee1   :  { %v8069_v51 = vadd.f32 %v8068_v46, %v8067_v22  ;;  %v5757_v63 = vpop.f32.mrf.mxu1  ;;  %v14802_v22 = vld [vmem:[#allocation27_spill] sm:$0xff] }
 0xee2   :  { %v8070_v9 = vpop.f32.mrf.mxu0  ;;  %v5490_v46 = vmul.f32 %v5458_v13, %v14802_v22 }
 0xee3   :  { %v5628_v2 = vadd.f32 %v8069_v51, %v5493_v12  ;;  %v8656_v47 = vpop.f32.mrf.mxu1 }
 0xee4   :  { %v8071_v53 = vpop.f32.mrf.mxu0  ;;  %v5613_v7 = vadd.f32 %v8060_v35, %v5490_v46  ;;  %v8057_v35 = vadd.f32 %v8056_v16, %v13814_v55  ;;  %v14807_v55 = vld [vmem:[#allocation19_spill] sm:$0xff] }
 0xee5   :  { %v5773_v42 = vadd.f32 %v8656_v47, %v5628_v2  ;;  %v8072_v1 = vadd.f32 %v8071_v53, %v8070_v9  ;;  %v5767_v18 = vpop.f32.mrf.mxu1  ;;  %v14804_v47 = vld [vmem:[#allocation23_spill] sm:$0xff]  ;;  %v5486_v16 = vmul.f32 %v13820_v61, %v14807_v55 }
 0xee6   :  { %v5768_v56 = vadd.f32 %v5767_v18, %v5623_v28  ;;  %v8073_v38 = vpop.f32.mrf.mxu0  ;;  %v5491_v9 = vmul.f32 %v13772_v15, %v14804_v47  ;;  %v14805_v2 = vld [vmem:[#allocation15_spill] sm:$0xff]  ;;  %v5758_v30 = vadd.f32 %v5757_v63, %v5613_v7  ;;  %v8048_v15 = vadd.f32 %v13796_v11, %v13794_v34 }
 0xee7   :  { %v5863_v12 = vadd.f32 %v13782_v33, %v5773_v42  ;;  %v8659_v51 = vpop.f32.mrf.mxu1  ;;  %v5633_v52 = vadd.f32 %v8072_v1, %v5494_v50  ;;  %v5488_v33 = vmul.f32 %v13798_v17, %v14805_v2  ;;  %v8051_v34 = vadd.f32 %v13804_v40, %v13800_v59  ;;  %v14809_v40 = vld [vmem:[#allocation12_spill] sm:$0xff]  ;;  %v14815_v2 = vld [vmem:[#allocation35_spill] sm:$0xff] }
 0xee8   :  { %v5862_v26 = vadd.f32 %v13792_v32, %v5768_v56  ;;  %v8074_v31 = vpop.f32.mrf.mxu0  ;;  %v13863_v32 = vpop.permute.xlu1 %5807  ;;  %v5618_v48 = vadd.f32 %v8063_v25, %v5491_v9  ;;  %v5860_v46 = vadd.f32 %v13810_v43, %v5758_v30  ;;  %v14816_v30 = vld [vmem:[#allocation34_spill] sm:$0xff] }
 0xee9   :  { %v13857_v53 = vmax.f32 %v5863_v12, 0.0  ;;  %v8075_v28 = vadd.f32 %v8074_v31, %v8073_v38  ;;  %v5777_v13 = vpop.f32.mrf.mxu1  ;;  %v5603_v42 = vadd.f32 %v8054_v6, %v5488_v33  ;;  %v8042_v38 = vadd.f32 %v13784_v29, %v13780_v23 }
 0xeea   :  { %v13861_v45 = vmax.f32 %v5862_v26, 0.0  ;;  %v5778_v5 = vadd.f32 %v5777_v13, %v5633_v52  ;;  %v14806_v52 = vld [vmem:[#allocation16_spill] sm:$0xff]  ;;  %v5763_v1 = vadd.f32 %v8653_v20, %v5618_v48  ;;  %v14808_v20 = vld [vmem:[#allocation21_spill] sm:$0xff]  ;;  %v14814_v13 = vld [vmem:[#allocation3_spill] sm:$0xff] }
 0xeeb   :  { %v5638_v50 = vadd.f32 %v8075_v28, %v5495_v10  ;;  %5972 = vrot.lane.b32.xlu0 %v13857_v53, %s8787_s2  ;;  %v5489_v63 = vmul.f32 %v13788_v19, %v14806_v52  ;;  %v5748_v22 = vadd.f32 %v5747_v49, %v5603_v42  ;;  %v5593_v19 = vadd.f32 %v8048_v15, %v5486_v16  ;;  %v5422_v49 = vpop.permute.xlu0 %5421 }
 0xeec   :  { %v5864_v17 = vadd.f32 %v13774_v39, %v5778_v5  ;;  %5970 = vrot.lane.b32.xlu1 %v13861_v45, %s8787_s2  ;;  %v5487_v61 = vmul.f32 %v13808_v60, %v14808_v20  ;;  %v5804_v43 = vpop.permute.xlu1 %5803  ;;  %v5861_v12 = vadd.f32 %v13802_v41, %v5763_v1  ;;  %v8045_v60 = vadd.f32 %v13790_v57, %v13786_v8  ;;  %v14811_v8 = vld [vmem:[#allocation18_spill] sm:$0xff] }
 0xeed   :  { %v5783_v18 = vadd.f32 %v8659_v51, %v5638_v50  ;;  %v5608_v39 = vadd.f32 %v8057_v35, %v5489_v63  ;;  %v5738_v23 = vadd.f32 %v13834_v0, %v5593_v19  ;;  %v5858_v29 = vadd.f32 %v13832_v37, %v5748_v22  ;;  %v14820_v1 = vld [vmem:[#allocation2_spill] sm:$0xff]  ;;  %v14821_v22 = vld [vmem:[#allocation5_spill] sm:$0xff]  ;;  %v14823_v19 = vld [vmem:[#allocation39_spill] sm:$0xff] }
 0xeee   :  { %v13878_v56 = vmax.f32 %v5864_v17, 0.0  ;;  %v13897_v51 = vmax.f32 %v5860_v46, 0.0  ;;  %v5598_v6 = vadd.f32 %v8051_v34, %v5487_v61  ;;  %v13910_v7 = vmax.f32 %v5861_v12, 0.0  ;;  %v14819_v17 = vld [vmem:[#allocation40_spill] sm:$0xff]  ;;  %v14822_v34 = vld [vmem:[#allocation26_spill] sm:$0xff] }
 0xeef   :  { %v5865_v11 = vadd.f32 %v13768_v62, %v5783_v18  ;;  %v5753_v25 = vadd.f32 %v13836_v4, %v5608_v39  ;;  %v5484_v62 = vmul.f32 %v13838_v44, %v14809_v40  ;;  %v14810_v4 = vld [vmem:[#allocation31_spill] sm:$0xff]  ;;  %v5482_v57 = vmul.f32 %v5426_v24, %v14811_v8  ;;  %v5418_v10 = vpop.permute.xlu0 %5417  ;;  %v5922_v8 = vld [vmem:[%s14355_s16 + $0x20] sm:$0xff] }
 0xef0   :  { %5974 = vrot.lane.b32.xlu1 %v13878_v56, %s8787_s2  ;;  %v5485_v0 = vmul.f32 %v13830_v21, %v14810_v4  ;;  %v5743_v37 = vadd.f32 %v13828_v27, %v5598_v6  ;;  %v5856_v31 = vadd.f32 %v13848_v3, %v5738_v23  ;;  %v13915_v54 = vmax.f32 %v5858_v29, 0.0  ;;  %v5800_v47 = vpop.permute.xlu1 %5799  ;;  %v14813_v21 = vld [vmem:[#allocation38_spill] sm:$0xff]  ;;  %v14817_v24 = vld [vmem:[#allocation11_spill] sm:$0xff] }
 0xef1   :  { %v13891_v59 = vmax.f32 %v5865_v11, 0.0  ;;  %v5583_v41 = vadd.f32 %v8042_v38, %v5484_v62  ;;  %v5859_v44 = vadd.f32 %v13822_v36, %v5753_v25  ;;  %v5573_v27 = vadd.f32 %v13776_v58, %v5482_v57  ;;  %v14812_v36 = vld [vmem:[#allocation7_spill] sm:$0xff]  ;;  %v14818_v58 = vld [vmem:[#allocation10_spill] sm:$0xff]  ;;  %v5925_v57 = vld [vmem:[%s14355_s16 + $0x38] sm:$0xff] }
 0xef2   :  { %v5588_v9 = vadd.f32 %v8045_v60, %v5485_v0  ;;  %v5483_v28 = vmul.f32 %v14813_v21, %v14812_v36  ;;  %v5857_v3 = vadd.f32 %v14815_v2, %v5743_v37  ;;  %v5481_v5 = vmul.f32 %v5422_v49, %v14816_v30  ;;  %v5883_v23 = vld [vmem:[%s14354_s15 + $0x8] sm:$0xff]  ;;  %v5920_v0 = vld [vmem:[%s14355_s16 + $0x10] sm:$0xff]  ;;  %v5921_v37 = vld [vmem:[%s14355_s16 + $0x18] sm:$0xff] }
 0xef3   :  { %8108 = vmatprep.subr.mxu1 %v13891_v59  ;;  %5976 = vrot.lane.b32.xlu0 %v13891_v59, %s8787_s2  ;;  %v5728_v26 = vadd.f32 %v13826_v14, %v5583_v41  ;;  %v13926_v33 = vmax.f32 %v5859_v44, 0.0  ;;  %v5718_v35 = vadd.f32 %v14817_v24, %v5573_v27  ;;  %v13930_v50 = vmax.f32 %v5856_v31, 0.0  ;;  %v5796_v42 = vpop.permute.xlu0 %5795  ;;  %v5918_v41 = vld [vmem:[%s14355_s16] sm:$0xff]  ;;  %v5919_v4 = vld [vmem:[%s14355_s16 + $0x8] sm:$0xff]  ;;  %v5901_v2 = vld [vmem:[%s14354_s15 + $0x98] sm:$0xff] }
 0xef4   :  { %5966 = vrot.lane.b32.xlu1 %v13897_v51, %s8787_s2  ;;  %v5733_v14 = vadd.f32 %v14814_v13, %v5588_v9  ;;  %v5578_v15 = vadd.f32 %v14818_v58, %v5483_v28  ;;  %v5568_v52 = vadd.f32 %v14819_v17, %v5481_v5  ;;  %v5792_v63 = vpop.permute.xlu1 %5791  ;;  %v13940_v16 = vmax.f32 %v5857_v3, 0.0  ;;  %6230 = vmatprep.mubr.f32.mxu1 %v5883_v23  ;;  %v5923_v44 = vld [vmem:[%s14355_s16 + $0x28] sm:$0xff]  ;;  %v5928_v9 = vld [vmem:[%s14355_s16 + $0x50] sm:$0xff] }
 0xef5   :  { %v5854_v48 = vadd.f32 %v5804_v43, %v5728_v26  ;;  %v5480_v46 = vmul.f32 %v5418_v10, %v14821_v22  ;;  %v5852_v11 = vadd.f32 %v5796_v42, %v5718_v35  ;;  %v14824_v43 = vld [vmem:[#allocation33_spill] sm:$0xff]  ;;  %v5924_v26 = vld [vmem:[%s14355_s16 + $0x30] sm:$0xff]  ;;  %v5927_v31 = vld [vmem:[%s14355_s16 + $0x48] sm:$0xff] }
 0xef6   :  { %v5723_v18 = vadd.f32 %v14820_v1, %v5578_v15  ;;  %v5855_v55 = vadd.f32 %v13863_v32, %v5733_v14  ;;  %v5713_v39 = vadd.f32 %v14822_v34, %v5568_v52  ;;  %v5926_v10 = vld [vmem:[%s14355_s16 + $0x40] sm:$0xff] }
 0xef7   :  { %5968 = vrot.lane.b32.xlu0 %v13910_v7, %s8787_s2  ;;  %v13944_v38 = vmax.f32 %v5854_v48, 0.0  ;;  %v5563_v20 = vadd.f32 %v14823_v19, %v5480_v46  ;;  %v13954_v12 = vmax.f32 %v5852_v11, 0.0  ;;  %v5882_v19 = vld [vmem:[%s14354_s15] sm:$0xff] }
 0xef8   :  { %5962 = vrot.lane.b32.xlu1 %v13915_v54, %s8787_s2  ;;  %v5853_v61 = vadd.f32 %v5800_v47, %v5723_v18  ;;  %v13951_v49 = vmax.f32 %v5855_v55, 0.0  ;;  %v5851_v32 = vadd.f32 %v5792_v63, %v5713_v39  ;;  %v5788_v40 = vpop.permute.xlu1 %5787  ;;  %v5929_v47 = vld [vmem:[%s14355_s16 + $0x58] sm:$0xff] }
 0xef9   :  { %v5708_v25 = vadd.f32 %v14824_v43, %v5563_v20 }
 0xefa   :  { %v13960_v62 = vmax.f32 %v5853_v61, 0.0  ;;  %v13965_v29 = vmax.f32 %v5851_v32, 0.0 }
 0xefb   :  { %5964 = vrot.lane.b32.xlu0 %v13926_v33, %s8787_s2  ;;  %v5850_v60 = vadd.f32 %v5788_v40, %v5708_v25 }
 0xefc   :  { %5958 = vrot.lane.b32.xlu1 %v13930_v50, %s8787_s2 }
 0xefd   :  { %v13971_v6 = vmax.f32 %v5850_v60, 0.0 }
 0xeff   :  { %5960 = vrot.lane.b32.xlu0 %v13940_v16, %s8787_s2 }
 0xf00   :  { %5954 = vrot.lane.b32.xlu1 %v13944_v38, %s8787_s2 }
 0xf03   :  { %5956 = vrot.lane.b32.xlu0 %v13951_v49, %s8787_s2 }
 0xf04   :  { %5950 = vrot.lane.b32.xlu1 %v13954_v12, %s8787_s2 }
 0xf07   :  { %5952 = vrot.lane.b32.xlu0 %v13960_v62, %s8787_s2 }
 0xf08   :  { %5948 = vrot.lane.b32.xlu1 %v13965_v29, %s8787_s2 }
 0xf0b   :  { %6054 = vrot.lane.b32.xlu0 %v13878_v56, %s8788_s21 }
 0xf0c   :  { %5946 = vrot.lane.b32.xlu1 %v13971_v6, %s8787_s2 }
 0xf0f   :  { %6056 = vrot.lane.b32.xlu0 %v13891_v59, %s8788_s21  ;;  %v5884_v59 = vld [vmem:[%s14354_s15 + $0x10] sm:$0xff] }
 0xf10   :  { %6050 = vrot.lane.b32.xlu1 %v13861_v45, %s8788_s21  ;;  %8692 = vmatprep.mubr.f32.mxu0 %v5884_v59 }
 0xf13   :  { %6052 = vrot.lane.b32.xlu0 %v13857_v53, %s8788_s21 }
 0xf14   :  { %6046 = vrot.lane.b32.xlu1 %v13897_v51, %s8788_s21 }
 0xf17   :  { %6048 = vrot.lane.b32.xlu0 %v13910_v7, %s8788_s21 }
 0xf18   :  { %6042 = vrot.lane.b32.xlu1 %v13915_v54, %s8788_s21 }
 0xf1b   :  { %6044 = vrot.lane.b32.xlu0 %v13926_v33, %s8788_s21 }
 0xf1c   :  { %6038 = vrot.lane.b32.xlu1 %v13930_v50, %s8788_s21 }
 0xf1f   :  { %6040 = vrot.lane.b32.xlu0 %v13940_v16, %s8788_s21 }
 0xf20   :  { %6034 = vrot.lane.b32.xlu1 %v13944_v38, %s8788_s21 }
 0xf23   :  { %6036 = vrot.lane.b32.xlu0 %v13951_v49, %s8788_s21 }
 0xf24   :  { %6030 = vrot.lane.b32.xlu1 %v13954_v12, %s8788_s21 }
 0xf27   :  { %6032 = vrot.lane.b32.xlu0 %v13960_v62, %s8788_s21 }
 0xf28   :  { %6026 = vrot.lane.b32.xlu1 %v13971_v6, %s8788_s21 }
 0xf2b   :  { %6028 = vrot.lane.b32.xlu0 %v13965_v29, %s8788_s21 }
 0xf2c   :  { %6113 = vperm.xlu1 %8750, %v5919_v4  }
 0xf2f   :  { %6108 = vperm.xlu0 %8749, %v5918_v41   ;;  %v5892_v41 = vld [vmem:[%s14354_s15 + $0x50] sm:$0xff] }
 0xf30   :  { %6118 = vperm.xlu1 %8750, %v5920_v0  }
 0xf33   :  { %6123 = vperm.xlu0 %8749, %v5921_v37  }
 0xf34   :  { %6128 = vperm.xlu1 %8750, %v5922_v8  }
 0xf37   :  { %6133 = vperm.xlu0 %8749, %v5923_v44   ;;  %v5891_v44 = vld [vmem:[%s14354_s15 + $0x48] sm:$0xff] }
 0xf38   :  { %6138 = vperm.xlu1 %8750, %v5924_v26  }
 0xf3b   :  { %6143 = vperm.xlu0 %8749, %v5925_v57   ;;  %v5895_v57 = vld [vmem:[%s14354_s15 + $0x68] sm:$0xff] }
 0xf3c   :  { %6148 = vperm.xlu1 %8750, %v5926_v10  }
 0xf3f   :  { %6153 = vperm.xlu0 %8749, %v5927_v31  }
 0xf40   :  { %6158 = vperm.xlu1 %8750, %v5928_v9  }
 0xf43   :  { %6163 = vperm.xlu0 %8749, %v5929_v47   ;;  %v5894_v47 = vld [vmem:[%s14354_s15 + $0x60] sm:$0xff] }
 0xf5d   :  { %v5973_v36 = vpop.permute.xlu0 %5972 }
 0xf5e   :  { %v5971_v27 = vpop.permute.xlu1 %5970  ;;  %v6007_v5 = vsel %vm960_vm2, 0.0, %v5973_v36 }
 0xf5f   :  { %v6006_v35 = vsel %vm960_vm2, 0.0, %v5971_v27  ;;  %v5898_v27 = vld [vmem:[%s14354_s15 + $0x80] sm:$0xff] }
 0xf62   :  { %v5975_v21 = vpop.permute.xlu1 %5974 }
 0xf63   :  { %v6008_v3 = vsel %vm960_vm2, 0.0, %v5975_v21 }
 0xf65   :  { %v5977_v28 = vpop.permute.xlu0 %5976 }
 0xf66   :  { %v6009_v13 = vsel %vm960_vm2, 0.0, %v5977_v28  ;;  %v5967_v14 = vpop.permute.xlu1 %5966 }
 0xf67   :  { %8109 = vmatpush3.msk.msra.mxu1 %vm11902_vm0, %v6009_v13  ;;  %v5897_v13 = vld [vmem:[%s14354_s15 + $0x78] sm:$0xff] }
 0xf68   :  { %8110 = vmatprep.subr.mxu1 %v13878_v56 }
 0xf69   :  { %v5969_v30 = vpop.permute.xlu0 %5968  ;;  %8111 = vmatpush3.msk.msra.mxu1 %vm11902_vm0, %v6008_v3 }
 0xf6a   :  { %8112 = vmatprep.subr.mxu1 %v13857_v53  ;;  %v5963_v24 = vpop.permute.xlu1 %5962  ;;  %v6005_v56 = vsel %vm960_vm2, 0.0, %v5969_v30  ;;  %v6004_v53 = vsel %vm960_vm2, 0.0, %v5967_v14 }
 0xf6b   :  { %8113 = vmatpush3.msk.msra.mxu1 %vm11902_vm0, %v6007_v5  ;;  %v5900_v5 = vld [vmem:[%s14354_s15 + $0x90] sm:$0xff] }
 0xf6c   :  { %8114 = vmatprep.subr.mxu1 %v13861_v45 }
 0xf6d   :  { %v5965_v48 = vpop.permute.xlu0 %5964  ;;  %8115 = vmatpush3.msk.msra.mxu1 %vm11902_vm0, %v6006_v35  ;;  %v5904_v35 = vld [vmem:[%s14354_s15 + $0xb0] sm:$0xff] }
 0xf6e   :  { %8116 = vmatprep.subr.mxu1 %v13910_v7  ;;  %v5959_v58 = vpop.permute.xlu1 %5958  ;;  %v6003_v45 = vsel %vm960_vm2, 0.0, %v5965_v48  ;;  %v6002_v7 = vsel %vm960_vm2, 0.0, %v5963_v24 }
 0xf6f   :  { %8117 = vmatpush3.msk.msra.mxu1 %vm11902_vm0, %v6005_v56 }
 0xf70   :  { %8118 = vmatprep.subr.mxu1 %v13897_v51 }
 0xf71   :  { %v5961_v15 = vpop.permute.xlu0 %5960  ;;  %8119 = vmatpush3.msk.msra.mxu1 %vm11902_vm0, %v6004_v53  ;;  %v5903_v53 = vld [vmem:[%s14354_s15 + $0xa8] sm:$0xff] }
 0xf72   :  { %8120 = vmatprep.subr.mxu1 %v13926_v33  ;;  %v5955_v42 = vpop.permute.xlu1 %5954  ;;  %v6001_v51 = vsel %vm960_vm2, 0.0, %v5961_v15  ;;  %v6000_v33 = vsel %vm960_vm2, 0.0, %v5959_v58 }
 0xf73   :  { %8121 = vmatpush3.msk.msra.mxu1 %vm11902_vm0, %v6003_v45  ;;  %v5998_v18 = vsel %vm960_vm2, 0.0, %v5955_v42  ;;  %v5887_v45 = vld [vmem:[%s14354_s15 + $0x28] sm:$0xff] }
 0xf74   :  { %8122 = vmatprep.subr.mxu1 %v13915_v54  ;;  %v5907_v42 = vld [vmem:[%s14354_s15 + $0xc8] sm:$0xff] }
 0xf75   :  { %v5957_v17 = vpop.permute.xlu0 %5956  ;;  %8123 = vmatpush3.msk.msra.mxu1 %vm11902_vm0, %v6002_v7  ;;  %v5890_v7 = vld [vmem:[%s14354_s15 + $0x40] sm:$0xff] }
 0xf76   :  { %8124 = vmatprep.subr.mxu1 %v13940_v16  ;;  %v5951_v52 = vpop.permute.xlu1 %5950  ;;  %v5999_v54 = vsel %vm960_vm2, 0.0, %v5957_v17  ;;  %v5906_v17 = vld [vmem:[%s14354_s15 + $0xc0] sm:$0xff] }
 0xf77   :  { %8125 = vmatpush3.msk.msra.mxu1 %vm11902_vm0, %v6001_v51  ;;  %v5996_v22 = vsel %vm960_vm2, 0.0, %v5951_v52  ;;  %v5893_v51 = vld [vmem:[%s14354_s15 + $0x58] sm:$0xff]  ;;  %v5910_v52 = vld [vmem:[%s14354_s15 + $0xe0] sm:$0xff] }
 0xf78   :  { %8126 = vmatprep.subr.mxu1 %v13930_v50 }
 0xf79   :  { %v5953_v63 = vpop.permute.xlu0 %5952  ;;  %8127 = vmatpush3.msk.msra.mxu1 %vm11902_vm0, %v6000_v33  ;;  %v5896_v33 = vld [vmem:[%s14354_s15 + $0x70] sm:$0xff] }
 0xf7a   :  { %8128 = vmatprep.subr.mxu1 %v13951_v49  ;;  %v5949_v1 = vpop.permute.xlu1 %5948  ;;  %v5997_v50 = vsel %vm960_vm2, 0.0, %v5953_v63  ;;  %v5886_v49 = vld [vmem:[%s14354_s15 + $0x20] sm:$0xff]  ;;  %v5909_v63 = vld [vmem:[%s14354_s15 + $0xd8] sm:$0xff] }
 0xf7b   :  { %8129 = vmatpush3.msk.msra.mxu1 %vm11902_vm0, %v5999_v54  ;;  %v5995_v34 = vsel %vm960_vm2, 0.0, %v5949_v1  ;;  %v5899_v54 = vld [vmem:[%s14354_s15 + $0x88] sm:$0xff]  ;;  %v5913_v1 = vld [vmem:[%s14354_s15 + $0xf8] sm:$0xff] }
 0xf7c   :  { %8130 = vmatprep.subr.mxu1 %v13944_v38 }
 0xf7d   :  { %v6055_v55 = vpop.permute.xlu0 %6054  ;;  %8131 = vmatpush3.msk.msra.mxu1 %vm11902_vm0, %v5998_v18  ;;  %v5902_v18 = vld [vmem:[%s14354_s15 + $0xa0] sm:$0xff] }
 0xf7e   :  { %8132 = vmatprep.subr.mxu1 %v13960_v62  ;;  %v5947_v16 = vpop.permute.xlu1 %5946  ;;  %v6088_v20 = vsel %vm4031_vm5, %v6055_v55, 0.0  ;;  %v5889_v62 = vld [vmem:[%s14354_s15 + $0x38] sm:$0xff]  ;;  %v5912_v55 = vld [vmem:[%s14354_s15 + $0xf0] sm:$0xff] }
 0xf7f   :  { %8133 = vmatpush3.msk.msra.mxu1 %vm11902_vm0, %v5997_v50  ;;  %v5994_v61 = vsel %vm960_vm2, 0.0, %v5947_v16  ;;  %v5905_v50 = vld [vmem:[%s14354_s15 + $0xb8] sm:$0xff]  ;;  %v5916_v16 = vld [vmem:[%s14354_s15 + $0x110] sm:$0xff] }
 0xf80   :  { %8134 = vmatprep.subr.mxu1 %v13954_v12  ;;  %v5885_v12 = vld [vmem:[%s14354_s15 + $0x18] sm:$0xff] }
 0xf81   :  { %v6057_v46 = vpop.permute.xlu0 %6056  ;;  %8135 = vmatpush3.msk.msra.mxu1 %vm11902_vm0, %v5996_v22  ;;  %v5908_v22 = vld [vmem:[%s14354_s15 + $0xd0] sm:$0xff] }
 0xf82   :  { %v6089_v39 = vsel %vm4031_vm5, %v6057_v46, 0.0  ;;  %8136 = vmatprep.subr.mxu1 %v13965_v29  ;;  %v6051_v11 = vpop.permute.xlu1 %6050  ;;  %v5915_v46 = vld [vmem:[%s14354_s15 + $0x108] sm:$0xff] }
 0xf83   :  { %8137 = vmatpush3.msk.msra.mxu1 %vm11902_vm0, %v5995_v34  ;;  %8660 = vmatprep.subr.msk.mxu0 %vm12324_vm6, %v6089_v39  ;;  %v6086_v40 = vsel %vm4031_vm5, %v6051_v11, 0.0  ;;  %v5911_v34 = vld [vmem:[%s14354_s15 + $0xe8] sm:$0xff]  ;;  %v5917_v11 = vld [vmem:[%s14354_s15 + $0x118] sm:$0xff] }
 0xf84   :  { %8138 = vmatprep.subr.mxu1 %v13971_v6  ;;  %8661 = vmatpush3.msk.msra.mxu0 %vm12324_vm6, %v6089_v39  ;;  %v5888_v6 = vld [vmem:[%s14354_s15 + $0x30] sm:$0xff]  ;;  %v5914_v39 = vld [vmem:[%s14354_s15 + $0x100] sm:$0xff] }
 0xf85   :  { %8662 = vmatprep.subr.msk.mxu0 %vm12324_vm6, %v6088_v20  ;;  %v6053_v32 = vpop.permute.xlu0 %6052  ;;  %8139 = vmatpush3.msk.msra.mxu1 %vm11902_vm0, %v5994_v61 }
 0xf86   :  { %v6087_v43 = vsel %vm4031_vm5, %v6053_v32, 0.0  ;;  %8663 = vmatpush3.msk.msra.mxu0 %vm12324_vm6, %v6088_v20  ;;  %v6047_v25 = vpop.permute.xlu1 %6046  ;;  %6231 = vmatmul.mubr.f32.vlgmr.msra.gmra.mxu1 %v5882_v19 }
 0xf87   :  { %8664 = vmatprep.subr.msk.mxu0 %vm12324_vm6, %v6087_v43  ;;  %6235 = vmatprep.mubr.f32.mxu1 %v5886_v49  ;;  %v6084_v59 = vsel %vm4031_vm5, %v6047_v25, 0.0 }
 0xf88   :  { %8665 = vmatpush3.msk.msra.mxu0 %vm12324_vm6, %v6087_v43 }
 0xf89   :  { %v6049_v23 = vpop.permute.xlu0 %6048  ;;  %8666 = vmatprep.subr.msk.mxu0 %vm12324_vm6, %v6086_v40 }
 0xf8a   :  { %v6085_v29 = vsel %vm4031_vm5, %v6049_v23, 0.0  ;;  %8667 = vmatpush3.msk.msra.mxu0 %vm12324_vm6, %v6086_v40  ;;  %v6043_v60 = vpop.permute.xlu1 %6042  ;;  %6236 = vmatmul.mubr.f32.gmra.mxu1 %v5885_v12 }
 0xf8b   :  { %8668 = vmatprep.subr.msk.mxu0 %vm12324_vm6, %v6085_v29  ;;  %6240 = vmatprep.mubr.f32.mxu1 %v5889_v62  ;;  %v6082_v8 = vsel %vm4031_vm5, %v6043_v60, 0.0 }
 0xf8c   :  { %8669 = vmatpush3.msk.msra.mxu0 %vm12324_vm6, %v6085_v29 }
 0xf8d   :  { %v6045_v4 = vpop.permute.xlu0 %6044  ;;  %8670 = vmatprep.subr.msk.mxu0 %vm12324_vm6, %v6084_v59 }
 0xf8e   :  { %v6083_v0 = vsel %vm4031_vm5, %v6045_v4, 0.0  ;;  %8671 = vmatpush3.msk.msra.mxu0 %vm12324_vm6, %v6084_v59  ;;  %v6039_v37 = vpop.permute.xlu1 %6038  ;;  %6241 = vmatmul.mubr.f32.gmra.mxu1 %v5888_v6 }
 0xf8f   :  { %8672 = vmatprep.subr.msk.mxu0 %vm12324_vm6, %v6083_v0  ;;  %6245 = vmatprep.mubr.f32.mxu1 %v5892_v41  ;;  %v6080_v9 = vsel %vm4031_vm5, %v6039_v37, 0.0 }
 0xf90   :  { %8673 = vmatpush3.msk.msra.mxu0 %vm12324_vm6, %v6083_v0 }
 0xf91   :  { %v6041_v26 = vpop.permute.xlu0 %6040  ;;  %8674 = vmatprep.subr.msk.mxu0 %vm12324_vm6, %v6082_v8 }
 0xf92   :  { %v6081_v31 = vsel %vm4031_vm5, %v6041_v26, 0.0  ;;  %8675 = vmatpush3.msk.msra.mxu0 %vm12324_vm6, %v6082_v8  ;;  %v6035_v10 = vpop.permute.xlu1 %6034  ;;  %6246 = vmatmul.mubr.f32.gmra.mxu1 %v5891_v44 }
 0xf93   :  { %8676 = vmatprep.subr.msk.mxu0 %vm12324_vm6, %v6081_v31  ;;  %6250 = vmatprep.mubr.f32.mxu1 %v5895_v57  ;;  %v6078_v14 = vsel %vm4031_vm5, %v6035_v10, 0.0 }
 0xf94   :  { %8677 = vmatpush3.msk.msra.mxu0 %vm12324_vm6, %v6081_v31 }
 0xf95   :  { %v6037_v36 = vpop.permute.xlu0 %6036  ;;  %8678 = vmatprep.subr.msk.mxu0 %vm12324_vm6, %v6080_v9 }
 0xf96   :  { %v6079_v21 = vsel %vm4031_vm5, %v6037_v36, 0.0  ;;  %8679 = vmatpush3.msk.msra.mxu0 %vm12324_vm6, %v6080_v9  ;;  %6251 = vmatmul.mubr.f32.gmra.mxu1 %v5894_v47  ;;  %v6031_v28 = vpop.permute.xlu1 %6030 }
 0xf97   :  { %8680 = vmatprep.subr.msk.mxu0 %vm12324_vm6, %v6079_v21  ;;  %6255 = vmatprep.mubr.f32.mxu1 %v5898_v27  ;;  %v6076_v24 = vsel %vm4031_vm5, %v6031_v28, 0.0 }
 0xf98   :  { %8681 = vmatpush3.msk.msra.mxu0 %vm12324_vm6, %v6079_v21 }
 0xf99   :  { %v6033_v3 = vpop.permute.xlu0 %6032  ;;  %8682 = vmatprep.subr.msk.mxu0 %vm12324_vm6, %v6078_v14 }
 0xf9a   :  { %v6077_v30 = vsel %vm4031_vm5, %v6033_v3, 0.0  ;;  %8683 = vmatpush3.msk.msra.mxu0 %vm12324_vm6, %v6078_v14  ;;  %6256 = vmatmul.mubr.f32.gmra.mxu1 %v5897_v13  ;;  %v6027_v48 = vpop.permute.xlu1 %6026 }
 0xf9b   :  { %8684 = vmatprep.subr.msk.mxu0 %vm12324_vm6, %v6077_v30  ;;  %6260 = vmatprep.mubr.f32.mxu1 %v5901_v2  ;;  %v6074_v15 = vsel %vm4031_vm5, %v6027_v48, 0.0 }
 0xf9c   :  { %8685 = vmatpush3.msk.msra.mxu0 %vm12324_vm6, %v6077_v30 }
 0xf9d   :  { %v6029_v56 = vpop.permute.xlu0 %6028  ;;  %8686 = vmatprep.subr.msk.mxu0 %vm12324_vm6, %v6076_v24 }
 0xf9e   :  { %v6075_v58 = vsel %vm4031_vm5, %v6029_v56, 0.0  ;;  %8687 = vmatpush3.msk.msra.mxu0 %vm12324_vm6, %v6076_v24  ;;  %6261 = vmatmul.mubr.f32.gmra.mxu1 %v5900_v5 }
 0xf9f   :  { %8688 = vmatprep.subr.msk.mxu0 %vm12324_vm6, %v6075_v58  ;;  %6265 = vmatprep.mubr.f32.mxu1 %v5904_v35 }
 0xfa0   :  { %8689 = vmatpush3.msk.msra.mxu0 %vm12324_vm6, %v6075_v58 }
 0xfa1   :  { %8690 = vmatprep.subr.msk.mxu0 %vm12324_vm6, %v6074_v15 }
 0xfa2   :  { %8691 = vmatpush3.msk.msra.mxu0 %vm12324_vm6, %v6074_v15  ;;  %6266 = vmatmul.mubr.f32.gmra.mxu1 %v5903_v53 }
 0xfa3   :  { %8693 = vmatmul.mubr.f32.vlgmr.msra.gmra.mxu0 %v5887_v45  ;;  %6270 = vmatprep.mubr.f32.mxu1 %v5907_v42 }
 0xfa4   :  { %8695 = vmatprep.mubr.f32.mxu0 %v5890_v7 }
 0xfa6   :  { %6271 = vmatmul.mubr.f32.gmra.mxu1 %v5906_v17 }
 0xfa7   :  { %8696 = vmatmul.mubr.f32.gmra.mxu0 %v5893_v51  ;;  %6275 = vmatprep.mubr.f32.mxu1 %v5910_v52  ;;  %v6114_v62 = vpop.permute.xlu1 %6113 }
 0xfa8   :  { %8698 = vmatprep.mubr.f32.mxu0 %v5896_v33 }
 0xfaa   :  { %6276 = vmatmul.mubr.f32.gmra.mxu1 %v5909_v63  ;;  %v6109_v29 = vpop.permute.xlu0 %6108 }
 0xfab   :  { %8699 = vmatmul.mubr.f32.gmra.mxu0 %v5899_v54  ;;  %6280 = vmatprep.mubr.f32.mxu1 %v5913_v1  ;;  %v6119_v4 = vpop.permute.xlu1 %6118 }
 0xfac   :  { %8701 = vmatprep.mubr.f32.mxu0 %v5902_v18 }
 0xfae   :  { %6281 = vmatmul.mubr.f32.gmra.mxu1 %v5912_v55  ;;  %v6124_v41 = vpop.permute.xlu0 %6123 }
 0xfaf   :  { %8702 = vmatmul.mubr.f32.gmra.mxu0 %v5905_v50  ;;  %6285 = vmatprep.mubr.f32.mxu1 %v5916_v16  ;;  %v6129_v21 = vpop.permute.xlu1 %6128 }
 0xfb0   :  { %8704 = vmatprep.mubr.f32.mxu0 %v5908_v22 }
 0xfb2   :  { %6286 = vmatmul.mubr.f32.gmra.mxu1 %v5915_v46  ;;  %v6134_v27 = vpop.permute.xlu0 %6133 }
 0xfb3   :  { %8705 = vmatmul.mubr.f32.gmra.mxu0 %v5911_v34  ;;  %v6139_v7 = vpop.permute.xlu1 %6138 }
 0xfb4   :  { %8707 = vmatprep.mubr.f32.mxu0 %v5914_v39 }
 0xfb6   :  { %v6144_v45 = vpop.permute.xlu0 %6143 }
 0xfb7   :  { %8708 = vmatmul.mubr.f32.gmra.mxu0 %v5917_v11 }
 0xfba   :  { %v6154_v39 = vpop.permute.xlu0 %6153 }
0x1046   :  { %v8140_v38 = vpop.f32.mrf.mxu1 }
0x1048   :  { %v8141_v19 = vpop.f32.mrf.mxu1 }
0x1049   :  { %v8142_v0 = vadd.f32 %v8141_v19, %v8140_v38  ;;  %v6149_v38 = vpop.permute.xlu1 %6148 }
0x104a   :  { %v8143_v20 = vpop.f32.mrf.mxu1 }
0x104b   :  { %v6233_v10 = vadd.f32 %v8142_v0, %v6109_v29  ;;  %v6164_v29 = vpop.permute.xlu0 %6163 }
0x104c   :  { %v8144_v61 = vpop.f32.mrf.mxu1 }
0x104d   :  { %v8145_v6 = vadd.f32 %v8144_v61, %v8143_v20 }
0x104e   :  { %v8146_v49 = vpop.f32.mrf.mxu1 }
0x104f   :  { %v6238_v8 = vadd.f32 %v8145_v6, %v6114_v62 }
0x1050   :  { %v8147_v32 = vpop.f32.mrf.mxu1 }
0x1051   :  { %v8148_v31 = vadd.f32 %v8147_v32, %v8146_v49 }
0x1052   :  { %v8149_v43 = vpop.f32.mrf.mxu1 }
0x1053   :  { %v6243_v5 = vadd.f32 %v8148_v31, %v6119_v4 }
0x1054   :  { %v8150_v25 = vpop.f32.mrf.mxu1 }
0x1055   :  { %v8151_v44 = vadd.f32 %v8150_v25, %v8149_v43 }
0x1056   :  { %v8152_v12 = vpop.f32.mrf.mxu1 }
0x1057   :  { %v6248_v14 = vadd.f32 %v8151_v44, %v6124_v41 }
0x1058   :  { %v8153_v40 = vpop.f32.mrf.mxu1 }
0x1059   :  { %v8154_v30 = vadd.f32 %v8153_v40, %v8152_v12 }
0x105a   :  { %v8155_v23 = vpop.f32.mrf.mxu1 }
0x105b   :  { %v6253_v52 = vadd.f32 %v8154_v30, %v6129_v21 }
0x105c   :  { %v8156_v60 = vpop.f32.mrf.mxu1 }
0x105d   :  { %v8157_v28 = vadd.f32 %v8156_v60, %v8155_v23 }
0x105e   :  { %v8158_v59 = vpop.f32.mrf.mxu1 }
0x105f   :  { %v6258_v53 = vadd.f32 %v8157_v28, %v6134_v27 }
0x1060   :  { %v8159_v37 = vpop.f32.mrf.mxu1 }
0x1061   :  { %v8160_v17 = vadd.f32 %v8159_v37, %v8158_v59  ;;  %v6159_v59 = vpop.permute.xlu1 %6158 }
0x1062   :  { %v8161_v57 = vpop.f32.mrf.mxu1 }
0x1063   :  { %v8694_v26 = vpop.f32.mrf.mxu0  ;;  %v6263_v46 = vadd.f32 %v8160_v17, %v6139_v7 }
0x1064   :  { %v6363_v47 = vadd.f32 %v8694_v26, %v6238_v8  ;;  %v8162_v9 = vpop.f32.mrf.mxu1 }
0x1065   :  { %v6357_v36 = vpop.f32.mrf.mxu0  ;;  %v8163_v56 = vadd.f32 %v8162_v9, %v8161_v57 }
0x1066   :  { %v6358_v13 = vadd.f32 %v6357_v36, %v6233_v10  ;;  %6417 = vst.msk [vmem:[%s14356_s17 + $0x8] sm:$0xff] %vm3418_vm12, %v6363_v47  ;;  %v8164_v2 = vpop.f32.mrf.mxu1 }
0x1067   :  { %v8697_v3 = vpop.f32.mrf.mxu0  ;;  %v6268_v18 = vadd.f32 %v8163_v56, %v6144_v45 }
0x1068   :  { %6416 = vst.msk [vmem:[%s14356_s17] sm:$0xff] %vm3418_vm12, %v6358_v13  ;;  %v6373_v24 = vadd.f32 %v8697_v3, %v6248_v14  ;;  %v8165_v35 = vpop.f32.mrf.mxu1 }
0x1069   :  { %v6367_v48 = vpop.f32.mrf.mxu0  ;;  %v8166_v16 = vadd.f32 %v8165_v35, %v8164_v2 }
0x106a   :  { %6419 = vst.msk [vmem:[%s14356_s17 + $0x18] sm:$0xff] %vm3418_vm12, %v6373_v24  ;;  %v6368_v58 = vadd.f32 %v6367_v48, %v6243_v5  ;;  %v8167_v15 = vpop.f32.mrf.mxu1 }
0x106b   :  { %v8700_v42 = vpop.f32.mrf.mxu0  ;;  %v6273_v25 = vadd.f32 %v8166_v16, %v6149_v38 }
0x106c   :  { %6418 = vst.msk [vmem:[%s14356_s17 + $0x10] sm:$0xff] %vm3418_vm12, %v6368_v58  ;;  %v6383_v51 = vadd.f32 %v8700_v42, %v6258_v53  ;;  %v8168_v33 = vpop.f32.mrf.mxu1 }
0x106d   :  { %v6377_v63 = vpop.f32.mrf.mxu0  ;;  %v8169_v54 = vadd.f32 %v8168_v33, %v8167_v15 }
0x106e   :  { %6421 = vst.msk [vmem:[%s14356_s17 + $0x28] sm:$0xff] %vm3418_vm12, %v6383_v51  ;;  %v6378_v1 = vadd.f32 %v6377_v63, %v6253_v52  ;;  %v8170_v55 = vpop.f32.mrf.mxu1 }
0x106f   :  { %v8703_v50 = vpop.f32.mrf.mxu0  ;;  %v6278_v20 = vadd.f32 %v8169_v54, %v6154_v39 }
0x1070   :  { %6420 = vst.msk [vmem:[%s14356_s17 + $0x20] sm:$0xff] %vm3418_vm12, %v6378_v1  ;;  %v6393_v22 = vadd.f32 %v8703_v50, %v6268_v18  ;;  %v8171_v34 = vpop.f32.mrf.mxu1 }
0x1071   :  { %v6387_v11 = vpop.f32.mrf.mxu0  ;;  %v8172_v32 = vadd.f32 %v8171_v34, %v8170_v55 }
0x1072   :  { %6423 = vst.msk [vmem:[%s14356_s17 + $0x38] sm:$0xff] %vm3418_vm12, %v6393_v22  ;;  %v6388_v19 = vadd.f32 %v6387_v11, %v6263_v46  ;;  %v8173_v61 = vpop.f32.mrf.mxu1 }
0x1073   :  { %v8706_v49 = vpop.f32.mrf.mxu0  ;;  %v6283_v41 = vadd.f32 %v8172_v32, %v6159_v59 }
0x1074   :  { %6422 = vst.msk [vmem:[%s14356_s17 + $0x30] sm:$0xff] %vm3418_vm12, %v6388_v19  ;;  %v6403_v43 = vadd.f32 %v8706_v49, %v6278_v20  ;;  %v8174_v12 = vpop.f32.mrf.mxu1 }
0x1075   :  { %v8175_v40 = vadd.f32 %v8174_v12, %v8173_v61  ;;  %v6397_v62 = vpop.f32.mrf.mxu0 }
0x1076   :  { %6425 = vst.msk [vmem:[%s14356_s17 + $0x48] sm:$0xff] %vm3418_vm12, %v6403_v43  ;;  %v6398_v23 = vadd.f32 %v6397_v62, %v6273_v25 }
0x1077   :  { %v6288_v60 = vadd.f32 %v8175_v40, %v6164_v29  ;;  %v8709_v6 = vpop.f32.mrf.mxu0 }
0x1078   :  { %6424 = vst.msk [vmem:[%s14356_s17 + $0x40] sm:$0xff] %vm3418_vm12, %v6398_v23 }
0x1079   :  { %v6413_v4 = vadd.f32 %v8709_v6, %v6288_v60  ;;  %v6407_v0 = vpop.f32.mrf.mxu0 }
0x107a   :  { %v6408_v37 = vadd.f32 %v6407_v0, %v6283_v41 }
0x107b   :  { %6427 = vst.msk [vmem:[%s14356_s17 + $0x58] sm:$0xff] %vm3418_vm12, %v6413_v4 }
0x107c   :  { %6426 = vst.msk [vmem:[%s14356_s17 + $0x50] sm:$0xff] %vm3418_vm12, %v6408_v37 }

</bundles_post_ra>
